<compile_context>
chip_gen: v6e
topology: v6e:2x2x1
jax: 0.10.0
libtpu: 0.0.40
codegen_flags: <defaults>
</compile_context>

<pallas_src>
import functools

import jax
import jax.numpy as jnp
from jax import lax
from jax.experimental import pallas as pl
from jax.experimental.pallas import tpu as pltpu

C1, C3, C5, F6, F7 = 8, 16, 32, 84, 10
KS = 5  # conv kernel size


# ---------------------------------------------------------------------------
# In-kernel building blocks (operate on VMEM refs, HWC layout per image)
# ---------------------------------------------------------------------------
def _conv5x5_relu(in_ref, w_ref, b_ref, out_ref, *, h, w, cin, cout):
    """Valid 5x5 conv + bias + ReLU.

    in_ref : (h, w, cin)      VMEM
    w_ref  : (25, cin, cout)  VMEM (tap-major; matches PyTorch OIHW weights)
    b_ref  : (1, cout)        VMEM
    out_ref: (h-4, w-4, cout) VMEM
    """
    oh, ow = h - KS + 1, w - KS + 1
    bias = b_ref[...]                                    # (1, cout)
    taps = [w_ref[k] for k in range(KS * KS)]            # each (cin, cout)

    def row(r, carry):
        acc = jnp.zeros((ow, cout), jnp.float32)
        for i in range(KS):
            for j in range(KS):
                patch = in_ref[r + i, pl.ds(j, ow), :]   # (ow, cin)
                w_ij = taps[i * KS + j]                  # (cin, cout)
                if cin == 1:
                    acc = acc + patch * w_ij             # outer product (VPU)
                else:
                    acc = acc + jnp.dot(
                        patch, w_ij,
                        preferred_element_type=jnp.float32,
                        precision=lax.Precision.HIGHEST)
        acc = jnp.maximum(acc + bias, 0.0)
        out_ref[r] = acc.astype(out_ref.dtype)
        return carry

    lax.fori_loop(0, oh, row, 0)


def _maxpool2x2(in_ref, out_ref, *, ph, pw):
    """2x2 / stride-2 max pool. in_ref: (2*ph, 2*pw, c) -> out_ref: (ph, pw, c)."""

    def row(r, carry):
        r0 = in_ref[2 * r]                               # (2*pw, c)
        r1 = in_ref[2 * r + 1]                           # (2*pw, c)
        m = jnp.maximum(r0, r1)                          # pooled over H
        cols = [jnp.maximum(m[2 * q:2 * q + 1, :], m[2 * q + 1:2 * q + 2, :])
                for q in range(pw)]                      # each (1, c)
        out_ref[r] = jnp.concatenate(cols, axis=0)       # (pw, c)
        return carry

    lax.fori_loop(0, ph, row, 0)


# ---------------------------------------------------------------------------
# The single fused kernel (one image per grid step)
# ---------------------------------------------------------------------------
def _lenet5_kernel(x_ref, w1_ref, b1_ref, w2_ref, b2_ref, w3_ref, b3_ref,
                   w6_ref, b6_ref, w7_ref, b7_ref, out_ref,
                   a1_ref, p1_ref, a2_ref, p2_ref, *, h, w):
    ch1, cw1 = h - 4, w - 4
    ph1, pw1 = ch1 // 2, cw1 // 2
    ch2, cw2 = ph1 - 4, pw1 - 4
    ph2, pw2 = ch2 // 2, cw2 // 2

    # c1 + relu1 + s2
    _conv5x5_relu(x_ref, w1_ref, b1_ref, a1_ref, h=h, w=w, cin=1, cout=C1)
    _maxpool2x2(a1_ref, p1_ref, ph=ph1, pw=pw1)
    # c3 + relu3 + s4
    _conv5x5_relu(p1_ref, w2_ref, b2_ref, a2_ref, h=ph1, w=pw1, cin=C1, cout=C3)
    _maxpool2x2(a2_ref, p2_ref, ph=ph2, pw=pw2)

    # c5 + relu5 : (5, 5, C3) -> (1, C5); 5x5 valid conv with 1x1 output, i.e.
    # a fully-connected layer over the remaining 5*5*C3 activations.
    acc = jnp.zeros((1, C5), jnp.float32)
    for i in range(KS):
        for j in range(KS):
            patch = p2_ref[i, pl.ds(j, 1), :]            # (1, C3)
            acc = acc + jnp.dot(patch, w3_ref[i * KS + j],
                                preferred_element_type=jnp.float32,
                                precision=lax.Precision.HIGHEST)
    x5 = jnp.maximum(acc + b3_ref[...], 0.0)             # (1, C5)

    # f6 + relu6
    h6 = jnp.dot(x5, w6_ref[...], preferred_element_type=jnp.float32,
                 precision=lax.Precision.HIGHEST) + b6_ref[...]
    h6 = jnp.maximum(h6, 0.0)                            # (1, F6)

    # f7 + log_softmax (fused epilogue)
    logits = jnp.dot(h6, w7_ref[...], preferred_element_type=jnp.float32,
                     precision=lax.Precision.HIGHEST) + b7_ref[...]  # (1, F7)
    mx = jnp.max(logits, axis=-1, keepdims=True)
    s = logits - mx
    lse = jnp.log(jnp.sum(jnp.exp(s), axis=-1, keepdims=True))
    out_ref[...] = (s - lse).astype(out_ref.dtype)


# ---------------------------------------------------------------------------
# Wrapper
# ---------------------------------------------------------------------------
def _prep_conv_w(wt):
    """(cout, cin, kh, kw) [PyTorch OIHW] -> (kh*kw, cin, cout)."""
    co, ci, kh, kw = wt.shape
    return jnp.transpose(wt, (2, 3, 1, 0)).reshape(kh * kw, ci, co)


def lenet5_forward(params, img):
    n, cin, h, w = img.shape
    assert cin == 1
    ch1, cw1 = h - 4, w - 4
    ph1, pw1 = ch1 // 2, cw1 // 2
    ch2, cw2 = ph1 - 4, pw1 - 4
    ph2, pw2 = ch2 // 2, cw2 // 2
    assert ph2 == KS and pw2 == KS, "c5 expects a 5x5 spatial input"

    x = jnp.transpose(img, (0, 2, 3, 1))                 # NHWC (one-time glue)

    w1 = _prep_conv_w(params["c1_w"]); b1 = params["c1_b"].reshape(1, -1)
    w2 = _prep_conv_w(params["c3_w"]); b2 = params["c3_b"].reshape(1, -1)
    w3 = _prep_conv_w(params["c5_w"]); b3 = params["c5_b"].reshape(1, -1)
    w6 = params["f6_w"];               b6 = params["f6_b"].reshape(1, -1)
    w7 = params["f7_w"];               b7 = params["f7_b"].reshape(1, -1)

    def whole(arr):
        return pl.BlockSpec(arr.shape, lambda i, _nd=arr.ndim: (0,) * _nd)

    flops_per_img = 2 * (ch1 * cw1 * 25 * 1 * C1 + ch2 * cw2 * 25 * C1 * C3
                         + 25 * C3 * C5 + C5 * F6 + F6 * F7)
    weight_bytes = 4 * sum(int(a.size)
                           for a in (w1, b1, w2, b2, w3, b3, w6, b6, w7, b7))
    cost = pl.CostEstimate(
        flops=int(n * flops_per_img),
        transcendentals=int(n * (F7 + 1)),
        bytes_accessed=int(x.size) * 4 + weight_bytes + n * F7 * 4)

    kernel = functools.partial(_lenet5_kernel, h=h, w=w)

    out = pl.pallas_call(
        kernel,
        out_shape=jax.ShapeDtypeStruct((n, 1, F7), jnp.float32),
        grid=(n,),
        in_specs=[
            pl.BlockSpec((None, h, w, 1), lambda i: (i, 0, 0, 0)),
            whole(w1), whole(b1),
            whole(w2), whole(b2),
            whole(w3), whole(b3),
            whole(w6), whole(b6),
            whole(w7), whole(b7),
        ],
        out_specs=pl.BlockSpec((None, 1, F7), lambda i: (i, 0, 0)),
        scratch_shapes=[
            pltpu.VMEM((ch1, cw1, C1), jnp.float32),     # c1 output (pre-pool)
            pltpu.VMEM((ph1, pw1, C1), jnp.float32),     # s2 output
            pltpu.VMEM((ch2, cw2, C3), jnp.float32),     # c3 output (pre-pool)
            pltpu.VMEM((ph2, pw2, C3), jnp.float32),     # s4 output
        ],
        compiler_params=pltpu.CompilerParams(
            dimension_semantics=("parallel",)),
        cost_estimate=cost,
    )(x, w1, b1, w2, b2, w3, b3, w6, b6, w7, b7)
    return out.reshape(n, F7)


# ---------------------------------------------------------------------------
# Params + pure-JAX reference (for the correctness check in __main__)
# ---------------------------------------------------------------------------
def init_params(key, dtype=jnp.float32):
    ks = jax.random.split(key, 10)
    s = 0.05
    return {
        "c1_w": jax.random.normal(ks[0], (C1, 1, 5, 5), dtype) * s,
        "c1_b": jax.random.normal(ks[1], (C1,), dtype) * s,
        "c3_w": jax.random.normal(ks[2], (C3, C1, 5, 5), dtype) * s,
        "c3_b": jax.random.normal(ks[3], (C3,), dtype) * s,
        "c5_w": jax.random.normal(ks[4], (C5, C3, 5, 5), dtype) * s,
        "c5_b": jax.random.normal(ks[5], (C5,), dtype) * s,
        "f6_w": jax.random.normal(ks[6], (C5, F6), dtype) * s,   # (in, out)
        "f6_b": jax.random.normal(ks[7], (F6,), dtype) * s,
        "f7_w": jax.random.normal(ks[8], (F6, F7), dtype) * s,
        "f7_b": jax.random.normal(ks[9], (F7,), dtype) * s,
    }


def _reference_forward(params, img):
    dn = ("NCHW", "OIHW", "NCHW")
    hp = lax.Precision.HIGHEST

    def conv_relu(x, wt, b):
        y = lax.conv_general_dilated(x, wt, window_strides=(1, 1),
                                     padding="VALID", dimension_numbers=dn,
                                     precision=hp)
        return jax.nn.relu(y + b[None, :, None, None])

    def pool(x):
        return lax.reduce_window(x, -jnp.inf, lax.max,
                                 (1, 1, 2, 2), (1, 1, 2, 2), "VALID")

    x = pool(conv_relu(img, params["c1_w"], params["c1_b"]))
    x = pool(conv_relu(x, params["c3_w"], params["c3_b"]))
    x = conv_relu(x, params["c5_w"], params["c5_b"])
    x = x.reshape(img.shape[0], -1)
    x = jax.nn.relu(jnp.dot(x, params["f6_w"], precision=hp) + params["f6_b"])
    x = jnp.dot(x, params["f7_w"], precision=hp) + params["f7_b"]
    return jax.nn.log_softmax(x, axis=-1)


if __name__ == "__main__":
    key = jax.random.PRNGKey(0)
    pkey, xkey = jax.random.split(key)
    params = init_params(pkey)
    img = jax.random.normal(xkey, (2, 1, 32, 32), jnp.float32)

    out = jax.block_until_ready(jax.jit(lenet5_forward)(params, img))

    assert out.shape == (2, F7), out.shape
    assert bool(jnp.all(jnp.isfinite(out)))
    # log-softmax rows should exp-sum to ~1
    assert bool(jnp.allclose(jnp.sum(jnp.exp(out), axis=-1), 1.0, atol=1e-4))
    # match a pure-JAX reference of the same network
    ref = _reference_forward(params, img)
    assert bool(jnp.allclose(out, ref, atol=1e-3, rtol=1e-3)), \
        float(jnp.max(jnp.abs(out - ref)))
    print("KERNEL_OK")
</pallas_src>

<mosaic_0001>
module attributes {stable_mosaic.version = 11 : i64} {
  func.func @_lenet5_kernel(%arg0: i32, %arg1: memref<1x32x32x1xf32, #tpu.memory_space<vmem>>, %arg2: memref<25x1x8xf32, #tpu.memory_space<vmem>>, %arg3: memref<1x8xf32, #tpu.memory_space<vmem>>, %arg4: memref<25x8x16xf32, #tpu.memory_space<vmem>>, %arg5: memref<1x16xf32, #tpu.memory_space<vmem>>, %arg6: memref<25x16x32xf32, #tpu.memory_space<vmem>>, %arg7: memref<1x32xf32, #tpu.memory_space<vmem>>, %arg8: memref<32x84xf32, #tpu.memory_space<vmem>>, %arg9: memref<1x84xf32, #tpu.memory_space<vmem>>, %arg10: memref<84x10xf32, #tpu.memory_space<vmem>>, %arg11: memref<1x10xf32, #tpu.memory_space<vmem>>, %arg12: memref<1x1x10xf32, #tpu.memory_space<vmem>>, %arg13: memref<28x28x8xf32, #tpu.memory_space<vmem>>, %arg14: memref<14x14x8xf32, #tpu.memory_space<vmem>>, %arg15: memref<10x10x16xf32, #tpu.memory_space<vmem>>, %arg16: memref<5x5x16xf32, #tpu.memory_space<vmem>>) attributes {dimension_semantics = [#tpu.dimension_semantics<parallel>], iteration_bounds = array<i64: 2>, scalar_prefetch = 0 : i64, scratch_operands = 4 : i64, tpu.core_type = #tpu.core_type<tc>, window_params = [{transform_indices = @transform_0, window_bounds = array<i64: 1, 32, 32, 1>}, {pipeline_mode = #tpu.pipeline_mode<synchronous>, transform_indices = @transform_1, window_bounds = array<i64: 25, 1, 8>}, {pipeline_mode = #tpu.pipeline_mode<synchronous>, transform_indices = @transform_2, window_bounds = array<i64: 1, 8>}, {pipeline_mode = #tpu.pipeline_mode<synchronous>, transform_indices = @transform_3, window_bounds = array<i64: 25, 8, 16>}, {pipeline_mode = #tpu.pipeline_mode<synchronous>, transform_indices = @transform_4, window_bounds = array<i64: 1, 16>}, {pipeline_mode = #tpu.pipeline_mode<synchronous>, transform_indices = @transform_5, window_bounds = array<i64: 25, 16, 32>}, {pipeline_mode = #tpu.pipeline_mode<synchronous>, transform_indices = @transform_6, window_bounds = array<i64: 1, 32>}, {pipeline_mode = #tpu.pipeline_mode<synchronous>, transform_indices = @transform_7, window_bounds = array<i64: 32, 84>}, {pipeline_mode = #tpu.pipeline_mode<synchronous>, transform_indices = @transform_8, window_bounds = array<i64: 1, 84>}, {pipeline_mode = #tpu.pipeline_mode<synchronous>, transform_indices = @transform_9, window_bounds = array<i64: 84, 10>}, {pipeline_mode = #tpu.pipeline_mode<synchronous>, transform_indices = @transform_10, window_bounds = array<i64: 1, 10>}, {transform_indices = @transform_11, window_bounds = array<i64: 1, 1, 10>}]} {
    %c0 = arith.constant 0 : index
    %c0_0 = arith.constant 0 : index
    %0 = vector.load %arg3[%c0, %c0_0] : memref<1x8xf32, #tpu.memory_space<vmem>>, vector<1x8xf32>
    %c0_1 = arith.constant 0 : index
    %c0_2 = arith.constant 0 : index
    %c0_3 = arith.constant 0 : index
    %1 = vector.load %arg2[%c0_1, %c0_2, %c0_3] : memref<25x1x8xf32, #tpu.memory_space<vmem>>, vector<1x1x8xf32>
    %2 = vector.shape_cast %1 : vector<1x1x8xf32> to vector<1x8xf32>
    %c1 = arith.constant 1 : index
    %c0_4 = arith.constant 0 : index
    %c0_5 = arith.constant 0 : index
    %3 = vector.load %arg2[%c1, %c0_4, %c0_5] : memref<25x1x8xf32, #tpu.memory_space<vmem>>, vector<1x1x8xf32>
    %4 = vector.shape_cast %3 : vector<1x1x8xf32> to vector<1x8xf32>
    %c2 = arith.constant 2 : index
    %c0_6 = arith.constant 0 : index
    %c0_7 = arith.constant 0 : index
    %5 = vector.load %arg2[%c2, %c0_6, %c0_7] : memref<25x1x8xf32, #tpu.memory_space<vmem>>, vector<1x1x8xf32>
    %6 = vector.shape_cast %5 : vector<1x1x8xf32> to vector<1x8xf32>
    %c3 = arith.constant 3 : index
    %c0_8 = arith.constant 0 : index
    %c0_9 = arith.constant 0 : index
    %7 = vector.load %arg2[%c3, %c0_8, %c0_9] : memref<25x1x8xf32, #tpu.memory_space<vmem>>, vector<1x1x8xf32>
    %8 = vector.shape_cast %7 : vector<1x1x8xf32> to vector<1x8xf32>
    %c4 = arith.constant 4 : index
    %c0_10 = arith.constant 0 : index
    %c0_11 = arith.constant 0 : index
    %9 = vector.load %arg2[%c4, %c0_10, %c0_11] : memref<25x1x8xf32, #tpu.memory_space<vmem>>, vector<1x1x8xf32>
    %10 = vector.shape_cast %9 : vector<1x1x8xf32> to vector<1x8xf32>
    %c5 = arith.constant 5 : index
    %c0_12 = arith.constant 0 : index
    %c0_13 = arith.constant 0 : index
    %11 = vector.load %arg2[%c5, %c0_12, %c0_13] : memref<25x1x8xf32, #tpu.memory_space<vmem>>, vector<1x1x8xf32>
    %12 = vector.shape_cast %11 : vector<1x1x8xf32> to vector<1x8xf32>
    %c6 = arith.constant 6 : index
    %c0_14 = arith.constant 0 : index
    %c0_15 = arith.constant 0 : index
    %13 = vector.load %arg2[%c6, %c0_14, %c0_15] : memref<25x1x8xf32, #tpu.memory_space<vmem>>, vector<1x1x8xf32>
    %14 = vector.shape_cast %13 : vector<1x1x8xf32> to vector<1x8xf32>
    %c7 = arith.constant 7 : index
    %c0_16 = arith.constant 0 : index
    %c0_17 = arith.constant 0 : index
    %15 = vector.load %arg2[%c7, %c0_16, %c0_17] : memref<25x1x8xf32, #tpu.memory_space<vmem>>, vector<1x1x8xf32>
    %16 = vector.shape_cast %15 : vector<1x1x8xf32> to vector<1x8xf32>
    %c8 = arith.constant 8 : index
    %c0_18 = arith.constant 0 : index
    %c0_19 = arith.constant 0 : index
    %17 = vector.load %arg2[%c8, %c0_18, %c0_19] : memref<25x1x8xf32, #tpu.memory_space<vmem>>, vector<1x1x8xf32>
    %18 = vector.shape_cast %17 : vector<1x1x8xf32> to vector<1x8xf32>
    %c9 = arith.constant 9 : index
    %c0_20 = arith.constant 0 : index
    %c0_21 = arith.constant 0 : index
    %19 = vector.load %arg2[%c9, %c0_20, %c0_21] : memref<25x1x8xf32, #tpu.memory_space<vmem>>, vector<1x1x8xf32>
    %20 = vector.shape_cast %19 : vector<1x1x8xf32> to vector<1x8xf32>
    %c10 = arith.constant 10 : index
    %c0_22 = arith.constant 0 : index
    %c0_23 = arith.constant 0 : index
    %21 = vector.load %arg2[%c10, %c0_22, %c0_23] : memref<25x1x8xf32, #tpu.memory_space<vmem>>, vector<1x1x8xf32>
    %22 = vector.shape_cast %21 : vector<1x1x8xf32> to vector<1x8xf32>
    %c11 = arith.constant 11 : index
    %c0_24 = arith.constant 0 : index
    %c0_25 = arith.constant 0 : index
    %23 = vector.load %arg2[%c11, %c0_24, %c0_25] : memref<25x1x8xf32, #tpu.memory_space<vmem>>, vector<1x1x8xf32>
    %24 = vector.shape_cast %23 : vector<1x1x8xf32> to vector<1x8xf32>
    %c12 = arith.constant 12 : index
    %c0_26 = arith.constant 0 : index
    %c0_27 = arith.constant 0 : index
    %25 = vector.load %arg2[%c12, %c0_26, %c0_27] : memref<25x1x8xf32, #tpu.memory_space<vmem>>, vector<1x1x8xf32>
    %26 = vector.shape_cast %25 : vector<1x1x8xf32> to vector<1x8xf32>
    %c13 = arith.constant 13 : index
    %c0_28 = arith.constant 0 : index
    %c0_29 = arith.constant 0 : index
    %27 = vector.load %arg2[%c13, %c0_28, %c0_29] : memref<25x1x8xf32, #tpu.memory_space<vmem>>, vector<1x1x8xf32>
    %28 = vector.shape_cast %27 : vector<1x1x8xf32> to vector<1x8xf32>
    %c14 = arith.constant 14 : index
    %c0_30 = arith.constant 0 : index
    %c0_31 = arith.constant 0 : index
    %29 = vector.load %arg2[%c14, %c0_30, %c0_31] : memref<25x1x8xf32, #tpu.memory_space<vmem>>, vector<1x1x8xf32>
    %30 = vector.shape_cast %29 : vector<1x1x8xf32> to vector<1x8xf32>
    %c15 = arith.constant 15 : index
    %c0_32 = arith.constant 0 : index
    %c0_33 = arith.constant 0 : index
    %31 = vector.load %arg2[%c15, %c0_32, %c0_33] : memref<25x1x8xf32, #tpu.memory_space<vmem>>, vector<1x1x8xf32>
    %32 = vector.shape_cast %31 : vector<1x1x8xf32> to vector<1x8xf32>
    %c16 = arith.constant 16 : index
    %c0_34 = arith.constant 0 : index
    %c0_35 = arith.constant 0 : index
    %33 = vector.load %arg2[%c16, %c0_34, %c0_35] : memref<25x1x8xf32, #tpu.memory_space<vmem>>, vector<1x1x8xf32>
    %34 = vector.shape_cast %33 : vector<1x1x8xf32> to vector<1x8xf32>
    %c17 = arith.constant 17 : index
    %c0_36 = arith.constant 0 : index
    %c0_37 = arith.constant 0 : index
    %35 = vector.load %arg2[%c17, %c0_36, %c0_37] : memref<25x1x8xf32, #tpu.memory_space<vmem>>, vector<1x1x8xf32>
    %36 = vector.shape_cast %35 : vector<1x1x8xf32> to vector<1x8xf32>
    %c18 = arith.constant 18 : index
    %c0_38 = arith.constant 0 : index
    %c0_39 = arith.constant 0 : index
    %37 = vector.load %arg2[%c18, %c0_38, %c0_39] : memref<25x1x8xf32, #tpu.memory_space<vmem>>, vector<1x1x8xf32>
    %38 = vector.shape_cast %37 : vector<1x1x8xf32> to vector<1x8xf32>
    %c19 = arith.constant 19 : index
    %c0_40 = arith.constant 0 : index
    %c0_41 = arith.constant 0 : index
    %39 = vector.load %arg2[%c19, %c0_40, %c0_41] : memref<25x1x8xf32, #tpu.memory_space<vmem>>, vector<1x1x8xf32>
    %40 = vector.shape_cast %39 : vector<1x1x8xf32> to vector<1x8xf32>
    %c20 = arith.constant 20 : index
    %c0_42 = arith.constant 0 : index
    %c0_43 = arith.constant 0 : index
    %41 = vector.load %arg2[%c20, %c0_42, %c0_43] : memref<25x1x8xf32, #tpu.memory_space<vmem>>, vector<1x1x8xf32>
    %42 = vector.shape_cast %41 : vector<1x1x8xf32> to vector<1x8xf32>
    %c21 = arith.constant 21 : index
    %c0_44 = arith.constant 0 : index
    %c0_45 = arith.constant 0 : index
    %43 = vector.load %arg2[%c21, %c0_44, %c0_45] : memref<25x1x8xf32, #tpu.memory_space<vmem>>, vector<1x1x8xf32>
    %44 = vector.shape_cast %43 : vector<1x1x8xf32> to vector<1x8xf32>
    %c22 = arith.constant 22 : index
    %c0_46 = arith.constant 0 : index
    %c0_47 = arith.constant 0 : index
    %45 = vector.load %arg2[%c22, %c0_46, %c0_47] : memref<25x1x8xf32, #tpu.memory_space<vmem>>, vector<1x1x8xf32>
    %46 = vector.shape_cast %45 : vector<1x1x8xf32> to vector<1x8xf32>
    %c23 = arith.constant 23 : index
    %c0_48 = arith.constant 0 : index
    %c0_49 = arith.constant 0 : index
    %47 = vector.load %arg2[%c23, %c0_48, %c0_49] : memref<25x1x8xf32, #tpu.memory_space<vmem>>, vector<1x1x8xf32>
    %48 = vector.shape_cast %47 : vector<1x1x8xf32> to vector<1x8xf32>
    %c24 = arith.constant 24 : index
    %c0_50 = arith.constant 0 : index
    %c0_51 = arith.constant 0 : index
    %49 = vector.load %arg2[%c24, %c0_50, %c0_51] : memref<25x1x8xf32, #tpu.memory_space<vmem>>, vector<1x1x8xf32>
    %50 = vector.shape_cast %49 : vector<1x1x8xf32> to vector<1x8xf32>
    %c0_i32 = arith.constant 0 : i32
    %c28_i32 = arith.constant 28 : i32
    %51 = arith.addi %c0_i32, %c28_i32 : i32
    %c1_i32 = arith.constant 1 : i32
    scf.for %arg17 = %c0_i32 to %51 step %c1_i32  : i32 {
      %cst_333 = arith.constant 0.000000e+00 : f32
      %284 = vector.broadcast %cst_333 : f32 to vector<28x8xf32>
      %c0_i32_334 = arith.constant 0 : i32
      %285 = arith.addi %arg17, %c0_i32_334 : i32
      %c0_335 = arith.constant 0 : index
      %286 = arith.index_cast %285 : i32 to index
      %c0_336 = arith.constant 0 : index
      %c0_337 = arith.constant 0 : index
      %287 = vector.load %arg1[%c0_335, %286, %c0_336, %c0_337] : memref<1x32x32x1xf32, #tpu.memory_space<vmem>>, vector<1x1x28x1xf32>
      %288 = vector.shape_cast %287 : vector<1x1x28x1xf32> to vector<28x1xf32>
      %289 = vector.broadcast %288 : vector<28x1xf32> to vector<28x8xf32>
      %290 = vector.broadcast %2 : vector<1x8xf32> to vector<28x8xf32>
      %291 = arith.mulf %289, %290 : vector<28x8xf32>
      %292 = arith.addf %284, %291 : vector<28x8xf32>
      %c0_i32_338 = arith.constant 0 : i32
      %293 = arith.addi %arg17, %c0_i32_338 : i32
      %c0_339 = arith.constant 0 : index
      %294 = arith.index_cast %293 : i32 to index
      %c1_340 = arith.constant 1 : index
      %c0_341 = arith.constant 0 : index
      %295 = vector.load %arg1[%c0_339, %294, %c1_340, %c0_341] : memref<1x32x32x1xf32, #tpu.memory_space<vmem>>, vector<1x1x28x1xf32>
      %296 = vector.shape_cast %295 : vector<1x1x28x1xf32> to vector<28x1xf32>
      %297 = vector.broadcast %296 : vector<28x1xf32> to vector<28x8xf32>
      %298 = vector.broadcast %4 : vector<1x8xf32> to vector<28x8xf32>
      %299 = arith.mulf %297, %298 : vector<28x8xf32>
      %300 = arith.addf %292, %299 : vector<28x8xf32>
      %c0_i32_342 = arith.constant 0 : i32
      %301 = arith.addi %arg17, %c0_i32_342 : i32
      %c0_343 = arith.constant 0 : index
      %302 = arith.index_cast %301 : i32 to index
      %c2_344 = arith.constant 2 : index
      %c0_345 = arith.constant 0 : index
      %303 = vector.load %arg1[%c0_343, %302, %c2_344, %c0_345] : memref<1x32x32x1xf32, #tpu.memory_space<vmem>>, vector<1x1x28x1xf32>
      %304 = vector.shape_cast %303 : vector<1x1x28x1xf32> to vector<28x1xf32>
      %305 = vector.broadcast %304 : vector<28x1xf32> to vector<28x8xf32>
      %306 = vector.broadcast %6 : vector<1x8xf32> to vector<28x8xf32>
      %307 = arith.mulf %305, %306 : vector<28x8xf32>
      %308 = arith.addf %300, %307 : vector<28x8xf32>
      %c0_i32_346 = arith.constant 0 : i32
      %309 = arith.addi %arg17, %c0_i32_346 : i32
      %c0_347 = arith.constant 0 : index
      %310 = arith.index_cast %309 : i32 to index
      %c3_348 = arith.constant 3 : index
      %c0_349 = arith.constant 0 : index
      %311 = vector.load %arg1[%c0_347, %310, %c3_348, %c0_349] : memref<1x32x32x1xf32, #tpu.memory_space<vmem>>, vector<1x1x28x1xf32>
      %312 = vector.shape_cast %311 : vector<1x1x28x1xf32> to vector<28x1xf32>
      %313 = vector.broadcast %312 : vector<28x1xf32> to vector<28x8xf32>
      %314 = vector.broadcast %8 : vector<1x8xf32> to vector<28x8xf32>
      %315 = arith.mulf %313, %314 : vector<28x8xf32>
      %316 = arith.addf %308, %315 : vector<28x8xf32>
      %c0_i32_350 = arith.constant 0 : i32
      %317 = arith.addi %arg17, %c0_i32_350 : i32
      %c0_351 = arith.constant 0 : index
      %318 = arith.index_cast %317 : i32 to index
      %c4_352 = arith.constant 4 : index
      %c0_353 = arith.constant 0 : index
      %319 = vector.load %arg1[%c0_351, %318, %c4_352, %c0_353] : memref<1x32x32x1xf32, #tpu.memory_space<vmem>>, vector<1x1x28x1xf32>
      %320 = vector.shape_cast %319 : vector<1x1x28x1xf32> to vector<28x1xf32>
      %321 = vector.broadcast %320 : vector<28x1xf32> to vector<28x8xf32>
      %322 = vector.broadcast %10 : vector<1x8xf32> to vector<28x8xf32>
      %323 = arith.mulf %321, %322 : vector<28x8xf32>
      %324 = arith.addf %316, %323 : vector<28x8xf32>
      %c1_i32_354 = arith.constant 1 : i32
      %325 = arith.addi %arg17, %c1_i32_354 : i32
      %c0_355 = arith.constant 0 : index
      %326 = arith.index_cast %325 : i32 to index
      %c0_356 = arith.constant 0 : index
      %c0_357 = arith.constant 0 : index
      %327 = vector.load %arg1[%c0_355, %326, %c0_356, %c0_357] : memref<1x32x32x1xf32, #tpu.memory_space<vmem>>, vector<1x1x28x1xf32>
      %328 = vector.shape_cast %327 : vector<1x1x28x1xf32> to vector<28x1xf32>
      %329 = vector.broadcast %328 : vector<28x1xf32> to vector<28x8xf32>
      %330 = vector.broadcast %12 : vector<1x8xf32> to vector<28x8xf32>
      %331 = arith.mulf %329, %330 : vector<28x8xf32>
      %332 = arith.addf %324, %331 : vector<28x8xf32>
      %c1_i32_358 = arith.constant 1 : i32
      %333 = arith.addi %arg17, %c1_i32_358 : i32
      %c0_359 = arith.constant 0 : index
      %334 = arith.index_cast %333 : i32 to index
      %c1_360 = arith.constant 1 : index
      %c0_361 = arith.constant 0 : index
      %335 = vector.load %arg1[%c0_359, %334, %c1_360, %c0_361] : memref<1x32x32x1xf32, #tpu.memory_space<vmem>>, vector<1x1x28x1xf32>
      %336 = vector.shape_cast %335 : vector<1x1x28x1xf32> to vector<28x1xf32>
      %337 = vector.broadcast %336 : vector<28x1xf32> to vector<28x8xf32>
      %338 = vector.broadcast %14 : vector<1x8xf32> to vector<28x8xf32>
      %339 = arith.mulf %337, %338 : vector<28x8xf32>
      %340 = arith.addf %332, %339 : vector<28x8xf32>
      %c1_i32_362 = arith.constant 1 : i32
      %341 = arith.addi %arg17, %c1_i32_362 : i32
      %c0_363 = arith.constant 0 : index
      %342 = arith.index_cast %341 : i32 to index
      %c2_364 = arith.constant 2 : index
      %c0_365 = arith.constant 0 : index
      %343 = vector.load %arg1[%c0_363, %342, %c2_364, %c0_365] : memref<1x32x32x1xf32, #tpu.memory_space<vmem>>, vector<1x1x28x1xf32>
      %344 = vector.shape_cast %343 : vector<1x1x28x1xf32> to vector<28x1xf32>
      %345 = vector.broadcast %344 : vector<28x1xf32> to vector<28x8xf32>
      %346 = vector.broadcast %16 : vector<1x8xf32> to vector<28x8xf32>
      %347 = arith.mulf %345, %346 : vector<28x8xf32>
      %348 = arith.addf %340, %347 : vector<28x8xf32>
      %c1_i32_366 = arith.constant 1 : i32
      %349 = arith.addi %arg17, %c1_i32_366 : i32
      %c0_367 = arith.constant 0 : index
      %350 = arith.index_cast %349 : i32 to index
      %c3_368 = arith.constant 3 : index
      %c0_369 = arith.constant 0 : index
      %351 = vector.load %arg1[%c0_367, %350, %c3_368, %c0_369] : memref<1x32x32x1xf32, #tpu.memory_space<vmem>>, vector<1x1x28x1xf32>
      %352 = vector.shape_cast %351 : vector<1x1x28x1xf32> to vector<28x1xf32>
      %353 = vector.broadcast %352 : vector<28x1xf32> to vector<28x8xf32>
      %354 = vector.broadcast %18 : vector<1x8xf32> to vector<28x8xf32>
      %355 = arith.mulf %353, %354 : vector<28x8xf32>
      %356 = arith.addf %348, %355 : vector<28x8xf32>
      %c1_i32_370 = arith.constant 1 : i32
      %357 = arith.addi %arg17, %c1_i32_370 : i32
      %c0_371 = arith.constant 0 : index
      %358 = arith.index_cast %357 : i32 to index
      %c4_372 = arith.constant 4 : index
      %c0_373 = arith.constant 0 : index
      %359 = vector.load %arg1[%c0_371, %358, %c4_372, %c0_373] : memref<1x32x32x1xf32, #tpu.memory_space<vmem>>, vector<1x1x28x1xf32>
      %360 = vector.shape_cast %359 : vector<1x1x28x1xf32> to vector<28x1xf32>
      %361 = vector.broadcast %360 : vector<28x1xf32> to vector<28x8xf32>
      %362 = vector.broadcast %20 : vector<1x8xf32> to vector<28x8xf32>
      %363 = arith.mulf %361, %362 : vector<28x8xf32>
      %364 = arith.addf %356, %363 : vector<28x8xf32>
      %c2_i32 = arith.constant 2 : i32
      %365 = arith.addi %arg17, %c2_i32 : i32
      %c0_374 = arith.constant 0 : index
      %366 = arith.index_cast %365 : i32 to index
      %c0_375 = arith.constant 0 : index
      %c0_376 = arith.constant 0 : index
      %367 = vector.load %arg1[%c0_374, %366, %c0_375, %c0_376] : memref<1x32x32x1xf32, #tpu.memory_space<vmem>>, vector<1x1x28x1xf32>
      %368 = vector.shape_cast %367 : vector<1x1x28x1xf32> to vector<28x1xf32>
      %369 = vector.broadcast %368 : vector<28x1xf32> to vector<28x8xf32>
      %370 = vector.broadcast %22 : vector<1x8xf32> to vector<28x8xf32>
      %371 = arith.mulf %369, %370 : vector<28x8xf32>
      %372 = arith.addf %364, %371 : vector<28x8xf32>
      %c2_i32_377 = arith.constant 2 : i32
      %373 = arith.addi %arg17, %c2_i32_377 : i32
      %c0_378 = arith.constant 0 : index
      %374 = arith.index_cast %373 : i32 to index
      %c1_379 = arith.constant 1 : index
      %c0_380 = arith.constant 0 : index
      %375 = vector.load %arg1[%c0_378, %374, %c1_379, %c0_380] : memref<1x32x32x1xf32, #tpu.memory_space<vmem>>, vector<1x1x28x1xf32>
      %376 = vector.shape_cast %375 : vector<1x1x28x1xf32> to vector<28x1xf32>
      %377 = vector.broadcast %376 : vector<28x1xf32> to vector<28x8xf32>
      %378 = vector.broadcast %24 : vector<1x8xf32> to vector<28x8xf32>
      %379 = arith.mulf %377, %378 : vector<28x8xf32>
      %380 = arith.addf %372, %379 : vector<28x8xf32>
      %c2_i32_381 = arith.constant 2 : i32
      %381 = arith.addi %arg17, %c2_i32_381 : i32
      %c0_382 = arith.constant 0 : index
      %382 = arith.index_cast %381 : i32 to index
      %c2_383 = arith.constant 2 : index
      %c0_384 = arith.constant 0 : index
      %383 = vector.load %arg1[%c0_382, %382, %c2_383, %c0_384] : memref<1x32x32x1xf32, #tpu.memory_space<vmem>>, vector<1x1x28x1xf32>
      %384 = vector.shape_cast %383 : vector<1x1x28x1xf32> to vector<28x1xf32>
      %385 = vector.broadcast %384 : vector<28x1xf32> to vector<28x8xf32>
      %386 = vector.broadcast %26 : vector<1x8xf32> to vector<28x8xf32>
      %387 = arith.mulf %385, %386 : vector<28x8xf32>
      %388 = arith.addf %380, %387 : vector<28x8xf32>
      %c2_i32_385 = arith.constant 2 : i32
      %389 = arith.addi %arg17, %c2_i32_385 : i32
      %c0_386 = arith.constant 0 : index
      %390 = arith.index_cast %389 : i32 to index
      %c3_387 = arith.constant 3 : index
      %c0_388 = arith.constant 0 : index
      %391 = vector.load %arg1[%c0_386, %390, %c3_387, %c0_388] : memref<1x32x32x1xf32, #tpu.memory_space<vmem>>, vector<1x1x28x1xf32>
      %392 = vector.shape_cast %391 : vector<1x1x28x1xf32> to vector<28x1xf32>
      %393 = vector.broadcast %392 : vector<28x1xf32> to vector<28x8xf32>
      %394 = vector.broadcast %28 : vector<1x8xf32> to vector<28x8xf32>
      %395 = arith.mulf %393, %394 : vector<28x8xf32>
      %396 = arith.addf %388, %395 : vector<28x8xf32>
      %c2_i32_389 = arith.constant 2 : i32
      %397 = arith.addi %arg17, %c2_i32_389 : i32
      %c0_390 = arith.constant 0 : index
      %398 = arith.index_cast %397 : i32 to index
      %c4_391 = arith.constant 4 : index
      %c0_392 = arith.constant 0 : index
      %399 = vector.load %arg1[%c0_390, %398, %c4_391, %c0_392] : memref<1x32x32x1xf32, #tpu.memory_space<vmem>>, vector<1x1x28x1xf32>
      %400 = vector.shape_cast %399 : vector<1x1x28x1xf32> to vector<28x1xf32>
      %401 = vector.broadcast %400 : vector<28x1xf32> to vector<28x8xf32>
      %402 = vector.broadcast %30 : vector<1x8xf32> to vector<28x8xf32>
      %403 = arith.mulf %401, %402 : vector<28x8xf32>
      %404 = arith.addf %396, %403 : vector<28x8xf32>
      %c3_i32 = arith.constant 3 : i32
      %405 = arith.addi %arg17, %c3_i32 : i32
      %c0_393 = arith.constant 0 : index
      %406 = arith.index_cast %405 : i32 to index
      %c0_394 = arith.constant 0 : index
      %c0_395 = arith.constant 0 : index
      %407 = vector.load %arg1[%c0_393, %406, %c0_394, %c0_395] : memref<1x32x32x1xf32, #tpu.memory_space<vmem>>, vector<1x1x28x1xf32>
      %408 = vector.shape_cast %407 : vector<1x1x28x1xf32> to vector<28x1xf32>
      %409 = vector.broadcast %408 : vector<28x1xf32> to vector<28x8xf32>
      %410 = vector.broadcast %32 : vector<1x8xf32> to vector<28x8xf32>
      %411 = arith.mulf %409, %410 : vector<28x8xf32>
      %412 = arith.addf %404, %411 : vector<28x8xf32>
      %c3_i32_396 = arith.constant 3 : i32
      %413 = arith.addi %arg17, %c3_i32_396 : i32
      %c0_397 = arith.constant 0 : index
      %414 = arith.index_cast %413 : i32 to index
      %c1_398 = arith.constant 1 : index
      %c0_399 = arith.constant 0 : index
      %415 = vector.load %arg1[%c0_397, %414, %c1_398, %c0_399] : memref<1x32x32x1xf32, #tpu.memory_space<vmem>>, vector<1x1x28x1xf32>
      %416 = vector.shape_cast %415 : vector<1x1x28x1xf32> to vector<28x1xf32>
      %417 = vector.broadcast %416 : vector<28x1xf32> to vector<28x8xf32>
      %418 = vector.broadcast %34 : vector<1x8xf32> to vector<28x8xf32>
      %419 = arith.mulf %417, %418 : vector<28x8xf32>
      %420 = arith.addf %412, %419 : vector<28x8xf32>
      %c3_i32_400 = arith.constant 3 : i32
      %421 = arith.addi %arg17, %c3_i32_400 : i32
      %c0_401 = arith.constant 0 : index
      %422 = arith.index_cast %421 : i32 to index
      %c2_402 = arith.constant 2 : index
      %c0_403 = arith.constant 0 : index
      %423 = vector.load %arg1[%c0_401, %422, %c2_402, %c0_403] : memref<1x32x32x1xf32, #tpu.memory_space<vmem>>, vector<1x1x28x1xf32>
      %424 = vector.shape_cast %423 : vector<1x1x28x1xf32> to vector<28x1xf32>
      %425 = vector.broadcast %424 : vector<28x1xf32> to vector<28x8xf32>
      %426 = vector.broadcast %36 : vector<1x8xf32> to vector<28x8xf32>
      %427 = arith.mulf %425, %426 : vector<28x8xf32>
      %428 = arith.addf %420, %427 : vector<28x8xf32>
      %c3_i32_404 = arith.constant 3 : i32
      %429 = arith.addi %arg17, %c3_i32_404 : i32
      %c0_405 = arith.constant 0 : index
      %430 = arith.index_cast %429 : i32 to index
      %c3_406 = arith.constant 3 : index
      %c0_407 = arith.constant 0 : index
      %431 = vector.load %arg1[%c0_405, %430, %c3_406, %c0_407] : memref<1x32x32x1xf32, #tpu.memory_space<vmem>>, vector<1x1x28x1xf32>
      %432 = vector.shape_cast %431 : vector<1x1x28x1xf32> to vector<28x1xf32>
      %433 = vector.broadcast %432 : vector<28x1xf32> to vector<28x8xf32>
      %434 = vector.broadcast %38 : vector<1x8xf32> to vector<28x8xf32>
      %435 = arith.mulf %433, %434 : vector<28x8xf32>
      %436 = arith.addf %428, %435 : vector<28x8xf32>
      %c3_i32_408 = arith.constant 3 : i32
      %437 = arith.addi %arg17, %c3_i32_408 : i32
      %c0_409 = arith.constant 0 : index
      %438 = arith.index_cast %437 : i32 to index
      %c4_410 = arith.constant 4 : index
      %c0_411 = arith.constant 0 : index
      %439 = vector.load %arg1[%c0_409, %438, %c4_410, %c0_411] : memref<1x32x32x1xf32, #tpu.memory_space<vmem>>, vector<1x1x28x1xf32>
      %440 = vector.shape_cast %439 : vector<1x1x28x1xf32> to vector<28x1xf32>
      %441 = vector.broadcast %440 : vector<28x1xf32> to vector<28x8xf32>
      %442 = vector.broadcast %40 : vector<1x8xf32> to vector<28x8xf32>
      %443 = arith.mulf %441, %442 : vector<28x8xf32>
      %444 = arith.addf %436, %443 : vector<28x8xf32>
      %c4_i32 = arith.constant 4 : i32
      %445 = arith.addi %arg17, %c4_i32 : i32
      %c0_412 = arith.constant 0 : index
      %446 = arith.index_cast %445 : i32 to index
      %c0_413 = arith.constant 0 : index
      %c0_414 = arith.constant 0 : index
      %447 = vector.load %arg1[%c0_412, %446, %c0_413, %c0_414] : memref<1x32x32x1xf32, #tpu.memory_space<vmem>>, vector<1x1x28x1xf32>
      %448 = vector.shape_cast %447 : vector<1x1x28x1xf32> to vector<28x1xf32>
      %449 = vector.broadcast %448 : vector<28x1xf32> to vector<28x8xf32>
      %450 = vector.broadcast %42 : vector<1x8xf32> to vector<28x8xf32>
      %451 = arith.mulf %449, %450 : vector<28x8xf32>
      %452 = arith.addf %444, %451 : vector<28x8xf32>
      %c4_i32_415 = arith.constant 4 : i32
      %453 = arith.addi %arg17, %c4_i32_415 : i32
      %c0_416 = arith.constant 0 : index
      %454 = arith.index_cast %453 : i32 to index
      %c1_417 = arith.constant 1 : index
      %c0_418 = arith.constant 0 : index
      %455 = vector.load %arg1[%c0_416, %454, %c1_417, %c0_418] : memref<1x32x32x1xf32, #tpu.memory_space<vmem>>, vector<1x1x28x1xf32>
      %456 = vector.shape_cast %455 : vector<1x1x28x1xf32> to vector<28x1xf32>
      %457 = vector.broadcast %456 : vector<28x1xf32> to vector<28x8xf32>
      %458 = vector.broadcast %44 : vector<1x8xf32> to vector<28x8xf32>
      %459 = arith.mulf %457, %458 : vector<28x8xf32>
      %460 = arith.addf %452, %459 : vector<28x8xf32>
      %c4_i32_419 = arith.constant 4 : i32
      %461 = arith.addi %arg17, %c4_i32_419 : i32
      %c0_420 = arith.constant 0 : index
      %462 = arith.index_cast %461 : i32 to index
      %c2_421 = arith.constant 2 : index
      %c0_422 = arith.constant 0 : index
      %463 = vector.load %arg1[%c0_420, %462, %c2_421, %c0_422] : memref<1x32x32x1xf32, #tpu.memory_space<vmem>>, vector<1x1x28x1xf32>
      %464 = vector.shape_cast %463 : vector<1x1x28x1xf32> to vector<28x1xf32>
      %465 = vector.broadcast %464 : vector<28x1xf32> to vector<28x8xf32>
      %466 = vector.broadcast %46 : vector<1x8xf32> to vector<28x8xf32>
      %467 = arith.mulf %465, %466 : vector<28x8xf32>
      %468 = arith.addf %460, %467 : vector<28x8xf32>
      %c4_i32_423 = arith.constant 4 : i32
      %469 = arith.addi %arg17, %c4_i32_423 : i32
      %c0_424 = arith.constant 0 : index
      %470 = arith.index_cast %469 : i32 to index
      %c3_425 = arith.constant 3 : index
      %c0_426 = arith.constant 0 : index
      %471 = vector.load %arg1[%c0_424, %470, %c3_425, %c0_426] : memref<1x32x32x1xf32, #tpu.memory_space<vmem>>, vector<1x1x28x1xf32>
      %472 = vector.shape_cast %471 : vector<1x1x28x1xf32> to vector<28x1xf32>
      %473 = vector.broadcast %472 : vector<28x1xf32> to vector<28x8xf32>
      %474 = vector.broadcast %48 : vector<1x8xf32> to vector<28x8xf32>
      %475 = arith.mulf %473, %474 : vector<28x8xf32>
      %476 = arith.addf %468, %475 : vector<28x8xf32>
      %c4_i32_427 = arith.constant 4 : i32
      %477 = arith.addi %arg17, %c4_i32_427 : i32
      %c0_428 = arith.constant 0 : index
      %478 = arith.index_cast %477 : i32 to index
      %c4_429 = arith.constant 4 : index
      %c0_430 = arith.constant 0 : index
      %479 = vector.load %arg1[%c0_428, %478, %c4_429, %c0_430] : memref<1x32x32x1xf32, #tpu.memory_space<vmem>>, vector<1x1x28x1xf32>
      %480 = vector.shape_cast %479 : vector<1x1x28x1xf32> to vector<28x1xf32>
      %481 = vector.broadcast %480 : vector<28x1xf32> to vector<28x8xf32>
      %482 = vector.broadcast %50 : vector<1x8xf32> to vector<28x8xf32>
      %483 = arith.mulf %481, %482 : vector<28x8xf32>
      %484 = arith.addf %476, %483 : vector<28x8xf32>
      %485 = vector.broadcast %0 : vector<1x8xf32> to vector<28x8xf32>
      %486 = arith.addf %484, %485 : vector<28x8xf32>
      %cst_431 = arith.constant 0.000000e+00 : f32
      %487 = vector.broadcast %cst_431 : f32 to vector<28x8xf32>
      %488 = arith.maximumf %486, %487 : vector<28x8xf32>
      %489 = arith.index_cast %arg17 : i32 to index
      %c0_432 = arith.constant 0 : index
      %c0_433 = arith.constant 0 : index
      %490 = vector.load %arg13[%489, %c0_432, %c0_433] : memref<28x28x8xf32, #tpu.memory_space<vmem>>, vector<1x28x8xf32>
      %491 = vector.shape_cast %490 : vector<1x28x8xf32> to vector<28x8xf32>
      %492 = vector.shape_cast %488 : vector<28x8xf32> to vector<1x28x8xf32>
      tpu.vector_store %arg13[%489, %c0_432, %c0_433], %492 {strides = array<i32>} : memref<28x28x8xf32, #tpu.memory_space<vmem>>, vector<1x28x8xf32>,
    }
    %c28_i32_52 = arith.constant 28 : i32
    %c0_i32_53 = arith.constant 0 : i32
    %c14_i32 = arith.constant 14 : i32
    %52 = arith.addi %c0_i32_53, %c14_i32 : i32
    %c1_i32_54 = arith.constant 1 : i32
    scf.for %arg17 = %c0_i32_53 to %52 step %c1_i32_54  : i32 {
      %c2_i32 = arith.constant 2 : i32
      %284 = arith.muli %c2_i32, %arg17 : i32
      %285 = arith.index_cast %284 : i32 to index
      %c0_333 = arith.constant 0 : index
      %c0_334 = arith.constant 0 : index
      %286 = vector.load %arg13[%285, %c0_333, %c0_334] : memref<28x28x8xf32, #tpu.memory_space<vmem>>, vector<1x28x8xf32>
      %287 = vector.shape_cast %286 : vector<1x28x8xf32> to vector<28x8xf32>
      %c2_i32_335 = arith.constant 2 : i32
      %288 = arith.muli %c2_i32_335, %arg17 : i32
      %c1_i32_336 = arith.constant 1 : i32
      %289 = arith.addi %288, %c1_i32_336 : i32
      %290 = arith.index_cast %289 : i32 to index
      %c0_337 = arith.constant 0 : index
      %c0_338 = arith.constant 0 : index
      %291 = vector.load %arg13[%290, %c0_337, %c0_338] : memref<28x28x8xf32, #tpu.memory_space<vmem>>, vector<1x28x8xf32>
      %292 = vector.shape_cast %291 : vector<1x28x8xf32> to vector<28x8xf32>
      %293 = arith.maximumf %287, %292 : vector<28x8xf32>
      %294 = vector.extract_strided_slice %293 {offsets = [0, 0], sizes = [1, 8], strides = [1, 1]} : vector<28x8xf32> to vector<1x8xf32>
      %295 = vector.extract_strided_slice %293 {offsets = [1, 0], sizes = [1, 8], strides = [1, 1]} : vector<28x8xf32> to vector<1x8xf32>
      %296 = arith.maximumf %294, %295 : vector<1x8xf32>
      %297 = vector.extract_strided_slice %293 {offsets = [2, 0], sizes = [1, 8], strides = [1, 1]} : vector<28x8xf32> to vector<1x8xf32>
      %298 = vector.extract_strided_slice %293 {offsets = [3, 0], sizes = [1, 8], strides = [1, 1]} : vector<28x8xf32> to vector<1x8xf32>
      %299 = arith.maximumf %297, %298 : vector<1x8xf32>
      %300 = vector.extract_strided_slice %293 {offsets = [4, 0], sizes = [1, 8], strides = [1, 1]} : vector<28x8xf32> to vector<1x8xf32>
      %301 = vector.extract_strided_slice %293 {offsets = [5, 0], sizes = [1, 8], strides = [1, 1]} : vector<28x8xf32> to vector<1x8xf32>
      %302 = arith.maximumf %300, %301 : vector<1x8xf32>
      %303 = vector.extract_strided_slice %293 {offsets = [6, 0], sizes = [1, 8], strides = [1, 1]} : vector<28x8xf32> to vector<1x8xf32>
      %304 = vector.extract_strided_slice %293 {offsets = [7, 0], sizes = [1, 8], strides = [1, 1]} : vector<28x8xf32> to vector<1x8xf32>
      %305 = arith.maximumf %303, %304 : vector<1x8xf32>
      %306 = vector.extract_strided_slice %293 {offsets = [8, 0], sizes = [1, 8], strides = [1, 1]} : vector<28x8xf32> to vector<1x8xf32>
      %307 = vector.extract_strided_slice %293 {offsets = [9, 0], sizes = [1, 8], strides = [1, 1]} : vector<28x8xf32> to vector<1x8xf32>
      %308 = arith.maximumf %306, %307 : vector<1x8xf32>
      %309 = vector.extract_strided_slice %293 {offsets = [10, 0], sizes = [1, 8], strides = [1, 1]} : vector<28x8xf32> to vector<1x8xf32>
      %310 = vector.extract_strided_slice %293 {offsets = [11, 0], sizes = [1, 8], strides = [1, 1]} : vector<28x8xf32> to vector<1x8xf32>
      %311 = arith.maximumf %309, %310 : vector<1x8xf32>
      %312 = vector.extract_strided_slice %293 {offsets = [12, 0], sizes = [1, 8], strides = [1, 1]} : vector<28x8xf32> to vector<1x8xf32>
      %313 = vector.extract_strided_slice %293 {offsets = [13, 0], sizes = [1, 8], strides = [1, 1]} : vector<28x8xf32> to vector<1x8xf32>
      %314 = arith.maximumf %312, %313 : vector<1x8xf32>
      %315 = vector.extract_strided_slice %293 {offsets = [14, 0], sizes = [1, 8], strides = [1, 1]} : vector<28x8xf32> to vector<1x8xf32>
      %316 = vector.extract_strided_slice %293 {offsets = [15, 0], sizes = [1, 8], strides = [1, 1]} : vector<28x8xf32> to vector<1x8xf32>
      %317 = arith.maximumf %315, %316 : vector<1x8xf32>
      %318 = vector.extract_strided_slice %293 {offsets = [16, 0], sizes = [1, 8], strides = [1, 1]} : vector<28x8xf32> to vector<1x8xf32>
      %319 = vector.extract_strided_slice %293 {offsets = [17, 0], sizes = [1, 8], strides = [1, 1]} : vector<28x8xf32> to vector<1x8xf32>
      %320 = arith.maximumf %318, %319 : vector<1x8xf32>
      %321 = vector.extract_strided_slice %293 {offsets = [18, 0], sizes = [1, 8], strides = [1, 1]} : vector<28x8xf32> to vector<1x8xf32>
      %322 = vector.extract_strided_slice %293 {offsets = [19, 0], sizes = [1, 8], strides = [1, 1]} : vector<28x8xf32> to vector<1x8xf32>
      %323 = arith.maximumf %321, %322 : vector<1x8xf32>
      %324 = vector.extract_strided_slice %293 {offsets = [20, 0], sizes = [1, 8], strides = [1, 1]} : vector<28x8xf32> to vector<1x8xf32>
      %325 = vector.extract_strided_slice %293 {offsets = [21, 0], sizes = [1, 8], strides = [1, 1]} : vector<28x8xf32> to vector<1x8xf32>
      %326 = arith.maximumf %324, %325 : vector<1x8xf32>
      %327 = vector.extract_strided_slice %293 {offsets = [22, 0], sizes = [1, 8], strides = [1, 1]} : vector<28x8xf32> to vector<1x8xf32>
      %328 = vector.extract_strided_slice %293 {offsets = [23, 0], sizes = [1, 8], strides = [1, 1]} : vector<28x8xf32> to vector<1x8xf32>
      %329 = arith.maximumf %327, %328 : vector<1x8xf32>
      %330 = vector.extract_strided_slice %293 {offsets = [24, 0], sizes = [1, 8], strides = [1, 1]} : vector<28x8xf32> to vector<1x8xf32>
      %331 = vector.extract_strided_slice %293 {offsets = [25, 0], sizes = [1, 8], strides = [1, 1]} : vector<28x8xf32> to vector<1x8xf32>
      %332 = arith.maximumf %330, %331 : vector<1x8xf32>
      %333 = vector.extract_strided_slice %293 {offsets = [26, 0], sizes = [1, 8], strides = [1, 1]} : vector<28x8xf32> to vector<1x8xf32>
      %334 = vector.extract_strided_slice %293 {offsets = [27, 0], sizes = [1, 8], strides = [1, 1]} : vector<28x8xf32> to vector<1x8xf32>
      %335 = arith.maximumf %333, %334 : vector<1x8xf32>
      %336 = tpu.concatenate %296, %299, %302, %305, %308, %311, %314, %317, %320, %323, %326, %329, %332, %335 in 0 : vector<1x8xf32>, vector<1x8xf32>, vector<1x8xf32>, vector<1x8xf32>, vector<1x8xf32>, vector<1x8xf32>, vector<1x8xf32>, vector<1x8xf32>, vector<1x8xf32>, vector<1x8xf32>, vector<1x8xf32>, vector<1x8xf32>, vector<1x8xf32>, vector<1x8xf32> -> vector<14x8xf32>
      %337 = arith.index_cast %arg17 : i32 to index
      %c0_339 = arith.constant 0 : index
      %c0_340 = arith.constant 0 : index
      %338 = vector.load %arg14[%337, %c0_339, %c0_340] : memref<14x14x8xf32, #tpu.memory_space<vmem>>, vector<1x14x8xf32>
      %339 = vector.shape_cast %338 : vector<1x14x8xf32> to vector<14x8xf32>
      %340 = vector.shape_cast %336 : vector<14x8xf32> to vector<1x14x8xf32>
      tpu.vector_store %arg14[%337, %c0_339, %c0_340], %340 {strides = array<i32>} : memref<14x14x8xf32, #tpu.memory_space<vmem>>, vector<1x14x8xf32>,
    }
    %c14_i32_55 = arith.constant 14 : i32
    %c0_56 = arith.constant 0 : index
    %c0_57 = arith.constant 0 : index
    %53 = vector.load %arg5[%c0_56, %c0_57] : memref<1x16xf32, #tpu.memory_space<vmem>>, vector<1x16xf32>
    %c0_58 = arith.constant 0 : index
    %c0_59 = arith.constant 0 : index
    %c0_60 = arith.constant 0 : index
    %54 = vector.load %arg4[%c0_58, %c0_59, %c0_60] : memref<25x8x16xf32, #tpu.memory_space<vmem>>, vector<1x8x16xf32>
    %55 = vector.shape_cast %54 : vector<1x8x16xf32> to vector<8x16xf32>
    %c1_61 = arith.constant 1 : index
    %c0_62 = arith.constant 0 : index
    %c0_63 = arith.constant 0 : index
    %56 = vector.load %arg4[%c1_61, %c0_62, %c0_63] : memref<25x8x16xf32, #tpu.memory_space<vmem>>, vector<1x8x16xf32>
    %57 = vector.shape_cast %56 : vector<1x8x16xf32> to vector<8x16xf32>
    %c2_64 = arith.constant 2 : index
    %c0_65 = arith.constant 0 : index
    %c0_66 = arith.constant 0 : index
    %58 = vector.load %arg4[%c2_64, %c0_65, %c0_66] : memref<25x8x16xf32, #tpu.memory_space<vmem>>, vector<1x8x16xf32>
    %59 = vector.shape_cast %58 : vector<1x8x16xf32> to vector<8x16xf32>
    %c3_67 = arith.constant 3 : index
    %c0_68 = arith.constant 0 : index
    %c0_69 = arith.constant 0 : index
    %60 = vector.load %arg4[%c3_67, %c0_68, %c0_69] : memref<25x8x16xf32, #tpu.memory_space<vmem>>, vector<1x8x16xf32>
    %61 = vector.shape_cast %60 : vector<1x8x16xf32> to vector<8x16xf32>
    %c4_70 = arith.constant 4 : index
    %c0_71 = arith.constant 0 : index
    %c0_72 = arith.constant 0 : index
    %62 = vector.load %arg4[%c4_70, %c0_71, %c0_72] : memref<25x8x16xf32, #tpu.memory_space<vmem>>, vector<1x8x16xf32>
    %63 = vector.shape_cast %62 : vector<1x8x16xf32> to vector<8x16xf32>
    %c5_73 = arith.constant 5 : index
    %c0_74 = arith.constant 0 : index
    %c0_75 = arith.constant 0 : index
    %64 = vector.load %arg4[%c5_73, %c0_74, %c0_75] : memref<25x8x16xf32, #tpu.memory_space<vmem>>, vector<1x8x16xf32>
    %65 = vector.shape_cast %64 : vector<1x8x16xf32> to vector<8x16xf32>
    %c6_76 = arith.constant 6 : index
    %c0_77 = arith.constant 0 : index
    %c0_78 = arith.constant 0 : index
    %66 = vector.load %arg4[%c6_76, %c0_77, %c0_78] : memref<25x8x16xf32, #tpu.memory_space<vmem>>, vector<1x8x16xf32>
    %67 = vector.shape_cast %66 : vector<1x8x16xf32> to vector<8x16xf32>
    %c7_79 = arith.constant 7 : index
    %c0_80 = arith.constant 0 : index
    %c0_81 = arith.constant 0 : index
    %68 = vector.load %arg4[%c7_79, %c0_80, %c0_81] : memref<25x8x16xf32, #tpu.memory_space<vmem>>, vector<1x8x16xf32>
    %69 = vector.shape_cast %68 : vector<1x8x16xf32> to vector<8x16xf32>
    %c8_82 = arith.constant 8 : index
    %c0_83 = arith.constant 0 : index
    %c0_84 = arith.constant 0 : index
    %70 = vector.load %arg4[%c8_82, %c0_83, %c0_84] : memref<25x8x16xf32, #tpu.memory_space<vmem>>, vector<1x8x16xf32>
    %71 = vector.shape_cast %70 : vector<1x8x16xf32> to vector<8x16xf32>
    %c9_85 = arith.constant 9 : index
    %c0_86 = arith.constant 0 : index
    %c0_87 = arith.constant 0 : index
    %72 = vector.load %arg4[%c9_85, %c0_86, %c0_87] : memref<25x8x16xf32, #tpu.memory_space<vmem>>, vector<1x8x16xf32>
    %73 = vector.shape_cast %72 : vector<1x8x16xf32> to vector<8x16xf32>
    %c10_88 = arith.constant 10 : index
    %c0_89 = arith.constant 0 : index
    %c0_90 = arith.constant 0 : index
    %74 = vector.load %arg4[%c10_88, %c0_89, %c0_90] : memref<25x8x16xf32, #tpu.memory_space<vmem>>, vector<1x8x16xf32>
    %75 = vector.shape_cast %74 : vector<1x8x16xf32> to vector<8x16xf32>
    %c11_91 = arith.constant 11 : index
    %c0_92 = arith.constant 0 : index
    %c0_93 = arith.constant 0 : index
    %76 = vector.load %arg4[%c11_91, %c0_92, %c0_93] : memref<25x8x16xf32, #tpu.memory_space<vmem>>, vector<1x8x16xf32>
    %77 = vector.shape_cast %76 : vector<1x8x16xf32> to vector<8x16xf32>
    %c12_94 = arith.constant 12 : index
    %c0_95 = arith.constant 0 : index
    %c0_96 = arith.constant 0 : index
    %78 = vector.load %arg4[%c12_94, %c0_95, %c0_96] : memref<25x8x16xf32, #tpu.memory_space<vmem>>, vector<1x8x16xf32>
    %79 = vector.shape_cast %78 : vector<1x8x16xf32> to vector<8x16xf32>
    %c13_97 = arith.constant 13 : index
    %c0_98 = arith.constant 0 : index
    %c0_99 = arith.constant 0 : index
    %80 = vector.load %arg4[%c13_97, %c0_98, %c0_99] : memref<25x8x16xf32, #tpu.memory_space<vmem>>, vector<1x8x16xf32>
    %81 = vector.shape_cast %80 : vector<1x8x16xf32> to vector<8x16xf32>
    %c14_100 = arith.constant 14 : index
    %c0_101 = arith.constant 0 : index
    %c0_102 = arith.constant 0 : index
    %82 = vector.load %arg4[%c14_100, %c0_101, %c0_102] : memref<25x8x16xf32, #tpu.memory_space<vmem>>, vector<1x8x16xf32>
    %83 = vector.shape_cast %82 : vector<1x8x16xf32> to vector<8x16xf32>
    %c15_103 = arith.constant 15 : index
    %c0_104 = arith.constant 0 : index
    %c0_105 = arith.constant 0 : index
    %84 = vector.load %arg4[%c15_103, %c0_104, %c0_105] : memref<25x8x16xf32, #tpu.memory_space<vmem>>, vector<1x8x16xf32>
    %85 = vector.shape_cast %84 : vector<1x8x16xf32> to vector<8x16xf32>
    %c16_106 = arith.constant 16 : index
    %c0_107 = arith.constant 0 : index
    %c0_108 = arith.constant 0 : index
    %86 = vector.load %arg4[%c16_106, %c0_107, %c0_108] : memref<25x8x16xf32, #tpu.memory_space<vmem>>, vector<1x8x16xf32>
    %87 = vector.shape_cast %86 : vector<1x8x16xf32> to vector<8x16xf32>
    %c17_109 = arith.constant 17 : index
    %c0_110 = arith.constant 0 : index
    %c0_111 = arith.constant 0 : index
    %88 = vector.load %arg4[%c17_109, %c0_110, %c0_111] : memref<25x8x16xf32, #tpu.memory_space<vmem>>, vector<1x8x16xf32>
    %89 = vector.shape_cast %88 : vector<1x8x16xf32> to vector<8x16xf32>
    %c18_112 = arith.constant 18 : index
    %c0_113 = arith.constant 0 : index
    %c0_114 = arith.constant 0 : index
    %90 = vector.load %arg4[%c18_112, %c0_113, %c0_114] : memref<25x8x16xf32, #tpu.memory_space<vmem>>, vector<1x8x16xf32>
    %91 = vector.shape_cast %90 : vector<1x8x16xf32> to vector<8x16xf32>
    %c19_115 = arith.constant 19 : index
    %c0_116 = arith.constant 0 : index
    %c0_117 = arith.constant 0 : index
    %92 = vector.load %arg4[%c19_115, %c0_116, %c0_117] : memref<25x8x16xf32, #tpu.memory_space<vmem>>, vector<1x8x16xf32>
    %93 = vector.shape_cast %92 : vector<1x8x16xf32> to vector<8x16xf32>
    %c20_118 = arith.constant 20 : index
    %c0_119 = arith.constant 0 : index
    %c0_120 = arith.constant 0 : index
    %94 = vector.load %arg4[%c20_118, %c0_119, %c0_120] : memref<25x8x16xf32, #tpu.memory_space<vmem>>, vector<1x8x16xf32>
    %95 = vector.shape_cast %94 : vector<1x8x16xf32> to vector<8x16xf32>
    %c21_121 = arith.constant 21 : index
    %c0_122 = arith.constant 0 : index
    %c0_123 = arith.constant 0 : index
    %96 = vector.load %arg4[%c21_121, %c0_122, %c0_123] : memref<25x8x16xf32, #tpu.memory_space<vmem>>, vector<1x8x16xf32>
    %97 = vector.shape_cast %96 : vector<1x8x16xf32> to vector<8x16xf32>
    %c22_124 = arith.constant 22 : index
    %c0_125 = arith.constant 0 : index
    %c0_126 = arith.constant 0 : index
    %98 = vector.load %arg4[%c22_124, %c0_125, %c0_126] : memref<25x8x16xf32, #tpu.memory_space<vmem>>, vector<1x8x16xf32>
    %99 = vector.shape_cast %98 : vector<1x8x16xf32> to vector<8x16xf32>
    %c23_127 = arith.constant 23 : index
    %c0_128 = arith.constant 0 : index
    %c0_129 = arith.constant 0 : index
    %100 = vector.load %arg4[%c23_127, %c0_128, %c0_129] : memref<25x8x16xf32, #tpu.memory_space<vmem>>, vector<1x8x16xf32>
    %101 = vector.shape_cast %100 : vector<1x8x16xf32> to vector<8x16xf32>
    %c24_130 = arith.constant 24 : index
    %c0_131 = arith.constant 0 : index
    %c0_132 = arith.constant 0 : index
    %102 = vector.load %arg4[%c24_130, %c0_131, %c0_132] : memref<25x8x16xf32, #tpu.memory_space<vmem>>, vector<1x8x16xf32>
    %103 = vector.shape_cast %102 : vector<1x8x16xf32> to vector<8x16xf32>
    %c0_i32_133 = arith.constant 0 : i32
    %c10_i32 = arith.constant 10 : i32
    %104 = arith.addi %c0_i32_133, %c10_i32 : i32
    %c1_i32_134 = arith.constant 1 : i32
    scf.for %arg17 = %c0_i32_133 to %104 step %c1_i32_134  : i32 {
      %cst_333 = arith.constant 0.000000e+00 : f32
      %284 = vector.broadcast %cst_333 : f32 to vector<10x16xf32>
      %c0_i32_334 = arith.constant 0 : i32
      %285 = arith.addi %arg17, %c0_i32_334 : i32
      %286 = arith.index_cast %285 : i32 to index
      %c0_335 = arith.constant 0 : index
      %c0_336 = arith.constant 0 : index
      %287 = vector.load %arg14[%286, %c0_335, %c0_336] : memref<14x14x8xf32, #tpu.memory_space<vmem>>, vector<1x10x8xf32>
      %288 = vector.shape_cast %287 : vector<1x10x8xf32> to vector<10x8xf32>
      %cst_337 = arith.constant dense<0.000000e+00> : vector<10x16xf32>
      %289 = tpu.matmul %288, %55, %cst_337 {dimension_numbers = #tpu.dot_dimension_numbers<[1], [0], [0], [1], [0, 0, 1, 1], [], []>, precision = #tpu.contract_precision<fp32>} : vector<10x8xf32>, vector<8x16xf32>, vector<10x16xf32> -> vector<10x16xf32>
      %290 = arith.addf %284, %289 : vector<10x16xf32>
      %c0_i32_338 = arith.constant 0 : i32
      %291 = arith.addi %arg17, %c0_i32_338 : i32
      %292 = arith.index_cast %291 : i32 to index
      %c1_339 = arith.constant 1 : index
      %c0_340 = arith.constant 0 : index
      %293 = vector.load %arg14[%292, %c1_339, %c0_340] : memref<14x14x8xf32, #tpu.memory_space<vmem>>, vector<1x10x8xf32>
      %294 = vector.shape_cast %293 : vector<1x10x8xf32> to vector<10x8xf32>
      %cst_341 = arith.constant dense<0.000000e+00> : vector<10x16xf32>
      %295 = tpu.matmul %294, %57, %cst_341 {dimension_numbers = #tpu.dot_dimension_numbers<[1], [0], [0], [1], [0, 0, 1, 1], [], []>, precision = #tpu.contract_precision<fp32>} : vector<10x8xf32>, vector<8x16xf32>, vector<10x16xf32> -> vector<10x16xf32>
      %296 = arith.addf %290, %295 : vector<10x16xf32>
      %c0_i32_342 = arith.constant 0 : i32
      %297 = arith.addi %arg17, %c0_i32_342 : i32
      %298 = arith.index_cast %297 : i32 to index
      %c2_343 = arith.constant 2 : index
      %c0_344 = arith.constant 0 : index
      %299 = vector.load %arg14[%298, %c2_343, %c0_344] : memref<14x14x8xf32, #tpu.memory_space<vmem>>, vector<1x10x8xf32>
      %300 = vector.shape_cast %299 : vector<1x10x8xf32> to vector<10x8xf32>
      %cst_345 = arith.constant dense<0.000000e+00> : vector<10x16xf32>
      %301 = tpu.matmul %300, %59, %cst_345 {dimension_numbers = #tpu.dot_dimension_numbers<[1], [0], [0], [1], [0, 0, 1, 1], [], []>, precision = #tpu.contract_precision<fp32>} : vector<10x8xf32>, vector<8x16xf32>, vector<10x16xf32> -> vector<10x16xf32>
      %302 = arith.addf %296, %301 : vector<10x16xf32>
      %c0_i32_346 = arith.constant 0 : i32
      %303 = arith.addi %arg17, %c0_i32_346 : i32
      %304 = arith.index_cast %303 : i32 to index
      %c3_347 = arith.constant 3 : index
      %c0_348 = arith.constant 0 : index
      %305 = vector.load %arg14[%304, %c3_347, %c0_348] : memref<14x14x8xf32, #tpu.memory_space<vmem>>, vector<1x10x8xf32>
      %306 = vector.shape_cast %305 : vector<1x10x8xf32> to vector<10x8xf32>
      %cst_349 = arith.constant dense<0.000000e+00> : vector<10x16xf32>
      %307 = tpu.matmul %306, %61, %cst_349 {dimension_numbers = #tpu.dot_dimension_numbers<[1], [0], [0], [1], [0, 0, 1, 1], [], []>, precision = #tpu.contract_precision<fp32>} : vector<10x8xf32>, vector<8x16xf32>, vector<10x16xf32> -> vector<10x16xf32>
      %308 = arith.addf %302, %307 : vector<10x16xf32>
      %c0_i32_350 = arith.constant 0 : i32
      %309 = arith.addi %arg17, %c0_i32_350 : i32
      %310 = arith.index_cast %309 : i32 to index
      %c4_351 = arith.constant 4 : index
      %c0_352 = arith.constant 0 : index
      %311 = vector.load %arg14[%310, %c4_351, %c0_352] : memref<14x14x8xf32, #tpu.memory_space<vmem>>, vector<1x10x8xf32>
      %312 = vector.shape_cast %311 : vector<1x10x8xf32> to vector<10x8xf32>
      %cst_353 = arith.constant dense<0.000000e+00> : vector<10x16xf32>
      %313 = tpu.matmul %312, %63, %cst_353 {dimension_numbers = #tpu.dot_dimension_numbers<[1], [0], [0], [1], [0, 0, 1, 1], [], []>, precision = #tpu.contract_precision<fp32>} : vector<10x8xf32>, vector<8x16xf32>, vector<10x16xf32> -> vector<10x16xf32>
      %314 = arith.addf %308, %313 : vector<10x16xf32>
      %c1_i32_354 = arith.constant 1 : i32
      %315 = arith.addi %arg17, %c1_i32_354 : i32
      %316 = arith.index_cast %315 : i32 to index
      %c0_355 = arith.constant 0 : index
      %c0_356 = arith.constant 0 : index
      %317 = vector.load %arg14[%316, %c0_355, %c0_356] : memref<14x14x8xf32, #tpu.memory_space<vmem>>, vector<1x10x8xf32>
      %318 = vector.shape_cast %317 : vector<1x10x8xf32> to vector<10x8xf32>
      %cst_357 = arith.constant dense<0.000000e+00> : vector<10x16xf32>
      %319 = tpu.matmul %318, %65, %cst_357 {dimension_numbers = #tpu.dot_dimension_numbers<[1], [0], [0], [1], [0, 0, 1, 1], [], []>, precision = #tpu.contract_precision<fp32>} : vector<10x8xf32>, vector<8x16xf32>, vector<10x16xf32> -> vector<10x16xf32>
      %320 = arith.addf %314, %319 : vector<10x16xf32>
      %c1_i32_358 = arith.constant 1 : i32
      %321 = arith.addi %arg17, %c1_i32_358 : i32
      %322 = arith.index_cast %321 : i32 to index
      %c1_359 = arith.constant 1 : index
      %c0_360 = arith.constant 0 : index
      %323 = vector.load %arg14[%322, %c1_359, %c0_360] : memref<14x14x8xf32, #tpu.memory_space<vmem>>, vector<1x10x8xf32>
      %324 = vector.shape_cast %323 : vector<1x10x8xf32> to vector<10x8xf32>
      %cst_361 = arith.constant dense<0.000000e+00> : vector<10x16xf32>
      %325 = tpu.matmul %324, %67, %cst_361 {dimension_numbers = #tpu.dot_dimension_numbers<[1], [0], [0], [1], [0, 0, 1, 1], [], []>, precision = #tpu.contract_precision<fp32>} : vector<10x8xf32>, vector<8x16xf32>, vector<10x16xf32> -> vector<10x16xf32>
      %326 = arith.addf %320, %325 : vector<10x16xf32>
      %c1_i32_362 = arith.constant 1 : i32
      %327 = arith.addi %arg17, %c1_i32_362 : i32
      %328 = arith.index_cast %327 : i32 to index
      %c2_363 = arith.constant 2 : index
      %c0_364 = arith.constant 0 : index
      %329 = vector.load %arg14[%328, %c2_363, %c0_364] : memref<14x14x8xf32, #tpu.memory_space<vmem>>, vector<1x10x8xf32>
      %330 = vector.shape_cast %329 : vector<1x10x8xf32> to vector<10x8xf32>
      %cst_365 = arith.constant dense<0.000000e+00> : vector<10x16xf32>
      %331 = tpu.matmul %330, %69, %cst_365 {dimension_numbers = #tpu.dot_dimension_numbers<[1], [0], [0], [1], [0, 0, 1, 1], [], []>, precision = #tpu.contract_precision<fp32>} : vector<10x8xf32>, vector<8x16xf32>, vector<10x16xf32> -> vector<10x16xf32>
      %332 = arith.addf %326, %331 : vector<10x16xf32>
      %c1_i32_366 = arith.constant 1 : i32
      %333 = arith.addi %arg17, %c1_i32_366 : i32
      %334 = arith.index_cast %333 : i32 to index
      %c3_367 = arith.constant 3 : index
      %c0_368 = arith.constant 0 : index
      %335 = vector.load %arg14[%334, %c3_367, %c0_368] : memref<14x14x8xf32, #tpu.memory_space<vmem>>, vector<1x10x8xf32>
      %336 = vector.shape_cast %335 : vector<1x10x8xf32> to vector<10x8xf32>
      %cst_369 = arith.constant dense<0.000000e+00> : vector<10x16xf32>
      %337 = tpu.matmul %336, %71, %cst_369 {dimension_numbers = #tpu.dot_dimension_numbers<[1], [0], [0], [1], [0, 0, 1, 1], [], []>, precision = #tpu.contract_precision<fp32>} : vector<10x8xf32>, vector<8x16xf32>, vector<10x16xf32> -> vector<10x16xf32>
      %338 = arith.addf %332, %337 : vector<10x16xf32>
      %c1_i32_370 = arith.constant 1 : i32
      %339 = arith.addi %arg17, %c1_i32_370 : i32
      %340 = arith.index_cast %339 : i32 to index
      %c4_371 = arith.constant 4 : index
      %c0_372 = arith.constant 0 : index
      %341 = vector.load %arg14[%340, %c4_371, %c0_372] : memref<14x14x8xf32, #tpu.memory_space<vmem>>, vector<1x10x8xf32>
      %342 = vector.shape_cast %341 : vector<1x10x8xf32> to vector<10x8xf32>
      %cst_373 = arith.constant dense<0.000000e+00> : vector<10x16xf32>
      %343 = tpu.matmul %342, %73, %cst_373 {dimension_numbers = #tpu.dot_dimension_numbers<[1], [0], [0], [1], [0, 0, 1, 1], [], []>, precision = #tpu.contract_precision<fp32>} : vector<10x8xf32>, vector<8x16xf32>, vector<10x16xf32> -> vector<10x16xf32>
      %344 = arith.addf %338, %343 : vector<10x16xf32>
      %c2_i32 = arith.constant 2 : i32
      %345 = arith.addi %arg17, %c2_i32 : i32
      %346 = arith.index_cast %345 : i32 to index
      %c0_374 = arith.constant 0 : index
      %c0_375 = arith.constant 0 : index
      %347 = vector.load %arg14[%346, %c0_374, %c0_375] : memref<14x14x8xf32, #tpu.memory_space<vmem>>, vector<1x10x8xf32>
      %348 = vector.shape_cast %347 : vector<1x10x8xf32> to vector<10x8xf32>
      %cst_376 = arith.constant dense<0.000000e+00> : vector<10x16xf32>
      %349 = tpu.matmul %348, %75, %cst_376 {dimension_numbers = #tpu.dot_dimension_numbers<[1], [0], [0], [1], [0, 0, 1, 1], [], []>, precision = #tpu.contract_precision<fp32>} : vector<10x8xf32>, vector<8x16xf32>, vector<10x16xf32> -> vector<10x16xf32>
      %350 = arith.addf %344, %349 : vector<10x16xf32>
      %c2_i32_377 = arith.constant 2 : i32
      %351 = arith.addi %arg17, %c2_i32_377 : i32
      %352 = arith.index_cast %351 : i32 to index
      %c1_378 = arith.constant 1 : index
      %c0_379 = arith.constant 0 : index
      %353 = vector.load %arg14[%352, %c1_378, %c0_379] : memref<14x14x8xf32, #tpu.memory_space<vmem>>, vector<1x10x8xf32>
      %354 = vector.shape_cast %353 : vector<1x10x8xf32> to vector<10x8xf32>
      %cst_380 = arith.constant dense<0.000000e+00> : vector<10x16xf32>
      %355 = tpu.matmul %354, %77, %cst_380 {dimension_numbers = #tpu.dot_dimension_numbers<[1], [0], [0], [1], [0, 0, 1, 1], [], []>, precision = #tpu.contract_precision<fp32>} : vector<10x8xf32>, vector<8x16xf32>, vector<10x16xf32> -> vector<10x16xf32>
      %356 = arith.addf %350, %355 : vector<10x16xf32>
      %c2_i32_381 = arith.constant 2 : i32
      %357 = arith.addi %arg17, %c2_i32_381 : i32
      %358 = arith.index_cast %357 : i32 to index
      %c2_382 = arith.constant 2 : index
      %c0_383 = arith.constant 0 : index
      %359 = vector.load %arg14[%358, %c2_382, %c0_383] : memref<14x14x8xf32, #tpu.memory_space<vmem>>, vector<1x10x8xf32>
      %360 = vector.shape_cast %359 : vector<1x10x8xf32> to vector<10x8xf32>
      %cst_384 = arith.constant dense<0.000000e+00> : vector<10x16xf32>
      %361 = tpu.matmul %360, %79, %cst_384 {dimension_numbers = #tpu.dot_dimension_numbers<[1], [0], [0], [1], [0, 0, 1, 1], [], []>, precision = #tpu.contract_precision<fp32>} : vector<10x8xf32>, vector<8x16xf32>, vector<10x16xf32> -> vector<10x16xf32>
      %362 = arith.addf %356, %361 : vector<10x16xf32>
      %c2_i32_385 = arith.constant 2 : i32
      %363 = arith.addi %arg17, %c2_i32_385 : i32
      %364 = arith.index_cast %363 : i32 to index
      %c3_386 = arith.constant 3 : index
      %c0_387 = arith.constant 0 : index
      %365 = vector.load %arg14[%364, %c3_386, %c0_387] : memref<14x14x8xf32, #tpu.memory_space<vmem>>, vector<1x10x8xf32>
      %366 = vector.shape_cast %365 : vector<1x10x8xf32> to vector<10x8xf32>
      %cst_388 = arith.constant dense<0.000000e+00> : vector<10x16xf32>
      %367 = tpu.matmul %366, %81, %cst_388 {dimension_numbers = #tpu.dot_dimension_numbers<[1], [0], [0], [1], [0, 0, 1, 1], [], []>, precision = #tpu.contract_precision<fp32>} : vector<10x8xf32>, vector<8x16xf32>, vector<10x16xf32> -> vector<10x16xf32>
      %368 = arith.addf %362, %367 : vector<10x16xf32>
      %c2_i32_389 = arith.constant 2 : i32
      %369 = arith.addi %arg17, %c2_i32_389 : i32
      %370 = arith.index_cast %369 : i32 to index
      %c4_390 = arith.constant 4 : index
      %c0_391 = arith.constant 0 : index
      %371 = vector.load %arg14[%370, %c4_390, %c0_391] : memref<14x14x8xf32, #tpu.memory_space<vmem>>, vector<1x10x8xf32>
      %372 = vector.shape_cast %371 : vector<1x10x8xf32> to vector<10x8xf32>
      %cst_392 = arith.constant dense<0.000000e+00> : vector<10x16xf32>
      %373 = tpu.matmul %372, %83, %cst_392 {dimension_numbers = #tpu.dot_dimension_numbers<[1], [0], [0], [1], [0, 0, 1, 1], [], []>, precision = #tpu.contract_precision<fp32>} : vector<10x8xf32>, vector<8x16xf32>, vector<10x16xf32> -> vector<10x16xf32>
      %374 = arith.addf %368, %373 : vector<10x16xf32>
      %c3_i32 = arith.constant 3 : i32
      %375 = arith.addi %arg17, %c3_i32 : i32
      %376 = arith.index_cast %375 : i32 to index
      %c0_393 = arith.constant 0 : index
      %c0_394 = arith.constant 0 : index
      %377 = vector.load %arg14[%376, %c0_393, %c0_394] : memref<14x14x8xf32, #tpu.memory_space<vmem>>, vector<1x10x8xf32>
      %378 = vector.shape_cast %377 : vector<1x10x8xf32> to vector<10x8xf32>
      %cst_395 = arith.constant dense<0.000000e+00> : vector<10x16xf32>
      %379 = tpu.matmul %378, %85, %cst_395 {dimension_numbers = #tpu.dot_dimension_numbers<[1], [0], [0], [1], [0, 0, 1, 1], [], []>, precision = #tpu.contract_precision<fp32>} : vector<10x8xf32>, vector<8x16xf32>, vector<10x16xf32> -> vector<10x16xf32>
      %380 = arith.addf %374, %379 : vector<10x16xf32>
      %c3_i32_396 = arith.constant 3 : i32
      %381 = arith.addi %arg17, %c3_i32_396 : i32
      %382 = arith.index_cast %381 : i32 to index
      %c1_397 = arith.constant 1 : index
      %c0_398 = arith.constant 0 : index
      %383 = vector.load %arg14[%382, %c1_397, %c0_398] : memref<14x14x8xf32, #tpu.memory_space<vmem>>, vector<1x10x8xf32>
      %384 = vector.shape_cast %383 : vector<1x10x8xf32> to vector<10x8xf32>
      %cst_399 = arith.constant dense<0.000000e+00> : vector<10x16xf32>
      %385 = tpu.matmul %384, %87, %cst_399 {dimension_numbers = #tpu.dot_dimension_numbers<[1], [0], [0], [1], [0, 0, 1, 1], [], []>, precision = #tpu.contract_precision<fp32>} : vector<10x8xf32>, vector<8x16xf32>, vector<10x16xf32> -> vector<10x16xf32>
      %386 = arith.addf %380, %385 : vector<10x16xf32>
      %c3_i32_400 = arith.constant 3 : i32
      %387 = arith.addi %arg17, %c3_i32_400 : i32
      %388 = arith.index_cast %387 : i32 to index
      %c2_401 = arith.constant 2 : index
      %c0_402 = arith.constant 0 : index
      %389 = vector.load %arg14[%388, %c2_401, %c0_402] : memref<14x14x8xf32, #tpu.memory_space<vmem>>, vector<1x10x8xf32>
      %390 = vector.shape_cast %389 : vector<1x10x8xf32> to vector<10x8xf32>
      %cst_403 = arith.constant dense<0.000000e+00> : vector<10x16xf32>
      %391 = tpu.matmul %390, %89, %cst_403 {dimension_numbers = #tpu.dot_dimension_numbers<[1], [0], [0], [1], [0, 0, 1, 1], [], []>, precision = #tpu.contract_precision<fp32>} : vector<10x8xf32>, vector<8x16xf32>, vector<10x16xf32> -> vector<10x16xf32>
      %392 = arith.addf %386, %391 : vector<10x16xf32>
      %c3_i32_404 = arith.constant 3 : i32
      %393 = arith.addi %arg17, %c3_i32_404 : i32
      %394 = arith.index_cast %393 : i32 to index
      %c3_405 = arith.constant 3 : index
      %c0_406 = arith.constant 0 : index
      %395 = vector.load %arg14[%394, %c3_405, %c0_406] : memref<14x14x8xf32, #tpu.memory_space<vmem>>, vector<1x10x8xf32>
      %396 = vector.shape_cast %395 : vector<1x10x8xf32> to vector<10x8xf32>
      %cst_407 = arith.constant dense<0.000000e+00> : vector<10x16xf32>
      %397 = tpu.matmul %396, %91, %cst_407 {dimension_numbers = #tpu.dot_dimension_numbers<[1], [0], [0], [1], [0, 0, 1, 1], [], []>, precision = #tpu.contract_precision<fp32>} : vector<10x8xf32>, vector<8x16xf32>, vector<10x16xf32> -> vector<10x16xf32>
      %398 = arith.addf %392, %397 : vector<10x16xf32>
      %c3_i32_408 = arith.constant 3 : i32
      %399 = arith.addi %arg17, %c3_i32_408 : i32
      %400 = arith.index_cast %399 : i32 to index
      %c4_409 = arith.constant 4 : index
      %c0_410 = arith.constant 0 : index
      %401 = vector.load %arg14[%400, %c4_409, %c0_410] : memref<14x14x8xf32, #tpu.memory_space<vmem>>, vector<1x10x8xf32>
      %402 = vector.shape_cast %401 : vector<1x10x8xf32> to vector<10x8xf32>
      %cst_411 = arith.constant dense<0.000000e+00> : vector<10x16xf32>
      %403 = tpu.matmul %402, %93, %cst_411 {dimension_numbers = #tpu.dot_dimension_numbers<[1], [0], [0], [1], [0, 0, 1, 1], [], []>, precision = #tpu.contract_precision<fp32>} : vector<10x8xf32>, vector<8x16xf32>, vector<10x16xf32> -> vector<10x16xf32>
      %404 = arith.addf %398, %403 : vector<10x16xf32>
      %c4_i32 = arith.constant 4 : i32
      %405 = arith.addi %arg17, %c4_i32 : i32
      %406 = arith.index_cast %405 : i32 to index
      %c0_412 = arith.constant 0 : index
      %c0_413 = arith.constant 0 : index
      %407 = vector.load %arg14[%406, %c0_412, %c0_413] : memref<14x14x8xf32, #tpu.memory_space<vmem>>, vector<1x10x8xf32>
      %408 = vector.shape_cast %407 : vector<1x10x8xf32> to vector<10x8xf32>
      %cst_414 = arith.constant dense<0.000000e+00> : vector<10x16xf32>
      %409 = tpu.matmul %408, %95, %cst_414 {dimension_numbers = #tpu.dot_dimension_numbers<[1], [0], [0], [1], [0, 0, 1, 1], [], []>, precision = #tpu.contract_precision<fp32>} : vector<10x8xf32>, vector<8x16xf32>, vector<10x16xf32> -> vector<10x16xf32>
      %410 = arith.addf %404, %409 : vector<10x16xf32>
      %c4_i32_415 = arith.constant 4 : i32
      %411 = arith.addi %arg17, %c4_i32_415 : i32
      %412 = arith.index_cast %411 : i32 to index
      %c1_416 = arith.constant 1 : index
      %c0_417 = arith.constant 0 : index
      %413 = vector.load %arg14[%412, %c1_416, %c0_417] : memref<14x14x8xf32, #tpu.memory_space<vmem>>, vector<1x10x8xf32>
      %414 = vector.shape_cast %413 : vector<1x10x8xf32> to vector<10x8xf32>
      %cst_418 = arith.constant dense<0.000000e+00> : vector<10x16xf32>
      %415 = tpu.matmul %414, %97, %cst_418 {dimension_numbers = #tpu.dot_dimension_numbers<[1], [0], [0], [1], [0, 0, 1, 1], [], []>, precision = #tpu.contract_precision<fp32>} : vector<10x8xf32>, vector<8x16xf32>, vector<10x16xf32> -> vector<10x16xf32>
      %416 = arith.addf %410, %415 : vector<10x16xf32>
      %c4_i32_419 = arith.constant 4 : i32
      %417 = arith.addi %arg17, %c4_i32_419 : i32
      %418 = arith.index_cast %417 : i32 to index
      %c2_420 = arith.constant 2 : index
      %c0_421 = arith.constant 0 : index
      %419 = vector.load %arg14[%418, %c2_420, %c0_421] : memref<14x14x8xf32, #tpu.memory_space<vmem>>, vector<1x10x8xf32>
      %420 = vector.shape_cast %419 : vector<1x10x8xf32> to vector<10x8xf32>
      %cst_422 = arith.constant dense<0.000000e+00> : vector<10x16xf32>
      %421 = tpu.matmul %420, %99, %cst_422 {dimension_numbers = #tpu.dot_dimension_numbers<[1], [0], [0], [1], [0, 0, 1, 1], [], []>, precision = #tpu.contract_precision<fp32>} : vector<10x8xf32>, vector<8x16xf32>, vector<10x16xf32> -> vector<10x16xf32>
      %422 = arith.addf %416, %421 : vector<10x16xf32>
      %c4_i32_423 = arith.constant 4 : i32
      %423 = arith.addi %arg17, %c4_i32_423 : i32
      %424 = arith.index_cast %423 : i32 to index
      %c3_424 = arith.constant 3 : index
      %c0_425 = arith.constant 0 : index
      %425 = vector.load %arg14[%424, %c3_424, %c0_425] : memref<14x14x8xf32, #tpu.memory_space<vmem>>, vector<1x10x8xf32>
      %426 = vector.shape_cast %425 : vector<1x10x8xf32> to vector<10x8xf32>
      %cst_426 = arith.constant dense<0.000000e+00> : vector<10x16xf32>
      %427 = tpu.matmul %426, %101, %cst_426 {dimension_numbers = #tpu.dot_dimension_numbers<[1], [0], [0], [1], [0, 0, 1, 1], [], []>, precision = #tpu.contract_precision<fp32>} : vector<10x8xf32>, vector<8x16xf32>, vector<10x16xf32> -> vector<10x16xf32>
      %428 = arith.addf %422, %427 : vector<10x16xf32>
      %c4_i32_427 = arith.constant 4 : i32
      %429 = arith.addi %arg17, %c4_i32_427 : i32
      %430 = arith.index_cast %429 : i32 to index
      %c4_428 = arith.constant 4 : index
      %c0_429 = arith.constant 0 : index
      %431 = vector.load %arg14[%430, %c4_428, %c0_429] : memref<14x14x8xf32, #tpu.memory_space<vmem>>, vector<1x10x8xf32>
      %432 = vector.shape_cast %431 : vector<1x10x8xf32> to vector<10x8xf32>
      %cst_430 = arith.constant dense<0.000000e+00> : vector<10x16xf32>
      %433 = tpu.matmul %432, %103, %cst_430 {dimension_numbers = #tpu.dot_dimension_numbers<[1], [0], [0], [1], [0, 0, 1, 1], [], []>, precision = #tpu.contract_precision<fp32>} : vector<10x8xf32>, vector<8x16xf32>, vector<10x16xf32> -> vector<10x16xf32>
      %434 = arith.addf %428, %433 : vector<10x16xf32>
      %435 = vector.broadcast %53 : vector<1x16xf32> to vector<10x16xf32>
      %436 = arith.addf %434, %435 : vector<10x16xf32>
      %cst_431 = arith.constant 0.000000e+00 : f32
      %437 = vector.broadcast %cst_431 : f32 to vector<10x16xf32>
      %438 = arith.maximumf %436, %437 : vector<10x16xf32>
      %439 = arith.index_cast %arg17 : i32 to index
      %c0_432 = arith.constant 0 : index
      %c0_433 = arith.constant 0 : index
      %440 = vector.load %arg15[%439, %c0_432, %c0_433] : memref<10x10x16xf32, #tpu.memory_space<vmem>>, vector<1x10x16xf32>
      %441 = vector.shape_cast %440 : vector<1x10x16xf32> to vector<10x16xf32>
      %442 = vector.shape_cast %438 : vector<10x16xf32> to vector<1x10x16xf32>
      tpu.vector_store %arg15[%439, %c0_432, %c0_433], %442 {strides = array<i32>} : memref<10x10x16xf32, #tpu.memory_space<vmem>>, vector<1x10x16xf32>,
    }
    %c10_i32_135 = arith.constant 10 : i32
    %c0_i32_136 = arith.constant 0 : i32
    %c5_i32 = arith.constant 5 : i32
    %105 = arith.addi %c0_i32_136, %c5_i32 : i32
    %c1_i32_137 = arith.constant 1 : i32
    scf.for %arg17 = %c0_i32_136 to %105 step %c1_i32_137  : i32 {
      %c2_i32 = arith.constant 2 : i32
      %284 = arith.muli %c2_i32, %arg17 : i32
      %285 = arith.index_cast %284 : i32 to index
      %c0_333 = arith.constant 0 : index
      %c0_334 = arith.constant 0 : index
      %286 = vector.load %arg15[%285, %c0_333, %c0_334] : memref<10x10x16xf32, #tpu.memory_space<vmem>>, vector<1x10x16xf32>
      %287 = vector.shape_cast %286 : vector<1x10x16xf32> to vector<10x16xf32>
      %c2_i32_335 = arith.constant 2 : i32
      %288 = arith.muli %c2_i32_335, %arg17 : i32
      %c1_i32_336 = arith.constant 1 : i32
      %289 = arith.addi %288, %c1_i32_336 : i32
      %290 = arith.index_cast %289 : i32 to index
      %c0_337 = arith.constant 0 : index
      %c0_338 = arith.constant 0 : index
      %291 = vector.load %arg15[%290, %c0_337, %c0_338] : memref<10x10x16xf32, #tpu.memory_space<vmem>>, vector<1x10x16xf32>
      %292 = vector.shape_cast %291 : vector<1x10x16xf32> to vector<10x16xf32>
      %293 = arith.maximumf %287, %292 : vector<10x16xf32>
      %294 = vector.extract_strided_slice %293 {offsets = [0, 0], sizes = [1, 16], strides = [1, 1]} : vector<10x16xf32> to vector<1x16xf32>
      %295 = vector.extract_strided_slice %293 {offsets = [1, 0], sizes = [1, 16], strides = [1, 1]} : vector<10x16xf32> to vector<1x16xf32>
      %296 = arith.maximumf %294, %295 : vector<1x16xf32>
      %297 = vector.extract_strided_slice %293 {offsets = [2, 0], sizes = [1, 16], strides = [1, 1]} : vector<10x16xf32> to vector<1x16xf32>
      %298 = vector.extract_strided_slice %293 {offsets = [3, 0], sizes = [1, 16], strides = [1, 1]} : vector<10x16xf32> to vector<1x16xf32>
      %299 = arith.maximumf %297, %298 : vector<1x16xf32>
      %300 = vector.extract_strided_slice %293 {offsets = [4, 0], sizes = [1, 16], strides = [1, 1]} : vector<10x16xf32> to vector<1x16xf32>
      %301 = vector.extract_strided_slice %293 {offsets = [5, 0], sizes = [1, 16], strides = [1, 1]} : vector<10x16xf32> to vector<1x16xf32>
      %302 = arith.maximumf %300, %301 : vector<1x16xf32>
      %303 = vector.extract_strided_slice %293 {offsets = [6, 0], sizes = [1, 16], strides = [1, 1]} : vector<10x16xf32> to vector<1x16xf32>
      %304 = vector.extract_strided_slice %293 {offsets = [7, 0], sizes = [1, 16], strides = [1, 1]} : vector<10x16xf32> to vector<1x16xf32>
      %305 = arith.maximumf %303, %304 : vector<1x16xf32>
      %306 = vector.extract_strided_slice %293 {offsets = [8, 0], sizes = [1, 16], strides = [1, 1]} : vector<10x16xf32> to vector<1x16xf32>
      %307 = vector.extract_strided_slice %293 {offsets = [9, 0], sizes = [1, 16], strides = [1, 1]} : vector<10x16xf32> to vector<1x16xf32>
      %308 = arith.maximumf %306, %307 : vector<1x16xf32>
      %309 = tpu.concatenate %296, %299, %302, %305, %308 in 0 : vector<1x16xf32>, vector<1x16xf32>, vector<1x16xf32>, vector<1x16xf32>, vector<1x16xf32> -> vector<5x16xf32>
      %310 = arith.index_cast %arg17 : i32 to index
      %c0_339 = arith.constant 0 : index
      %c0_340 = arith.constant 0 : index
      %311 = vector.load %arg16[%310, %c0_339, %c0_340] : memref<5x5x16xf32, #tpu.memory_space<vmem>>, vector<1x5x16xf32>
      %312 = vector.shape_cast %311 : vector<1x5x16xf32> to vector<5x16xf32>
      %313 = vector.shape_cast %309 : vector<5x16xf32> to vector<1x5x16xf32>
      tpu.vector_store %arg16[%310, %c0_339, %c0_340], %313 {strides = array<i32>} : memref<5x5x16xf32, #tpu.memory_space<vmem>>, vector<1x5x16xf32>,
    }
    %c5_i32_138 = arith.constant 5 : i32
    %cst = arith.constant 0.000000e+00 : f32
    %106 = vector.broadcast %cst : f32 to vector<1x32xf32>
    %c0_139 = arith.constant 0 : index
    %c0_140 = arith.constant 0 : index
    %c0_141 = arith.constant 0 : index
    %107 = vector.load %arg16[%c0_139, %c0_140, %c0_141] : memref<5x5x16xf32, #tpu.memory_space<vmem>>, vector<1x1x16xf32>
    %108 = vector.shape_cast %107 : vector<1x1x16xf32> to vector<1x16xf32>
    %c0_142 = arith.constant 0 : index
    %c0_143 = arith.constant 0 : index
    %c0_144 = arith.constant 0 : index
    %109 = vector.load %arg6[%c0_142, %c0_143, %c0_144] : memref<25x16x32xf32, #tpu.memory_space<vmem>>, vector<1x16x32xf32>
    %110 = vector.shape_cast %109 : vector<1x16x32xf32> to vector<16x32xf32>
    %cst_145 = arith.constant dense<0.000000e+00> : vector<1x32xf32>
    %111 = tpu.matmul %108, %110, %cst_145 {dimension_numbers = #tpu.dot_dimension_numbers<[1], [0], [0], [1], [0, 0, 1, 1], [], []>, precision = #tpu.contract_precision<fp32>} : vector<1x16xf32>, vector<16x32xf32>, vector<1x32xf32> -> vector<1x32xf32>
    %112 = arith.addf %106, %111 : vector<1x32xf32>
    %c0_146 = arith.constant 0 : index
    %c1_147 = arith.constant 1 : index
    %c0_148 = arith.constant 0 : index
    %113 = vector.load %arg16[%c0_146, %c1_147, %c0_148] : memref<5x5x16xf32, #tpu.memory_space<vmem>>, vector<1x1x16xf32>
    %114 = vector.shape_cast %113 : vector<1x1x16xf32> to vector<1x16xf32>
    %c1_149 = arith.constant 1 : index
    %c0_150 = arith.constant 0 : index
    %c0_151 = arith.constant 0 : index
    %115 = vector.load %arg6[%c1_149, %c0_150, %c0_151] : memref<25x16x32xf32, #tpu.memory_space<vmem>>, vector<1x16x32xf32>
    %116 = vector.shape_cast %115 : vector<1x16x32xf32> to vector<16x32xf32>
    %cst_152 = arith.constant dense<0.000000e+00> : vector<1x32xf32>
    %117 = tpu.matmul %114, %116, %cst_152 {dimension_numbers = #tpu.dot_dimension_numbers<[1], [0], [0], [1], [0, 0, 1, 1], [], []>, precision = #tpu.contract_precision<fp32>} : vector<1x16xf32>, vector<16x32xf32>, vector<1x32xf32> -> vector<1x32xf32>
    %118 = arith.addf %112, %117 : vector<1x32xf32>
    %c0_153 = arith.constant 0 : index
    %c2_154 = arith.constant 2 : index
    %c0_155 = arith.constant 0 : index
    %119 = vector.load %arg16[%c0_153, %c2_154, %c0_155] : memref<5x5x16xf32, #tpu.memory_space<vmem>>, vector<1x1x16xf32>
    %120 = vector.shape_cast %119 : vector<1x1x16xf32> to vector<1x16xf32>
    %c2_156 = arith.constant 2 : index
    %c0_157 = arith.constant 0 : index
    %c0_158 = arith.constant 0 : index
    %121 = vector.load %arg6[%c2_156, %c0_157, %c0_158] : memref<25x16x32xf32, #tpu.memory_space<vmem>>, vector<1x16x32xf32>
    %122 = vector.shape_cast %121 : vector<1x16x32xf32> to vector<16x32xf32>
    %cst_159 = arith.constant dense<0.000000e+00> : vector<1x32xf32>
    %123 = tpu.matmul %120, %122, %cst_159 {dimension_numbers = #tpu.dot_dimension_numbers<[1], [0], [0], [1], [0, 0, 1, 1], [], []>, precision = #tpu.contract_precision<fp32>} : vector<1x16xf32>, vector<16x32xf32>, vector<1x32xf32> -> vector<1x32xf32>
    %124 = arith.addf %118, %123 : vector<1x32xf32>
    %c0_160 = arith.constant 0 : index
    %c3_161 = arith.constant 3 : index
    %c0_162 = arith.constant 0 : index
    %125 = vector.load %arg16[%c0_160, %c3_161, %c0_162] : memref<5x5x16xf32, #tpu.memory_space<vmem>>, vector<1x1x16xf32>
    %126 = vector.shape_cast %125 : vector<1x1x16xf32> to vector<1x16xf32>
    %c3_163 = arith.constant 3 : index
    %c0_164 = arith.constant 0 : index
    %c0_165 = arith.constant 0 : index
    %127 = vector.load %arg6[%c3_163, %c0_164, %c0_165] : memref<25x16x32xf32, #tpu.memory_space<vmem>>, vector<1x16x32xf32>
    %128 = vector.shape_cast %127 : vector<1x16x32xf32> to vector<16x32xf32>
    %cst_166 = arith.constant dense<0.000000e+00> : vector<1x32xf32>
    %129 = tpu.matmul %126, %128, %cst_166 {dimension_numbers = #tpu.dot_dimension_numbers<[1], [0], [0], [1], [0, 0, 1, 1], [], []>, precision = #tpu.contract_precision<fp32>} : vector<1x16xf32>, vector<16x32xf32>, vector<1x32xf32> -> vector<1x32xf32>
    %130 = arith.addf %124, %129 : vector<1x32xf32>
    %c0_167 = arith.constant 0 : index
    %c4_168 = arith.constant 4 : index
    %c0_169 = arith.constant 0 : index
    %131 = vector.load %arg16[%c0_167, %c4_168, %c0_169] : memref<5x5x16xf32, #tpu.memory_space<vmem>>, vector<1x1x16xf32>
    %132 = vector.shape_cast %131 : vector<1x1x16xf32> to vector<1x16xf32>
    %c4_170 = arith.constant 4 : index
    %c0_171 = arith.constant 0 : index
    %c0_172 = arith.constant 0 : index
    %133 = vector.load %arg6[%c4_170, %c0_171, %c0_172] : memref<25x16x32xf32, #tpu.memory_space<vmem>>, vector<1x16x32xf32>
    %134 = vector.shape_cast %133 : vector<1x16x32xf32> to vector<16x32xf32>
    %cst_173 = arith.constant dense<0.000000e+00> : vector<1x32xf32>
    %135 = tpu.matmul %132, %134, %cst_173 {dimension_numbers = #tpu.dot_dimension_numbers<[1], [0], [0], [1], [0, 0, 1, 1], [], []>, precision = #tpu.contract_precision<fp32>} : vector<1x16xf32>, vector<16x32xf32>, vector<1x32xf32> -> vector<1x32xf32>
    %136 = arith.addf %130, %135 : vector<1x32xf32>
    %c1_174 = arith.constant 1 : index
    %c0_175 = arith.constant 0 : index
    %c0_176 = arith.constant 0 : index
    %137 = vector.load %arg16[%c1_174, %c0_175, %c0_176] : memref<5x5x16xf32, #tpu.memory_space<vmem>>, vector<1x1x16xf32>
    %138 = vector.shape_cast %137 : vector<1x1x16xf32> to vector<1x16xf32>
    %c5_177 = arith.constant 5 : index
    %c0_178 = arith.constant 0 : index
    %c0_179 = arith.constant 0 : index
    %139 = vector.load %arg6[%c5_177, %c0_178, %c0_179] : memref<25x16x32xf32, #tpu.memory_space<vmem>>, vector<1x16x32xf32>
    %140 = vector.shape_cast %139 : vector<1x16x32xf32> to vector<16x32xf32>
    %cst_180 = arith.constant dense<0.000000e+00> : vector<1x32xf32>
    %141 = tpu.matmul %138, %140, %cst_180 {dimension_numbers = #tpu.dot_dimension_numbers<[1], [0], [0], [1], [0, 0, 1, 1], [], []>, precision = #tpu.contract_precision<fp32>} : vector<1x16xf32>, vector<16x32xf32>, vector<1x32xf32> -> vector<1x32xf32>
    %142 = arith.addf %136, %141 : vector<1x32xf32>
    %c1_181 = arith.constant 1 : index
    %c1_182 = arith.constant 1 : index
    %c0_183 = arith.constant 0 : index
    %143 = vector.load %arg16[%c1_181, %c1_182, %c0_183] : memref<5x5x16xf32, #tpu.memory_space<vmem>>, vector<1x1x16xf32>
    %144 = vector.shape_cast %143 : vector<1x1x16xf32> to vector<1x16xf32>
    %c6_184 = arith.constant 6 : index
    %c0_185 = arith.constant 0 : index
    %c0_186 = arith.constant 0 : index
    %145 = vector.load %arg6[%c6_184, %c0_185, %c0_186] : memref<25x16x32xf32, #tpu.memory_space<vmem>>, vector<1x16x32xf32>
    %146 = vector.shape_cast %145 : vector<1x16x32xf32> to vector<16x32xf32>
    %cst_187 = arith.constant dense<0.000000e+00> : vector<1x32xf32>
    %147 = tpu.matmul %144, %146, %cst_187 {dimension_numbers = #tpu.dot_dimension_numbers<[1], [0], [0], [1], [0, 0, 1, 1], [], []>, precision = #tpu.contract_precision<fp32>} : vector<1x16xf32>, vector<16x32xf32>, vector<1x32xf32> -> vector<1x32xf32>
    %148 = arith.addf %142, %147 : vector<1x32xf32>
    %c1_188 = arith.constant 1 : index
    %c2_189 = arith.constant 2 : index
    %c0_190 = arith.constant 0 : index
    %149 = vector.load %arg16[%c1_188, %c2_189, %c0_190] : memref<5x5x16xf32, #tpu.memory_space<vmem>>, vector<1x1x16xf32>
    %150 = vector.shape_cast %149 : vector<1x1x16xf32> to vector<1x16xf32>
    %c7_191 = arith.constant 7 : index
    %c0_192 = arith.constant 0 : index
    %c0_193 = arith.constant 0 : index
    %151 = vector.load %arg6[%c7_191, %c0_192, %c0_193] : memref<25x16x32xf32, #tpu.memory_space<vmem>>, vector<1x16x32xf32>
    %152 = vector.shape_cast %151 : vector<1x16x32xf32> to vector<16x32xf32>
    %cst_194 = arith.constant dense<0.000000e+00> : vector<1x32xf32>
    %153 = tpu.matmul %150, %152, %cst_194 {dimension_numbers = #tpu.dot_dimension_numbers<[1], [0], [0], [1], [0, 0, 1, 1], [], []>, precision = #tpu.contract_precision<fp32>} : vector<1x16xf32>, vector<16x32xf32>, vector<1x32xf32> -> vector<1x32xf32>
    %154 = arith.addf %148, %153 : vector<1x32xf32>
    %c1_195 = arith.constant 1 : index
    %c3_196 = arith.constant 3 : index
    %c0_197 = arith.constant 0 : index
    %155 = vector.load %arg16[%c1_195, %c3_196, %c0_197] : memref<5x5x16xf32, #tpu.memory_space<vmem>>, vector<1x1x16xf32>
    %156 = vector.shape_cast %155 : vector<1x1x16xf32> to vector<1x16xf32>
    %c8_198 = arith.constant 8 : index
    %c0_199 = arith.constant 0 : index
    %c0_200 = arith.constant 0 : index
    %157 = vector.load %arg6[%c8_198, %c0_199, %c0_200] : memref<25x16x32xf32, #tpu.memory_space<vmem>>, vector<1x16x32xf32>
    %158 = vector.shape_cast %157 : vector<1x16x32xf32> to vector<16x32xf32>
    %cst_201 = arith.constant dense<0.000000e+00> : vector<1x32xf32>
    %159 = tpu.matmul %156, %158, %cst_201 {dimension_numbers = #tpu.dot_dimension_numbers<[1], [0], [0], [1], [0, 0, 1, 1], [], []>, precision = #tpu.contract_precision<fp32>} : vector<1x16xf32>, vector<16x32xf32>, vector<1x32xf32> -> vector<1x32xf32>
    %160 = arith.addf %154, %159 : vector<1x32xf32>
    %c1_202 = arith.constant 1 : index
    %c4_203 = arith.constant 4 : index
    %c0_204 = arith.constant 0 : index
    %161 = vector.load %arg16[%c1_202, %c4_203, %c0_204] : memref<5x5x16xf32, #tpu.memory_space<vmem>>, vector<1x1x16xf32>
    %162 = vector.shape_cast %161 : vector<1x1x16xf32> to vector<1x16xf32>
    %c9_205 = arith.constant 9 : index
    %c0_206 = arith.constant 0 : index
    %c0_207 = arith.constant 0 : index
    %163 = vector.load %arg6[%c9_205, %c0_206, %c0_207] : memref<25x16x32xf32, #tpu.memory_space<vmem>>, vector<1x16x32xf32>
    %164 = vector.shape_cast %163 : vector<1x16x32xf32> to vector<16x32xf32>
    %cst_208 = arith.constant dense<0.000000e+00> : vector<1x32xf32>
    %165 = tpu.matmul %162, %164, %cst_208 {dimension_numbers = #tpu.dot_dimension_numbers<[1], [0], [0], [1], [0, 0, 1, 1], [], []>, precision = #tpu.contract_precision<fp32>} : vector<1x16xf32>, vector<16x32xf32>, vector<1x32xf32> -> vector<1x32xf32>
    %166 = arith.addf %160, %165 : vector<1x32xf32>
    %c2_209 = arith.constant 2 : index
    %c0_210 = arith.constant 0 : index
    %c0_211 = arith.constant 0 : index
    %167 = vector.load %arg16[%c2_209, %c0_210, %c0_211] : memref<5x5x16xf32, #tpu.memory_space<vmem>>, vector<1x1x16xf32>
    %168 = vector.shape_cast %167 : vector<1x1x16xf32> to vector<1x16xf32>
    %c10_212 = arith.constant 10 : index
    %c0_213 = arith.constant 0 : index
    %c0_214 = arith.constant 0 : index
    %169 = vector.load %arg6[%c10_212, %c0_213, %c0_214] : memref<25x16x32xf32, #tpu.memory_space<vmem>>, vector<1x16x32xf32>
    %170 = vector.shape_cast %169 : vector<1x16x32xf32> to vector<16x32xf32>
    %cst_215 = arith.constant dense<0.000000e+00> : vector<1x32xf32>
    %171 = tpu.matmul %168, %170, %cst_215 {dimension_numbers = #tpu.dot_dimension_numbers<[1], [0], [0], [1], [0, 0, 1, 1], [], []>, precision = #tpu.contract_precision<fp32>} : vector<1x16xf32>, vector<16x32xf32>, vector<1x32xf32> -> vector<1x32xf32>
    %172 = arith.addf %166, %171 : vector<1x32xf32>
    %c2_216 = arith.constant 2 : index
    %c1_217 = arith.constant 1 : index
    %c0_218 = arith.constant 0 : index
    %173 = vector.load %arg16[%c2_216, %c1_217, %c0_218] : memref<5x5x16xf32, #tpu.memory_space<vmem>>, vector<1x1x16xf32>
    %174 = vector.shape_cast %173 : vector<1x1x16xf32> to vector<1x16xf32>
    %c11_219 = arith.constant 11 : index
    %c0_220 = arith.constant 0 : index
    %c0_221 = arith.constant 0 : index
    %175 = vector.load %arg6[%c11_219, %c0_220, %c0_221] : memref<25x16x32xf32, #tpu.memory_space<vmem>>, vector<1x16x32xf32>
    %176 = vector.shape_cast %175 : vector<1x16x32xf32> to vector<16x32xf32>
    %cst_222 = arith.constant dense<0.000000e+00> : vector<1x32xf32>
    %177 = tpu.matmul %174, %176, %cst_222 {dimension_numbers = #tpu.dot_dimension_numbers<[1], [0], [0], [1], [0, 0, 1, 1], [], []>, precision = #tpu.contract_precision<fp32>} : vector<1x16xf32>, vector<16x32xf32>, vector<1x32xf32> -> vector<1x32xf32>
    %178 = arith.addf %172, %177 : vector<1x32xf32>
    %c2_223 = arith.constant 2 : index
    %c2_224 = arith.constant 2 : index
    %c0_225 = arith.constant 0 : index
    %179 = vector.load %arg16[%c2_223, %c2_224, %c0_225] : memref<5x5x16xf32, #tpu.memory_space<vmem>>, vector<1x1x16xf32>
    %180 = vector.shape_cast %179 : vector<1x1x16xf32> to vector<1x16xf32>
    %c12_226 = arith.constant 12 : index
    %c0_227 = arith.constant 0 : index
    %c0_228 = arith.constant 0 : index
    %181 = vector.load %arg6[%c12_226, %c0_227, %c0_228] : memref<25x16x32xf32, #tpu.memory_space<vmem>>, vector<1x16x32xf32>
    %182 = vector.shape_cast %181 : vector<1x16x32xf32> to vector<16x32xf32>
    %cst_229 = arith.constant dense<0.000000e+00> : vector<1x32xf32>
    %183 = tpu.matmul %180, %182, %cst_229 {dimension_numbers = #tpu.dot_dimension_numbers<[1], [0], [0], [1], [0, 0, 1, 1], [], []>, precision = #tpu.contract_precision<fp32>} : vector<1x16xf32>, vector<16x32xf32>, vector<1x32xf32> -> vector<1x32xf32>
    %184 = arith.addf %178, %183 : vector<1x32xf32>
    %c2_230 = arith.constant 2 : index
    %c3_231 = arith.constant 3 : index
    %c0_232 = arith.constant 0 : index
    %185 = vector.load %arg16[%c2_230, %c3_231, %c0_232] : memref<5x5x16xf32, #tpu.memory_space<vmem>>, vector<1x1x16xf32>
    %186 = vector.shape_cast %185 : vector<1x1x16xf32> to vector<1x16xf32>
    %c13_233 = arith.constant 13 : index
    %c0_234 = arith.constant 0 : index
    %c0_235 = arith.constant 0 : index
    %187 = vector.load %arg6[%c13_233, %c0_234, %c0_235] : memref<25x16x32xf32, #tpu.memory_space<vmem>>, vector<1x16x32xf32>
    %188 = vector.shape_cast %187 : vector<1x16x32xf32> to vector<16x32xf32>
    %cst_236 = arith.constant dense<0.000000e+00> : vector<1x32xf32>
    %189 = tpu.matmul %186, %188, %cst_236 {dimension_numbers = #tpu.dot_dimension_numbers<[1], [0], [0], [1], [0, 0, 1, 1], [], []>, precision = #tpu.contract_precision<fp32>} : vector<1x16xf32>, vector<16x32xf32>, vector<1x32xf32> -> vector<1x32xf32>
    %190 = arith.addf %184, %189 : vector<1x32xf32>
    %c2_237 = arith.constant 2 : index
    %c4_238 = arith.constant 4 : index
    %c0_239 = arith.constant 0 : index
    %191 = vector.load %arg16[%c2_237, %c4_238, %c0_239] : memref<5x5x16xf32, #tpu.memory_space<vmem>>, vector<1x1x16xf32>
    %192 = vector.shape_cast %191 : vector<1x1x16xf32> to vector<1x16xf32>
    %c14_240 = arith.constant 14 : index
    %c0_241 = arith.constant 0 : index
    %c0_242 = arith.constant 0 : index
    %193 = vector.load %arg6[%c14_240, %c0_241, %c0_242] : memref<25x16x32xf32, #tpu.memory_space<vmem>>, vector<1x16x32xf32>
    %194 = vector.shape_cast %193 : vector<1x16x32xf32> to vector<16x32xf32>
    %cst_243 = arith.constant dense<0.000000e+00> : vector<1x32xf32>
    %195 = tpu.matmul %192, %194, %cst_243 {dimension_numbers = #tpu.dot_dimension_numbers<[1], [0], [0], [1], [0, 0, 1, 1], [], []>, precision = #tpu.contract_precision<fp32>} : vector<1x16xf32>, vector<16x32xf32>, vector<1x32xf32> -> vector<1x32xf32>
    %196 = arith.addf %190, %195 : vector<1x32xf32>
    %c3_244 = arith.constant 3 : index
    %c0_245 = arith.constant 0 : index
    %c0_246 = arith.constant 0 : index
    %197 = vector.load %arg16[%c3_244, %c0_245, %c0_246] : memref<5x5x16xf32, #tpu.memory_space<vmem>>, vector<1x1x16xf32>
    %198 = vector.shape_cast %197 : vector<1x1x16xf32> to vector<1x16xf32>
    %c15_247 = arith.constant 15 : index
    %c0_248 = arith.constant 0 : index
    %c0_249 = arith.constant 0 : index
    %199 = vector.load %arg6[%c15_247, %c0_248, %c0_249] : memref<25x16x32xf32, #tpu.memory_space<vmem>>, vector<1x16x32xf32>
    %200 = vector.shape_cast %199 : vector<1x16x32xf32> to vector<16x32xf32>
    %cst_250 = arith.constant dense<0.000000e+00> : vector<1x32xf32>
    %201 = tpu.matmul %198, %200, %cst_250 {dimension_numbers = #tpu.dot_dimension_numbers<[1], [0], [0], [1], [0, 0, 1, 1], [], []>, precision = #tpu.contract_precision<fp32>} : vector<1x16xf32>, vector<16x32xf32>, vector<1x32xf32> -> vector<1x32xf32>
    %202 = arith.addf %196, %201 : vector<1x32xf32>
    %c3_251 = arith.constant 3 : index
    %c1_252 = arith.constant 1 : index
    %c0_253 = arith.constant 0 : index
    %203 = vector.load %arg16[%c3_251, %c1_252, %c0_253] : memref<5x5x16xf32, #tpu.memory_space<vmem>>, vector<1x1x16xf32>
    %204 = vector.shape_cast %203 : vector<1x1x16xf32> to vector<1x16xf32>
    %c16_254 = arith.constant 16 : index
    %c0_255 = arith.constant 0 : index
    %c0_256 = arith.constant 0 : index
    %205 = vector.load %arg6[%c16_254, %c0_255, %c0_256] : memref<25x16x32xf32, #tpu.memory_space<vmem>>, vector<1x16x32xf32>
    %206 = vector.shape_cast %205 : vector<1x16x32xf32> to vector<16x32xf32>
    %cst_257 = arith.constant dense<0.000000e+00> : vector<1x32xf32>
    %207 = tpu.matmul %204, %206, %cst_257 {dimension_numbers = #tpu.dot_dimension_numbers<[1], [0], [0], [1], [0, 0, 1, 1], [], []>, precision = #tpu.contract_precision<fp32>} : vector<1x16xf32>, vector<16x32xf32>, vector<1x32xf32> -> vector<1x32xf32>
    %208 = arith.addf %202, %207 : vector<1x32xf32>
    %c3_258 = arith.constant 3 : index
    %c2_259 = arith.constant 2 : index
    %c0_260 = arith.constant 0 : index
    %209 = vector.load %arg16[%c3_258, %c2_259, %c0_260] : memref<5x5x16xf32, #tpu.memory_space<vmem>>, vector<1x1x16xf32>
    %210 = vector.shape_cast %209 : vector<1x1x16xf32> to vector<1x16xf32>
    %c17_261 = arith.constant 17 : index
    %c0_262 = arith.constant 0 : index
    %c0_263 = arith.constant 0 : index
    %211 = vector.load %arg6[%c17_261, %c0_262, %c0_263] : memref<25x16x32xf32, #tpu.memory_space<vmem>>, vector<1x16x32xf32>
    %212 = vector.shape_cast %211 : vector<1x16x32xf32> to vector<16x32xf32>
    %cst_264 = arith.constant dense<0.000000e+00> : vector<1x32xf32>
    %213 = tpu.matmul %210, %212, %cst_264 {dimension_numbers = #tpu.dot_dimension_numbers<[1], [0], [0], [1], [0, 0, 1, 1], [], []>, precision = #tpu.contract_precision<fp32>} : vector<1x16xf32>, vector<16x32xf32>, vector<1x32xf32> -> vector<1x32xf32>
    %214 = arith.addf %208, %213 : vector<1x32xf32>
    %c3_265 = arith.constant 3 : index
    %c3_266 = arith.constant 3 : index
    %c0_267 = arith.constant 0 : index
    %215 = vector.load %arg16[%c3_265, %c3_266, %c0_267] : memref<5x5x16xf32, #tpu.memory_space<vmem>>, vector<1x1x16xf32>
    %216 = vector.shape_cast %215 : vector<1x1x16xf32> to vector<1x16xf32>
    %c18_268 = arith.constant 18 : index
    %c0_269 = arith.constant 0 : index
    %c0_270 = arith.constant 0 : index
    %217 = vector.load %arg6[%c18_268, %c0_269, %c0_270] : memref<25x16x32xf32, #tpu.memory_space<vmem>>, vector<1x16x32xf32>
    %218 = vector.shape_cast %217 : vector<1x16x32xf32> to vector<16x32xf32>
    %cst_271 = arith.constant dense<0.000000e+00> : vector<1x32xf32>
    %219 = tpu.matmul %216, %218, %cst_271 {dimension_numbers = #tpu.dot_dimension_numbers<[1], [0], [0], [1], [0, 0, 1, 1], [], []>, precision = #tpu.contract_precision<fp32>} : vector<1x16xf32>, vector<16x32xf32>, vector<1x32xf32> -> vector<1x32xf32>
    %220 = arith.addf %214, %219 : vector<1x32xf32>
    %c3_272 = arith.constant 3 : index
    %c4_273 = arith.constant 4 : index
    %c0_274 = arith.constant 0 : index
    %221 = vector.load %arg16[%c3_272, %c4_273, %c0_274] : memref<5x5x16xf32, #tpu.memory_space<vmem>>, vector<1x1x16xf32>
    %222 = vector.shape_cast %221 : vector<1x1x16xf32> to vector<1x16xf32>
    %c19_275 = arith.constant 19 : index
    %c0_276 = arith.constant 0 : index
    %c0_277 = arith.constant 0 : index
    %223 = vector.load %arg6[%c19_275, %c0_276, %c0_277] : memref<25x16x32xf32, #tpu.memory_space<vmem>>, vector<1x16x32xf32>
    %224 = vector.shape_cast %223 : vector<1x16x32xf32> to vector<16x32xf32>
    %cst_278 = arith.constant dense<0.000000e+00> : vector<1x32xf32>
    %225 = tpu.matmul %222, %224, %cst_278 {dimension_numbers = #tpu.dot_dimension_numbers<[1], [0], [0], [1], [0, 0, 1, 1], [], []>, precision = #tpu.contract_precision<fp32>} : vector<1x16xf32>, vector<16x32xf32>, vector<1x32xf32> -> vector<1x32xf32>
    %226 = arith.addf %220, %225 : vector<1x32xf32>
    %c4_279 = arith.constant 4 : index
    %c0_280 = arith.constant 0 : index
    %c0_281 = arith.constant 0 : index
    %227 = vector.load %arg16[%c4_279, %c0_280, %c0_281] : memref<5x5x16xf32, #tpu.memory_space<vmem>>, vector<1x1x16xf32>
    %228 = vector.shape_cast %227 : vector<1x1x16xf32> to vector<1x16xf32>
    %c20_282 = arith.constant 20 : index
    %c0_283 = arith.constant 0 : index
    %c0_284 = arith.constant 0 : index
    %229 = vector.load %arg6[%c20_282, %c0_283, %c0_284] : memref<25x16x32xf32, #tpu.memory_space<vmem>>, vector<1x16x32xf32>
    %230 = vector.shape_cast %229 : vector<1x16x32xf32> to vector<16x32xf32>
    %cst_285 = arith.constant dense<0.000000e+00> : vector<1x32xf32>
    %231 = tpu.matmul %228, %230, %cst_285 {dimension_numbers = #tpu.dot_dimension_numbers<[1], [0], [0], [1], [0, 0, 1, 1], [], []>, precision = #tpu.contract_precision<fp32>} : vector<1x16xf32>, vector<16x32xf32>, vector<1x32xf32> -> vector<1x32xf32>
    %232 = arith.addf %226, %231 : vector<1x32xf32>
    %c4_286 = arith.constant 4 : index
    %c1_287 = arith.constant 1 : index
    %c0_288 = arith.constant 0 : index
    %233 = vector.load %arg16[%c4_286, %c1_287, %c0_288] : memref<5x5x16xf32, #tpu.memory_space<vmem>>, vector<1x1x16xf32>
    %234 = vector.shape_cast %233 : vector<1x1x16xf32> to vector<1x16xf32>
    %c21_289 = arith.constant 21 : index
    %c0_290 = arith.constant 0 : index
    %c0_291 = arith.constant 0 : index
    %235 = vector.load %arg6[%c21_289, %c0_290, %c0_291] : memref<25x16x32xf32, #tpu.memory_space<vmem>>, vector<1x16x32xf32>
    %236 = vector.shape_cast %235 : vector<1x16x32xf32> to vector<16x32xf32>
    %cst_292 = arith.constant dense<0.000000e+00> : vector<1x32xf32>
    %237 = tpu.matmul %234, %236, %cst_292 {dimension_numbers = #tpu.dot_dimension_numbers<[1], [0], [0], [1], [0, 0, 1, 1], [], []>, precision = #tpu.contract_precision<fp32>} : vector<1x16xf32>, vector<16x32xf32>, vector<1x32xf32> -> vector<1x32xf32>
    %238 = arith.addf %232, %237 : vector<1x32xf32>
    %c4_293 = arith.constant 4 : index
    %c2_294 = arith.constant 2 : index
    %c0_295 = arith.constant 0 : index
    %239 = vector.load %arg16[%c4_293, %c2_294, %c0_295] : memref<5x5x16xf32, #tpu.memory_space<vmem>>, vector<1x1x16xf32>
    %240 = vector.shape_cast %239 : vector<1x1x16xf32> to vector<1x16xf32>
    %c22_296 = arith.constant 22 : index
    %c0_297 = arith.constant 0 : index
    %c0_298 = arith.constant 0 : index
    %241 = vector.load %arg6[%c22_296, %c0_297, %c0_298] : memref<25x16x32xf32, #tpu.memory_space<vmem>>, vector<1x16x32xf32>
    %242 = vector.shape_cast %241 : vector<1x16x32xf32> to vector<16x32xf32>
    %cst_299 = arith.constant dense<0.000000e+00> : vector<1x32xf32>
    %243 = tpu.matmul %240, %242, %cst_299 {dimension_numbers = #tpu.dot_dimension_numbers<[1], [0], [0], [1], [0, 0, 1, 1], [], []>, precision = #tpu.contract_precision<fp32>} : vector<1x16xf32>, vector<16x32xf32>, vector<1x32xf32> -> vector<1x32xf32>
    %244 = arith.addf %238, %243 : vector<1x32xf32>
    %c4_300 = arith.constant 4 : index
    %c3_301 = arith.constant 3 : index
    %c0_302 = arith.constant 0 : index
    %245 = vector.load %arg16[%c4_300, %c3_301, %c0_302] : memref<5x5x16xf32, #tpu.memory_space<vmem>>, vector<1x1x16xf32>
    %246 = vector.shape_cast %245 : vector<1x1x16xf32> to vector<1x16xf32>
    %c23_303 = arith.constant 23 : index
    %c0_304 = arith.constant 0 : index
    %c0_305 = arith.constant 0 : index
    %247 = vector.load %arg6[%c23_303, %c0_304, %c0_305] : memref<25x16x32xf32, #tpu.memory_space<vmem>>, vector<1x16x32xf32>
    %248 = vector.shape_cast %247 : vector<1x16x32xf32> to vector<16x32xf32>
    %cst_306 = arith.constant dense<0.000000e+00> : vector<1x32xf32>
    %249 = tpu.matmul %246, %248, %cst_306 {dimension_numbers = #tpu.dot_dimension_numbers<[1], [0], [0], [1], [0, 0, 1, 1], [], []>, precision = #tpu.contract_precision<fp32>} : vector<1x16xf32>, vector<16x32xf32>, vector<1x32xf32> -> vector<1x32xf32>
    %250 = arith.addf %244, %249 : vector<1x32xf32>
    %c4_307 = arith.constant 4 : index
    %c4_308 = arith.constant 4 : index
    %c0_309 = arith.constant 0 : index
    %251 = vector.load %arg16[%c4_307, %c4_308, %c0_309] : memref<5x5x16xf32, #tpu.memory_space<vmem>>, vector<1x1x16xf32>
    %252 = vector.shape_cast %251 : vector<1x1x16xf32> to vector<1x16xf32>
    %c24_310 = arith.constant 24 : index
    %c0_311 = arith.constant 0 : index
    %c0_312 = arith.constant 0 : index
    %253 = vector.load %arg6[%c24_310, %c0_311, %c0_312] : memref<25x16x32xf32, #tpu.memory_space<vmem>>, vector<1x16x32xf32>
    %254 = vector.shape_cast %253 : vector<1x16x32xf32> to vector<16x32xf32>
    %cst_313 = arith.constant dense<0.000000e+00> : vector<1x32xf32>
    %255 = tpu.matmul %252, %254, %cst_313 {dimension_numbers = #tpu.dot_dimension_numbers<[1], [0], [0], [1], [0, 0, 1, 1], [], []>, precision = #tpu.contract_precision<fp32>} : vector<1x16xf32>, vector<16x32xf32>, vector<1x32xf32> -> vector<1x32xf32>
    %256 = arith.addf %250, %255 : vector<1x32xf32>
    %c0_314 = arith.constant 0 : index
    %c0_315 = arith.constant 0 : index
    %257 = vector.load %arg7[%c0_314, %c0_315] : memref<1x32xf32, #tpu.memory_space<vmem>>, vector<1x32xf32>
    %258 = arith.addf %256, %257 : vector<1x32xf32>
    %cst_316 = arith.constant 0.000000e+00 : f32
    %259 = vector.broadcast %cst_316 : f32 to vector<1x32xf32>
    %260 = arith.maximumf %258, %259 : vector<1x32xf32>
    %c0_317 = arith.constant 0 : index
    %c0_318 = arith.constant 0 : index
    %261 = vector.load %arg8[%c0_317, %c0_318] : memref<32x84xf32, #tpu.memory_space<vmem>>, vector<32x84xf32>
    %cst_319 = arith.constant dense<0.000000e+00> : vector<1x84xf32>
    %262 = tpu.matmul %260, %261, %cst_319 {dimension_numbers = #tpu.dot_dimension_numbers<[1], [0], [0], [1], [0, 0, 1, 1], [], []>, precision = #tpu.contract_precision<fp32>} : vector<1x32xf32>, vector<32x84xf32>, vector<1x84xf32> -> vector<1x84xf32>
    %c0_320 = arith.constant 0 : index
    %c0_321 = arith.constant 0 : index
    %263 = vector.load %arg9[%c0_320, %c0_321] : memref<1x84xf32, #tpu.memory_space<vmem>>, vector<1x84xf32>
    %264 = arith.addf %262, %263 : vector<1x84xf32>
    %cst_322 = arith.constant 0.000000e+00 : f32
    %265 = vector.broadcast %cst_322 : f32 to vector<1x84xf32>
    %266 = arith.maximumf %264, %265 : vector<1x84xf32>
    %c0_323 = arith.constant 0 : index
    %c0_324 = arith.constant 0 : index
    %267 = vector.load %arg10[%c0_323, %c0_324] : memref<84x10xf32, #tpu.memory_space<vmem>>, vector<84x10xf32>
    %cst_325 = arith.constant dense<0.000000e+00> : vector<1x10xf32>
    %268 = tpu.matmul %266, %267, %cst_325 {dimension_numbers = #tpu.dot_dimension_numbers<[1], [0], [0], [1], [0, 0, 1, 1], [], []>, precision = #tpu.contract_precision<fp32>} : vector<1x84xf32>, vector<84x10xf32>, vector<1x10xf32> -> vector<1x10xf32>
    %c0_326 = arith.constant 0 : index
    %c0_327 = arith.constant 0 : index
    %269 = vector.load %arg11[%c0_326, %c0_327] : memref<1x10xf32, #tpu.memory_space<vmem>>, vector<1x10xf32>
    %270 = arith.addf %268, %269 : vector<1x10xf32>
    %cst_328 = arith.constant dense<0xFF800000> : vector<1xf32>
    %271 = vector.multi_reduction <maximumf>, %270, %cst_328 [1] : vector<1x10xf32> to vector<1xf32>
    %272 = vector.shape_cast %271 : vector<1xf32> to vector<1x1xf32>
    %273 = vector.broadcast %272 : vector<1x1xf32> to vector<1x10xf32>
    %274 = arith.subf %270, %273 : vector<1x10xf32>
    %275 = math.exp %274 : vector<1x10xf32>
    %cst_329 = arith.constant dense<0.000000e+00> : vector<1xf32>
    %276 = vector.multi_reduction <add>, %275, %cst_329 [1] : vector<1x10xf32> to vector<1xf32>
    %277 = vector.shape_cast %276 : vector<1xf32> to vector<1x1xf32>
    %278 = math.log %277 : vector<1x1xf32>
    %279 = vector.broadcast %278 : vector<1x1xf32> to vector<1x10xf32>
    %280 = arith.subf %274, %279 : vector<1x10xf32>
    %c0_330 = arith.constant 0 : index
    %c0_331 = arith.constant 0 : index
    %c0_332 = arith.constant 0 : index
    %281 = vector.load %arg12[%c0_330, %c0_331, %c0_332] : memref<1x1x10xf32, #tpu.memory_space<vmem>>, vector<1x1x10xf32>
    %282 = vector.shape_cast %281 : vector<1x1x10xf32> to vector<1x10xf32>
    %283 = vector.shape_cast %280 : vector<1x10xf32> to vector<1x1x10xf32>
    tpu.vector_store %arg12[%c0_330, %c0_331, %c0_332], %283 {strides = array<i32>} : memref<1x1x10xf32, #tpu.memory_space<vmem>>, vector<1x1x10xf32>,
    return
  }
  func.func @transform_0(%arg0: i32) -> (i32, i32, i32, i32) {
    %c0_i32 = arith.constant 0 : i32
    %c0_i32_0 = arith.constant 0 : i32
    %c0_i32_1 = arith.constant 0 : i32
    %c0_i32_2 = arith.constant 0 : i32
    return %arg0, %c0_i32, %c0_i32_0, %c0_i32_1 : i32, i32, i32, i32
  }
  func.func @transform_1(%arg0: i32) -> (i32, i32, i32) {
    %c0_i32 = arith.constant 0 : i32
    %c0_i32_0 = arith.constant 0 : i32
    %c0_i32_1 = arith.constant 0 : i32
    %c0_i32_2 = arith.constant 0 : i32
    return %c0_i32, %c0_i32_0, %c0_i32_1 : i32, i32, i32
  }
  func.func @transform_2(%arg0: i32) -> (i32, i32) {
    %c0_i32 = arith.constant 0 : i32
    %c0_i32_0 = arith.constant 0 : i32
    %c0_i32_1 = arith.constant 0 : i32
    return %c0_i32, %c0_i32_0 : i32, i32
  }
  func.func @transform_3(%arg0: i32) -> (i32, i32, i32) {
    %c0_i32 = arith.constant 0 : i32
    %c0_i32_0 = arith.constant 0 : i32
    %c0_i32_1 = arith.constant 0 : i32
    %c0_i32_2 = arith.constant 0 : i32
    return %c0_i32, %c0_i32_0, %c0_i32_1 : i32, i32, i32
  }
  func.func @transform_4(%arg0: i32) -> (i32, i32) {
    %c0_i32 = arith.constant 0 : i32
    %c0_i32_0 = arith.constant 0 : i32
    %c0_i32_1 = arith.constant 0 : i32
    return %c0_i32, %c0_i32_0 : i32, i32
  }
  func.func @transform_5(%arg0: i32) -> (i32, i32, i32) {
    %c0_i32 = arith.constant 0 : i32
    %c0_i32_0 = arith.constant 0 : i32
    %c0_i32_1 = arith.constant 0 : i32
    %c0_i32_2 = arith.constant 0 : i32
    return %c0_i32, %c0_i32_0, %c0_i32_1 : i32, i32, i32
  }
  func.func @transform_6(%arg0: i32) -> (i32, i32) {
    %c0_i32 = arith.constant 0 : i32
    %c0_i32_0 = arith.constant 0 : i32
    %c0_i32_1 = arith.constant 0 : i32
    return %c0_i32, %c0_i32_0 : i32, i32
  }
  func.func @transform_7(%arg0: i32) -> (i32, i32) {
    %c0_i32 = arith.constant 0 : i32
    %c0_i32_0 = arith.constant 0 : i32
    %c0_i32_1 = arith.constant 0 : i32
    return %c0_i32, %c0_i32_0 : i32, i32
  }
  func.func @transform_8(%arg0: i32) -> (i32, i32) {
    %c0_i32 = arith.constant 0 : i32
    %c0_i32_0 = arith.constant 0 : i32
    %c0_i32_1 = arith.constant 0 : i32
    return %c0_i32, %c0_i32_0 : i32, i32
  }
  func.func @transform_9(%arg0: i32) -> (i32, i32) {
    %c0_i32 = arith.constant 0 : i32
    %c0_i32_0 = arith.constant 0 : i32
    %c0_i32_1 = arith.constant 0 : i32
    return %c0_i32, %c0_i32_0 : i32, i32
  }
  func.func @transform_10(%arg0: i32) -> (i32, i32) {
    %c0_i32 = arith.constant 0 : i32
    %c0_i32_0 = arith.constant 0 : i32
    %c0_i32_1 = arith.constant 0 : i32
    return %c0_i32, %c0_i32_0 : i32, i32
  }
  func.func @transform_11(%arg0: i32) -> (i32, i32, i32) {
    %c0_i32 = arith.constant 0 : i32
    %c0_i32_0 = arith.constant 0 : i32
    %c0_i32_1 = arith.constant 0 : i32
    return %arg0, %c0_i32, %c0_i32_0 : i32, i32, i32
  }
}

</mosaic_0001>

<bundles_post_ra>
// kernel: lenet5_forward.1
= control target key start
LH: loop header
LB: loop body
LE: loop exit
PB: predicated region body
PF: predicated region fallthrough
CT: control target
= control target key end

     0   :  { %s34748_s0 = inlined_call_operand.vmem [shape: f32[2,32,32,1], index: 0, kind: input, shape index: {}]   ;;  %s34749_s1 = inlined_call_operand.vmem [shape: f32[25,1,8], index: 1, kind: input, shape index: {}]   ;;  %s34750_s2 = inlined_call_operand.vmem [shape: f32[1,8], index: 2, kind: input, shape index: {}]   ;;  %s34751_s3 = inlined_call_operand.vmem [shape: f32[25,8,16], index: 3, kind: input, shape index: {}]   ;;  %s34752_s4 = inlined_call_operand.vmem [shape: f32[1,16], index: 4, kind: input, shape index: {}]   ;;  %s34753_s5 = inlined_call_operand.vmem [shape: f32[25,16,32], index: 5, kind: input, shape index: {}]   ;;  %s34754_s6 = inlined_call_operand.vmem [shape: f32[1,32], index: 6, kind: input, shape index: {}]   ;;  %s34755_s7 = inlined_call_operand.vmem [shape: f32[32,84], index: 7, kind: input, shape index: {}]   ;;  %s34756_s8 = inlined_call_operand.vmem [shape: f32[1,84], index: 8, kind: input, shape index: {}]   ;;  %s34757_s9 = inlined_call_operand.vmem [shape: f32[84,10], index: 9, kind: input, shape index: {}]   ;;  %s34758_s10 = inlined_call_operand.vmem [shape: f32[1,10], index: 10, kind: input, shape index: {}]   ;;  %s34759_s11 = inlined_call_operand.hbm [shape: f32[2,1,10], index: 11, kind: output, shape index: {}]  }
   0x1   :  { %34799 = sst [smem:[#allocation49_spill]] %s34750_s2 }
   0x2   :  { %16 = vsyncpa [#allocation7], 0 }
   0x3   :  { %18 = vsyncpa [#allocation7 + $0x1], 0  ;;  %s30583_s17 = smov 0   ;;  %s30585_s18 = smov 0  }
   0x4   :  { %s30587_s19 = smov 0   ;;  %s30589_s20 = smov 0  }
   0x5 LB: > { %s30604_s21 = sadd.s32 4294967295, %s30501_s20   ;;  %s27044_s22 = sadd.s32 4294967294, %s30501_s20   ;;  %s30501_s20 = sphi %s30589_s20, %s34923_s20   ;;  %s30497_s19 = sphi %s30587_s19, %s34922_s19   ;;  %s30493_s18 = sphi %s30585_s18, %s34921_s18   ;;  %s30489_s17 = sphi %s30583_s17, %s34920_s17  }
   0x6   : > { %s30608_s23 = sadd.s32 1, %s30501_s20   ;;  %s267_s24 = sadd.s32 1, %s30497_s19 }
   0x7   : > { %s264_s25 = ssub.s32 %s30501_s20, %s30608_s23  ;;  %p277_p0 = scmp.ne.s32.totalorder %s30497_s19, %s30493_s18 }
   0x8   : > { %p265_p1 = scmp.eq.s32.totalorder %s264_s25, 0  ;;  %p278_p2 = scmp.eq.s32.totalorder %s30604_s21, 1 }
   0x9   : > { %p283_p3 = scmp.ne.s32.totalorder %s30493_s18, %s30489_s17  ;;  %p284_p4 = scmp.eq.s32.totalorder %s27044_s22, 1 }
   0xa   : > { %s30619_s26 = scalar_select %p265_p1, %s30497_s19, %s267_s24  }
   0xb   : > { %p30621_p5 = por %p278_p2, %p277_p0  ;;  %p30625_p6 = por %p284_p4, %p283_p3 }
   0xc   : > { %34800 = sst [smem:[#allocation9_spill]] %s30619_s26  ;;  %p27047_p7 = scmp.ge.s32.totalorder %s30501_s20, 1 }
   0xd   : > { %p340_p8 = scmp.lt.s32.totalorder %s30501_s20, 3 }
   0xf   : > { %p341_p9 = pnand %p27047_p7, %p340_p8 }
  0x11   : > { %344 = sbr.rel (%p341_p9) target bundleno = 2405 (0x965), region = 64 }
  0x16   : > { %p379_p10 = scmp.lt.s32.totalorder %s30604_s21, 1  ;;  %s34803_s2 = sld [smem:[#allocation49_spill]]  ;;  %v30641_v1 = vld [vmem:[%s34749_s1] ss:$0 sm:$0xff]  ;;  %v30646_v2 = vld [vmem:[%s34749_s1 + $0x1] ss:$0 sm:$0xff] }
  0x17   : > { %34804 = vst [vmem:[#allocation10_spill] sm:$0xff] %v30641_v1  ;;  %34805 = vst [vmem:[#allocation11_spill] sm:$0xff] %v30646_v2  ;;  %v30651_v3 = vld [vmem:[%s34749_s1 + $0x2] ss:$0 sm:$0xff]  ;;  %v30657_v4 = vld [vmem:[%s34749_s1 + $0x3] ss:$0 sm:$0xff] }
  0x18   : > { %34806 = vst [vmem:[#allocation12_spill] sm:$0xff] %v30651_v3  ;;  %s380_s25 = scalar_select %p379_p10, %s30604_s21, 1  ;;  %34807 = vst [vmem:[#allocation13_spill] sm:$0xff] %v30657_v4  ;;  %v30662_v5 = vld [vmem:[%s34749_s1 + $0x4] ss:$0 sm:$0xff] }
  0x19   : > { %34808 = vst [vmem:[#allocation14_spill] sm:$0xff] %v30662_v5  ;;  %v30667_v6 = vld [vmem:[%s34749_s1 + $0x5] ss:$0 sm:$0xff]  ;;  %v30672_v7 = vld [vmem:[%s34749_s1 + $0x6] ss:$0 sm:$0xff]  ;;  %s30773_s15 = smov 0  }
  0x1a   : > { %34809 = vst [vmem:[#allocation15_spill] sm:$0xff] %v30667_v6  ;;  %34810 = vst [vmem:[#allocation16_spill] sm:$0xff] %v30672_v7  ;;  %v30677_v8 = vld [vmem:[%s34749_s1 + $0x7] ss:$0 sm:$0xff]  ;;  %s27322_s29 = sshll.u32 %s380_s25, 10 }
  0x1b   : > { %34811 = vst [vmem:[#allocation17_spill] sm:$0xff] %v30677_v8  ;;  %v30682_v9 = vld [vmem:[%s34749_s1 + $0x8] ss:$0 sm:$0xff]  ;;  %v30687_v10 = vld [vmem:[%s34749_s1 + $0x9] ss:$0 sm:$0xff]  ;;  %s30692_s22 = scalar_lea.vmem %s34748_s0, %s27322_s29  ;;  %s34816_s29 = sand.u32 1, %s30493_s18  }
  0x1c   : > { %v30636_v0 = vld [vmem:[%s34803_s2] ss:$0 sm:$0xff]  ;;  %34812 = vst [vmem:[#allocation18_spill] sm:$0xff] %v30682_v9  ;;  %34813 = vst [vmem:[#allocation19_spill] sm:$0xff] %v30687_v10  ;;  %v30697_v11 = vld [vmem:[%s34749_s1 + $0xa] ss:$0 sm:$0xff] }
  0x1d   : > { %34814 = vst [vmem:[#allocation20_spill] sm:$0xff] %v30697_v11  ;;  %v30702_v12 = vld [vmem:[%s34749_s1 + $0xb] ss:$0 sm:$0xff]  ;;  %v30707_v13 = vld [vmem:[%s34749_s1 + $0xc] ss:$0 sm:$0xff]  ;;  %s30771_s26 = scalar_lea.vmem [#allocation6], %s34816_s29 }
  0x1e   : > { %34815 = vst [vmem:[#allocation21_spill] sm:$0xff] %v30702_v12  ;;  %v30712_v14 = vld [vmem:[%s34749_s1 + $0xd] ss:$0 sm:$0xff]  ;;  %v30717_v15 = vld [vmem:[%s34749_s1 + $0xe] ss:$0 sm:$0xff] }
  0x1f   : > { %v30722_v16 = vld [vmem:[%s34749_s1 + $0xf] ss:$0 sm:$0xff]  ;;  %v30727_v17 = vld [vmem:[%s34749_s1 + $0x10] ss:$0 sm:$0xff]  ;;  %v30732_v18 = vld [vmem:[%s34749_s1 + $0x11] ss:$0 sm:$0xff] }
  0x20   : > { %v30737_v19 = vld [vmem:[%s34749_s1 + $0x12] ss:$0 sm:$0xff]  ;;  %v30742_v20 = vld [vmem:[%s34749_s1 + $0x13] ss:$0 sm:$0xff]  ;;  %v30747_v21 = vld [vmem:[%s34749_s1 + $0x14] ss:$0 sm:$0xff] }
  0x21   : > { %v30752_v22 = vld [vmem:[%s34749_s1 + $0x15] ss:$0 sm:$0xff]  ;;  %v30757_v23 = vld [vmem:[%s34749_s1 + $0x16] ss:$0 sm:$0xff]  ;;  %v30762_v24 = vld [vmem:[%s34749_s1 + $0x17] ss:$0 sm:$0xff] }
  0x22   : > { %v30767_v25 = vld [vmem:[%s34749_s1 + $0x18] ss:$0 sm:$0xff] }
  0x23 LB: >> { %v34819_v10 = vld [vmem:[#allocation19_spill] sm:$0xff]  ;;  %v34820_v9 = vld [vmem:[#allocation18_spill] sm:$0xff]  ;;  %v34821_v8 = vld [vmem:[#allocation17_spill] sm:$0xff]  ;;  %v30519_v26 = vmov 0   ;;  %s27074_s16 = sshll.u32 %s30505_s15, 5  ;;  %vm1419_vm0 = vcmask 64512   ;;  %s30505_s15 = sphi %s30773_s15, %s439_s15  }
  0x24   : >> { %v34818_v11 = vld [vmem:[#allocation20_spill] sm:$0xff]  ;;  %v34823_v6 = vld [vmem:[#allocation15_spill] sm:$0xff]  ;;  %v34824_v5 = vld [vmem:[#allocation14_spill] sm:$0xff]  ;;  %30420 = vset.pattern.permute.xlu1 %v30519_v26  ;;  %30419 = vset.pattern.permute.xlu0 %v30519_v26  ;;  %s30782_s2 = scalar_lea.vmem %s30692_s22, %s27074_s16  ;;  %s1418_s25 = scalar_lea.vmem [#allocation2], %s27074_s16  ;;  %vm1423_vm1 = vcmask 60416  }
  0x25   : >> { %v34817_v12 = vld [vmem:[#allocation21_spill] sm:$0xff]  ;;  %v34822_v7 = vld [vmem:[#allocation16_spill] sm:$0xff]  ;;  %v34827_v2 = vld [vmem:[#allocation11_spill] sm:$0xff]  ;;  %s439_s15 = sadd.s32 1, %s30505_s15  }
  0x26   : >> { %v34825_v4 = vld [vmem:[#allocation13_spill] sm:$0xff]  ;;  %v34826_v3 = vld [vmem:[#allocation12_spill] sm:$0xff]  ;;  %v34828_v1 = vld [vmem:[#allocation10_spill] sm:$0xff]  ;;  %p436_p11 = scmp.ge.s32.totalorder %s439_s15, 28  }
  0x27   : >> { %v444_v27 = vld [vmem:[%s30782_s2 + $0x10] sm:$0xff]  ;;  %v442_v28 = vld [vmem:[%s30782_s2] sm:$0xff]  ;;  %v445_v29 = vld [vmem:[%s30782_s2 + $0x18] sm:$0xf]  ;;  %s31002_s24 = smov (%p436_p11), 0  }
  0x28   : >> { %458 = vperm.xlu1 %30420, %v444_v27   ;;  %448 = vperm.xlu0 %30419, %v442_v28   ;;  %v443_v30 = vld [vmem:[%s30782_s2 + $0x8] sm:$0xff]  ;;  %v483_v33 = vld [vmem:[%s30782_s2 + $0x19] sm:$0xf]  ;;  %v482_v34 = vld [vmem:[%s30782_s2 + $0x11] sm:$0xff] }
  0x29   : >> { %v481_v31 = vld [vmem:[%s30782_s2 + $0x9] sm:$0xff]  ;;  %v480_v32 = vld [vmem:[%s30782_s2 + $0x1] sm:$0xff]  ;;  %v521_v37 = vld [vmem:[%s30782_s2 + $0x1a] sm:$0xf] }
  0x2a   : >> { %v519_v35 = vld [vmem:[%s30782_s2 + $0xa] sm:$0xff]  ;;  %v518_v36 = vld [vmem:[%s30782_s2 + $0x2] sm:$0xff]  ;;  %v520_v38 = vld [vmem:[%s30782_s2 + $0x12] sm:$0xff] }
  0x2b   : >> { %v557_v39 = vld [vmem:[%s30782_s2 + $0xb] sm:$0xff]  ;;  %v556_v40 = vld [vmem:[%s30782_s2 + $0x3] sm:$0xff]  ;;  %v559_v41 = vld [vmem:[%s30782_s2 + $0x1b] sm:$0xf] }
  0x2c   : >> { %463 = vperm.xlu1 %30420, %v445_v29   ;;  %453 = vperm.xlu0 %30419, %v443_v30   ;;  %v558_v42 = vld [vmem:[%s30782_s2 + $0x13] sm:$0xff]  ;;  %v594_v44 = vld [vmem:[%s30782_s2 + $0x4] sm:$0xff]  ;;  %v597_v45 = vld [vmem:[%s30782_s2 + $0x1c] sm:$0xf] }
  0x2d   : >> { %v595_v43 = vld [vmem:[%s30782_s2 + $0xc] sm:$0xff]  ;;  %v596_v46 = vld [vmem:[%s30782_s2 + $0x14] sm:$0xff]  ;;  %v27081_v48 = vld [vmem:[%s30782_s2 + $0x20] sm:$0xff] }
  0x2e   : >> { %v27082_v47 = vld [vmem:[%s30782_s2 + $0x28] sm:$0xff]  ;;  %v27084_v49 = vld [vmem:[%s30782_s2 + $0x38] sm:$0xf]  ;;  %v27083_v50 = vld [vmem:[%s30782_s2 + $0x30] sm:$0xff] }
  0x2f   : >> { %v27087_v51 = vld [vmem:[%s30782_s2 + $0x29] sm:$0xff]  ;;  %v27086_v52 = vld [vmem:[%s30782_s2 + $0x21] sm:$0xff]  ;;  %v27089_v53 = vld [vmem:[%s30782_s2 + $0x39] sm:$0xf] }
  0x30   : >> { %491 = vperm.xlu1 %30420, %v481_v31   ;;  %486 = vperm.xlu0 %30419, %v480_v32   ;;  %v27088_v54 = vld [vmem:[%s30782_s2 + $0x31] sm:$0xff]  ;;  %v27091_v56 = vld [vmem:[%s30782_s2 + $0x22] sm:$0xff]  ;;  %v27094_v57 = vld [vmem:[%s30782_s2 + $0x3a] sm:$0xf] }
  0x31   : >> { %v27092_v55 = vld [vmem:[%s30782_s2 + $0x2a] sm:$0xff]  ;;  %v27093_v58 = vld [vmem:[%s30782_s2 + $0x32] sm:$0xff]  ;;  %v27099_v61 = vld [vmem:[%s30782_s2 + $0x3b] sm:$0xf] }
  0x32   : >> { %v27097_v59 = vld [vmem:[%s30782_s2 + $0x2b] sm:$0xff]  ;;  %v27096_v60 = vld [vmem:[%s30782_s2 + $0x23] sm:$0xff]  ;;  %v27098_v62 = vld [vmem:[%s30782_s2 + $0x33] sm:$0xff] }
  0x33   : >> { %v27102_v63 = vld [vmem:[%s30782_s2 + $0x2c] sm:$0xff]  ;;  %v27101_v26 = vld [vmem:[%s30782_s2 + $0x24] sm:$0xff]  ;;  %v27104_v27 = vld [vmem:[%s30782_s2 + $0x3c] sm:$0xf] }
  0x34   : >> { %501 = vperm.xlu1 %30420, %v483_v33   ;;  %496 = vperm.xlu0 %30419, %v482_v34   ;;  %v27103_v28 = vld [vmem:[%s30782_s2 + $0x34] sm:$0xff]  ;;  %v27108_v29 = vld [vmem:[%s30782_s2 + $0x48] sm:$0xff]  ;;  %v27107_v30 = vld [vmem:[%s30782_s2 + $0x40] sm:$0xff] }
  0x35   : >> { %v27110_v31 = vld [vmem:[%s30782_s2 + $0x58] sm:$0xf]  ;;  %v27109_v32 = vld [vmem:[%s30782_s2 + $0x50] sm:$0xff]  ;;  %v27112_v34 = vld [vmem:[%s30782_s2 + $0x41] sm:$0xff] }
  0x36   : >> { %v27113_v33 = vld [vmem:[%s30782_s2 + $0x49] sm:$0xff] }
  0x38   : >> { %529 = vperm.xlu1 %30420, %v519_v35   ;;  %524 = vperm.xlu0 %30419, %v518_v36   ;;  %v27115_v35 = vld [vmem:[%s30782_s2 + $0x59] sm:$0xf]  ;;  %v27114_v36 = vld [vmem:[%s30782_s2 + $0x51] sm:$0xff] }
  0x3c   : >> { %539 = vperm.xlu1 %30420, %v521_v37   ;;  %534 = vperm.xlu0 %30419, %v520_v38   ;;  %v27118_v37 = vld [vmem:[%s30782_s2 + $0x4a] sm:$0xff]  ;;  %v27117_v38 = vld [vmem:[%s30782_s2 + $0x42] sm:$0xff] }
  0x40   : >> { %567 = vperm.xlu1 %30420, %v557_v39   ;;  %562 = vperm.xlu0 %30419, %v556_v40   ;;  %v27120_v39 = vld [vmem:[%s30782_s2 + $0x5a] sm:$0xf]  ;;  %v27119_v40 = vld [vmem:[%s30782_s2 + $0x52] sm:$0xff] }
  0x44   : >> { %577 = vperm.xlu1 %30420, %v559_v41   ;;  %572 = vperm.xlu0 %30419, %v558_v42   ;;  %v27123_v41 = vld [vmem:[%s30782_s2 + $0x4b] sm:$0xff]  ;;  %v27122_v42 = vld [vmem:[%s30782_s2 + $0x43] sm:$0xff] }
  0x48   : >> { %605 = vperm.xlu1 %30420, %v595_v43   ;;  %600 = vperm.xlu0 %30419, %v594_v44   ;;  %v27125_v43 = vld [vmem:[%s30782_s2 + $0x5b] sm:$0xf]  ;;  %v27124_v44 = vld [vmem:[%s30782_s2 + $0x53] sm:$0xff] }
  0x4c   : >> { %615 = vperm.xlu1 %30420, %v597_v45   ;;  %610 = vperm.xlu0 %30419, %v596_v46   ;;  %v27128_v45 = vld [vmem:[%s30782_s2 + $0x4c] sm:$0xff]  ;;  %v27127_v46 = vld [vmem:[%s30782_s2 + $0x44] sm:$0xff] }
  0x50   : >> { %646 = vperm.xlu1 %30420, %v27082_v47   ;;  %641 = vperm.xlu0 %30419, %v27081_v48   ;;  %v27130_v47 = vld [vmem:[%s30782_s2 + $0x5c] sm:$0xf]  ;;  %v27129_v48 = vld [vmem:[%s30782_s2 + $0x54] sm:$0xff] }
  0x54   : >> { %656 = vperm.xlu1 %30420, %v27084_v49   ;;  %651 = vperm.xlu0 %30419, %v27083_v50   ;;  %v27134_v49 = vld [vmem:[%s30782_s2 + $0x68] sm:$0xff]  ;;  %v27133_v50 = vld [vmem:[%s30782_s2 + $0x60] sm:$0xff] }
  0x58   : >> { %684 = vperm.xlu1 %30420, %v27087_v51   ;;  %679 = vperm.xlu0 %30419, %v27086_v52   ;;  %v27136_v51 = vld [vmem:[%s30782_s2 + $0x78] sm:$0xf]  ;;  %v27135_v52 = vld [vmem:[%s30782_s2 + $0x70] sm:$0xff] }
  0x5c   : >> { %694 = vperm.xlu1 %30420, %v27089_v53   ;;  %689 = vperm.xlu0 %30419, %v27088_v54  }
  0x60   : >> { %722 = vperm.xlu1 %30420, %v27092_v55   ;;  %717 = vperm.xlu0 %30419, %v27091_v56   ;;  %v27139_v55 = vld [vmem:[%s30782_s2 + $0x69] sm:$0xff]  ;;  %v27138_v56 = vld [vmem:[%s30782_s2 + $0x61] sm:$0xff] }
  0x64   : >> { %732 = vperm.xlu1 %30420, %v27094_v57   ;;  %727 = vperm.xlu0 %30419, %v27093_v58  }
  0x68   : >> { %760 = vperm.xlu1 %30420, %v27097_v59   ;;  %755 = vperm.xlu0 %30419, %v27096_v60   ;;  %v27141_v59 = vld [vmem:[%s30782_s2 + $0x79] sm:$0xf]  ;;  %v27140_v60 = vld [vmem:[%s30782_s2 + $0x71] sm:$0xff] }
  0x6c   : >> { %770 = vperm.xlu1 %30420, %v27099_v61   ;;  %765 = vperm.xlu0 %30419, %v27098_v62  }
  0x70   : >> { %798 = vperm.xlu1 %30420, %v27102_v63   ;;  %793 = vperm.xlu0 %30419, %v27101_v26  }
  0x74   : >> { %808 = vperm.xlu1 %30420, %v27104_v27   ;;  %803 = vperm.xlu0 %30419, %v27103_v28   ;;  %v27144_v27 = vld [vmem:[%s30782_s2 + $0x6a] sm:$0xff]  ;;  %v27143_v28 = vld [vmem:[%s30782_s2 + $0x62] sm:$0xff] }
  0x78   : >> { %839 = vperm.xlu1 %30420, %v27108_v29   ;;  %834 = vperm.xlu0 %30419, %v27107_v30  }
  0x7c   : >> { %849 = vperm.xlu1 %30420, %v27110_v31   ;;  %844 = vperm.xlu0 %30419, %v27109_v32  }
  0x80   : >> { %877 = vperm.xlu1 %30420, %v27113_v33   ;;  %872 = vperm.xlu0 %30419, %v27112_v34  }
  0x84   : >> { %887 = vperm.xlu1 %30420, %v27115_v35   ;;  %882 = vperm.xlu0 %30419, %v27114_v36   ;;  %v27146_v36 = vld [vmem:[%s30782_s2 + $0x7a] sm:$0xf] }
  0x88   : >> { %915 = vperm.xlu1 %30420, %v27118_v37   ;;  %910 = vperm.xlu0 %30419, %v27117_v38   ;;  %v27145_v37 = vld [vmem:[%s30782_s2 + $0x72] sm:$0xff] }
  0x8c   : >> { %925 = vperm.xlu1 %30420, %v27120_v39   ;;  %920 = vperm.xlu0 %30419, %v27119_v40  }
  0x90   : >> { %953 = vperm.xlu1 %30420, %v27123_v41   ;;  %948 = vperm.xlu0 %30419, %v27122_v42  }
  0x94   : >> { %963 = vperm.xlu1 %30420, %v27125_v43   ;;  %958 = vperm.xlu0 %30419, %v27124_v44  }
  0x98   : >> { %991 = vperm.xlu1 %30420, %v27128_v45   ;;  %986 = vperm.xlu0 %30419, %v27127_v46   ;;  %v27149_v45 = vld [vmem:[%s30782_s2 + $0x6b] sm:$0xff]  ;;  %v27148_v46 = vld [vmem:[%s30782_s2 + $0x63] sm:$0xff] }
  0x9c   : >> { %1001 = vperm.xlu1 %30420, %v27130_v47   ;;  %996 = vperm.xlu0 %30419, %v27129_v48  }
  0xa0   : >> { %1032 = vperm.xlu1 %30420, %v27134_v49   ;;  %1027 = vperm.xlu0 %30419, %v27133_v50  }
  0xa3   : >> { %v459_v53 = vpop.permute.xlu1 %458  ;;  %v449_v54 = vpop.permute.xlu0 %448 }
  0xa4   : >> { %1042 = vperm.xlu1 %30420, %v27136_v51   ;;  %1037 = vperm.xlu0 %30419, %v27135_v52   ;;  %v472_v35 = vmul.f32 %v34828_v1, %v449_v54  ;;  %v474_v47 = vmul.f32 %v34828_v1, %v459_v53 }
  0xa7   : >> { %v464_v57 = vpop.permute.xlu1 %463  ;;  %v454_v58 = vpop.permute.xlu0 %453 }
  0xa8   : >> { %1070 = vperm.xlu1 %30420, %v27139_v55   ;;  %1065 = vperm.xlu0 %30419, %v27138_v56   ;;  %v473_v63 = vmul.f32 %v34828_v1, %v454_v58  ;;  %v475_v33 = vmul.f32 %v34828_v1, %v464_v57  ;;  %v27151_v56 = vld [vmem:[%s30782_s2 + $0x7b] sm:$0xf]  ;;  %v27150_v57 = vld [vmem:[%s30782_s2 + $0x73] sm:$0xff] }
  0xab   : >> { %v492_v61 = vpop.permute.xlu1 %491  ;;  %v487_v62 = vpop.permute.xlu0 %486 }
  0xac   : >> { %v511_v26 = vmul.f32 %v34827_v2, %v492_v61  ;;  %1080 = vperm.xlu1 %30420, %v27141_v59   ;;  %1075 = vperm.xlu0 %30419, %v27140_v60   ;;  %v510_v30 = vmul.f32 %v34827_v2, %v487_v62 }
  0xae   : >> { %v515_v29 = vadd.f32 %v511_v26, %v473_v63  ;;  %v514_v39 = vadd.f32 %v510_v30, %v472_v35  ;;  %v27154_v63 = vld [vmem:[%s30782_s2 + $0x6c] sm:$0xff]  ;;  %v27153_v26 = vld [vmem:[%s30782_s2 + $0x64] sm:$0xff] }
  0xaf   : >> { %v502_v31 = vpop.permute.xlu1 %501  ;;  %v497_v32 = vpop.permute.xlu0 %496 }
  0xb0   : >> { %v513_v34 = vmul.f32 %v34827_v2, %v502_v31  ;;  %1108 = vperm.xlu1 %30420, %v27144_v27   ;;  %1103 = vperm.xlu0 %30419, %v27143_v28   ;;  %v512_v42 = vmul.f32 %v34827_v2, %v497_v32 }
  0xb2   : >> { %v517_v38 = vadd.f32 %v513_v34, %v475_v33  ;;  %v516_v52 = vadd.f32 %v512_v42, %v474_v47  ;;  %v27156_v33 = vld [vmem:[%s30782_s2 + $0x7c] sm:$0xf]  ;;  %v27155_v34 = vld [vmem:[%s30782_s2 + $0x74] sm:$0xff]  ;;  %v27159_v42 = vld [vmem:[%s30782_s2 + $0x80] sm:$0xff] }
  0xb3   : >> { %v530_v40 = vpop.permute.xlu1 %529  ;;  %v525_v41 = vpop.permute.xlu0 %524 }
  0xb4   : >> { %v549_v43 = vmul.f32 %v34826_v3, %v530_v40  ;;  %v548_v44 = vmul.f32 %v34826_v3, %v525_v41  ;;  %1118 = vperm.xlu1 %30420, %v27146_v36   ;;  %1113 = vperm.xlu0 %30419, %v27145_v37   ;;  %v27160_v41 = vld [vmem:[%s30782_s2 + $0x88] sm:$0xff] }
  0xb6   : >> { %v553_v48 = vadd.f32 %v549_v43, %v515_v29  ;;  %v552_v49 = vadd.f32 %v548_v44, %v514_v39 }
  0xb7   : >> { %v540_v50 = vpop.permute.xlu1 %539  ;;  %v535_v51 = vpop.permute.xlu0 %534 }
  0xb8   : >> { %v551_v54 = vmul.f32 %v34826_v3, %v540_v50  ;;  %v550_v55 = vmul.f32 %v34826_v3, %v535_v51  ;;  %1146 = vperm.xlu1 %30420, %v27149_v45   ;;  %1141 = vperm.xlu0 %30419, %v27148_v46   ;;  %v27161_v50 = vld [vmem:[%s30782_s2 + $0x90] sm:$0xff] }
  0xba   : >> { %v555_v58 = vadd.f32 %v551_v54, %v517_v38  ;;  %v554_v59 = vadd.f32 %v550_v55, %v516_v52 }
  0xbb   : >> { %v568_v60 = vpop.permute.xlu1 %567  ;;  %v563_v53 = vpop.permute.xlu0 %562 }
  0xbc   : >> { %v587_v61 = vmul.f32 %v34825_v4, %v568_v60  ;;  %v586_v62 = vmul.f32 %v34825_v4, %v563_v53  ;;  %1156 = vperm.xlu1 %30420, %v27151_v56   ;;  %1151 = vperm.xlu0 %30419, %v27150_v57  }
  0xbe   : >> { %v591_v27 = vadd.f32 %v587_v61, %v553_v48  ;;  %v590_v28 = vadd.f32 %v586_v62, %v552_v49  ;;  %v27162_v49 = vld [vmem:[%s30782_s2 + $0x98] sm:$0xf] }
  0xbf   : >> { %v578_v29 = vpop.permute.xlu1 %577  ;;  %v573_v30 = vpop.permute.xlu0 %572 }
  0xc0   : >> { %v589_v31 = vmul.f32 %v34825_v4, %v578_v29  ;;  %v588_v32 = vmul.f32 %v34825_v4, %v573_v30  ;;  %1184 = vperm.xlu1 %30420, %v27154_v63   ;;  %1179 = vperm.xlu0 %30419, %v27153_v26  }
  0xc2   : >> { %v593_v35 = vadd.f32 %v589_v31, %v555_v58  ;;  %v592_v36 = vadd.f32 %v588_v32, %v554_v59  ;;  %v27165_v58 = vld [vmem:[%s30782_s2 + $0x89] sm:$0xff]  ;;  %v27164_v59 = vld [vmem:[%s30782_s2 + $0x81] sm:$0xff] }
  0xc3   : >> { %v606_v37 = vpop.permute.xlu1 %605  ;;  %v601_v38 = vpop.permute.xlu0 %600 }
  0xc4   : >> { %v625_v39 = vmul.f32 %v34824_v5, %v606_v37  ;;  %v624_v40 = vmul.f32 %v34824_v5, %v601_v38  ;;  %1194 = vperm.xlu1 %30420, %v27156_v33   ;;  %1189 = vperm.xlu0 %30419, %v27155_v34  }
  0xc6   : >> { %v629_v43 = vadd.f32 %v625_v39, %v591_v27  ;;  %v628_v44 = vadd.f32 %v624_v40, %v590_v28  ;;  %v27167_v27 = vld [vmem:[%s30782_s2 + $0x99] sm:$0xf]  ;;  %v27166_v28 = vld [vmem:[%s30782_s2 + $0x91] sm:$0xff] }
  0xc7   : >> { %v616_v45 = vpop.permute.xlu1 %615  ;;  %v611_v46 = vpop.permute.xlu0 %610 }
  0xc8   : >> { %v627_v47 = vmul.f32 %v34824_v5, %v616_v45  ;;  %v626_v48 = vmul.f32 %v34824_v5, %v611_v46  ;;  %1225 = vperm.xlu1 %30420, %v27160_v41   ;;  %1220 = vperm.xlu0 %30419, %v27159_v42  }
  0xca   : >> { %v631_v51 = vadd.f32 %v627_v47, %v593_v35  ;;  %v630_v52 = vadd.f32 %v626_v48, %v592_v36  ;;  %v27170_v35 = vld [vmem:[%s30782_s2 + $0x8a] sm:$0xff]  ;;  %v27169_v36 = vld [vmem:[%s30782_s2 + $0x82] sm:$0xff] }
  0xcb   : >> { %v647_v54 = vpop.permute.xlu1 %646  ;;  %v642_v55 = vpop.permute.xlu0 %641 }
  0xcc   : >> { %v666_v56 = vmul.f32 %v34823_v6, %v647_v54  ;;  %v665_v57 = vmul.f32 %v34823_v6, %v642_v55  ;;  %1235 = vperm.xlu1 %30420, %v27162_v49   ;;  %1230 = vperm.xlu0 %30419, %v27161_v50  }
  0xce   : >> { %v670_v60 = vadd.f32 %v666_v56, %v629_v43  ;;  %v669_v53 = vadd.f32 %v665_v57, %v628_v44  ;;  %v27172_v43 = vld [vmem:[%s30782_s2 + $0x9a] sm:$0xf]  ;;  %v27171_v44 = vld [vmem:[%s30782_s2 + $0x92] sm:$0xff] }
  0xcf   : >> { %v657_v61 = vpop.permute.xlu1 %656  ;;  %v652_v62 = vpop.permute.xlu0 %651 }
  0xd0   : >> { %v668_v63 = vmul.f32 %v34823_v6, %v657_v61  ;;  %v667_v26 = vmul.f32 %v34823_v6, %v652_v62  ;;  %1263 = vperm.xlu1 %30420, %v27165_v58   ;;  %1258 = vperm.xlu0 %30419, %v27164_v59  }
  0xd2   : >> { %v672_v29 = vadd.f32 %v668_v63, %v631_v51  ;;  %v671_v30 = vadd.f32 %v667_v26, %v630_v52  ;;  %v27175_v51 = vld [vmem:[%s30782_s2 + $0x8b] sm:$0xff]  ;;  %v27174_v52 = vld [vmem:[%s30782_s2 + $0x83] sm:$0xff] }
  0xd3   : >> { %v685_v31 = vpop.permute.xlu1 %684  ;;  %v680_v32 = vpop.permute.xlu0 %679 }
  0xd4   : >> { %v704_v33 = vmul.f32 %v34822_v7, %v685_v31  ;;  %v703_v34 = vmul.f32 %v34822_v7, %v680_v32  ;;  %1273 = vperm.xlu1 %30420, %v27167_v27   ;;  %1268 = vperm.xlu0 %30419, %v27166_v28  }
  0xd6   : >> { %v708_v37 = vadd.f32 %v704_v33, %v670_v60  ;;  %v707_v38 = vadd.f32 %v703_v34, %v669_v53  ;;  %v27177_v60 = vld [vmem:[%s30782_s2 + $0x9b] sm:$0xf]  ;;  %v27176_v53 = vld [vmem:[%s30782_s2 + $0x93] sm:$0xff] }
  0xd7   : >> { %v695_v39 = vpop.permute.xlu1 %694  ;;  %v690_v40 = vpop.permute.xlu0 %689 }
  0xd8   : >> { %v706_v41 = vmul.f32 %v34822_v7, %v695_v39  ;;  %v705_v42 = vmul.f32 %v34822_v7, %v690_v40  ;;  %1301 = vperm.xlu1 %30420, %v27170_v35   ;;  %1296 = vperm.xlu0 %30419, %v27169_v36  }
  0xda   : >> { %v710_v45 = vadd.f32 %v706_v41, %v672_v29  ;;  %v709_v46 = vadd.f32 %v705_v42, %v671_v30  ;;  %v27180_v29 = vld [vmem:[%s30782_s2 + $0x8c] sm:$0xff]  ;;  %v27179_v30 = vld [vmem:[%s30782_s2 + $0x84] sm:$0xff] }
  0xdb   : >> { %v723_v47 = vpop.permute.xlu1 %722  ;;  %v718_v48 = vpop.permute.xlu0 %717 }
  0xdc   : >> { %v742_v49 = vmul.f32 %v34821_v8, %v723_v47  ;;  %v741_v50 = vmul.f32 %v34821_v8, %v718_v48  ;;  %1311 = vperm.xlu1 %30420, %v27172_v43   ;;  %1306 = vperm.xlu0 %30419, %v27171_v44  }
  0xde   : >> { %v746_v54 = vadd.f32 %v742_v49, %v708_v37  ;;  %v745_v55 = vadd.f32 %v741_v50, %v707_v38  ;;  %v27182_v37 = vld [vmem:[%s30782_s2 + $0x9c] sm:$0xf]  ;;  %v27181_v38 = vld [vmem:[%s30782_s2 + $0x94] sm:$0xff] }
  0xdf   : >> { %v733_v56 = vpop.permute.xlu1 %732  ;;  %v728_v57 = vpop.permute.xlu0 %727 }
  0xe0   : >> { %v744_v58 = vmul.f32 %v34821_v8, %v733_v56  ;;  %v743_v59 = vmul.f32 %v34821_v8, %v728_v57  ;;  %1339 = vperm.xlu1 %30420, %v27175_v51   ;;  %1334 = vperm.xlu0 %30419, %v27174_v52  }
  0xe2   : >> { %v748_v61 = vadd.f32 %v744_v58, %v710_v45  ;;  %v747_v62 = vadd.f32 %v743_v59, %v709_v46 }
  0xe3   : >> { %v761_v63 = vpop.permute.xlu1 %760  ;;  %v756_v26 = vpop.permute.xlu0 %755 }
  0xe4   : >> { %v780_v27 = vmul.f32 %v34820_v9, %v761_v63  ;;  %v779_v28 = vmul.f32 %v34820_v9, %v756_v26  ;;  %1349 = vperm.xlu1 %30420, %v27177_v60   ;;  %1344 = vperm.xlu0 %30419, %v27176_v53  }
  0xe6   : >> { %v784_v31 = vadd.f32 %v780_v27, %v746_v54  ;;  %v783_v32 = vadd.f32 %v779_v28, %v745_v55 }
  0xe7   : >> { %v771_v33 = vpop.permute.xlu1 %770  ;;  %v766_v34 = vpop.permute.xlu0 %765 }
  0xe8   : >> { %v782_v35 = vmul.f32 %v34820_v9, %v771_v33  ;;  %v781_v36 = vmul.f32 %v34820_v9, %v766_v34  ;;  %1377 = vperm.xlu1 %30420, %v27180_v29   ;;  %1372 = vperm.xlu0 %30419, %v27179_v30  }
  0xea   : >> { %v786_v39 = vadd.f32 %v782_v35, %v748_v61  ;;  %v785_v40 = vadd.f32 %v781_v36, %v747_v62 }
  0xeb   : >> { %v799_v41 = vpop.permute.xlu1 %798  ;;  %v794_v42 = vpop.permute.xlu0 %793 }
  0xec   : >> { %v818_v43 = vmul.f32 %v34819_v10, %v799_v41  ;;  %v817_v44 = vmul.f32 %v34819_v10, %v794_v42  ;;  %1387 = vperm.xlu1 %30420, %v27182_v37   ;;  %1382 = vperm.xlu0 %30419, %v27181_v38  }
  0xee   : >> { %v822_v45 = vadd.f32 %v818_v43, %v784_v31  ;;  %v821_v46 = vadd.f32 %v817_v44, %v783_v32 }
  0xef   : >> { %v809_v47 = vpop.permute.xlu1 %808  ;;  %v804_v48 = vpop.permute.xlu0 %803 }
  0xf0   : >> { %v820_v49 = vmul.f32 %v34819_v10, %v809_v47  ;;  %v819_v50 = vmul.f32 %v34819_v10, %v804_v48 }
  0xf2   : >> { %v824_v51 = vadd.f32 %v820_v49, %v786_v39  ;;  %v823_v52 = vadd.f32 %v819_v50, %v785_v40 }
  0xf3   : >> { %v840_v54 = vpop.permute.xlu1 %839  ;;  %v835_v55 = vpop.permute.xlu0 %834 }
  0xf4   : >> { %v859_v56 = vmul.f32 %v34818_v11, %v840_v54  ;;  %v858_v57 = vmul.f32 %v34818_v11, %v835_v55 }
  0xf6   : >> { %v863_v58 = vadd.f32 %v859_v56, %v822_v45  ;;  %v862_v59 = vadd.f32 %v858_v57, %v821_v46 }
  0xf7   : >> { %v850_v60 = vpop.permute.xlu1 %849  ;;  %v845_v53 = vpop.permute.xlu0 %844 }
  0xf8   : >> { %v861_v61 = vmul.f32 %v34818_v11, %v850_v60  ;;  %v860_v62 = vmul.f32 %v34818_v11, %v845_v53 }
  0xfa   : >> { %v865_v63 = vadd.f32 %v861_v61, %v824_v51  ;;  %v864_v26 = vadd.f32 %v860_v62, %v823_v52 }
  0xfb   : >> { %v878_v27 = vpop.permute.xlu1 %877  ;;  %v873_v28 = vpop.permute.xlu0 %872 }
  0xfc   : >> { %v897_v29 = vmul.f32 %v34817_v12, %v878_v27  ;;  %v896_v30 = vmul.f32 %v34817_v12, %v873_v28 }
  0xfe   : >> { %v901_v31 = vadd.f32 %v897_v29, %v863_v58  ;;  %v900_v32 = vadd.f32 %v896_v30, %v862_v59 }
  0xff   : >> { %v888_v33 = vpop.permute.xlu1 %887  ;;  %v883_v34 = vpop.permute.xlu0 %882 }
 0x100   : >> { %v899_v35 = vmul.f32 %v34817_v12, %v888_v33  ;;  %v898_v36 = vmul.f32 %v34817_v12, %v883_v34 }
 0x102   : >> { %v903_v37 = vadd.f32 %v899_v35, %v865_v63  ;;  %v902_v38 = vadd.f32 %v898_v36, %v864_v26 }
 0x103   : >> { %v916_v39 = vpop.permute.xlu1 %915  ;;  %v911_v40 = vpop.permute.xlu0 %910 }
 0x104   : >> { %v935_v41 = vmul.f32 %v30707_v13, %v916_v39  ;;  %v934_v42 = vmul.f32 %v30707_v13, %v911_v40 }
 0x106   : >> { %v939_v43 = vadd.f32 %v935_v41, %v901_v31  ;;  %v938_v44 = vadd.f32 %v934_v42, %v900_v32 }
 0x107   : >> { %v926_v45 = vpop.permute.xlu1 %925  ;;  %v921_v46 = vpop.permute.xlu0 %920 }
 0x108   : >> { %v937_v47 = vmul.f32 %v30707_v13, %v926_v45  ;;  %v936_v48 = vmul.f32 %v30707_v13, %v921_v46 }
 0x10a   : >> { %v941_v49 = vadd.f32 %v937_v47, %v903_v37  ;;  %v940_v50 = vadd.f32 %v936_v48, %v902_v38 }
 0x10b   : >> { %v954_v51 = vpop.permute.xlu1 %953  ;;  %v949_v52 = vpop.permute.xlu0 %948 }
 0x10c   : >> { %v973_v54 = vmul.f32 %v30712_v14, %v954_v51  ;;  %v972_v55 = vmul.f32 %v30712_v14, %v949_v52 }
 0x10e   : >> { %v977_v56 = vadd.f32 %v973_v54, %v939_v43  ;;  %v976_v57 = vadd.f32 %v972_v55, %v938_v44 }
 0x10f   : >> { %v964_v58 = vpop.permute.xlu1 %963  ;;  %v959_v59 = vpop.permute.xlu0 %958 }
 0x110   : >> { %v975_v60 = vmul.f32 %v30712_v14, %v964_v58  ;;  %v974_v53 = vmul.f32 %v30712_v14, %v959_v59 }
 0x112   : >> { %v979_v61 = vadd.f32 %v975_v60, %v941_v49  ;;  %v978_v62 = vadd.f32 %v974_v53, %v940_v50 }
 0x113   : >> { %v992_v63 = vpop.permute.xlu1 %991  ;;  %v987_v26 = vpop.permute.xlu0 %986 }
 0x114   : >> { %v1011_v58 = vmul.f32 %v30717_v15, %v992_v63  ;;  %v1010_v59 = vmul.f32 %v30717_v15, %v987_v26 }
 0x116   : >> { %v1015_v5 = vadd.f32 %v1011_v58, %v977_v56  ;;  %v1014_v6 = vadd.f32 %v1010_v59, %v976_v57 }
 0x117   : >> { %v1002_v27 = vpop.permute.xlu1 %1001  ;;  %v997_v28 = vpop.permute.xlu0 %996 }
 0x118   : >> { %v1013_v3 = vmul.f32 %v30717_v15, %v1002_v27  ;;  %v1012_v4 = vmul.f32 %v30717_v15, %v997_v28 }
 0x11a   : >> { %v1017_v12 = vadd.f32 %v1013_v3, %v979_v61  ;;  %v1016_v28 = vadd.f32 %v1012_v4, %v978_v62 }
 0x11b   : >> { %v1033_v29 = vpop.permute.xlu1 %1032  ;;  %v1028_v30 = vpop.permute.xlu0 %1027 }
 0x11c   : >> { %v1052_v1 = vmul.f32 %v30722_v16, %v1033_v29  ;;  %v1051_v2 = vmul.f32 %v30722_v16, %v1028_v30 }
 0x11e   : >> { %v1056_v11 = vadd.f32 %v1052_v1, %v1015_v5  ;;  %v1055_v29 = vadd.f32 %v1051_v2, %v1014_v6 }
 0x11f   : >> { %v1043_v31 = vpop.permute.xlu1 %1042  ;;  %v1038_v32 = vpop.permute.xlu0 %1037 }
 0x120   : >> { %v1054_v26 = vmul.f32 %v30722_v16, %v1043_v31  ;;  %v1053_v8 = vmul.f32 %v30722_v16, %v1038_v32 }
 0x122   : >> { %v1058_v58 = vadd.f32 %v1054_v26, %v1017_v12  ;;  %v1057_v59 = vadd.f32 %v1053_v8, %v1016_v28 }
 0x123   : >> { %v1071_v33 = vpop.permute.xlu1 %1070  ;;  %v1066_v34 = vpop.permute.xlu0 %1065 }
 0x124   : >> { %v1090_v7 = vmul.f32 %v30727_v17, %v1071_v33  ;;  %v1089_v63 = vmul.f32 %v30727_v17, %v1066_v34 }
 0x126   : >> { %v1094_v33 = vadd.f32 %v1090_v7, %v1056_v11  ;;  %v1093_v34 = vadd.f32 %v1089_v63, %v1055_v29 }
 0x127   : >> { %v1081_v35 = vpop.permute.xlu1 %1080  ;;  %v1076_v36 = vpop.permute.xlu0 %1075 }
 0x128   : >> { %v1092_v56 = vmul.f32 %v30727_v17, %v1081_v35  ;;  %v1091_v57 = vmul.f32 %v30727_v17, %v1076_v36 }
 0x12a   : >> { %v1096_v7 = vadd.f32 %v1092_v56, %v1058_v58  ;;  %v1095_v11 = vadd.f32 %v1091_v57, %v1057_v59 }
 0x12b   : >> { %v1109_v37 = vpop.permute.xlu1 %1108  ;;  %v1104_v38 = vpop.permute.xlu0 %1103 }
 0x12c   : >> { %v1128_v30 = vmul.f32 %v30732_v18, %v1109_v37  ;;  %v1127_v27 = vmul.f32 %v30732_v18, %v1104_v38 }
 0x12e   : >> { %v1132_v3 = vadd.f32 %v1128_v30, %v1094_v33  ;;  %v1131_v4 = vadd.f32 %v1127_v27, %v1093_v34 }
 0x12f   : >> { %v1119_v39 = vpop.permute.xlu1 %1118  ;;  %v1114_v40 = vpop.permute.xlu0 %1113 }
 0x130   : >> { %v1130_v1 = vmul.f32 %v30732_v18, %v1119_v39  ;;  %v1129_v2 = vmul.f32 %v30732_v18, %v1114_v40 }
 0x132   : >> { %v1134_v39 = vadd.f32 %v1130_v1, %v1096_v7  ;;  %v1133_v40 = vadd.f32 %v1129_v2, %v1095_v11 }
 0x133   : >> { %v1147_v41 = vpop.permute.xlu1 %1146  ;;  %v1142_v42 = vpop.permute.xlu0 %1141 }
 0x134   : >> { %v1166_v31 = vmul.f32 %v30737_v19, %v1147_v41  ;;  %v1165_v32 = vmul.f32 %v30737_v19, %v1142_v42 }
 0x136   : >> { %v1170_v12 = vadd.f32 %v1166_v31, %v1132_v3  ;;  %v1169_v8 = vadd.f32 %v1165_v32, %v1131_v4 }
 0x137   : >> { %v1157_v43 = vpop.permute.xlu1 %1156  ;;  %v1152_v44 = vpop.permute.xlu0 %1151 }
 0x138   : >> { %v1168_v35 = vmul.f32 %v30737_v19, %v1157_v43  ;;  %v1167_v36 = vmul.f32 %v30737_v19, %v1152_v44 }
 0x13a   : >> { %v1172_v29 = vadd.f32 %v1168_v35, %v1134_v39  ;;  %v1171_v30 = vadd.f32 %v1167_v36, %v1133_v40 }
 0x13b   : >> { %v1185_v45 = vpop.permute.xlu1 %1184  ;;  %v1180_v46 = vpop.permute.xlu0 %1179 }
 0x13c   : >> { %v1204_v61 = vmul.f32 %v30742_v20, %v1185_v45  ;;  %v1203_v62 = vmul.f32 %v30742_v20, %v1180_v46 }
 0x13e   : >> { %v1208_v63 = vadd.f32 %v1204_v61, %v1170_v12  ;;  %v1207_v26 = vadd.f32 %v1203_v62, %v1169_v8 }
 0x13f   : >> { %v1195_v47 = vpop.permute.xlu1 %1194  ;;  %v1190_v48 = vpop.permute.xlu0 %1189 }
 0x140   : >> { %v1206_v41 = vmul.f32 %v30742_v20, %v1195_v47  ;;  %v1205_v42 = vmul.f32 %v30742_v20, %v1190_v48 }
 0x142   : >> { %v1210_v56 = vadd.f32 %v1206_v41, %v1172_v29  ;;  %v1209_v57 = vadd.f32 %v1205_v42, %v1171_v30 }
 0x143   : >> { %v1226_v49 = vpop.permute.xlu1 %1225  ;;  %v1221_v50 = vpop.permute.xlu0 %1220 }
 0x144   : >> { %v1245_v37 = vmul.f32 %v30747_v21, %v1226_v49  ;;  %v1244_v38 = vmul.f32 %v30747_v21, %v1221_v50 }
 0x146   : >> { %v1249_v27 = vadd.f32 %v1245_v37, %v1208_v63  ;;  %v1248_v28 = vadd.f32 %v1244_v38, %v1207_v26 }
 0x147   : >> { %v1236_v51 = vpop.permute.xlu1 %1235  ;;  %v1231_v52 = vpop.permute.xlu0 %1230 }
 0x148   : >> { %v1247_v49 = vmul.f32 %v30747_v21, %v1236_v51  ;;  %v1246_v50 = vmul.f32 %v30747_v21, %v1231_v52 }
 0x14a   : >> { %v1251_v58 = vadd.f32 %v1247_v49, %v1210_v56 }
 0x14b   : >> { %v1264_v54 = vpop.permute.xlu1 %1263  ;;  %v1259_v55 = vpop.permute.xlu0 %1258 }
 0x14c   : >> { %v1283_v43 = vmul.f32 %v30752_v22, %v1264_v54  ;;  %v1282_v44 = vmul.f32 %v30752_v22, %v1259_v55 }
 0x14e   : >> { %v1287_v31 = vadd.f32 %v1283_v43, %v1249_v27  ;;  %v1286_v51 = vadd.f32 %v1282_v44, %v1248_v28 }
 0x14f   : >> { %v30942_v60 = vpop.permute.xlu1 %1273  ;;  %v30944_v53 = vpop.permute.xlu0 %1268 }
 0x150   : >> { %v1285_v33 = vmul.f32 %v30752_v22, %v30942_v60  ;;  %v1284_v54 = vmul.f32 %v30752_v22, %v30944_v53 }
 0x152   : >> { %v1289_v60 = vadd.f32 %v1285_v33, %v1251_v58 }
 0x153   : >> { %v1302_v9 = vpop.permute.xlu1 %1301  ;;  %v1297_v10 = vpop.permute.xlu0 %1296 }
 0x154   : >> { %v1321_v47 = vmul.f32 %v30757_v23, %v1302_v9  ;;  %v1320_v48 = vmul.f32 %v30757_v23, %v1297_v10  ;;  %v1250_v9 = vadd.f32 %v1246_v50, %v1209_v57 }
 0x156   : >> { %v1325_v1 = vadd.f32 %v1321_v47, %v1287_v31  ;;  %v1324_v2 = vadd.f32 %v1320_v48, %v1286_v51  ;;  %v1288_v3 = vadd.f32 %v1284_v54, %v1250_v9 }
 0x157   : >> { %v1312_v5 = vpop.permute.xlu1 %1311  ;;  %v1307_v6 = vpop.permute.xlu0 %1306 }
 0x158   : >> { %v1323_v10 = vmul.f32 %v30757_v23, %v1312_v5  ;;  %v1322_v59 = vmul.f32 %v30757_v23, %v1307_v6 }
 0x15a   : >> { %v1327_v12 = vadd.f32 %v1323_v10, %v1289_v60  ;;  %v1326_v5 = vadd.f32 %v1322_v59, %v1288_v3 }
 0x15b   : >> { %v1340_v45 = vpop.permute.xlu1 %1339  ;;  %v1335_v46 = vpop.permute.xlu0 %1334 }
 0x15c   : >> { %v1359_v52 = vmul.f32 %v30762_v24, %v1340_v45  ;;  %v1358_v32 = vmul.f32 %v30762_v24, %v1335_v46 }
 0x15e   : >> { %v1363_v7 = vadd.f32 %v1359_v52, %v1325_v1  ;;  %v1362_v11 = vadd.f32 %v1358_v32, %v1324_v2 }
 0x15f   : >> { %v1350_v55 = vpop.permute.xlu1 %1349  ;;  %v1345_v34 = vpop.permute.xlu0 %1344 }
 0x160   : >> { %v1361_v53 = vmul.f32 %v30762_v24, %v1350_v55  ;;  %v1360_v4 = vmul.f32 %v30762_v24, %v1345_v34 }
 0x162   : >> { %v1365_v37 = vadd.f32 %v1361_v53, %v1327_v12  ;;  %v1364_v38 = vadd.f32 %v1360_v4, %v1326_v5 }
 0x163   : >> { %v1378_v61 = vpop.permute.xlu1 %1377  ;;  %v1373_v62 = vpop.permute.xlu0 %1372 }
 0x164   : >> { %v1397_v35 = vmul.f32 %v30767_v25, %v1378_v61  ;;  %v1396_v36 = vmul.f32 %v30767_v25, %v1373_v62 }
 0x166   : >> { %v1401_v6 = vadd.f32 %v1397_v35, %v1363_v7  ;;  %v1400_v8 = vadd.f32 %v1396_v36, %v1362_v11 }
 0x167   : >> { %v1388_v39 = vpop.permute.xlu1 %1387  ;;  %v1383_v40 = vpop.permute.xlu0 %1382 }
 0x168   : >> { %v1411_v41 = vadd.f32 %v30636_v0, %v1401_v6  ;;  %v1410_v42 = vadd.f32 %v30636_v0, %v1400_v8  ;;  %v1399_v45 = vmul.f32 %v30767_v25, %v1388_v39  ;;  %v1398_v46 = vmul.f32 %v30767_v25, %v1383_v40 }
 0x16a   : >> { %v1415_v63 = vmax.f32 %v1411_v41, 0.0  ;;  %v1414_v26 = vmax.f32 %v1410_v42, 0.0  ;;  %v1403_v43 = vadd.f32 %v1399_v45, %v1365_v37  ;;  %v1402_v44 = vadd.f32 %v1398_v46, %v1364_v38 }
 0x16c   : >> { %1421 = vst.msk [vmem:[%s1418_s25 + $0x8] sm:$0xff] %vm1419_vm0, %v1415_v63  ;;  %1420 = vst.msk [vmem:[%s1418_s25] sm:$0xff] %vm1419_vm0, %v1414_v26  ;;  %v1413_v29 = vadd.f32 %v30636_v0, %v1403_v43  ;;  %v1412_v30 = vadd.f32 %v30636_v0, %v1402_v44 }
 0x16d   : > { %438 = sbr.rel (!%p436_p11) target bundleno = 35 (0x23), region = 221 }
 0x16e   : >> { %v1417_v49 = vmax.f32 %v1413_v29, 0.0  ;;  %v1416_v50 = vmax.f32 %v1412_v30, 0.0 }
 0x170   : >> { %1424 = vst.msk [vmem:[%s1418_s25 + $0x18] sm:$0xf] %vm1423_vm1, %v1417_v49 }
 0x171   : >> { %1422 = vst.msk [vmem:[%s1418_s25 + $0x10] sm:$0xff] %vm1419_vm0, %v1416_v50 }
 0x172 LB: >> { %s27323_s30 = sshll.u32 %s30509_s24, 6  ;;  %vm1493_vm2 = vcmask 1040384   ;;  %vm1495_vm3 = vcmask 1041408   ;;  %vm1497_vm4 = vcmask 1042432   ;;  %vm1499_vm5 = vcmask 1043456   ;;  %s27193_s22 = sshll.u32 %s30509_s24, 4  ;;  %s30509_s24 = sphi %s31002_s24, %s1430_s24  }
 0x173   : >> { %s1433_s12 = scalar_lea.vmem [#allocation2], %s27323_s30  ;;  %vm1501_vm6 = vcmask 1044480   ;;  %vm1503_vm7 = vcmask 1045504   ;;  %vm1505_vm8 = vcmask 1046528   ;;  %vm1516_vm9 = vcmask 62464   ;;  %s1513_s13 = scalar_lea.vmem [#allocation3], %s27193_s22 }
 0x174   : >> { %s1430_s24 = sadd.s32 1, %s30509_s24  }
 0x175   : >> { %p1427_p12 = scmp.ge.s32.totalorder %s1430_s24, 14  }
 0x176   : > { %v31026_v12 = vld [vmem:[%s34752_s4] ss:$0 sm:$0xff] (%p1427_p12)  ;;  %v31036_v6 = vld [vmem:[%s34751_s3 + $0x8] sm:$0xff] (%p1427_p12)  ;;  %v31041_v8 = vld [vmem:[%s34751_s3 + $0x10] sm:$0xff] (%p1427_p12)  ;;  %s31153_s24 = smov (%p1427_p12), 0  }
 0x177   : > { %34829 = vst [vmem:[#allocation10_spill] sm:$0xff] (%p1427_p12), %v31026_v12  ;;  %v31031_v5 = vld [vmem:[%s34751_s3] sm:$0xff] (%p1427_p12)  ;;  %34831 = vst [vmem:[#allocation12_spill] sm:$0xff] (%p1427_p12), %v31036_v6  ;;  %v31046_v37 = vld [vmem:[%s34751_s3 + $0x18] sm:$0xff] (%p1427_p12) }
 0x178   : >> { %v1434_v27 = vld [vmem:[%s1433_s12] sm:$0xff]  ;;  %v1435_v28 = vld [vmem:[%s1433_s12 + $0x8] sm:$0xff]  ;;  %v1436_v47 = vld [vmem:[%s1433_s12 + $0x10] sm:$0xff]  ;;  %34830 = vst [vmem:[#allocation11_spill] sm:$0xff] (%p1427_p12), %v31031_v5 }
 0x179   : >> { %v27189_v48 = vld [vmem:[%s1433_s12 + $0x20] sm:$0xff]  ;;  %v27190_v56 = vld [vmem:[%s1433_s12 + $0x28] sm:$0xff]  ;;  %v27191_v57 = vld [vmem:[%s1433_s12 + $0x30] sm:$0xff]  ;;  %34832 = vst [vmem:[#allocation13_spill] sm:$0xff] (%p1427_p12), %v31041_v8 }
 0x17a   : >> { %v1445_v33 = vmax.f32 %v1434_v27, %v27189_v48  ;;  %v1446_v54 = vmax.f32 %v1435_v28, %v27190_v56  ;;  %v1447_v55 = vmax.f32 %v1436_v47, %v27191_v57  ;;  %v1437_v34 = vld [vmem:[%s1433_s12 + $0x18] sm:$0xf]  ;;  %34833 = vst [vmem:[#allocation14_spill] sm:$0xff] (%p1427_p12), %v31046_v37  ;;  %v31051_v38 = vld [vmem:[%s34751_s3 + $0x20] sm:$0xff] (%p1427_p12)  ;;  %v31056_v39 = vld [vmem:[%s34751_s3 + $0x28] sm:$0xff] (%p1427_p12) }
 0x17b   : >> { %v27192_v0 = vld [vmem:[%s1433_s12 + $0x38] sm:$0xf]  ;;  %34834 = vst [vmem:[#allocation15_spill] sm:$0xff] (%p1427_p12), %v31051_v38  ;;  %34835 = vst [vmem:[#allocation16_spill] sm:$0xff] (%p1427_p12), %v31056_v39  ;;  %v31061_v40 = vld [vmem:[%s34751_s3 + $0x30] sm:$0xff] (%p1427_p12) }
 0x17c   : >> { %v1448_v13 = vmax.f32 %v1437_v34, %v27192_v0  ;;  %v1450_v14 = vrot.slane %v1445_v33, 1  ;;  %v1454_v15 = vrot.slane %v1446_v54, 1  ;;  %v1458_v16 = vrot.slane %v1447_v55, 1  ;;  %34836 = vst [vmem:[#allocation17_spill] sm:$0xff] (%p1427_p12), %v31061_v40  ;;  %v31066_v41 = vld [vmem:[%s34751_s3 + $0x38] sm:$0xff] (%p1427_p12)  ;;  %v31071_v42 = vld [vmem:[%s34751_s3 + $0x40] sm:$0xff] (%p1427_p12) }
 0x17d   : > { %34837 = vst [vmem:[#allocation18_spill] sm:$0xff] (%p1427_p12), %v31066_v41  ;;  %34838 = vst [vmem:[#allocation19_spill] sm:$0xff] (%p1427_p12), %v31071_v42  ;;  %v31076_v45 = vld [vmem:[%s34751_s3 + $0x48] sm:$0xff] (%p1427_p12)  ;;  %v31081_v46 = vld [vmem:[%s34751_s3 + $0x50] sm:$0xff] (%p1427_p12) }
 0x17e   : >> { %v1462_v17 = vrot.slane %v1448_v13, 1  ;;  %v1452_v18 = vmax.f32 %v1445_v33, %v1450_v14  ;;  %v1456_v19 = vmax.f32 %v1446_v54, %v1454_v15  ;;  %v1460_v20 = vmax.f32 %v1447_v55, %v1458_v16  ;;  %34839 = vst [vmem:[#allocation20_spill] sm:$0xff] (%p1427_p12), %v31076_v45  ;;  %34840 = vst [vmem:[#allocation21_spill] sm:$0xff] (%p1427_p12), %v31081_v46  ;;  %v31086_v63 = vld [vmem:[%s34751_s3 + $0x58] sm:$0xff] (%p1427_p12)  ;;  %v31091_v26 = vld [vmem:[%s34751_s3 + $0x60] sm:$0xff] (%p1427_p12) }
 0x17f   : > { %34841 = vst [vmem:[#allocation22_spill] sm:$0xff] (%p1427_p12), %v31086_v63  ;;  %34842 = vst [vmem:[#allocation23_spill] sm:$0xff] (%p1427_p12), %v31091_v26  ;;  %v31096_v43 = vld [vmem:[%s34751_s3 + $0x68] sm:$0xff] (%p1427_p12)  ;;  %v31101_v44 = vld [vmem:[%s34751_s3 + $0x70] sm:$0xff] (%p1427_p12) }
 0x180   : >> { %v1464_v21 = vmax.f32 %v1448_v13, %v1462_v17  ;;  %v1466_v22 = vrot.slane %v1452_v18, 1  ;;  %v1468_v23 = vrot.slane %v1452_v18, 2  ;;  %v1470_v24 = vrot.slane %v1452_v18, 3  ;;  %34843 = vst [vmem:[#allocation24_spill] sm:$0xff] (%p1427_p12), %v31096_v43  ;;  %34844 = vst [vmem:[#allocation25_spill] sm:$0xff] (%p1427_p12), %v31101_v44  ;;  %v31106_v29 = vld [vmem:[%s34751_s3 + $0x78] sm:$0xff] (%p1427_p12) }
 0x181   : >> { %v1473_v25 = vrot.slane %v1456_v19, 4  ;;  %v1475_v31 = vrot.slane %v1456_v19, 5  ;;  %v1482_v51 = vrot.slane %v1460_v20, 1  ;;  %v1484_v32 = vrot.slane %v1460_v20, 2  ;;  %34845 = vst [vmem:[#allocation26_spill] sm:$0xff] (%p1427_p12), %v31106_v29  ;;  %v31111_v30 = vld [vmem:[%s34751_s3 + $0x80] sm:$0xff] (%p1427_p12) }
 0x182   : >> { %v1494_v52 = vsel %vm1493_vm2, %v1452_v18, %v1466_v22  ;;  %v1486_v58 = vrot.slane %v1460_v20, 3  ;;  %v1489_v9 = vrot.slane %v1464_v21, 4  ;;  %v1477_v10 = vrot.slane %v1456_v19, 6  ;;  %34846 = vst [vmem:[#allocation27_spill] sm:$0xff] (%p1427_p12), %v31111_v30  ;;  %v31116_v49 = vld [vmem:[%s34751_s3 + $0x88] sm:$0xff] (%p1427_p12)  ;;  %v31121_v50 = vld [vmem:[%s34751_s3 + $0x90] sm:$0xff] (%p1427_p12) }
 0x183   : >> { %v1496_v59 = vsel %vm1495_vm3, %v1494_v52, %v1468_v23  ;;  %v1491_v1 = vrot.slane %v1464_v21, 5  ;;  %v1507_v2 = vsel %vm1493_vm2, %v1460_v20, %v1482_v51  ;;  %v1479_v60 = vrot.slane %v1456_v19, 7  ;;  %34847 = vst [vmem:[#allocation28_spill] sm:$0xff] (%p1427_p12), %v31116_v49  ;;  %34848 = vst [vmem:[#allocation29_spill] sm:$0xff] (%p1427_p12), %v31121_v50  ;;  %v31126_v27 = vld [vmem:[%s34751_s3 + $0x98] sm:$0xff] (%p1427_p12)  ;;  %v31131_v28 = vld [vmem:[%s34751_s3 + $0xa0] sm:$0xff] (%p1427_p12) }
 0x184   : >> { %v1498_v3 = vsel %vm1497_vm4, %v1496_v59, %v1470_v24  ;;  %v1508_v53 = vsel %vm1495_vm3, %v1507_v2, %v1484_v32  ;;  %34849 = vst [vmem:[#allocation30_spill] sm:$0xff] (%p1427_p12), %v31126_v27  ;;  %34850 = vst [vmem:[#allocation31_spill] sm:$0xff] (%p1427_p12), %v31131_v28  ;;  %v31136_v47 = vld [vmem:[%s34751_s3 + $0xa8] sm:$0xff] (%p1427_p12)  ;;  %v31141_v48 = vld [vmem:[%s34751_s3 + $0xb0] sm:$0xff] (%p1427_p12) }
 0x185   : >> { %v1500_v4 = vsel %vm1499_vm5, %v1498_v3, %v1473_v25  ;;  %v1509_v61 = vsel %vm1497_vm4, %v1508_v53, %v1486_v58  ;;  %1429 = sbr.rel (!%p1427_p12) target bundleno = 370 (0x172), region = 232  ;;  %34851 = vst [vmem:[#allocation32_spill] sm:$0xff] (%p1427_p12), %v31136_v47  ;;  %34852 = vst [vmem:[#allocation33_spill] sm:$0xff] (%p1427_p12), %v31141_v48  ;;  %v31146_v56 = vld [vmem:[%s34751_s3 + $0xb8] sm:$0xff] (%p1427_p12)  ;;  %v31151_v57 = vld [vmem:[%s34751_s3 + $0xc0] sm:$0xff] (%p1427_p12) }
 0x186   : >> { %v1502_v62 = vsel %vm1501_vm6, %v1500_v4, %v1475_v31  ;;  %v1510_v7 = vsel %vm1499_vm5, %v1509_v61, %v1489_v9  ;;  %34853 = vst [vmem:[#allocation34_spill] sm:$0xff] (%p1427_p12), %v31146_v56  ;;  %34854 = vst [vmem:[#allocation35_spill] sm:$0xff] (%p1427_p12), %v31151_v57 }
 0x187   : >> { %v1504_v11 = vsel %vm1503_vm7, %v1502_v62, %v1477_v10  ;;  %v1511_v35 = vsel %vm1501_vm6, %v1510_v7, %v1491_v1 }
 0x188   : >> { %v1506_v36 = vsel %vm1505_vm8, %v1504_v11, %v1479_v60  ;;  %1517 = vst.msk [vmem:[%s1513_s13 + $0x8] sm:$0x3f] %vm1516_vm9, %v1511_v35 }
 0x189   : >> { %1515 = vst.msk [vmem:[%s1513_s13] sm:$0xff] %vm1419_vm0, %v1506_v36 }
 0x18a LB: >> { %v34855_v63 = vld [vmem:[#allocation22_spill] sm:$0xff]  ;;  %v34858_v50 = vld [vmem:[#allocation29_spill] sm:$0xff]  ;;  %v34859_v49 = vld [vmem:[#allocation28_spill] sm:$0xff]  ;;  %s27218_s22 = sshll.u32 %s30513_s24, 4  ;;  %vm14073_vm10 = vcmask 123904   ;;  %vm14071_vm11 = vcmask 130048   ;;  %s30513_s24 = sphi %s31153_s24, %s1573_s24  }
 0x18b   : >> { %v34862_v46 = vld [vmem:[#allocation21_spill] sm:$0xff]  ;;  %v34863_v45 = vld [vmem:[#allocation20_spill] sm:$0xff]  ;;  %v34866_v42 = vld [vmem:[#allocation19_spill] sm:$0xff]  ;;  %s31168_s13 = scalar_lea.vmem [#allocation3], %s27218_s22  ;;  %s14070_s14 = scalar_lea.vmem [#allocation4], %s27218_s22 }
 0x18c   : >> { %v34860_v48 = vld [vmem:[#allocation33_spill] sm:$0xff]  ;;  %v34861_v47 = vld [vmem:[#allocation32_spill] sm:$0xff]  ;;  %v34867_v41 = vld [vmem:[#allocation18_spill] sm:$0xff]  ;;  %s1573_s24 = sadd.s32 1, %s30513_s24  }
 0x18d   : >> { %v34856_v57 = vld [vmem:[#allocation35_spill] sm:$0xff]  ;;  %v34857_v56 = vld [vmem:[#allocation34_spill] sm:$0xff]  ;;  %v34864_v44 = vld [vmem:[#allocation25_spill] sm:$0xff]  ;;  %p1570_p13 = scmp.ge.s32.totalorder %s1573_s24, 10  }
 0x18e   : >> { %v34865_v43 = vld [vmem:[#allocation24_spill] sm:$0xff]  ;;  %v34868_v40 = vld [vmem:[#allocation17_spill] sm:$0xff]  ;;  %v34870_v38 = vld [vmem:[#allocation15_spill] sm:$0xff]  ;;  %s32479_s29 = smov (%p1570_p13), 0  }
 0x18f   : >> { %v34869_v39 = vld [vmem:[#allocation16_spill] sm:$0xff]  ;;  %v34871_v37 = vld [vmem:[#allocation14_spill] sm:$0xff]  ;;  %v34872_v30 = vld [vmem:[#allocation27_spill] sm:$0xff] }
 0x190   : >> { %v34873_v29 = vld [vmem:[#allocation26_spill] sm:$0xff]  ;;  %v34874_v28 = vld [vmem:[#allocation31_spill] sm:$0xff]  ;;  %v34877_v8 = vld [vmem:[#allocation13_spill] sm:$0xff] }
 0x191   : >> { %v34875_v27 = vld [vmem:[#allocation30_spill] sm:$0xff]  ;;  %v34876_v26 = vld [vmem:[#allocation23_spill] sm:$0xff]  ;;  %v34878_v6 = vld [vmem:[#allocation12_spill] sm:$0xff]  ;;  %v31196_v60 = vand.u32 4294901760, %v34877_v8 }
 0x192   : >> { %v34879_v5 = vld [vmem:[#allocation11_spill] sm:$0xff]  ;;  %v1618_v33 = vand.u32 4294901760, %v34878_v6  ;;  %v1578_v0 = vld [vmem:[%s31168_s13 + $0x1] sm:$0xff]  ;;  %v1579_v13 = vld [vmem:[%s31168_s13 + $0x9] sm:$0x3] }
 0x193   : >> { %v31160_v54 = vand.u32 4294901760, %v34879_v5  ;;  %v1576_v15 = vld [vmem:[%s31168_s13] sm:$0xff]  ;;  %v1582_v16 = vsel %vm1419_vm0, %v1578_v0, 0  ;;  %v1585_v17 = vsel %vm1419_vm0, %v1579_v13, 0  ;;  %v1577_v19 = vld [vmem:[%s31168_s13 + $0x8] sm:$0x3]  ;;  %v31207_v36 = vsub.f32 %v34877_v8, %v31196_v60 }
 0x194   : >> { %28329 = vmatprep.subr.mxu0 %v1618_v33  ;;  %v1705_v55 = vsub.f32 %v34878_v6, %v1618_v33  ;;  %v2077_v18 = vsel %vm1419_vm0, %v1576_v15, 0  ;;  %v1653_v21 = vand.u32 4294901760, %v1582_v16  ;;  %v1663_v22 = vand.u32 4294901760, %v1585_v17  ;;  %v2571_v3 = vld [vmem:[%s31168_s13 + $0x2] sm:$0xff]  ;;  %v2572_v11 = vld [vmem:[%s31168_s13 + $0xa] sm:$0x3] }
 0x195   : >> { %28330 = vmatpush3.msra.mxu0 %v1618_v33  ;;  %v31174_v14 = vsub.f32 %v34879_v5, %v31160_v54  ;;  %v31182_v23 = vand.u32 4294901760, %v2077_v18  ;;  %v2080_v24 = vsel %vm1419_vm0, %v1577_v19, 0  ;;  %v2574_v7 = vsel %vm1419_vm0, %v2571_v3, 0 }
 0x196   : >> { %v31164_v34 = vand.u32 4294901760, %v1705_v55  ;;  %28339 = vmatprep.subr.mxu0 %v1705_v55  ;;  %v1654_v31 = vsub.f32 %v1582_v16, %v1653_v21  ;;  %28336 = vmatprep.mubr.f32.mxu1 %v1653_v21  ;;  %v1664_v51 = vsub.f32 %v1585_v17, %v1663_v22  ;;  %v31188_v32 = vand.u32 4294901760, %v2080_v24 }
 0x197   : >> { %v31186_v52 = vand.u32 4294901760, %v31174_v14  ;;  %v31191_v10 = vsub.f32 %v2077_v18, %v31182_v23  ;;  %v31211_v15 = vand.u32 4294901760, %v2574_v7  ;;  %v2577_v16 = vsel %vm1419_vm0, %v2572_v11, 0 }
 0x198   : >> { %v1707_v20 = vsub.f32 %v1705_v55, %v31164_v34  ;;  %v1655_v58 = vand.u32 4294901760, %v1654_v31  ;;  %v1665_v9 = vand.u32 4294901760, %v1664_v51  ;;  %v31200_v53 = vsub.f32 %v2080_v24, %v31188_v32 }
 0x199   : >> { %v2202_v2 = vsub.f32 %v31174_v14, %v31186_v52  ;;  %v2150_v62 = vand.u32 4294901760, %v31191_v10  ;;  %v31216_v17 = vand.u32 4294901760, %v31207_v36  ;;  %v31223_v19 = vsub.f32 %v2574_v7, %v31211_v15 }
 0x19a   : >> { %v1708_v25 = vand.u32 4294901760, %v1707_v20  ;;  %v1656_v59 = vsub.f32 %v1654_v31, %v1655_v58  ;;  %v1666_v1 = vsub.f32 %v1664_v51, %v1665_v9  ;;  %v2160_v0 = vand.u32 4294901760, %v31200_v53 }
 0x19b   : >> { %v2203_v35 = vand.u32 4294901760, %v2202_v2  ;;  %v2151_v13 = vsub.f32 %v31191_v10, %v2150_v62  ;;  %v2699_v20 = vsub.f32 %v31207_v36, %v31216_v17  ;;  %v31232_v24 = vand.u32 4294901760, %v34871_v37 }
 0x19c   : >> { %28334 = vmatprep.subr.mxu1 %v1708_v25  ;;  %v1657_v4 = vand.u32 4294901760, %v1656_v59  ;;  %v1667_v61 = vand.u32 4294901760, %v1666_v1 }
 0x19d   : >> { %28335 = vmatpush3.msra.mxu1 %v1708_v25  ;;  %v2152_v18 = vand.u32 4294901760, %v2151_v13 }
 0x19e   : >> { %28337 = vmatmul.mubr.f32.vlgmr.msra.gmra.mxu1 %v1663_v22  ;;  %28344 = vmatprep.subr.mxu1 %v1618_v33 }
 0x19f   : >> { %28345 = vmatpush3.msra.mxu1 %v1618_v33  ;;  %28346 = vmatprep.mubr.f32.mxu1 %v1655_v58  ;;  %v3071_v58 = vld [vmem:[%s31168_s13 + $0xb] sm:$0x3] }
 0x1a0   : >> { %28354 = vmatprep.subr.mxu1 %v1618_v33  ;;  %28331 = vmatprep.mubr.f32.mxu0 %v1657_v4  ;;  %v3076_v3 = vsel %vm1419_vm0, %v3071_v58, 0 }
 0x1a1   : >> { %28332 = vmatmul.mubr.f32.vlgmr.msra.gmra.mxu0 %v1667_v61 }
 0x1a2   : >> { %28347 = vmatmul.mubr.f32.vlgmr.msra.gmra.mxu1 %v1665_v9  ;;  %28340 = vmatpush3.msra.mxu0 %v1705_v55  ;;  %v31219_v55 = vand.u32 4294901760, %v2577_v16  ;;  %v31247_v9 = vsub.f32 %v34871_v37, %v31232_v24 }
 0x1a3   : >> { %28355 = vmatpush3.msra.mxu1 %v1618_v33  ;;  %28341 = vmatprep.mubr.f32.mxu0 %v1654_v31  ;;  %v2161_v33 = vsub.f32 %v31200_v53, %v2160_v0  ;;  %v2647_v31 = vand.u32 4294901760, %v31223_v19 }
 0x1a4   : >> { %28349 = vmatprep.subr.mxu0 %v31164_v34  ;;  %28356 = vmatprep.mubr.f32.mxu1 %v1653_v21  ;;  %v31237_v25 = vsub.f32 %v2577_v16, %v31219_v55 }
 0x1a5   : >> { %28364 = vmatprep.subr.mxu1 %v2203_v35  ;;  %28342 = vmatmul.mubr.f32.vlgmr.msra.gmra.mxu0 %v1664_v51  ;;  %v2648_v1 = vsub.f32 %v31223_v19, %v2647_v31 }
 0x1a6   : >> { %28357 = vmatmul.mubr.f32.vlgmr.msra.gmra.mxu1 %v1663_v22  ;;  %28350 = vmatpush3.msra.mxu0 %v31164_v34  ;;  %v3070_v34 = vld [vmem:[%s31168_s13 + $0x3] sm:$0xff]  ;;  %v2657_v59 = vand.u32 4294901760, %v31237_v25 }
 0x1a7   : >> { %28365 = vmatpush3.msra.mxu1 %v2203_v35  ;;  %28351 = vmatprep.mubr.f32.mxu0 %v1653_v21  ;;  %v2162_v21 = vand.u32 4294901760, %v2161_v33  ;;  %v3073_v51 = vsel %vm1419_vm0, %v3070_v34, 0  ;;  %v2649_v4 = vand.u32 4294901760, %v2648_v1 }
 0x1a8   : >> { %28359 = vmatprep.subr.mxu0 %v31160_v54  ;;  %28366 = vmatprep.mubr.f32.mxu1 %v31182_v23  ;;  %v31254_v2 = vand.u32 4294901760, %v3073_v51 }
 0x1a9   : >> { %28374 = vmatprep.subr.mxu1 %v31160_v54  ;;  %28352 = vmatmul.mubr.f32.vlgmr.msra.gmra.mxu0 %v1663_v22  ;;  %v2700_v22 = vand.u32 4294901760, %v2699_v20 }
 0x1aa   : >> { %28367 = vmatmul.mubr.f32.vlgmr.msra.gmra.mxu1 %v31188_v32  ;;  %28360 = vmatpush3.msra.mxu0 %v31160_v54  ;;  %v31270_v61 = vsub.f32 %v3073_v51, %v31254_v2 }
 0x1ab   : >> { %28375 = vmatpush3.msra.mxu1 %v31160_v54  ;;  %28361 = vmatprep.mubr.f32.mxu0 %v2152_v18 }
 0x1ac   : >> { %28369 = vmatprep.subr.mxu0 %v31174_v14  ;;  %28376 = vmatprep.mubr.f32.mxu1 %v2150_v62  ;;  %v3146_v11 = vand.u32 4294901760, %v31270_v61 }
 0x1ad   : >> { %28384 = vmatprep.subr.mxu1 %v31160_v54  ;;  %28362 = vmatmul.mubr.f32.vlgmr.msra.gmra.mxu0 %v2162_v21 }
 0x1ae   : >> { %28377 = vmatmul.mubr.f32.vlgmr.msra.gmra.mxu1 %v2160_v0  ;;  %28370 = vmatpush3.msra.mxu0 %v31174_v14  ;;  %v2658_v14 = vsub.f32 %v31237_v25, %v2657_v59  ;;  %v3570_v0 = vld [vmem:[%s31168_s13 + $0xc] sm:$0x3]  ;;  %v3147_v33 = vsub.f32 %v31270_v61, %v3146_v11 }
 0x1af   : >> { %28385 = vmatpush3.msra.mxu1 %v31160_v54  ;;  %28371 = vmatprep.mubr.f32.mxu0 %v31191_v10  ;;  %v31261_v54 = vand.u32 4294901760, %v31247_v9  ;;  %v31265_v10 = vand.u32 4294901760, %v3076_v3  ;;  %v3575_v20 = vsel %vm1419_vm0, %v3570_v0, 0 }
 0x1b0   : >> { %28379 = vmatprep.subr.mxu0 %v31186_v52  ;;  %28386 = vmatprep.mubr.f32.mxu1 %v31182_v23  ;;  %v2659_v62 = vand.u32 4294901760, %v2658_v14  ;;  %v3148_v34 = vand.u32 4294901760, %v3147_v33 }
 0x1b1   : >> { %28394 = vmatprep.subr.mxu1 %v2700_v22  ;;  %28372 = vmatmul.mubr.f32.vlgmr.msra.gmra.mxu0 %v31200_v53  ;;  %v3198_v53 = vsub.f32 %v31247_v9, %v31261_v54  ;;  %v31285_v7 = vsub.f32 %v3076_v3, %v31265_v10 }
 0x1b2   : >> { %28387 = vmatmul.mubr.f32.vlgmr.msra.gmra.mxu1 %v31188_v32  ;;  %28380 = vmatpush3.msra.mxu0 %v31186_v52  ;;  %v31279_v52 = vand.u32 4294901760, %v34870_v38 }
 0x1b3   : >> { %28395 = vmatpush3.msra.mxu1 %v2700_v22  ;;  %28381 = vmatprep.mubr.f32.mxu0 %v31182_v23  ;;  %v3569_v23 = vld [vmem:[%s31168_s13 + $0x4] sm:$0xff]  ;;  %v3156_v16 = vand.u32 4294901760, %v31285_v7 }
 0x1b4   : >> { %28389 = vmatprep.subr.mxu0 %v31196_v60  ;;  %28396 = vmatprep.mubr.f32.mxu1 %v31211_v15  ;;  %v3572_v35 = vsel %vm1419_vm0, %v3569_v23, 0  ;;  %v31295_v13 = vsub.f32 %v34870_v38, %v31279_v52 }
 0x1b5   : >> { %28404 = vmatprep.subr.mxu1 %v31196_v60  ;;  %28382 = vmatmul.mubr.f32.vlgmr.msra.gmra.mxu0 %v31188_v32  ;;  %v3199_v32 = vand.u32 4294901760, %v3198_v53  ;;  %v31302_v18 = vand.u32 4294901760, %v3572_v35 }
 0x1b6   : >> { %28397 = vmatmul.mubr.f32.vlgmr.msra.gmra.mxu1 %v31219_v55  ;;  %28390 = vmatpush3.msra.mxu0 %v31196_v60 }
 0x1b7   : >> { %28405 = vmatpush3.msra.mxu1 %v31196_v60  ;;  %28391 = vmatprep.mubr.f32.mxu0 %v2649_v4  ;;  %v31318_v21 = vsub.f32 %v3572_v35, %v31302_v18 }
 0x1b8   : >> { %28399 = vmatprep.subr.mxu0 %v31207_v36  ;;  %28406 = vmatprep.mubr.f32.mxu1 %v2647_v31 }
 0x1b9   : >> { %28414 = vmatprep.subr.mxu1 %v31196_v60  ;;  %28392 = vmatmul.mubr.f32.vlgmr.msra.gmra.mxu0 %v2659_v62  ;;  %v3645_v58 = vand.u32 4294901760, %v31318_v21 }
 0x1ba   : >> { %28407 = vmatmul.mubr.f32.vlgmr.msra.gmra.mxu1 %v2657_v59  ;;  %28400 = vmatpush3.msra.mxu0 %v31207_v36  ;;  %v3157_v36 = vsub.f32 %v31285_v7, %v3156_v16  ;;  %v27221_v59 = vld [vmem:[%s31168_s13 + $0x18] sm:$0x3] }
 0x1bb   : >> { %28415 = vmatpush3.msra.mxu1 %v31196_v60  ;;  %28401 = vmatprep.mubr.f32.mxu0 %v31223_v19  ;;  %v31309_v60 = vand.u32 4294901760, %v31295_v13  ;;  %v31313_v19 = vand.u32 4294901760, %v3575_v20  ;;  %v3646_v14 = vsub.f32 %v31318_v21, %v3645_v58  ;;  %v4077_v53 = vsel %vm1419_vm0, %v27221_v59, 0 }
 0x1bc   : >> { %28409 = vmatprep.subr.mxu0 %v31216_v17  ;;  %28416 = vmatprep.mubr.f32.mxu1 %v31211_v15  ;;  %v3158_v31 = vand.u32 4294901760, %v3157_v36 }
 0x1bd   : >> { %28424 = vmatprep.subr.mxu1 %v3199_v32  ;;  %28402 = vmatmul.mubr.f32.vlgmr.msra.gmra.mxu0 %v31237_v25  ;;  %v3697_v25 = vsub.f32 %v31295_v13, %v31309_v60  ;;  %v31333_v51 = vsub.f32 %v3575_v20, %v31313_v19  ;;  %v3647_v23 = vand.u32 4294901760, %v3646_v14 }
 0x1be   : >> { %28417 = vmatmul.mubr.f32.vlgmr.msra.gmra.mxu1 %v31219_v55  ;;  %28410 = vmatpush3.msra.mxu0 %v31216_v17  ;;  %v31327_v17 = vand.u32 4294901760, %v34869_v39 }
 0x1bf   : >> { %28425 = vmatpush3.msra.mxu1 %v3199_v32  ;;  %28411 = vmatprep.mubr.f32.mxu0 %v31211_v15  ;;  %v27220_v15 = vld [vmem:[%s31168_s13 + $0x10] sm:$0xff]  ;;  %v3655_v3 = vand.u32 4294901760, %v31333_v51 }
 0x1c0   : >> { %28419 = vmatprep.subr.mxu0 %v31232_v24  ;;  %28426 = vmatprep.mubr.f32.mxu1 %v31254_v2  ;;  %v4074_v22 = vsel %vm1419_vm0, %v27220_v15, 0  ;;  %v31343_v1 = vsub.f32 %v34869_v39, %v31327_v17 }
 0x1c1   : >> { %28434 = vmatprep.subr.mxu1 %v31232_v24  ;;  %28412 = vmatmul.mubr.f32.vlgmr.msra.gmra.mxu0 %v31219_v55  ;;  %v3698_v55 = vand.u32 4294901760, %v3697_v25  ;;  %v31350_v4 = vand.u32 4294901760, %v4074_v22 }
 0x1c2   : >> { %28427 = vmatmul.mubr.f32.vlgmr.msra.gmra.mxu1 %v31265_v10  ;;  %28420 = vmatpush3.msra.mxu0 %v31232_v24 }
 0x1c3   : >> { %28435 = vmatpush3.msra.mxu1 %v31232_v24  ;;  %28421 = vmatprep.mubr.f32.mxu0 %v3148_v34  ;;  %v31366_v62 = vsub.f32 %v4074_v22, %v31350_v4 }
 0x1c4   : >> { %28429 = vmatprep.subr.mxu0 %v31247_v9  ;;  %28436 = vmatprep.mubr.f32.mxu1 %v3146_v11 }
 0x1c5   : >> { %28444 = vmatprep.subr.mxu1 %v31232_v24  ;;  %28422 = vmatmul.mubr.f32.vlgmr.msra.gmra.mxu0 %v3158_v31  ;;  %v4147_v0 = vand.u32 4294901760, %v31366_v62 }
 0x1c6   : >> { %28437 = vmatmul.mubr.f32.vlgmr.msra.gmra.mxu1 %v3156_v16  ;;  %28430 = vmatpush3.msra.mxu0 %v31247_v9  ;;  %v3656_v9 = vsub.f32 %v31333_v51, %v3655_v3  ;;  %v27223_v16 = vld [vmem:[%s31168_s13 + $0x19] sm:$0x3] }
 0x1c7   : >> { %28445 = vmatpush3.msra.mxu1 %v31232_v24  ;;  %28431 = vmatprep.mubr.f32.mxu0 %v31270_v61  ;;  %v31357_v24 = vand.u32 4294901760, %v31343_v1  ;;  %v31361_v61 = vand.u32 4294901760, %v4077_v53  ;;  %v4148_v36 = vsub.f32 %v31366_v62, %v4147_v0  ;;  %v4576_v25 = vsel %vm1419_vm0, %v27223_v16, 0 }
 0x1c8   : >> { %28439 = vmatprep.subr.mxu0 %v31261_v54  ;;  %28446 = vmatprep.mubr.f32.mxu1 %v31254_v2  ;;  %v3657_v11 = vand.u32 4294901760, %v3656_v9 }
 0x1c9   : >> { %28454 = vmatprep.subr.mxu1 %v3698_v55  ;;  %28432 = vmatmul.mubr.f32.vlgmr.msra.gmra.mxu0 %v31285_v7  ;;  %v4199_v7 = vsub.f32 %v31343_v1, %v31357_v24  ;;  %v31381_v35 = vsub.f32 %v4077_v53, %v31361_v61  ;;  %v4149_v15 = vand.u32 4294901760, %v4148_v36 }
 0x1ca   : >> { %28447 = vmatmul.mubr.f32.vlgmr.msra.gmra.mxu1 %v31265_v10  ;;  %28440 = vmatpush3.msra.mxu0 %v31261_v54  ;;  %v31375_v54 = vand.u32 4294901760, %v34868_v40 }
 0x1cb   : >> { %28455 = vmatpush3.msra.mxu1 %v3698_v55  ;;  %28441 = vmatprep.mubr.f32.mxu0 %v31254_v2  ;;  %v27222_v2 = vld [vmem:[%s31168_s13 + $0x11] sm:$0xff]  ;;  %v4157_v20 = vand.u32 4294901760, %v31381_v35 }
 0x1cc   : >> { %28449 = vmatprep.subr.mxu0 %v31279_v52  ;;  %28456 = vmatprep.mubr.f32.mxu1 %v31302_v18  ;;  %v4573_v32 = vsel %vm1419_vm0, %v27222_v2, 0  ;;  %v31391_v33 = vsub.f32 %v34868_v40, %v31375_v54 }
 0x1cd   : >> { %28464 = vmatprep.subr.mxu1 %v31279_v52  ;;  %28442 = vmatmul.mubr.f32.vlgmr.msra.gmra.mxu0 %v31265_v10  ;;  %v4200_v10 = vand.u32 4294901760, %v4199_v7  ;;  %v31398_v34 = vand.u32 4294901760, %v4573_v32 }
 0x1ce   : >> { %28457 = vmatmul.mubr.f32.vlgmr.msra.gmra.mxu1 %v31313_v19  ;;  %28450 = vmatpush3.msra.mxu0 %v31279_v52 }
 0x1cf   : >> { %28465 = vmatpush3.msra.mxu1 %v31279_v52  ;;  %28451 = vmatprep.mubr.f32.mxu0 %v3647_v23  ;;  %v31414_v31 = vsub.f32 %v4573_v32, %v31398_v34 }
 0x1d0   : >> { %28459 = vmatprep.subr.mxu0 %v31295_v13  ;;  %28466 = vmatprep.mubr.f32.mxu1 %v3645_v58 }
 0x1d1   : >> { %28474 = vmatprep.subr.mxu1 %v31279_v52  ;;  %28452 = vmatmul.mubr.f32.vlgmr.msra.gmra.mxu0 %v3657_v11  ;;  %v4646_v59 = vand.u32 4294901760, %v31414_v31 }
 0x1d2   : >> { %28467 = vmatmul.mubr.f32.vlgmr.msra.gmra.mxu1 %v3655_v3  ;;  %28460 = vmatpush3.msra.mxu0 %v31295_v13  ;;  %v4158_v13 = vsub.f32 %v31381_v35, %v4157_v20  ;;  %v27225_v3 = vld [vmem:[%s31168_s13 + $0x1a] sm:$0x3] }
 0x1d3   : >> { %28475 = vmatpush3.msra.mxu1 %v31279_v52  ;;  %28461 = vmatprep.mubr.f32.mxu0 %v31318_v21  ;;  %v31405_v52 = vand.u32 4294901760, %v31391_v33  ;;  %v31409_v21 = vand.u32 4294901760, %v4576_v25  ;;  %v4647_v9 = vsub.f32 %v31414_v31, %v4646_v59  ;;  %v5075_v7 = vsel %vm1419_vm0, %v27225_v3, 0 }
 0x1d4   : >> { %28469 = vmatprep.subr.mxu0 %v31309_v60  ;;  %28476 = vmatprep.mubr.f32.mxu1 %v31302_v18  ;;  %v4159_v58 = vand.u32 4294901760, %v4158_v13 }
 0x1d5   : >> { %28484 = vmatprep.subr.mxu1 %v4200_v10  ;;  %28462 = vmatmul.mubr.f32.vlgmr.msra.gmra.mxu0 %v31333_v51  ;;  %v4698_v51 = vsub.f32 %v31391_v33, %v31405_v52  ;;  %v31429_v22 = vsub.f32 %v4576_v25, %v31409_v21  ;;  %v4648_v2 = vand.u32 4294901760, %v4647_v9 }
 0x1d6   : >> { %28477 = vmatmul.mubr.f32.vlgmr.msra.gmra.mxu1 %v31313_v19  ;;  %28470 = vmatpush3.msra.mxu0 %v31309_v60  ;;  %v31423_v60 = vand.u32 4294901760, %v34867_v41 }
 0x1d7   : >> { %28485 = vmatpush3.msra.mxu1 %v4200_v10  ;;  %28471 = vmatprep.mubr.f32.mxu0 %v31302_v18  ;;  %v27224_v18 = vld [vmem:[%s31168_s13 + $0x12] sm:$0xff]  ;;  %v4656_v53 = vand.u32 4294901760, %v31429_v22 }
 0x1d8   : >> { %28479 = vmatprep.subr.mxu0 %v31327_v17  ;;  %28486 = vmatprep.mubr.f32.mxu1 %v31350_v4  ;;  %v5072_v55 = vsel %vm1419_vm0, %v27224_v18, 0  ;;  %v31439_v14 = vsub.f32 %v34867_v41, %v31423_v60 }
 0x1d9   : >> { %28494 = vmatprep.subr.mxu1 %v31327_v17  ;;  %28472 = vmatmul.mubr.f32.vlgmr.msra.gmra.mxu0 %v31313_v19  ;;  %v4699_v19 = vand.u32 4294901760, %v4698_v51  ;;  %v31446_v23 = vand.u32 4294901760, %v5072_v55 }
 0x1da   : >> { %28487 = vmatmul.mubr.f32.vlgmr.msra.gmra.mxu1 %v31361_v61  ;;  %28480 = vmatpush3.msra.mxu0 %v31327_v17 }
 0x1db   : >> { %28495 = vmatpush3.msra.mxu1 %v31327_v17  ;;  %28481 = vmatprep.mubr.f32.mxu0 %v4149_v15  ;;  %v31462_v11 = vsub.f32 %v5072_v55, %v31446_v23 }
 0x1dc   : >> { %28489 = vmatprep.subr.mxu0 %v31343_v1  ;;  %28496 = vmatprep.mubr.f32.mxu1 %v4147_v0 }
 0x1dd   : >> { %28504 = vmatprep.subr.mxu1 %v31327_v17  ;;  %28482 = vmatmul.mubr.f32.vlgmr.msra.gmra.mxu0 %v4159_v58  ;;  %v5145_v16 = vand.u32 4294901760, %v31462_v11 }
 0x1de   : >> { %28497 = vmatmul.mubr.f32.vlgmr.msra.gmra.mxu1 %v4157_v20  ;;  %28490 = vmatpush3.msra.mxu0 %v31343_v1  ;;  %v4657_v1 = vsub.f32 %v31429_v22, %v4656_v53  ;;  %v27227_v20 = vld [vmem:[%s31168_s13 + $0x1b] sm:$0x3] }
 0x1df   : >> { %28505 = vmatpush3.msra.mxu1 %v31327_v17  ;;  %28491 = vmatprep.mubr.f32.mxu0 %v31366_v62  ;;  %v31453_v17 = vand.u32 4294901760, %v31439_v14  ;;  %v31457_v62 = vand.u32 4294901760, %v5075_v7  ;;  %v5146_v13 = vsub.f32 %v31462_v11, %v5145_v16  ;;  %v5574_v51 = vsel %vm1419_vm0, %v27227_v20, 0 }
 0x1e0   : >> { %28499 = vmatprep.subr.mxu0 %v31357_v24  ;;  %28506 = vmatprep.mubr.f32.mxu1 %v31350_v4  ;;  %v4658_v0 = vand.u32 4294901760, %v4657_v1 }
 0x1e1   : >> { %28514 = vmatprep.subr.mxu1 %v4699_v19  ;;  %28492 = vmatmul.mubr.f32.vlgmr.msra.gmra.mxu0 %v31381_v35  ;;  %v5197_v35 = vsub.f32 %v31439_v14, %v31453_v17  ;;  %v31477_v32 = vsub.f32 %v5075_v7, %v31457_v62  ;;  %v5147_v18 = vand.u32 4294901760, %v5146_v13 }
 0x1e2   : >> { %28507 = vmatmul.mubr.f32.vlgmr.msra.gmra.mxu1 %v31361_v61  ;;  %28500 = vmatpush3.msra.mxu0 %v31357_v24  ;;  %v31471_v24 = vand.u32 4294901760, %v34866_v42 }
 0x1e3   : >> { %28515 = vmatpush3.msra.mxu1 %v4699_v19  ;;  %28501 = vmatprep.mubr.f32.mxu0 %v31350_v4  ;;  %v27226_v4 = vld [vmem:[%s31168_s13 + $0x13] sm:$0xff]  ;;  %v5155_v25 = vand.u32 4294901760, %v31477_v32 }
 0x1e4   : >> { %28509 = vmatprep.subr.mxu0 %v31375_v54  ;;  %28516 = vmatprep.mubr.f32.mxu1 %v31398_v34  ;;  %v5571_v10 = vsel %vm1419_vm0, %v27226_v4, 0  ;;  %v31487_v36 = vsub.f32 %v34866_v42, %v31471_v24 }
 0x1e5   : >> { %28524 = vmatprep.subr.mxu1 %v31375_v54  ;;  %28502 = vmatmul.mubr.f32.vlgmr.msra.gmra.mxu0 %v31361_v61  ;;  %v5198_v61 = vand.u32 4294901760, %v5197_v35  ;;  %v31494_v15 = vand.u32 4294901760, %v5571_v10 }
 0x1e6   : >> { %28517 = vmatmul.mubr.f32.vlgmr.msra.gmra.mxu1 %v31409_v21  ;;  %28510 = vmatpush3.msra.mxu0 %v31375_v54 }
 0x1e7   : >> { %28525 = vmatpush3.msra.mxu1 %v31375_v54  ;;  %28511 = vmatprep.mubr.f32.mxu0 %v4648_v2  ;;  %v31510_v58 = vsub.f32 %v5571_v10, %v31494_v15 }
 0x1e8   : >> { %28519 = vmatprep.subr.mxu0 %v31391_v33  ;;  %28526 = vmatprep.mubr.f32.mxu1 %v4646_v59 }
 0x1e9   : >> { %28534 = vmatprep.subr.mxu1 %v31375_v54  ;;  %28512 = vmatmul.mubr.f32.vlgmr.msra.gmra.mxu0 %v4658_v0  ;;  %v5644_v3 = vand.u32 4294901760, %v31510_v58 }
 0x1ea   : >> { %28527 = vmatmul.mubr.f32.vlgmr.msra.gmra.mxu1 %v4656_v53  ;;  %28520 = vmatpush3.msra.mxu0 %v31391_v33  ;;  %v5156_v33 = vsub.f32 %v31477_v32, %v5155_v25  ;;  %v27229_v53 = vld [vmem:[%s31168_s13 + $0x1c] sm:$0x3] }
 0x1eb   : >> { %28535 = vmatpush3.msra.mxu1 %v31375_v54  ;;  %28521 = vmatprep.mubr.f32.mxu0 %v31414_v31  ;;  %v31501_v54 = vand.u32 4294901760, %v31487_v36  ;;  %v31505_v31 = vand.u32 4294901760, %v5574_v51  ;;  %v5645_v1 = vsub.f32 %v31510_v58, %v5644_v3  ;;  %v6073_v35 = vsel %vm1419_vm0, %v27229_v53, 0 }
 0x1ec   : >> { %28529 = vmatprep.subr.mxu0 %v31405_v52  ;;  %28536 = vmatprep.mubr.f32.mxu1 %v31398_v34  ;;  %v5157_v59 = vand.u32 4294901760, %v5156_v33 }
 0x1ed   : >> { %28544 = vmatprep.subr.mxu1 %v5198_v61  ;;  %28522 = vmatmul.mubr.f32.vlgmr.msra.gmra.mxu0 %v31429_v22  ;;  %v5696_v22 = vsub.f32 %v31487_v36, %v31501_v54  ;;  %v31525_v55 = vsub.f32 %v5574_v51, %v31505_v31  ;;  %v5646_v4 = vand.u32 4294901760, %v5645_v1 }
 0x1ee   : >> { %28537 = vmatmul.mubr.f32.vlgmr.msra.gmra.mxu1 %v31409_v21  ;;  %28530 = vmatpush3.msra.mxu0 %v31405_v52  ;;  %v31519_v52 = vand.u32 4294901760, %v34863_v45 }
 0x1ef   : >> { %28545 = vmatpush3.msra.mxu1 %v5198_v61  ;;  %28531 = vmatprep.mubr.f32.mxu0 %v31398_v34  ;;  %v27228_v34 = vld [vmem:[%s31168_s13 + $0x14] sm:$0xff]  ;;  %v5654_v7 = vand.u32 4294901760, %v31525_v55 }
 0x1f0   : >> { %28539 = vmatprep.subr.mxu0 %v31423_v60  ;;  %28546 = vmatprep.mubr.f32.mxu1 %v31446_v23  ;;  %v6070_v19 = vsel %vm1419_vm0, %v27228_v34, 0  ;;  %v31535_v9 = vsub.f32 %v34863_v45, %v31519_v52 }
 0x1f1   : >> { %28554 = vmatprep.subr.mxu1 %v31423_v60  ;;  %28532 = vmatmul.mubr.f32.vlgmr.msra.gmra.mxu0 %v31409_v21  ;;  %v5697_v21 = vand.u32 4294901760, %v5696_v22  ;;  %v31542_v2 = vand.u32 4294901760, %v6070_v19 }
 0x1f2   : >> { %28547 = vmatmul.mubr.f32.vlgmr.msra.gmra.mxu1 %v31457_v62  ;;  %28540 = vmatpush3.msra.mxu0 %v31423_v60 }
 0x1f3   : >> { %28555 = vmatpush3.msra.mxu1 %v31423_v60  ;;  %28541 = vmatprep.mubr.f32.mxu0 %v5147_v18  ;;  %v31558_v0 = vsub.f32 %v6070_v19, %v31542_v2 }
 0x1f4   : >> { %28549 = vmatprep.subr.mxu0 %v31439_v14  ;;  %28556 = vmatprep.mubr.f32.mxu1 %v5145_v16 }
 0x1f5   : >> { %28564 = vmatprep.subr.mxu1 %v31423_v60  ;;  %28542 = vmatmul.mubr.f32.vlgmr.msra.gmra.mxu0 %v5157_v59  ;;  %v6143_v20 = vand.u32 4294901760, %v31558_v0 }
 0x1f6   : >> { %28557 = vmatmul.mubr.f32.vlgmr.msra.gmra.mxu1 %v5155_v25  ;;  %28550 = vmatpush3.msra.mxu0 %v31439_v14  ;;  %v5655_v14 = vsub.f32 %v31525_v55, %v5654_v7  ;;  %v27232_v25 = vld [vmem:[%s31168_s13 + $0x28] sm:$0x3] }
 0x1f7   : >> { %28565 = vmatpush3.msra.mxu1 %v31423_v60  ;;  %28551 = vmatprep.mubr.f32.mxu0 %v31462_v11  ;;  %v31549_v60 = vand.u32 4294901760, %v31535_v9  ;;  %v31553_v11 = vand.u32 4294901760, %v6073_v35  ;;  %v6144_v33 = vsub.f32 %v31558_v0, %v6143_v20  ;;  %v6575_v22 = vsel %vm1419_vm0, %v27232_v25, 0 }
 0x1f8   : >> { %28559 = vmatprep.subr.mxu0 %v31453_v17  ;;  %28566 = vmatprep.mubr.f32.mxu1 %v31446_v23  ;;  %v5656_v16 = vand.u32 4294901760, %v5655_v14 }
 0x1f9   : >> { %28574 = vmatprep.subr.mxu1 %v5697_v21  ;;  %28552 = vmatmul.mubr.f32.vlgmr.msra.gmra.mxu0 %v31477_v32  ;;  %v6195_v32 = vsub.f32 %v31535_v9, %v31549_v60  ;;  %v31573_v10 = vsub.f32 %v6073_v35, %v31553_v11  ;;  %v6145_v34 = vand.u32 4294901760, %v6144_v33 }
 0x1fa   : >> { %28567 = vmatmul.mubr.f32.vlgmr.msra.gmra.mxu1 %v31457_v62  ;;  %28560 = vmatpush3.msra.mxu0 %v31453_v17  ;;  %v31567_v17 = vand.u32 4294901760, %v34862_v46 }
 0x1fb   : >> { %28575 = vmatpush3.msra.mxu1 %v5697_v21  ;;  %28561 = vmatprep.mubr.f32.mxu0 %v31446_v23  ;;  %v27231_v23 = vld [vmem:[%s31168_s13 + $0x20] sm:$0xff]  ;;  %v6153_v51 = vand.u32 4294901760, %v31573_v10 }
 0x1fc   : >> { %28569 = vmatprep.subr.mxu0 %v31471_v24  ;;  %28576 = vmatprep.mubr.f32.mxu1 %v31494_v15  ;;  %v6572_v61 = vsel %vm1419_vm0, %v27231_v23, 0  ;;  %v31583_v13 = vsub.f32 %v34862_v46, %v31567_v17 }
 0x1fd   : >> { %28584 = vmatprep.subr.mxu1 %v31471_v24  ;;  %28562 = vmatmul.mubr.f32.vlgmr.msra.gmra.mxu0 %v31457_v62  ;;  %v6196_v62 = vand.u32 4294901760, %v6195_v32  ;;  %v31590_v18 = vand.u32 4294901760, %v6572_v61 }
 0x1fe   : >> { %28577 = vmatmul.mubr.f32.vlgmr.msra.gmra.mxu1 %v31505_v31  ;;  %28570 = vmatpush3.msra.mxu0 %v31471_v24 }
 0x1ff   : >> { %28585 = vmatpush3.msra.mxu1 %v31471_v24  ;;  %28571 = vmatprep.mubr.f32.mxu0 %v5646_v4  ;;  %v31606_v59 = vsub.f32 %v6572_v61, %v31590_v18 }
 0x200   : >> { %28579 = vmatprep.subr.mxu0 %v31487_v36  ;;  %28586 = vmatprep.mubr.f32.mxu1 %v5644_v3 }
 0x201   : >> { %28594 = vmatprep.subr.mxu1 %v31471_v24  ;;  %28572 = vmatmul.mubr.f32.vlgmr.msra.gmra.mxu0 %v5656_v16  ;;  %v6645_v53 = vand.u32 4294901760, %v31606_v59 }
 0x202   : >> { %28587 = vmatmul.mubr.f32.vlgmr.msra.gmra.mxu1 %v5654_v7  ;;  %28580 = vmatpush3.msra.mxu0 %v31487_v36  ;;  %v6154_v36 = vsub.f32 %v31573_v10, %v6153_v51  ;;  %v27234_v7 = vld [vmem:[%s31168_s13 + $0x29] sm:$0x3] }
 0x203   : >> { %28595 = vmatpush3.msra.mxu1 %v31471_v24  ;;  %28581 = vmatprep.mubr.f32.mxu0 %v31510_v58  ;;  %v31597_v24 = vand.u32 4294901760, %v31583_v13  ;;  %v31601_v58 = vand.u32 4294901760, %v6575_v22  ;;  %v6646_v14 = vsub.f32 %v31606_v59, %v6645_v53  ;;  %v7074_v32 = vsel %vm1419_vm0, %v27234_v7, 0 }
 0x204   : >> { %28589 = vmatprep.subr.mxu0 %v31501_v54  ;;  %28596 = vmatprep.mubr.f32.mxu1 %v31494_v15  ;;  %v6155_v3 = vand.u32 4294901760, %v6154_v36 }
 0x205   : >> { %28604 = vmatprep.subr.mxu1 %v6196_v62  ;;  %28582 = vmatmul.mubr.f32.vlgmr.msra.gmra.mxu0 %v31525_v55  ;;  %v6697_v55 = vsub.f32 %v31583_v13, %v31597_v24  ;;  %v31621_v19 = vsub.f32 %v6575_v22, %v31601_v58  ;;  %v6647_v23 = vand.u32 4294901760, %v6646_v14 }
 0x206   : >> { %28597 = vmatmul.mubr.f32.vlgmr.msra.gmra.mxu1 %v31505_v31  ;;  %28590 = vmatpush3.msra.mxu0 %v31501_v54  ;;  %v31615_v54 = vand.u32 4294901760, %v34855_v63 }
 0x207   : >> { %28605 = vmatpush3.msra.mxu1 %v6196_v62  ;;  %28591 = vmatprep.mubr.f32.mxu0 %v31494_v15  ;;  %v27233_v15 = vld [vmem:[%s31168_s13 + $0x21] sm:$0xff]  ;;  %v6655_v35 = vand.u32 4294901760, %v31621_v19 }
 0x208   : >> { %28599 = vmatprep.subr.mxu0 %v31519_v52  ;;  %28606 = vmatprep.mubr.f32.mxu1 %v31542_v2  ;;  %v7071_v21 = vsel %vm1419_vm0, %v27233_v15, 0  ;;  %v31631_v1 = vsub.f32 %v34855_v63, %v31615_v54 }
 0x209   : >> { %28614 = vmatprep.subr.mxu1 %v31519_v52  ;;  %28592 = vmatmul.mubr.f32.vlgmr.msra.gmra.mxu0 %v31505_v31  ;;  %v6698_v31 = vand.u32 4294901760, %v6697_v55  ;;  %v31638_v4 = vand.u32 4294901760, %v7071_v21 }
 0x20a   : >> { %28607 = vmatmul.mubr.f32.vlgmr.msra.gmra.mxu1 %v31553_v11  ;;  %28600 = vmatpush3.msra.mxu0 %v31519_v52 }
 0x20b   : >> { %28615 = vmatpush3.msra.mxu1 %v31519_v52  ;;  %28601 = vmatprep.mubr.f32.mxu0 %v6145_v34  ;;  %v31654_v16 = vsub.f32 %v7071_v21, %v31638_v4 }
 0x20c   : >> { %28609 = vmatprep.subr.mxu0 %v31535_v9  ;;  %28616 = vmatprep.mubr.f32.mxu1 %v6143_v20 }
 0x20d   : >> { %28624 = vmatprep.subr.mxu1 %v31519_v52  ;;  %28602 = vmatmul.mubr.f32.vlgmr.msra.gmra.mxu0 %v6155_v3  ;;  %v7144_v25 = vand.u32 4294901760, %v31654_v16 }
 0x20e   : >> { %28617 = vmatmul.mubr.f32.vlgmr.msra.gmra.mxu1 %v6153_v51  ;;  %28610 = vmatpush3.msra.mxu0 %v31535_v9  ;;  %v6656_v9 = vsub.f32 %v31621_v19, %v6655_v35  ;;  %v27236_v51 = vld [vmem:[%s31168_s13 + $0x2a] sm:$0x3] }
 0x20f   : >> { %28625 = vmatpush3.msra.mxu1 %v31519_v52  ;;  %28611 = vmatprep.mubr.f32.mxu0 %v31558_v0  ;;  %v31645_v52 = vand.u32 4294901760, %v31631_v1  ;;  %v31649_v0 = vand.u32 4294901760, %v7074_v32  ;;  %v7145_v36 = vsub.f32 %v31654_v16, %v7144_v25  ;;  %v7573_v55 = vsel %vm1419_vm0, %v27236_v51, 0 }
 0x210   : >> { %28619 = vmatprep.subr.mxu0 %v31549_v60  ;;  %28626 = vmatprep.mubr.f32.mxu1 %v31542_v2  ;;  %v6657_v20 = vand.u32 4294901760, %v6656_v9 }
 0x211   : >> { %28634 = vmatprep.subr.mxu1 %v6698_v31  ;;  %28612 = vmatmul.mubr.f32.vlgmr.msra.gmra.mxu0 %v31573_v10  ;;  %v7196_v10 = vsub.f32 %v31631_v1, %v31645_v52  ;;  %v31669_v61 = vsub.f32 %v7074_v32, %v31649_v0  ;;  %v7146_v15 = vand.u32 4294901760, %v7145_v36 }
 0x212   : >> { %28627 = vmatmul.mubr.f32.vlgmr.msra.gmra.mxu1 %v31553_v11  ;;  %28620 = vmatpush3.msra.mxu0 %v31549_v60  ;;  %v31663_v60 = vand.u32 4294901760, %v34876_v26 }
 0x213   : >> { %28635 = vmatpush3.msra.mxu1 %v6698_v31  ;;  %28621 = vmatprep.mubr.f32.mxu0 %v31542_v2  ;;  %v27235_v2 = vld [vmem:[%s31168_s13 + $0x22] sm:$0xff]  ;;  %v7154_v22 = vand.u32 4294901760, %v31669_v61 }
 0x214   : >> { %28629 = vmatprep.subr.mxu0 %v31567_v17  ;;  %28636 = vmatprep.mubr.f32.mxu1 %v31590_v18  ;;  %v7570_v62 = vsel %vm1419_vm0, %v27235_v2, 0  ;;  %v31679_v33 = vsub.f32 %v34876_v26, %v31663_v60 }
 0x215   : >> { %28644 = vmatprep.subr.mxu1 %v31567_v17  ;;  %28622 = vmatmul.mubr.f32.vlgmr.msra.gmra.mxu0 %v31553_v11  ;;  %v7197_v11 = vand.u32 4294901760, %v7196_v10  ;;  %v31686_v34 = vand.u32 4294901760, %v7570_v62 }
 0x216   : >> { %28637 = vmatmul.mubr.f32.vlgmr.msra.gmra.mxu1 %v31601_v58  ;;  %28630 = vmatpush3.msra.mxu0 %v31567_v17 }
 0x217   : >> { %28645 = vmatpush3.msra.mxu1 %v31567_v17  ;;  %28631 = vmatprep.mubr.f32.mxu0 %v6647_v23  ;;  %v31702_v3 = vsub.f32 %v7570_v62, %v31686_v34 }
 0x218   : >> { %28639 = vmatprep.subr.mxu0 %v31583_v13  ;;  %28646 = vmatprep.mubr.f32.mxu1 %v6645_v53 }
 0x219   : >> { %28654 = vmatprep.subr.mxu1 %v31567_v17  ;;  %28632 = vmatmul.mubr.f32.vlgmr.msra.gmra.mxu0 %v6657_v20  ;;  %v7643_v7 = vand.u32 4294901760, %v31702_v3 }
 0x21a   : >> { %28647 = vmatmul.mubr.f32.vlgmr.msra.gmra.mxu1 %v6655_v35  ;;  %28640 = vmatpush3.msra.mxu0 %v31583_v13  ;;  %v7155_v13 = vsub.f32 %v31669_v61, %v7154_v22  ;;  %v27238_v35 = vld [vmem:[%s31168_s13 + $0x2b] sm:$0x3] }
 0x21b   : >> { %28655 = vmatpush3.msra.mxu1 %v31567_v17  ;;  %28641 = vmatprep.mubr.f32.mxu0 %v31606_v59  ;;  %v31693_v17 = vand.u32 4294901760, %v31679_v33  ;;  %v31697_v59 = vand.u32 4294901760, %v7573_v55  ;;  %v7644_v9 = vsub.f32 %v31702_v3, %v7643_v7  ;;  %v8072_v10 = vsel %vm1419_vm0, %v27238_v35, 0 }
 0x21c   : >> { %28649 = vmatprep.subr.mxu0 %v31597_v24  ;;  %28656 = vmatprep.mubr.f32.mxu1 %v31590_v18  ;;  %v7156_v53 = vand.u32 4294901760, %v7155_v13 }
 0x21d   : >> { %28664 = vmatprep.subr.mxu1 %v7197_v11  ;;  %28642 = vmatmul.mubr.f32.vlgmr.msra.gmra.mxu0 %v31621_v19  ;;  %v7695_v19 = vsub.f32 %v31679_v33, %v31693_v17  ;;  %v31717_v21 = vsub.f32 %v7573_v55, %v31697_v59  ;;  %v7645_v2 = vand.u32 4294901760, %v7644_v9 }
 0x21e   : >> { %28657 = vmatmul.mubr.f32.vlgmr.msra.gmra.mxu1 %v31601_v58  ;;  %28650 = vmatpush3.msra.mxu0 %v31597_v24  ;;  %v31711_v24 = vand.u32 4294901760, %v34865_v43 }
 0x21f   : >> { %28665 = vmatpush3.msra.mxu1 %v7197_v11  ;;  %28651 = vmatprep.mubr.f32.mxu0 %v31590_v18  ;;  %v27237_v18 = vld [vmem:[%s31168_s13 + $0x23] sm:$0xff]  ;;  %v7653_v32 = vand.u32 4294901760, %v31717_v21 }
 0x220   : >> { %28659 = vmatprep.subr.mxu0 %v31615_v54  ;;  %28666 = vmatprep.mubr.f32.mxu1 %v31638_v4  ;;  %v8069_v31 = vsel %vm1419_vm0, %v27237_v18, 0  ;;  %v31727_v14 = vsub.f32 %v34865_v43, %v31711_v24 }
 0x221   : >> { %28674 = vmatprep.subr.mxu1 %v31615_v54  ;;  %28652 = vmatmul.mubr.f32.vlgmr.msra.gmra.mxu0 %v31601_v58  ;;  %v7696_v58 = vand.u32 4294901760, %v7695_v19  ;;  %v31734_v23 = vand.u32 4294901760, %v8069_v31 }
 0x222   : >> { %28667 = vmatmul.mubr.f32.vlgmr.msra.gmra.mxu1 %v31649_v0  ;;  %28660 = vmatpush3.msra.mxu0 %v31615_v54 }
 0x223   : >> { %28675 = vmatpush3.msra.mxu1 %v31615_v54  ;;  %28661 = vmatprep.mubr.f32.mxu0 %v7146_v15  ;;  %v31750_v20 = vsub.f32 %v8069_v31, %v31734_v23 }
 0x224   : >> { %28669 = vmatprep.subr.mxu0 %v31631_v1  ;;  %28676 = vmatprep.mubr.f32.mxu1 %v7144_v25 }
 0x225   : >> { %28684 = vmatprep.subr.mxu1 %v31615_v54  ;;  %28662 = vmatmul.mubr.f32.vlgmr.msra.gmra.mxu0 %v7156_v53  ;;  %v8142_v51 = vand.u32 4294901760, %v31750_v20 }
 0x226   : >> { %28677 = vmatmul.mubr.f32.vlgmr.msra.gmra.mxu1 %v7154_v22  ;;  %28670 = vmatpush3.msra.mxu0 %v31631_v1  ;;  %v7654_v1 = vsub.f32 %v31717_v21, %v7653_v32  ;;  %v27240_v22 = vld [vmem:[%s31168_s13 + $0x2c] sm:$0x3] }
 0x227   : >> { %28685 = vmatpush3.msra.mxu1 %v31615_v54  ;;  %28671 = vmatprep.mubr.f32.mxu0 %v31654_v16  ;;  %v31741_v54 = vand.u32 4294901760, %v31727_v14  ;;  %v31745_v16 = vand.u32 4294901760, %v8072_v10  ;;  %v8143_v13 = vsub.f32 %v31750_v20, %v8142_v51  ;;  %v8571_v19 = vsel %vm1419_vm0, %v27240_v22, 0 }
 0x228   : >> { %28679 = vmatprep.subr.mxu0 %v31645_v52  ;;  %28686 = vmatprep.mubr.f32.mxu1 %v31638_v4  ;;  %v7655_v25 = vand.u32 4294901760, %v7654_v1 }
 0x229   : >> { %28694 = vmatprep.subr.mxu1 %v7696_v58  ;;  %28672 = vmatmul.mubr.f32.vlgmr.msra.gmra.mxu0 %v31669_v61  ;;  %v8194_v61 = vsub.f32 %v31727_v14, %v31741_v54  ;;  %v31765_v62 = vsub.f32 %v8072_v10, %v31745_v16  ;;  %v8144_v18 = vand.u32 4294901760, %v8143_v13 }
 0x22a   : >> { %28687 = vmatmul.mubr.f32.vlgmr.msra.gmra.mxu1 %v31649_v0  ;;  %28680 = vmatpush3.msra.mxu0 %v31645_v52  ;;  %v31759_v52 = vand.u32 4294901760, %v34864_v44 }
 0x22b   : >> { %28695 = vmatpush3.msra.mxu1 %v7696_v58  ;;  %28681 = vmatprep.mubr.f32.mxu0 %v31638_v4  ;;  %v27239_v4 = vld [vmem:[%s31168_s13 + $0x24] sm:$0xff]  ;;  %v8152_v55 = vand.u32 4294901760, %v31765_v62 }
 0x22c   : >> { %28689 = vmatprep.subr.mxu0 %v31663_v60  ;;  %28696 = vmatprep.mubr.f32.mxu1 %v31686_v34  ;;  %v8568_v11 = vsel %vm1419_vm0, %v27239_v4, 0  ;;  %v31775_v36 = vsub.f32 %v34864_v44, %v31759_v52 }
 0x22d   : >> { %28704 = vmatprep.subr.mxu1 %v31663_v60  ;;  %28682 = vmatmul.mubr.f32.vlgmr.msra.gmra.mxu0 %v31649_v0  ;;  %v8195_v0 = vand.u32 4294901760, %v8194_v61  ;;  %v31782_v15 = vand.u32 4294901760, %v8568_v11 }
 0x22e   : >> { %28697 = vmatmul.mubr.f32.vlgmr.msra.gmra.mxu1 %v31697_v59  ;;  %28690 = vmatpush3.msra.mxu0 %v31663_v60 }
 0x22f   : >> { %28705 = vmatpush3.msra.mxu1 %v31663_v60  ;;  %28691 = vmatprep.mubr.f32.mxu0 %v7645_v2  ;;  %v31798_v53 = vsub.f32 %v8568_v11, %v31782_v15 }
 0x230   : >> { %28699 = vmatprep.subr.mxu0 %v31679_v33  ;;  %28706 = vmatprep.mubr.f32.mxu1 %v7643_v7 }
 0x231   : >> { %28714 = vmatprep.subr.mxu1 %v31663_v60  ;;  %28692 = vmatmul.mubr.f32.vlgmr.msra.gmra.mxu0 %v7655_v25  ;;  %v8641_v35 = vand.u32 4294901760, %v31798_v53 }
 0x232   : >> { %28707 = vmatmul.mubr.f32.vlgmr.msra.gmra.mxu1 %v7653_v32  ;;  %28700 = vmatpush3.msra.mxu0 %v31679_v33  ;;  %v8153_v33 = vsub.f32 %v31765_v62, %v8152_v55  ;;  %v27243_v32 = vld [vmem:[%s31168_s13 + $0x38] sm:$0x3] }
 0x233   : >> { %28715 = vmatpush3.msra.mxu1 %v31663_v60  ;;  %28701 = vmatprep.mubr.f32.mxu0 %v31702_v3  ;;  %v31789_v60 = vand.u32 4294901760, %v31775_v36  ;;  %v31793_v3 = vand.u32 4294901760, %v8571_v19  ;;  %v8642_v1 = vsub.f32 %v31798_v53, %v8641_v35  ;;  %v9073_v61 = vsel %vm1419_vm0, %v27243_v32, 0 }
 0x234   : >> { %28709 = vmatprep.subr.mxu0 %v31693_v17  ;;  %28716 = vmatprep.mubr.f32.mxu1 %v31686_v34  ;;  %v8154_v7 = vand.u32 4294901760, %v8153_v33 }
 0x235   : >> { %28724 = vmatprep.subr.mxu1 %v8195_v0  ;;  %28702 = vmatmul.mubr.f32.vlgmr.msra.gmra.mxu0 %v31717_v21  ;;  %v8693_v21 = vsub.f32 %v31775_v36, %v31789_v60  ;;  %v31813_v31 = vsub.f32 %v8571_v19, %v31793_v3  ;;  %v8643_v4 = vand.u32 4294901760, %v8642_v1 }
 0x236   : >> { %28717 = vmatmul.mubr.f32.vlgmr.msra.gmra.mxu1 %v31697_v59  ;;  %28710 = vmatpush3.msra.mxu0 %v31693_v17  ;;  %v31807_v17 = vand.u32 4294901760, %v34873_v29 }
 0x237   : >> { %28725 = vmatpush3.msra.mxu1 %v8195_v0  ;;  %28711 = vmatprep.mubr.f32.mxu0 %v31686_v34  ;;  %v27242_v34 = vld [vmem:[%s31168_s13 + $0x30] sm:$0xff]  ;;  %v8651_v10 = vand.u32 4294901760, %v31813_v31 }
 0x238   : >> { %28719 = vmatprep.subr.mxu0 %v31711_v24  ;;  %28726 = vmatprep.mubr.f32.mxu1 %v31734_v23  ;;  %v9070_v58 = vsel %vm1419_vm0, %v27242_v34, 0  ;;  %v31823_v9 = vsub.f32 %v34873_v29, %v31807_v17 }
 0x239   : >> { %28734 = vmatprep.subr.mxu1 %v31711_v24  ;;  %28712 = vmatmul.mubr.f32.vlgmr.msra.gmra.mxu0 %v31697_v59  ;;  %v8694_v59 = vand.u32 4294901760, %v8693_v21  ;;  %v31830_v2 = vand.u32 4294901760, %v9070_v58 }
 0x23a   : >> { %28727 = vmatmul.mubr.f32.vlgmr.msra.gmra.mxu1 %v31745_v16  ;;  %28720 = vmatpush3.msra.mxu0 %v31711_v24 }
 0x23b   : >> { %28735 = vmatpush3.msra.mxu1 %v31711_v24  ;;  %28721 = vmatprep.mubr.f32.mxu0 %v8144_v18  ;;  %v31846_v25 = vsub.f32 %v9070_v58, %v31830_v2 }
 0x23c   : >> { %28729 = vmatprep.subr.mxu0 %v31727_v14  ;;  %28736 = vmatprep.mubr.f32.mxu1 %v8142_v51 }
 0x23d   : >> { %28744 = vmatprep.subr.mxu1 %v31711_v24  ;;  %28722 = vmatmul.mubr.f32.vlgmr.msra.gmra.mxu0 %v8154_v7  ;;  %v9143_v22 = vand.u32 4294901760, %v31846_v25 }
 0x23e   : >> { %28737 = vmatmul.mubr.f32.vlgmr.msra.gmra.mxu1 %v8152_v55  ;;  %28730 = vmatpush3.msra.mxu0 %v31727_v14  ;;  %v8652_v14 = vsub.f32 %v31813_v31, %v8651_v10  ;;  %v27245_v55 = vld [vmem:[%s31168_s13 + $0x39] sm:$0x3] }
 0x23f   : >> { %28745 = vmatpush3.msra.mxu1 %v31711_v24  ;;  %28731 = vmatprep.mubr.f32.mxu0 %v31750_v20  ;;  %v31837_v24 = vand.u32 4294901760, %v31823_v9  ;;  %v31841_v20 = vand.u32 4294901760, %v9073_v61  ;;  %v9144_v33 = vsub.f32 %v31846_v25, %v9143_v22  ;;  %v9572_v21 = vsel %vm1419_vm0, %v27245_v55, 0 }
 0x240   : >> { %28739 = vmatprep.subr.mxu0 %v31741_v54  ;;  %28746 = vmatprep.mubr.f32.mxu1 %v31734_v23  ;;  %v8653_v51 = vand.u32 4294901760, %v8652_v14 }
 0x241   : >> { %28754 = vmatprep.subr.mxu1 %v8694_v59  ;;  %28732 = vmatmul.mubr.f32.vlgmr.msra.gmra.mxu0 %v31765_v62  ;;  %v9195_v62 = vsub.f32 %v31823_v9, %v31837_v24  ;;  %v31861_v11 = vsub.f32 %v9073_v61, %v31841_v20  ;;  %v9145_v34 = vand.u32 4294901760, %v9144_v33 }
 0x242   : >> { %28747 = vmatmul.mubr.f32.vlgmr.msra.gmra.mxu1 %v31745_v16  ;;  %28740 = vmatpush3.msra.mxu0 %v31741_v54  ;;  %v31855_v54 = vand.u32 4294901760, %v34872_v30 }
 0x243   : >> { %28755 = vmatpush3.msra.mxu1 %v8694_v59  ;;  %28741 = vmatprep.mubr.f32.mxu0 %v31734_v23  ;;  %v27244_v23 = vld [vmem:[%s31168_s13 + $0x31] sm:$0xff]  ;;  %v9153_v19 = vand.u32 4294901760, %v31861_v11 }
 0x244   : >> { %28749 = vmatprep.subr.mxu0 %v31759_v52  ;;  %28756 = vmatprep.mubr.f32.mxu1 %v31782_v15  ;;  %v9569_v0 = vsel %vm1419_vm0, %v27244_v23, 0  ;;  %v31871_v13 = vsub.f32 %v34872_v30, %v31855_v54 }
 0x245   : >> { %28764 = vmatprep.subr.mxu1 %v31759_v52  ;;  %28742 = vmatmul.mubr.f32.vlgmr.msra.gmra.mxu0 %v31745_v16  ;;  %v9196_v16 = vand.u32 4294901760, %v9195_v62  ;;  %v31878_v18 = vand.u32 4294901760, %v9569_v0 }
 0x246   : >> { %28757 = vmatmul.mubr.f32.vlgmr.msra.gmra.mxu1 %v31793_v3  ;;  %28750 = vmatpush3.msra.mxu0 %v31759_v52 }
 0x247   : >> { %28765 = vmatpush3.msra.mxu1 %v31759_v52  ;;  %28751 = vmatprep.mubr.f32.mxu0 %v8643_v4  ;;  %v31894_v7 = vsub.f32 %v9569_v0, %v31878_v18 }
 0x248   : >> { %28759 = vmatprep.subr.mxu0 %v31775_v36  ;;  %28766 = vmatprep.mubr.f32.mxu1 %v8641_v35 }
 0x249   : >> { %28774 = vmatprep.subr.mxu1 %v31759_v52  ;;  %28752 = vmatmul.mubr.f32.vlgmr.msra.gmra.mxu0 %v8653_v51  ;;  %v9642_v32 = vand.u32 4294901760, %v31894_v7 }
 0x24a   : >> { %28767 = vmatmul.mubr.f32.vlgmr.msra.gmra.mxu1 %v8651_v10  ;;  %28760 = vmatpush3.msra.mxu0 %v31775_v36  ;;  %v9154_v36 = vsub.f32 %v31861_v11, %v9153_v19  ;;  %v27247_v10 = vld [vmem:[%s31168_s13 + $0x3a] sm:$0x3] }
 0x24b   : >> { %28775 = vmatpush3.msra.mxu1 %v31759_v52  ;;  %28761 = vmatprep.mubr.f32.mxu0 %v31798_v53  ;;  %v31885_v52 = vand.u32 4294901760, %v31871_v13  ;;  %v31889_v53 = vand.u32 4294901760, %v9572_v21  ;;  %v9643_v14 = vsub.f32 %v31894_v7, %v9642_v32  ;;  %v10071_v62 = vsel %vm1419_vm0, %v27247_v10, 0 }
 0x24c   : >> { %28769 = vmatprep.subr.mxu0 %v31789_v60  ;;  %28776 = vmatprep.mubr.f32.mxu1 %v31782_v15  ;;  %v9155_v35 = vand.u32 4294901760, %v9154_v36 }
 0x24d   : >> { %28784 = vmatprep.subr.mxu1 %v9196_v16  ;;  %28762 = vmatmul.mubr.f32.vlgmr.msra.gmra.mxu0 %v31813_v31  ;;  %v9694_v31 = vsub.f32 %v31871_v13, %v31885_v52  ;;  %v31909_v58 = vsub.f32 %v9572_v21, %v31889_v53  ;;  %v9644_v23 = vand.u32 4294901760, %v9643_v14  ;;  %v27249_v21 = vld [vmem:[%s31168_s13 + $0x3b] sm:$0x3] }
 0x24e   : >> { %28777 = vmatmul.mubr.f32.vlgmr.msra.gmra.mxu1 %v31793_v3  ;;  %28770 = vmatpush3.msra.mxu0 %v31789_v60  ;;  %v31903_v60 = vand.u32 4294901760, %v34859_v49 }
 0x24f   : >> { %28785 = vmatpush3.msra.mxu1 %v9196_v16  ;;  %28771 = vmatprep.mubr.f32.mxu0 %v31782_v15  ;;  %v27246_v15 = vld [vmem:[%s31168_s13 + $0x32] sm:$0xff]  ;;  %v9652_v61 = vand.u32 4294901760, %v31909_v58 }
 0x250   : >> { %28779 = vmatprep.subr.mxu0 %v31807_v17  ;;  %28786 = vmatprep.mubr.f32.mxu1 %v31830_v2  ;;  %v10068_v59 = vsel %vm1419_vm0, %v27246_v15, 0  ;;  %v31919_v1 = vsub.f32 %v34859_v49, %v31903_v60 }
 0x251   : >> { %28794 = vmatprep.subr.mxu1 %v31807_v17  ;;  %28772 = vmatmul.mubr.f32.vlgmr.msra.gmra.mxu0 %v31793_v3  ;;  %v9695_v3 = vand.u32 4294901760, %v9694_v31  ;;  %v31926_v4 = vand.u32 4294901760, %v10068_v59 }
 0x252   : >> { %28787 = vmatmul.mubr.f32.vlgmr.msra.gmra.mxu1 %v31841_v20  ;;  %28780 = vmatpush3.msra.mxu0 %v31807_v17 }
 0x253   : >> { %28795 = vmatpush3.msra.mxu1 %v31807_v17  ;;  %28781 = vmatprep.mubr.f32.mxu0 %v9145_v34  ;;  %v31942_v51 = vsub.f32 %v10068_v59, %v31926_v4 }
 0x254   : >> { %28789 = vmatprep.subr.mxu0 %v31823_v9  ;;  %28796 = vmatprep.mubr.f32.mxu1 %v9143_v22  ;;  %v27248_v22 = vld [vmem:[%s31168_s13 + $0x33] sm:$0xff] }
 0x255   : >> { %28804 = vmatprep.subr.mxu1 %v31807_v17  ;;  %28782 = vmatmul.mubr.f32.vlgmr.msra.gmra.mxu0 %v9155_v35  ;;  %v10567_v33 = vsel %vm1419_vm0, %v27248_v22, 0 }
 0x256   : >> { %28797 = vmatmul.mubr.f32.vlgmr.msra.gmra.mxu1 %v9153_v19  ;;  %28790 = vmatpush3.msra.mxu0 %v31823_v9  ;;  %v9653_v9 = vsub.f32 %v31909_v58, %v9652_v61  ;;  %v10141_v19 = vand.u32 4294901760, %v31942_v51  ;;  %v31971_v35 = vand.u32 4294901760, %v10567_v33 }
 0x257   : >> { %28805 = vmatpush3.msra.mxu1 %v31807_v17  ;;  %28791 = vmatprep.mubr.f32.mxu0 %v31846_v25  ;;  %v31933_v17 = vand.u32 4294901760, %v31919_v1  ;;  %v31937_v25 = vand.u32 4294901760, %v10071_v62 }
 0x258   : >> { %28799 = vmatprep.subr.mxu0 %v31837_v24  ;;  %28806 = vmatprep.mubr.f32.mxu1 %v31830_v2  ;;  %v10142_v10 = vsub.f32 %v31942_v51, %v10141_v19 }
 0x259   : >> { %28814 = vmatprep.subr.mxu1 %v9695_v3  ;;  %28792 = vmatmul.mubr.f32.vlgmr.msra.gmra.mxu0 %v31861_v11  ;;  %v9654_v11 = vand.u32 4294901760, %v9653_v9  ;;  %v31957_v55 = vsub.f32 %v10071_v62, %v31937_v25  ;;  %v31988_v9 = vsub.f32 %v10567_v33, %v31971_v35 }
 0x25a   : >> { %28807 = vmatmul.mubr.f32.vlgmr.msra.gmra.mxu1 %v31841_v20  ;;  %28800 = vmatpush3.msra.mxu0 %v31837_v24  ;;  %v10193_v24 = vsub.f32 %v31919_v1, %v31933_v17 }
 0x25b   : >> { %28815 = vmatpush3.msra.mxu1 %v9695_v3  ;;  %28801 = vmatprep.mubr.f32.mxu0 %v31830_v2  ;;  %v31952_v2 = vand.u32 4294901760, %v34858_v50  ;;  %v10151_v15 = vand.u32 4294901760, %v31957_v55  ;;  %v10570_v3 = vsel %vm1419_vm0, %v27249_v21, 0 }
 0x25c   : >> { %28809 = vmatprep.subr.mxu0 %v31855_v54  ;;  %28816 = vmatprep.mubr.f32.mxu1 %v31878_v18 }
 0x25d   : >> { %28824 = vmatprep.subr.mxu1 %v31855_v54  ;;  %28802 = vmatmul.mubr.f32.vlgmr.msra.gmra.mxu0 %v31841_v20  ;;  %v10194_v20 = vand.u32 4294901760, %v10193_v24  ;;  %v31967_v34 = vsub.f32 %v34858_v50, %v31952_v2  ;;  %v10152_v62 = vsub.f32 %v31957_v55, %v10151_v15  ;;  %v10143_v24 = vand.u32 4294901760, %v10142_v10 }
 0x25e   : >> { %v28338_v0 = vpop.f32.mrf.mxu1  ;;  %28817 = vmatmul.mubr.f32.vlgmr.msra.gmra.mxu1 %v31889_v53  ;;  %28810 = vmatpush3.msra.mxu0 %v31855_v54 }
 0x25f   : >> { %28825 = vmatpush3.msra.mxu1 %v31855_v54  ;;  %28811 = vmatprep.mubr.f32.mxu0 %v9644_v23  ;;  %v31990_v23 = vand.u32 4294901760, %v10570_v3 }
 0x260   : >> { %v1745_v16 = vpop.f32.mrf.mxu1  ;;  %28819 = vmatprep.subr.mxu0 %v31871_v13  ;;  %28826 = vmatprep.mubr.f32.mxu1 %v9642_v32 }
 0x261   : >> { %28834 = vmatprep.subr.mxu1 %v31855_v54  ;;  %v28333_v31 = vpop.f32.mrf.mxu0  ;;  %28812 = vmatmul.mubr.f32.vlgmr.msra.gmra.mxu0 %v9654_v11 }
 0x262   : >> { %v28348_v36 = vpop.f32.mrf.mxu1  ;;  %28827 = vmatmul.mubr.f32.vlgmr.msra.gmra.mxu1 %v9652_v61  ;;  %v1752_v59 = vadd.f32 %v28338_v0, %v28333_v31  ;;  %28820 = vmatpush3.msra.mxu0 %v31871_v13  ;;  %v31983_v13 = vand.u32 4294901760, %v31967_v34  ;;  %v10153_v31 = vand.u32 4294901760, %v10152_v62  ;;  %v27251_v62 = vld [vmem:[%s31168_s13 + $0x3c] sm:$0x3] }
 0x263   : >> { %28835 = vmatpush3.msra.mxu1 %v31855_v54  ;;  %28821 = vmatprep.mubr.f32.mxu0 %v31894_v7  ;;  %v1659_v61 = vpop.f32.mrf.mxu0 }
 0x264   : >> { %v1906_v32 = vpop.f32.mrf.mxu1  ;;  %28829 = vmatprep.subr.mxu0 %v31885_v52  ;;  %28836 = vmatprep.mubr.f32.mxu1 %v31878_v18  ;;  %v1746_v54 = vadd.f32 %v1745_v16, %v1659_v61  ;;  %v10692_v33 = vsub.f32 %v31967_v34, %v31983_v13 }
 0x265   : >> { %28844 = vmatprep.subr.mxu1 %v10194_v20  ;;  %v28343_v7 = vpop.f32.mrf.mxu0  ;;  %28822 = vmatmul.mubr.f32.vlgmr.msra.gmra.mxu0 %v31909_v58 }
 0x266   : >> { %v28358_v14 = vpop.f32.mrf.mxu1  ;;  %28837 = vmatmul.mubr.f32.vlgmr.msra.gmra.mxu1 %v31889_v53  ;;  %v1833_v22 = vadd.f32 %v28343_v7, %v1752_v59  ;;  %28830 = vmatpush3.msra.mxu0 %v31885_v52  ;;  %v32001_v52 = vand.u32 4294901760, %v34875_v27  ;;  %v32008_v59 = vsub.f32 %v10570_v3, %v31990_v23 }
 0x267   : >> { %28845 = vmatpush3.msra.mxu1 %v10194_v20  ;;  %28831 = vmatprep.mubr.f32.mxu0 %v31878_v18  ;;  %v1825_v11 = vpop.f32.mrf.mxu0  ;;  %v27250_v18 = vld [vmem:[%s31168_s13 + $0x34] sm:$0xff] }
 0x268   : >> { %v2066_v0 = vpop.f32.mrf.mxu1  ;;  %28839 = vmatprep.subr.mxu0 %v31903_v60  ;;  %28846 = vmatprep.mubr.f32.mxu1 %v31926_v4  ;;  %v1915_v58 = vadd.f32 %v28348_v36, %v1833_v22  ;;  %v1826_v16 = vadd.f32 %v1825_v11, %v1746_v54  ;;  %v32019_v3 = vsub.f32 %v34875_v27, %v32001_v52 }
 0x269   : >> { %28854 = vmatprep.subr.mxu1 %v31903_v60  ;;  %v28353_v20 = vpop.f32.mrf.mxu0  ;;  %28832 = vmatmul.mubr.f32.vlgmr.msra.gmra.mxu0 %v31889_v53  ;;  %v11066_v53 = vsel %vm1419_vm0, %v27250_v18, 0 }
 0x26a   : >> { %v28368_v21 = vpop.f32.mrf.mxu1  ;;  %28847 = vmatmul.mubr.f32.vlgmr.msra.gmra.mxu1 %v31937_v25  ;;  %v1907_v10 = vadd.f32 %v1906_v32, %v1826_v16  ;;  %v1995_v61 = vadd.f32 %v28353_v20, %v1915_v58  ;;  %28840 = vmatpush3.msra.mxu0 %v31903_v60  ;;  %v10693_v32 = vand.u32 4294901760, %v10692_v33  ;;  %v32028_v33 = vand.u32 4294901760, %v11066_v53 }
 0x26b   : >> { %28855 = vmatpush3.msra.mxu1 %v31903_v60  ;;  %28841 = vmatprep.mubr.f32.mxu0 %v10143_v24  ;;  %v1988_v7 = vpop.f32.mrf.mxu0  ;;  %v11069_v20 = vsel %vm1419_vm0, %v27251_v62, 0 }
 0x26c   : >> { %v2240_v54 = vpop.f32.mrf.mxu1  ;;  %28849 = vmatprep.subr.mxu0 %v31919_v1  ;;  %28856 = vmatprep.mubr.f32.mxu1 %v10141_v19  ;;  %v2073_v22 = vadd.f32 %v28358_v14, %v1995_v61  ;;  %v1989_v11 = vadd.f32 %v1988_v7, %v1907_v10  ;;  %v34880_v19 = vand.u32 4294901760, %v31988_v9  ;;  %v10650_v14 = vand.u32 4294901760, %v32008_v59 }
 0x26d   : >> { %28864 = vmatprep.subr.mxu1 %v31903_v60  ;;  %v28363_v24 = vpop.f32.mrf.mxu0  ;;  %28842 = vmatmul.mubr.f32.vlgmr.msra.gmra.mxu0 %v10153_v31  ;;  %v32039_v7 = vand.u32 4294901760, %v11069_v20 }
 0x26e   : >> { %v28378_v36 = vpop.f32.mrf.mxu1  ;;  %28857 = vmatmul.mubr.f32.vlgmr.msra.gmra.mxu1 %v10151_v15  ;;  %v10641_v58 = vsub.f32 %v31988_v9, %v34880_v19  ;;  %v2067_v16 = vadd.f32 %v2066_v0, %v1989_v11  ;;  %v2165_v18 = vadd.f32 %v28363_v24, %v2073_v22  ;;  %28850 = vmatpush3.msra.mxu0 %v31919_v1  ;;  %v32035_v1 = vand.u32 4294901760, %v32019_v3 }
 0x26f   : >> { %28865 = vmatpush3.msra.mxu1 %v31903_v60  ;;  %28851 = vmatprep.mubr.f32.mxu0 %v31942_v51  ;;  %v2154_v31 = vpop.f32.mrf.mxu0  ;;  %v10651_v0 = vsub.f32 %v32008_v59, %v10650_v14  ;;  %v32044_v24 = vsub.f32 %v11066_v53, %v32028_v33 }
 0x270   : >> { %v2401_v15 = vpop.f32.mrf.mxu1  ;;  %28859 = vmatprep.subr.mxu0 %v31933_v17  ;;  %28866 = vmatprep.mubr.f32.mxu1 %v31926_v4  ;;  %v2247_v60 = vadd.f32 %v28368_v21, %v2165_v18  ;;  %v2155_v10 = vadd.f32 %v2154_v31, %v2067_v16  ;;  %v10642_v11 = vand.u32 4294901760, %v10641_v58 }
 0x271   : >> { %28874 = vmatprep.subr.mxu1 %v10693_v32  ;;  %v28373_v51 = vpop.f32.mrf.mxu0  ;;  %28852 = vmatmul.mubr.f32.vlgmr.msra.gmra.mxu0 %v31957_v55  ;;  %v27253_v55 = vld [vmem:[%s31168_s13 + $0x40] sm:$0xff]  ;;  %v10652_v53 = vand.u32 4294901760, %v10651_v0  ;;  %v27254_v0 = vld [vmem:[%s31168_s13 + $0x48] sm:$0x3] }
 0x272   : >> { %v28388_v61 = vpop.f32.mrf.mxu1  ;;  %28867 = vmatmul.mubr.f32.vlgmr.msra.gmra.mxu1 %v31937_v25  ;;  %v2241_v62 = vadd.f32 %v2240_v54, %v2155_v10  ;;  %v2328_v22 = vadd.f32 %v28373_v51, %v2247_v60  ;;  %28860 = vmatpush3.msra.mxu0 %v31933_v17  ;;  %v32054_v17 = vand.u32 4294901760, %v34874_v28  ;;  %v34772_v10 = vand.u32 4294901760, %v32044_v24 }
 0x273   : >> { %28875 = vmatpush3.msra.mxu1 %v10693_v32  ;;  %28861 = vmatprep.mubr.f32.mxu0 %v31926_v4  ;;  %v2320_v19 = vpop.f32.mrf.mxu0  ;;  %v11191_v4 = vsub.f32 %v32019_v3, %v32035_v1  ;;  %v11568_v51 = vsel %vm1419_vm0, %v27253_v55, 0 }
 0x274   : >> { %v2561_v21 = vpop.f32.mrf.mxu1  ;;  %28869 = vmatprep.subr.mxu0 %v31952_v2  ;;  %28876 = vmatprep.mubr.f32.mxu1 %v31971_v35  ;;  %v2410_v32 = vadd.f32 %v28378_v36, %v2328_v22  ;;  %v2321_v16 = vadd.f32 %v2320_v19, %v2241_v62  ;;  %v32059_v36 = vsub.f32 %v11069_v20, %v32039_v7 }
 0x275   : >> { %28884 = vmatprep.subr.mxu1 %v31952_v2  ;;  %v28383_v54 = vpop.f32.mrf.mxu0  ;;  %28862 = vmatmul.mubr.f32.vlgmr.msra.gmra.mxu0 %v31937_v25  ;;  %v34881_v25 = vand.u32 4294901760, %v31988_v9  ;;  %v32073_v19 = vsub.f32 %v34874_v28, %v32054_v17 }
 0x276   : >> { %v28398_v18 = vpop.f32.mrf.mxu1  ;;  %28877 = vmatmul.mubr.f32.vlgmr.msra.gmra.mxu1 %v31990_v23  ;;  %v2402_v58 = vadd.f32 %v2401_v15, %v2321_v16  ;;  %v2490_v31 = vadd.f32 %v28383_v54, %v2410_v32  ;;  %28870 = vmatpush3.msra.mxu0 %v31952_v2  ;;  %v11149_v32 = vand.u32 4294901760, %v32059_v36  ;;  %v32077_v16 = vand.u32 4294901760, %v11568_v51 }
 0x277   : >> { %28885 = vmatpush3.msra.mxu1 %v31952_v2  ;;  %28871 = vmatprep.mubr.f32.mxu0 %v10642_v11  ;;  %v2483_v62 = vpop.f32.mrf.mxu0  ;;  %v11192_v11 = vand.u32 4294901760, %v11191_v4  ;;  %v11140_v4 = vsub.f32 %v32044_v24, %v34772_v10 }
 0x278   : >> { %v2737_v60 = vpop.f32.mrf.mxu1  ;;  %28879 = vmatprep.subr.mxu0 %v31967_v34  ;;  %28886 = vmatprep.mubr.f32.mxu1 %v34881_v25  ;;  %v32068_v22 = vadd.f32 %v28388_v61, %v2490_v31  ;;  %v2484_v20 = vadd.f32 %v2483_v62, %v2402_v58  ;;  %v32096_v31 = vsub.f32 %v11568_v51, %v32077_v16 }
 0x279   : >> { %28894 = vmatprep.subr.mxu1 %v31952_v2  ;;  %v28393_v55 = vpop.f32.mrf.mxu0  ;;  %28872 = vmatmul.mubr.f32.vlgmr.msra.gmra.mxu0 %v10652_v53  ;;  %v11571_v53 = vsel %vm1419_vm0, %v27254_v0, 0  ;;  %v11141_v0 = vand.u32 4294901760, %v11140_v4 }
 0x27a   : >> { %v28408_v15 = vpop.f32.mrf.mxu1  ;;  %28887 = vmatmul.mubr.f32.vlgmr.msra.gmra.mxu1 %v10650_v14  ;;  %v32079_v61 = vadd.f32 %v2561_v21, %v2484_v20  ;;  %v2744_v54 = vadd.f32 %v28398_v18, %v28393_v55  ;;  %28880 = vmatpush3.msra.mxu0 %v31967_v34  ;;  %v32091_v34 = vand.u32 4294901760, %v32073_v19  ;;  %v11150_v18 = vsub.f32 %v32059_v36, %v11149_v32 }
 0x27b   : >> { %28895 = vmatpush3.msra.mxu1 %v31952_v2  ;;  %28881 = vmatprep.mubr.f32.mxu0 %v31988_v9  ;;  %v2651_v58 = vpop.f32.mrf.mxu0  ;;  %v32098_v62 = vand.u32 4294901760, %v11571_v53 }
 0x27c   : >> { %v2898_v14 = vpop.f32.mrf.mxu1  ;;  %28889 = vmatprep.subr.mxu0 %v31983_v13  ;;  %28896 = vmatprep.mubr.f32.mxu1 %v31971_v35  ;;  %v2738_v2 = vadd.f32 %v2737_v60, %v2651_v58 }
 0x27d   : >> { %28904 = vmatprep.subr.mxu1 %v11192_v11  ;;  %v28403_v9 = vpop.f32.mrf.mxu0  ;;  %28882 = vmatmul.mubr.f32.vlgmr.msra.gmra.mxu0 %v32008_v59  ;;  %v27255_v59 = vld [vmem:[%s31168_s13 + $0x41] sm:$0xff]  ;;  %v32116_v4 = vsub.f32 %v11571_v53, %v32098_v62 }
 0x27e   : >> { %v28418_v21 = vpop.f32.mrf.mxu1  ;;  %28897 = vmatmul.mubr.f32.vlgmr.msra.gmra.mxu1 %v31990_v23  ;;  %v2825_v60 = vadd.f32 %v28403_v9, %v2744_v54  ;;  %28890 = vmatpush3.msra.mxu0 %v31983_v13  ;;  %v11693_v13 = vsub.f32 %v32073_v19, %v32091_v34  ;;  %v11151_v54 = vand.u32 4294901760, %v11150_v18  ;;  %v27256_v18 = vld [vmem:[%s31168_s13 + $0x49] sm:$0x3] }
 0x27f   : >> { %28905 = vmatpush3.msra.mxu1 %v11192_v11  ;;  %28891 = vmatprep.mubr.f32.mxu0 %v31971_v35  ;;  %v2817_v20 = vpop.f32.mrf.mxu0  ;;  %v32110_v35 = vand.u32 4294901760, %v34861_v47 }
 0x280   : >> { %v3058_v25 = vpop.f32.mrf.mxu1  ;;  %28899 = vmatprep.subr.mxu0 %v32001_v52  ;;  %28906 = vmatprep.mubr.f32.mxu1 %v32028_v33  ;;  %v2907_v11 = vadd.f32 %v28408_v15, %v2825_v60  ;;  %v2818_v55 = vadd.f32 %v2817_v20, %v2738_v2  ;;  %v12067_v20 = vsel %vm1419_vm0, %v27255_v59, 0  ;;  %v34883_v59 = vand.u32 4294901760, %v32096_v31 }
 0x281   : >> { %28914 = vmatprep.subr.mxu1 %v32001_v52  ;;  %v28413_v51 = vpop.f32.mrf.mxu0  ;;  %28892 = vmatmul.mubr.f32.vlgmr.msra.gmra.mxu0 %v31990_v23  ;;  %v34882_v23 = vand.u32 4294901760, %v32044_v24  ;;  %v32127_v53 = vsub.f32 %v34861_v47, %v32110_v35 }
 0x282   : >> { %v28428_v58 = vpop.f32.mrf.mxu1  ;;  %28907 = vmatmul.mubr.f32.vlgmr.msra.gmra.mxu1 %v32039_v7  ;;  %v2899_v2 = vadd.f32 %v2898_v14, %v2818_v55  ;;  %v2987_v9 = vadd.f32 %v28413_v51, %v2907_v11  ;;  %28900 = vmatpush3.msra.mxu0 %v32001_v52  ;;  %v11694_v14 = vand.u32 4294901760, %v11693_v13  ;;  %v11642_v11 = vsub.f32 %v32096_v31, %v34883_v59 }
 0x283   : >> { %28915 = vmatpush3.msra.mxu1 %v32001_v52  ;;  %28901 = vmatprep.mubr.f32.mxu0 %v11141_v0  ;;  %v2980_v10 = vpop.f32.mrf.mxu0 }
 0x284   : >> { %v3236_v60 = vpop.f32.mrf.mxu1  ;;  %28909 = vmatprep.subr.mxu0 %v32019_v3  ;;  %28916 = vmatprep.mubr.f32.mxu1 %v34882_v23  ;;  %v3065_v5 = vadd.f32 %v28418_v21, %v2987_v9  ;;  %v2981_v15 = vadd.f32 %v2980_v10, %v2899_v2  ;;  %v11651_v21 = vand.u32 4294901760, %v32116_v4  ;;  %v32134_v10 = vand.u32 4294901760, %v12067_v20 }
 0x285   : >> { %28924 = vmatprep.subr.mxu1 %v32001_v52  ;;  %v28423_v0 = vpop.f32.mrf.mxu0  ;;  %28902 = vmatmul.mubr.f32.vlgmr.msra.gmra.mxu0 %v11151_v54 }
 0x286   : >> { %v28438_v6 = vpop.f32.mrf.mxu1  ;;  %28917 = vmatmul.mubr.f32.vlgmr.msra.gmra.mxu1 %v11149_v32  ;;  %v32137_v32 = vadd.f32 %v3065_v5, %v32068_v22  ;;  %v3059_v55 = vadd.f32 %v3058_v25, %v2981_v15  ;;  %v3243_v13 = vadd.f32 %v28428_v58, %v28423_v0  ;;  %28910 = vmatpush3.msra.mxu0 %v32019_v3  ;;  %v32149_v3 = vand.u32 4294901760, %v32127_v53 }
 0x287   : >> { %28925 = vmatpush3.msra.mxu1 %v32001_v52  ;;  %28911 = vmatprep.mubr.f32.mxu0 %v32044_v24  ;;  %v12070_v52 = vsel %vm1419_vm0, %v27256_v18, 0  ;;  %v3150_v54 = vpop.f32.mrf.mxu0  ;;  %v11652_v22 = vsub.f32 %v32116_v4, %v11651_v21  ;;  %v32154_v25 = vsub.f32 %v12067_v20, %v32134_v10 }
 0x288   : >> { %v3397_v51 = vpop.f32.mrf.mxu1  ;;  %28919 = vmatprep.subr.mxu0 %v32035_v1  ;;  %28926 = vmatprep.mubr.f32.mxu1 %v32028_v33  ;;  %v32145_v2 = vadd.f32 %v3059_v55, %v32079_v61  ;;  %v3237_v9 = vadd.f32 %v3236_v60, %v3150_v54  ;;  %v32156_v61 = vand.u32 4294901760, %v12070_v52  ;;  %v11643_v60 = vand.u32 4294901760, %v11642_v11 }
 0x289   : >> { %28934 = vmatprep.subr.mxu1 %v11694_v14  ;;  %v28433_v24 = vpop.f32.mrf.mxu0  ;;  %28912 = vmatmul.mubr.f32.vlgmr.msra.gmra.mxu0 %v32059_v36  ;;  %v27257_v36 = vld [vmem:[%s31168_s13 + $0x42] sm:$0xff]  ;;  %v11653_v59 = vand.u32 4294901760, %v11652_v22  ;;  %v27258_v22 = vld [vmem:[%s31168_s13 + $0x4a] sm:$0x3] }
 0x28a   : >> { %v28448_v5 = vpop.f32.mrf.mxu1  ;;  %28927 = vmatmul.mubr.f32.vlgmr.msra.gmra.mxu1 %v32039_v7  ;;  %v3324_v58 = vadd.f32 %v28433_v24, %v3243_v13  ;;  %28920 = vmatpush3.msra.mxu0 %v32035_v1  ;;  %v12192_v1 = vsub.f32 %v32127_v53, %v32149_v3  ;;  %v32174_v11 = vsub.f32 %v12070_v52, %v32156_v61 }
 0x28b   : >> { %28935 = vmatpush3.msra.mxu1 %v11694_v14  ;;  %28921 = vmatprep.mubr.f32.mxu0 %v32028_v33  ;;  %v3316_v23 = vpop.f32.mrf.mxu0  ;;  %v32168_v33 = vand.u32 4294901760, %v34860_v48 }
 0x28c   : >> { %v3557_v15 = vpop.f32.mrf.mxu1  ;;  %28929 = vmatprep.subr.mxu0 %v32054_v17  ;;  %28936 = vmatprep.mubr.f32.mxu1 %v32077_v16  ;;  %v3406_v18 = vadd.f32 %v28438_v6, %v3324_v58  ;;  %v3317_v14 = vadd.f32 %v3316_v23, %v3237_v9  ;;  %v12566_v9 = vsel %vm1419_vm0, %v27257_v36, 0  ;;  %v34885_v36 = vand.u32 4294901760, %v32154_v25 }
 0x28d   : >> { %28944 = vmatprep.subr.mxu1 %v32054_v17  ;;  %v28443_v20 = vpop.f32.mrf.mxu0  ;;  %28922 = vmatmul.mubr.f32.vlgmr.msra.gmra.mxu0 %v32039_v7  ;;  %v34884_v7 = vand.u32 4294901760, %v32096_v31  ;;  %v32185_v52 = vsub.f32 %v34860_v48, %v32168_v33 }
 0x28e   : >> { %v28458_v0 = vpop.f32.mrf.mxu1  ;;  %28937 = vmatmul.mubr.f32.vlgmr.msra.gmra.mxu1 %v32098_v62  ;;  %v3398_v55 = vadd.f32 %v3397_v51, %v3317_v14  ;;  %v3486_v13 = vadd.f32 %v28443_v20, %v3406_v18  ;;  %28930 = vmatpush3.msra.mxu0 %v32054_v17  ;;  %v12193_v51 = vand.u32 4294901760, %v12192_v1  ;;  %v12141_v18 = vsub.f32 %v32154_v25, %v34885_v36 }
 0x28f   : >> { %28945 = vmatpush3.msra.mxu1 %v32054_v17  ;;  %28931 = vmatprep.mubr.f32.mxu0 %v11643_v60  ;;  %v3479_v24 = vpop.f32.mrf.mxu0  ;;  %v32192_v14 = vand.u32 4294901760, %v12566_v9 }
 0x290   : >> { %v3735_v54 = vpop.f32.mrf.mxu1  ;;  %28939 = vmatprep.subr.mxu0 %v32073_v19  ;;  %28946 = vmatprep.mubr.f32.mxu1 %v34884_v7  ;;  %v3564_v58 = vadd.f32 %v28448_v5, %v3486_v13  ;;  %v3480_v23 = vadd.f32 %v3479_v24, %v3398_v55  ;;  %v12150_v5 = vand.u32 4294901760, %v32174_v11 }
 0x291   : >> { %28954 = vmatprep.subr.mxu1 %v32054_v17  ;;  %v28453_v60 = vpop.f32.mrf.mxu0  ;;  %28932 = vmatmul.mubr.f32.vlgmr.msra.gmra.mxu0 %v11653_v59 }
 0x292   : >> { %v28468_v6 = vpop.f32.mrf.mxu1  ;;  %28947 = vmatmul.mubr.f32.vlgmr.msra.gmra.mxu1 %v11651_v21  ;;  %v32195_v21 = vadd.f32 %v3564_v58, %v32137_v32  ;;  %v3558_v1 = vadd.f32 %v3557_v15, %v3480_v23  ;;  %v3742_v20 = vadd.f32 %v28458_v0, %v28453_v60  ;;  %28940 = vmatpush3.msra.mxu0 %v32073_v19  ;;  %v32207_v19 = vand.u32 4294901760, %v32185_v52 }
 0x293   : >> { %28955 = vmatpush3.msra.mxu1 %v32054_v17  ;;  %28941 = vmatprep.mubr.f32.mxu0 %v32096_v31  ;;  %v12569_v17 = vsel %vm1419_vm0, %v27258_v22, 0  ;;  %v3649_v55 = vpop.f32.mrf.mxu0  ;;  %v12151_v15 = vsub.f32 %v32174_v11, %v12150_v5  ;;  %v32212_v0 = vsub.f32 %v12566_v9, %v32192_v14  ;;  %v12142_v22 = vand.u32 4294901760, %v12141_v18 }
 0x294   : >> { %v3896_v59 = vpop.f32.mrf.mxu1  ;;  %28949 = vmatprep.subr.mxu0 %v32091_v34  ;;  %28956 = vmatprep.mubr.f32.mxu1 %v32077_v16  ;;  %v32203_v13 = vadd.f32 %v3558_v1, %v32145_v2  ;;  %v3736_v24 = vadd.f32 %v3735_v54, %v3649_v55  ;;  %v32214_v2 = vand.u32 4294901760, %v12569_v17 }
 0x295   : >> { %28964 = vmatprep.subr.mxu1 %v12193_v51  ;;  %v28463_v31 = vpop.f32.mrf.mxu0  ;;  %28942 = vmatmul.mubr.f32.vlgmr.msra.gmra.mxu0 %v32116_v4  ;;  %v27259_v4 = vld [vmem:[%s31168_s13 + $0x43] sm:$0xff]  ;;  %v12152_v36 = vand.u32 4294901760, %v12151_v15  ;;  %v27260_v15 = vld [vmem:[%s31168_s13 + $0x4b] sm:$0x3] }
 0x296   : >> { %v28478_v32 = vpop.f32.mrf.mxu1  ;;  %28957 = vmatmul.mubr.f32.vlgmr.msra.gmra.mxu1 %v32098_v62  ;;  %v3823_v54 = vadd.f32 %v28463_v31, %v3742_v20  ;;  %28950 = vmatpush3.msra.mxu0 %v32091_v34  ;;  %v12691_v34 = vsub.f32 %v32185_v52, %v32207_v19  ;;  %v32232_v18 = vsub.f32 %v12569_v17, %v32214_v2 }
 0x297   : >> { %28965 = vmatpush3.msra.mxu1 %v12193_v51  ;;  %28951 = vmatprep.mubr.f32.mxu0 %v32077_v16  ;;  %v3815_v58 = vpop.f32.mrf.mxu0  ;;  %v32226_v16 = vand.u32 4294901760, %v34857_v56 }
 0x298   : >> { %v4056_v7 = vpop.f32.mrf.mxu1  ;;  %28959 = vmatprep.subr.mxu0 %v32110_v35  ;;  %28966 = vmatprep.mubr.f32.mxu1 %v32134_v10  ;;  %v3905_v23 = vadd.f32 %v28468_v6, %v3823_v54  ;;  %v3816_v51 = vadd.f32 %v3815_v58, %v3736_v24  ;;  %v13065_v24 = vsel %vm1419_vm0, %v27259_v4, 0  ;;  %v34887_v4 = vand.u32 4294901760, %v32212_v0 }
 0x299   : >> { %28974 = vmatprep.subr.mxu1 %v32110_v35  ;;  %v28473_v9 = vpop.f32.mrf.mxu0  ;;  %28952 = vmatmul.mubr.f32.vlgmr.msra.gmra.mxu0 %v32098_v62  ;;  %v34886_v62 = vand.u32 4294901760, %v32154_v25  ;;  %v32243_v17 = vsub.f32 %v34857_v56, %v32226_v16 }
 0x29a   : >> { %v28488_v60 = vpop.f32.mrf.mxu1  ;;  %28967 = vmatmul.mubr.f32.vlgmr.msra.gmra.mxu1 %v32156_v61  ;;  %v3897_v1 = vadd.f32 %v3896_v59, %v3816_v51  ;;  %v3985_v20 = vadd.f32 %v28473_v9, %v3905_v23  ;;  %28960 = vmatpush3.msra.mxu0 %v32110_v35  ;;  %v12692_v59 = vand.u32 4294901760, %v12691_v34  ;;  %v12640_v23 = vsub.f32 %v32212_v0, %v34887_v4 }
 0x29b   : >> { %28975 = vmatpush3.msra.mxu1 %v32110_v35  ;;  %28961 = vmatprep.mubr.f32.mxu0 %v12142_v22  ;;  %v3978_v31 = vpop.f32.mrf.mxu0  ;;  %v32250_v51 = vand.u32 4294901760, %v13065_v24 }
 0x29c   : >> { %v4237_v55 = vpop.f32.mrf.mxu1  ;;  %28969 = vmatprep.subr.mxu0 %v32127_v53  ;;  %28976 = vmatprep.mubr.f32.mxu1 %v34886_v62  ;;  %v4063_v54 = vadd.f32 %v28478_v32, %v3985_v20  ;;  %v3979_v58 = vadd.f32 %v3978_v31, %v3897_v1  ;;  %v12649_v32 = vand.u32 4294901760, %v32232_v18 }
 0x29d   : >> { %28984 = vmatprep.subr.mxu1 %v32110_v35  ;;  %v28483_v22 = vpop.f32.mrf.mxu0  ;;  %28962 = vmatmul.mubr.f32.vlgmr.msra.gmra.mxu0 %v12152_v36 }
 0x29e   : >> { %v28498_v6 = vpop.f32.mrf.mxu1  ;;  %28977 = vmatmul.mubr.f32.vlgmr.msra.gmra.mxu1 %v12150_v5  ;;  %v32253_v5 = vadd.f32 %v4063_v54, %v32195_v21  ;;  %v4057_v34 = vadd.f32 %v4056_v7, %v3979_v58  ;;  %v4244_v9 = vadd.f32 %v28488_v60, %v28483_v22  ;;  %28970 = vmatpush3.msra.mxu0 %v32127_v53  ;;  %v32265_v53 = vand.u32 4294901760, %v32243_v17 }
 0x29f   : >> { %28985 = vmatpush3.msra.mxu1 %v32110_v35  ;;  %28971 = vmatprep.mubr.f32.mxu0 %v32154_v25  ;;  %v13068_v35 = vsel %vm1419_vm0, %v27260_v15, 0  ;;  %v4151_v1 = vpop.f32.mrf.mxu0  ;;  %v12650_v7 = vsub.f32 %v32232_v18, %v12649_v32  ;;  %v32270_v60 = vsub.f32 %v13065_v24, %v32250_v51  ;;  %v12641_v15 = vand.u32 4294901760, %v12640_v23 }
 0x2a0   : >> { %v4398_v36 = vpop.f32.mrf.mxu1  ;;  %28979 = vmatprep.subr.mxu0 %v32149_v3  ;;  %28986 = vmatprep.mubr.f32.mxu1 %v32134_v10  ;;  %v32261_v20 = vadd.f32 %v4057_v34, %v32203_v13  ;;  %v4238_v31 = vadd.f32 %v4237_v55, %v4151_v1  ;;  %v32272_v13 = vand.u32 4294901760, %v13068_v35 }
 0x2a1   : >> { %28994 = vmatprep.subr.mxu1 %v12692_v59  ;;  %v28493_v25 = vpop.f32.mrf.mxu0  ;;  %28972 = vmatmul.mubr.f32.vlgmr.msra.gmra.mxu0 %v32174_v11  ;;  %v27261_v11 = vld [vmem:[%s31168_s13 + $0x44] sm:$0xff]  ;;  %v12651_v4 = vand.u32 4294901760, %v12650_v7  ;;  %v27262_v7 = vld [vmem:[%s31168_s13 + $0x4c] sm:$0x3] }
 0x2a2   : >> { %v28508_v21 = vpop.f32.mrf.mxu1  ;;  %28987 = vmatmul.mubr.f32.vlgmr.msra.gmra.mxu1 %v32156_v61  ;;  %v4325_v55 = vadd.f32 %v28493_v25, %v4244_v9  ;;  %28980 = vmatpush3.msra.mxu0 %v32149_v3  ;;  %v13190_v3 = vsub.f32 %v32243_v17, %v32265_v53  ;;  %v32290_v23 = vsub.f32 %v13068_v35, %v32272_v13 }
 0x2a3   : >> { %28995 = vmatpush3.msra.mxu1 %v12692_v59  ;;  %28981 = vmatprep.mubr.f32.mxu0 %v32134_v10  ;;  %v4317_v54 = vpop.f32.mrf.mxu0  ;;  %v32284_v10 = vand.u32 4294901760, %v34856_v57 }
 0x2a4   : >> { %v4558_v62 = vpop.f32.mrf.mxu1  ;;  %28989 = vmatprep.subr.mxu0 %v32168_v33  ;;  %28996 = vmatprep.mubr.f32.mxu1 %v32192_v14  ;;  %v4407_v58 = vadd.f32 %v28498_v6, %v4325_v55  ;;  %v4318_v59 = vadd.f32 %v4317_v54, %v4238_v31  ;;  %v13564_v31 = vsel %vm1419_vm0, %v27261_v11, 0  ;;  %v34889_v11 = vand.u32 4294901760, %v32270_v60 }
 0x2a5   : >> { %29004 = vmatprep.subr.mxu1 %v32168_v33  ;;  %v28503_v24 = vpop.f32.mrf.mxu0  ;;  %28982 = vmatmul.mubr.f32.vlgmr.msra.gmra.mxu0 %v32156_v61  ;;  %v34888_v61 = vand.u32 4294901760, %v32212_v0  ;;  %v32301_v35 = vsub.f32 %v34856_v57, %v32284_v10 }
 0x2a6   : >> { %v28518_v22 = vpop.f32.mrf.mxu1  ;;  %28997 = vmatmul.mubr.f32.vlgmr.msra.gmra.mxu1 %v32214_v2  ;;  %v4399_v34 = vadd.f32 %v4398_v36, %v4318_v59  ;;  %v4487_v9 = vadd.f32 %v28503_v24, %v4407_v58  ;;  %28990 = vmatpush3.msra.mxu0 %v32168_v33  ;;  %v13191_v36 = vand.u32 4294901760, %v13190_v3  ;;  %v13139_v58 = vsub.f32 %v32270_v60, %v34889_v11 }
 0x2a7   : >> { %29005 = vmatpush3.msra.mxu1 %v32168_v33  ;;  %28991 = vmatprep.mubr.f32.mxu0 %v12641_v15  ;;  %v4480_v25 = vpop.f32.mrf.mxu0  ;;  %v32308_v59 = vand.u32 4294901760, %v13564_v31 }
 0x2a8   : >> { %v4736_v1 = vpop.f32.mrf.mxu1  ;;  %28999 = vmatprep.subr.mxu0 %v32185_v52  ;;  %29006 = vmatprep.mubr.f32.mxu1 %v34888_v61  ;;  %v4565_v55 = vadd.f32 %v28508_v21, %v4487_v9  ;;  %v4481_v54 = vadd.f32 %v4480_v25, %v4399_v34  ;;  %v13148_v21 = vand.u32 4294901760, %v32290_v23 }
 0x2a9   : >> { %29014 = vmatprep.subr.mxu1 %v32168_v33  ;;  %v28513_v15 = vpop.f32.mrf.mxu0  ;;  %28992 = vmatmul.mubr.f32.vlgmr.msra.gmra.mxu0 %v12651_v4  ;;  %v13567_v4 = vsel %vm1419_vm0, %v27262_v7, 0  ;;  %v13140_v7 = vand.u32 4294901760, %v13139_v58 }
 0x2aa   : >> { %v28528_v6 = vpop.f32.mrf.mxu1  ;;  %29007 = vmatmul.mubr.f32.vlgmr.msra.gmra.mxu1 %v12649_v32  ;;  %v4569_v32 = vadd.f32 %v4565_v55, %v32253_v5  ;;  %v4559_v24 = vadd.f32 %v4558_v62, %v4481_v54  ;;  %v4743_v3 = vadd.f32 %v28518_v22, %v28513_v15  ;;  %29000 = vmatpush3.msra.mxu0 %v32185_v52  ;;  %v32319_v5 = vand.u32 4294901760, %v32301_v35 }
 0x2ab   : >> { %29015 = vmatpush3.msra.mxu1 %v32168_v33  ;;  %29001 = vmatprep.mubr.f32.mxu0 %v32212_v0  ;;  %v4650_v33 = vpop.f32.mrf.mxu0  ;;  %v13149_v0 = vsub.f32 %v32290_v23, %v13148_v21  ;;  %v32324_v62 = vsub.f32 %v13564_v31, %v32308_v59  ;;  %v32326_v22 = vand.u32 4294901760, %v13567_v4 }
 0x2ac   : >> { %v4897_v34 = vpop.f32.mrf.mxu1  ;;  %29009 = vmatprep.subr.mxu0 %v32207_v19  ;;  %29016 = vmatprep.mubr.f32.mxu1 %v32192_v14  ;;  %v4568_v9 = vadd.f32 %v4559_v24, %v32261_v20  ;;  %v4737_v25 = vadd.f32 %v4736_v1, %v4650_v33  ;;  %v13689_v31 = vsub.f32 %v32301_v35, %v32319_v5  ;;  %v34890_v33 = vand.u32 4294901760, %v32270_v60 }
 0x2ad   : >> { %29024 = vmatprep.subr.mxu1 %v13191_v36  ;;  %v28523_v52 = vpop.f32.mrf.mxu0  ;;  %29002 = vmatmul.mubr.f32.vlgmr.msra.gmra.mxu0 %v32232_v18  ;;  %v13637_v15 = vand.u32 4294901760, %v32324_v62  ;;  %v32340_v11 = vsub.f32 %v13567_v4, %v32326_v22 }
 0x2ae   : >> { %v28538_v61 = vpop.f32.mrf.mxu1  ;;  %29017 = vmatmul.mubr.f32.vlgmr.msra.gmra.mxu1 %v32214_v2  ;;  %v4824_v20 = vadd.f32 %v28523_v52, %v4743_v3  ;;  %29010 = vmatpush3.msra.mxu0 %v32207_v19  ;;  %v13690_v4 = vand.u32 4294901760, %v13689_v31 }
 0x2af   : >> { %29025 = vmatpush3.msra.mxu1 %v13191_v36  ;;  %29011 = vmatprep.mubr.f32.mxu0 %v32192_v14  ;;  %v4816_v55 = vpop.f32.mrf.mxu0  ;;  %v13150_v14 = vand.u32 4294901760, %v13149_v0 }
 0x2b0   : >> { %v5057_v1 = vpop.f32.mrf.mxu1  ;;  %29019 = vmatprep.subr.mxu0 %v32226_v16  ;;  %29026 = vmatprep.mubr.f32.mxu1 %v32250_v51  ;;  %v4906_v18 = vadd.f32 %v28528_v6, %v4824_v20  ;;  %v4817_v54 = vadd.f32 %v4816_v55, %v4737_v25  ;;  %v13647_v20 = vand.u32 4294901760, %v32340_v11 }
 0x2b1   : >> { %29034 = vmatprep.subr.mxu1 %v32226_v16  ;;  %v28533_v19 = vpop.f32.mrf.mxu0  ;;  %29012 = vmatmul.mubr.f32.vlgmr.msra.gmra.mxu0 %v32214_v2 }
 0x2b2   : >> { %v28548_v36 = vpop.f32.mrf.mxu1  ;;  %29027 = vmatmul.mubr.f32.vlgmr.msra.gmra.mxu1 %v32272_v13  ;;  %v4898_v6 = vadd.f32 %v4897_v34, %v4817_v54  ;;  %v4986_v58 = vadd.f32 %v28533_v19, %v4906_v18  ;;  %29020 = vmatpush3.msra.mxu0 %v32226_v16  ;;  %v13638_v34 = vsub.f32 %v32324_v62, %v13637_v15 }
 0x2b3   : >> { %29035 = vmatpush3.msra.mxu1 %v32226_v16  ;;  %29021 = vmatprep.mubr.f32.mxu0 %v13140_v7  ;;  %v4979_v3 = vpop.f32.mrf.mxu0 }
 0x2b4   : >> { %v5235_v24 = vpop.f32.mrf.mxu1  ;;  %29029 = vmatprep.subr.mxu0 %v32243_v17  ;;  %29036 = vmatprep.mubr.f32.mxu1 %v34890_v33  ;;  %v5064_v2 = vadd.f32 %v28538_v61, %v4986_v58  ;;  %v4980_v25 = vadd.f32 %v4979_v3, %v4898_v6 }
 0x2b5   : >> { %29044 = vmatprep.subr.mxu1 %v32226_v16  ;;  %v28543_v0 = vpop.f32.mrf.mxu0  ;;  %29022 = vmatmul.mubr.f32.vlgmr.msra.gmra.mxu0 %v13150_v14 }
 0x2b6   : >> { %v28558_v52 = vpop.f32.mrf.mxu1  ;;  %29037 = vmatmul.mubr.f32.vlgmr.msra.gmra.mxu1 %v13148_v21  ;;  %v5068_v7 = vadd.f32 %v5064_v2, %v4569_v32  ;;  %v5058_v55 = vadd.f32 %v5057_v1, %v4980_v25  ;;  %v5242_v18 = vadd.f32 %v28548_v36, %v28543_v0  ;;  %29030 = vmatpush3.msra.mxu0 %v32243_v17  ;;  %v13639_v1 = vand.u32 4294901760, %v13638_v34 }
 0x2b7   : >> { %29045 = vmatpush3.msra.mxu1 %v32226_v16  ;;  %29031 = vmatprep.mubr.f32.mxu0 %v32270_v60  ;;  %v5149_v21 = vpop.f32.mrf.mxu0  ;;  %v13648_v17 = vsub.f32 %v32340_v11, %v13647_v20 }
 0x2b8   : >> { %v5396_v61 = vpop.f32.mrf.mxu1  ;;  %29039 = vmatprep.subr.mxu0 %v32265_v53  ;;  %29046 = vmatprep.mubr.f32.mxu1 %v32250_v51  ;;  %v5067_v54 = vadd.f32 %v5058_v55, %v4568_v9  ;;  %v5236_v31 = vadd.f32 %v5235_v24, %v5149_v21 }
 0x2b9   : >> { %29054 = vmatprep.subr.mxu1 %v13690_v4  ;;  %v28553_v19 = vpop.f32.mrf.mxu0  ;;  %29032 = vmatmul.mubr.f32.vlgmr.msra.gmra.mxu0 %v32290_v23 }
 0x2ba   : >> { %v28568_v16 = vpop.f32.mrf.mxu1  ;;  %29047 = vmatmul.mubr.f32.vlgmr.msra.gmra.mxu1 %v32272_v13  ;;  %v5323_v32 = vadd.f32 %v28553_v19, %v5242_v18  ;;  %29040 = vmatpush3.msra.mxu0 %v32265_v53  ;;  %v13649_v53 = vand.u32 4294901760, %v13648_v17 }
 0x2bb   : >> { %29055 = vmatpush3.msra.mxu1 %v13690_v4  ;;  %29041 = vmatprep.mubr.f32.mxu0 %v32250_v51  ;;  %v5315_v36 = vpop.f32.mrf.mxu0 }
 0x2bc   : >> { %v5556_v60 = vpop.f32.mrf.mxu1  ;;  %29049 = vmatprep.subr.mxu0 %v32284_v10  ;;  %29056 = vmatprep.mubr.f32.mxu1 %v32308_v59  ;;  %v5405_v9 = vadd.f32 %v28558_v52, %v5323_v32  ;;  %v5316_v14 = vadd.f32 %v5315_v36, %v5236_v31 }
 0x2bd   : >> { %29064 = vmatprep.subr.mxu1 %v32284_v10  ;;  %v28563_v23 = vpop.f32.mrf.mxu0  ;;  %29042 = vmatmul.mubr.f32.vlgmr.msra.gmra.mxu0 %v32272_v13 }
 0x2be   : >> { %v28578_v6 = vpop.f32.mrf.mxu1  ;;  %29057 = vmatmul.mubr.f32.vlgmr.msra.gmra.mxu1 %v32326_v22  ;;  %v5397_v51 = vadd.f32 %v5396_v61, %v5316_v14  ;;  %v5485_v58 = vadd.f32 %v28563_v23, %v5405_v9  ;;  %29050 = vmatpush3.msra.mxu0 %v32284_v10 }
 0x2bf   : >> { %29065 = vmatpush3.msra.mxu1 %v32284_v10  ;;  %29051 = vmatprep.mubr.f32.mxu0 %v13639_v1  ;;  %v5478_v3 = vpop.f32.mrf.mxu0 }
 0x2c0   : >> { %v5734_v24 = vpop.f32.mrf.mxu1  ;;  %29059 = vmatprep.subr.mxu0 %v32301_v35  ;;  %29066 = vmatprep.mubr.f32.mxu1 %v13637_v15  ;;  %v5563_v33 = vadd.f32 %v28568_v16, %v5485_v58  ;;  %v5479_v2 = vadd.f32 %v5478_v3, %v5397_v51 }
 0x2c1   : >> { %29074 = vmatprep.subr.mxu1 %v32284_v10  ;;  %v28573_v13 = vpop.f32.mrf.mxu0  ;;  %29052 = vmatmul.mubr.f32.vlgmr.msra.gmra.mxu0 %v13649_v53 }
 0x2c2   : >> { %v28588_v25 = vpop.f32.mrf.mxu1  ;;  %29067 = vmatmul.mubr.f32.vlgmr.msra.gmra.mxu1 %v13647_v20  ;;  %v5567_v52 = vadd.f32 %v5563_v33, %v5068_v7  ;;  %v5557_v4 = vadd.f32 %v5556_v60, %v5479_v2  ;;  %v5741_v0 = vadd.f32 %v28578_v6, %v28573_v13  ;;  %29060 = vmatpush3.msra.mxu0 %v32301_v35 }
 0x2c3   : >> { %29075 = vmatpush3.msra.mxu1 %v32284_v10  ;;  %29061 = vmatprep.mubr.f32.mxu0 %v32324_v62  ;;  %v5648_v55 = vpop.f32.mrf.mxu0 }
 0x2c4   : >> { %v5895_v34 = vpop.f32.mrf.mxu1  ;;  %29069 = vmatprep.subr.mxu0 %v32319_v5  ;;  %29076 = vmatprep.mubr.f32.mxu1 %v32308_v59  ;;  %v5566_v15 = vadd.f32 %v5557_v4, %v5067_v54  ;;  %v5735_v20 = vadd.f32 %v5734_v24, %v5648_v55 }
 0x2c5   : >> { %v28583_v61 = vpop.f32.mrf.mxu0  ;;  %29062 = vmatmul.mubr.f32.vlgmr.msra.gmra.mxu0 %v32340_v11 }
 0x2c6   : >> { %v28598_v18 = vpop.f32.mrf.mxu1  ;;  %29077 = vmatmul.mubr.f32.vlgmr.msra.gmra.mxu1 %v32326_v22  ;;  %v5822_v10 = vadd.f32 %v28583_v61, %v5741_v0  ;;  %29070 = vmatpush3.msra.mxu0 %v32319_v5 }
 0x2c7   : >> { %29071 = vmatprep.mubr.f32.mxu0 %v32308_v59  ;;  %v5814_v62 = vpop.f32.mrf.mxu0 }
 0x2c8   : >> { %v6055_v35 = vpop.f32.mrf.mxu1  ;;  %v5904_v7 = vadd.f32 %v28588_v25, %v5822_v10  ;;  %v5815_v21 = vadd.f32 %v5814_v62, %v5735_v20 }
 0x2c9   : >> { %v28593_v16 = vpop.f32.mrf.mxu0  ;;  %29072 = vmatmul.mubr.f32.vlgmr.msra.gmra.mxu0 %v32326_v22 }
 0x2ca   : >> { %v28608_v31 = vpop.f32.mrf.mxu1  ;;  %v5896_v54 = vadd.f32 %v5895_v34, %v5815_v21  ;;  %v5984_v19 = vadd.f32 %v28593_v16, %v5904_v7 }
 0x2cb   : >> { %v5977_v32 = vpop.f32.mrf.mxu0 }
 0x2cc   : >> { %v6233_v17 = vpop.f32.mrf.mxu1  ;;  %v6062_v60 = vadd.f32 %v28598_v18, %v5984_v19  ;;  %v5978_v1 = vadd.f32 %v5977_v32, %v5896_v54 }
 0x2cd   : >> { %v28603_v36 = vpop.f32.mrf.mxu0 }
 0x2ce   : >> { %v28618_v11 = vpop.f32.mrf.mxu1  ;;  %v6066_v9 = vadd.f32 %v6062_v60, %v5567_v52  ;;  %v6056_v5 = vadd.f32 %v6055_v35, %v5978_v1  ;;  %v6240_v14 = vadd.f32 %v28608_v31, %v28603_v36 }
 0x2cf   : >> { %v6147_v6 = vpop.f32.mrf.mxu0 }
 0x2d0   : >> { %v6394_v59 = vpop.f32.mrf.mxu1  ;;  %v6065_v23 = vadd.f32 %v6056_v5, %v5566_v15  ;;  %v6234_v53 = vadd.f32 %v6233_v17, %v6147_v6 }
 0x2d1   : >> { %v28613_v58 = vpop.f32.mrf.mxu0 }
 0x2d2   : >> { %v28628_v51 = vpop.f32.mrf.mxu1  ;;  %v6321_v24 = vadd.f32 %v28613_v58, %v6240_v14 }
 0x2d3   : >> { %v6313_v22 = vpop.f32.mrf.mxu0 }
 0x2d4   : >> { %v6554_v3 = vpop.f32.mrf.mxu1  ;;  %v6403_v33 = vadd.f32 %v28618_v11, %v6321_v24  ;;  %v6314_v2 = vadd.f32 %v6313_v22, %v6234_v53 }
 0x2d5   : >> { %v28623_v13 = vpop.f32.mrf.mxu0 }
 0x2d6   : >> { %v28638_v25 = vpop.f32.mrf.mxu1  ;;  %v6395_v4 = vadd.f32 %v6394_v59, %v6314_v2  ;;  %v6483_v0 = vadd.f32 %v28623_v13, %v6403_v33 }
 0x2d7   : >> { %v6476_v55 = vpop.f32.mrf.mxu0 }
 0x2d8   : >> { %v6735_v34 = vpop.f32.mrf.mxu1  ;;  %v6561_v52 = vadd.f32 %v28628_v51, %v6483_v0  ;;  %v6477_v20 = vadd.f32 %v6476_v55, %v6395_v4 }
 0x2d9   : >> { %v28633_v61 = vpop.f32.mrf.mxu0 }
 0x2da   : >> { %v28648_v18 = vpop.f32.mrf.mxu1  ;;  %v6565_v10 = vadd.f32 %v6561_v52, %v6066_v9  ;;  %v6555_v15 = vadd.f32 %v6554_v3, %v6477_v20  ;;  %v6742_v35 = vadd.f32 %v28638_v25, %v28633_v61 }
 0x2db   : >> { %v6649_v7 = vpop.f32.mrf.mxu0 }
 0x2dc   : >> { %v6896_v62 = vpop.f32.mrf.mxu1  ;;  %v6564_v21 = vadd.f32 %v6555_v15, %v6065_v23  ;;  %v6736_v31 = vadd.f32 %v6735_v34, %v6649_v7 }
 0x2dd   : >> { %v28643_v54 = vpop.f32.mrf.mxu0 }
 0x2de   : >> { %v28658_v16 = vpop.f32.mrf.mxu1  ;;  %v6823_v19 = vadd.f32 %v28643_v54, %v6742_v35 }
 0x2df   : >> { %v6815_v32 = vpop.f32.mrf.mxu0 }
 0x2e0   : >> { %v7056_v17 = vpop.f32.mrf.mxu1  ;;  %v6905_v60 = vadd.f32 %v28648_v18, %v6823_v19  ;;  %v6816_v1 = vadd.f32 %v6815_v32, %v6736_v31 }
 0x2e1   : >> { %v28653_v36 = vpop.f32.mrf.mxu0 }
 0x2e2   : >> { %v28668_v11 = vpop.f32.mrf.mxu1  ;;  %v6897_v5 = vadd.f32 %v6896_v62, %v6816_v1  ;;  %v6985_v14 = vadd.f32 %v28653_v36, %v6905_v60 }
 0x2e3   : >> { %v6978_v6 = vpop.f32.mrf.mxu0 }
 0x2e4   : >> { %v7234_v59 = vpop.f32.mrf.mxu1  ;;  %v7063_v9 = vadd.f32 %v28658_v16, %v6985_v14  ;;  %v6979_v53 = vadd.f32 %v6978_v6, %v6897_v5 }
 0x2e5   : >> { %v28663_v58 = vpop.f32.mrf.mxu0 }
 0x2e6   : >> { %v28678_v51 = vpop.f32.mrf.mxu1  ;;  %v7067_v24 = vadd.f32 %v7063_v9, %v6565_v10  ;;  %v7057_v23 = vadd.f32 %v7056_v17, %v6979_v53  ;;  %v7241_v3 = vadd.f32 %v28668_v11, %v28663_v58 }
 0x2e7   : >> { %v7148_v33 = vpop.f32.mrf.mxu0 }
 0x2e8   : >> { %v7395_v22 = vpop.f32.mrf.mxu1  ;;  %v7066_v2 = vadd.f32 %v7057_v23, %v6564_v21  ;;  %v7235_v25 = vadd.f32 %v7234_v59, %v7148_v33 }
 0x2e9   : >> { %v28673_v4 = vpop.f32.mrf.mxu0 }
 0x2ea   : >> { %v28688_v13 = vpop.f32.mrf.mxu1  ;;  %v7322_v0 = vadd.f32 %v28673_v4, %v7241_v3 }
 0x2eb   : >> { %v7314_v55 = vpop.f32.mrf.mxu0 }
 0x2ec   : >> { %v7555_v34 = vpop.f32.mrf.mxu1  ;;  %v7404_v52 = vadd.f32 %v28678_v51, %v7322_v0  ;;  %v7315_v20 = vadd.f32 %v7314_v55, %v7235_v25 }
 0x2ed   : >> { %v28683_v61 = vpop.f32.mrf.mxu0 }
 0x2ee   : >> { %v28698_v18 = vpop.f32.mrf.mxu1  ;;  %v7396_v15 = vadd.f32 %v7395_v22, %v7315_v20  ;;  %v7484_v35 = vadd.f32 %v28683_v61, %v7404_v52 }
 0x2ef   : >> { %v7477_v7 = vpop.f32.mrf.mxu0 }
 0x2f0   : >> { %v7733_v62 = vpop.f32.mrf.mxu1  ;;  %v7562_v10 = vadd.f32 %v28688_v13, %v7484_v35  ;;  %v7478_v31 = vadd.f32 %v7477_v7, %v7396_v15 }
 0x2f1   : >> { %v28693_v54 = vpop.f32.mrf.mxu0 }
 0x2f2   : >> { %v28708_v16 = vpop.f32.mrf.mxu1  ;;  %v7566_v19 = vadd.f32 %v7562_v10, %v7067_v24  ;;  %v7556_v21 = vadd.f32 %v7555_v34, %v7478_v31  ;;  %v7740_v17 = vadd.f32 %v28698_v18, %v28693_v54 }
 0x2f3   : >> { %v7647_v60 = vpop.f32.mrf.mxu0 }
 0x2f4   : >> { %v7894_v32 = vpop.f32.mrf.mxu1  ;;  %v7565_v1 = vadd.f32 %v7556_v21, %v7066_v2  ;;  %v7734_v11 = vadd.f32 %v7733_v62, %v7647_v60 }
 0x2f5   : >> { %v28703_v5 = vpop.f32.mrf.mxu0 }
 0x2f6   : >> { %v28718_v36 = vpop.f32.mrf.mxu1  ;;  %v7821_v14 = vadd.f32 %v28703_v5, %v7740_v17 }
 0x2f7   : >> { %v7813_v6 = vpop.f32.mrf.mxu0 }
 0x2f8   : >> { %v8054_v59 = vpop.f32.mrf.mxu1  ;;  %v7903_v9 = vadd.f32 %v28708_v16, %v7821_v14  ;;  %v7814_v53 = vadd.f32 %v7813_v6, %v7734_v11 }
 0x2f9   : >> { %v28713_v58 = vpop.f32.mrf.mxu0 }
 0x2fa   : >> { %v28728_v51 = vpop.f32.mrf.mxu1  ;;  %v7895_v23 = vadd.f32 %v7894_v32, %v7814_v53  ;;  %v7983_v3 = vadd.f32 %v28713_v58, %v7903_v9 }
 0x2fb   : >> { %v7976_v33 = vpop.f32.mrf.mxu0 }
 0x2fc   : >> { %v8232_v22 = vpop.f32.mrf.mxu1  ;;  %v8061_v24 = vadd.f32 %v28718_v36, %v7983_v3  ;;  %v7977_v25 = vadd.f32 %v7976_v33, %v7895_v23 }
 0x2fd   : >> { %v28723_v4 = vpop.f32.mrf.mxu0 }
 0x2fe   : >> { %v28738_v13 = vpop.f32.mrf.mxu1  ;;  %v8065_v0 = vadd.f32 %v8061_v24, %v7566_v19  ;;  %v8055_v2 = vadd.f32 %v8054_v59, %v7977_v25  ;;  %v8239_v34 = vadd.f32 %v28728_v51, %v28723_v4 }
 0x2ff   : >> { %v8146_v52 = vpop.f32.mrf.mxu0 }
 0x300   : >> { %v8393_v55 = vpop.f32.mrf.mxu1  ;;  %v8064_v20 = vadd.f32 %v8055_v2, %v7565_v1  ;;  %v8233_v18 = vadd.f32 %v8232_v22, %v8146_v52 }
 0x301   : >> { %v28733_v15 = vpop.f32.mrf.mxu0 }
 0x302   : >> { %v28748_v61 = vpop.f32.mrf.mxu1  ;;  %v8320_v35 = vadd.f32 %v28733_v15, %v8239_v34 }
 0x303   : >> { %v8312_v7 = vpop.f32.mrf.mxu0 }
 0x304   : >> { %v8553_v62 = vpop.f32.mrf.mxu1  ;;  %v8402_v10 = vadd.f32 %v28738_v13, %v8320_v35  ;;  %v8313_v31 = vadd.f32 %v8312_v7, %v8233_v18 }
 0x305   : >> { %v28743_v54 = vpop.f32.mrf.mxu0 }
 0x306   : >> { %v28758_v16 = vpop.f32.mrf.mxu1  ;;  %v8394_v21 = vadd.f32 %v8393_v55, %v8313_v31  ;;  %v8482_v17 = vadd.f32 %v28743_v54, %v8402_v10 }
 0x307   : >> { %v8475_v60 = vpop.f32.mrf.mxu0 }
 0x308   : >> { %v8731_v32 = vpop.f32.mrf.mxu1  ;;  %v8560_v19 = vadd.f32 %v28748_v61, %v8482_v17  ;;  %v8476_v11 = vadd.f32 %v8475_v60, %v8394_v21 }
 0x309   : >> { %v28753_v5 = vpop.f32.mrf.mxu0 }
 0x30a   : >> { %v28768_v36 = vpop.f32.mrf.mxu1  ;;  %v8564_v14 = vadd.f32 %v8560_v19, %v8065_v0  ;;  %v8554_v1 = vadd.f32 %v8553_v62, %v8476_v11  ;;  %v8738_v59 = vadd.f32 %v28758_v16, %v28753_v5 }
 0x30b   : >> { %v8645_v9 = vpop.f32.mrf.mxu0 }
 0x30c   : >> { %v8892_v6 = vpop.f32.mrf.mxu1  ;;  %v8563_v53 = vadd.f32 %v8554_v1, %v8064_v20  ;;  %v8732_v51 = vadd.f32 %v8731_v32, %v8645_v9 }
 0x30d   : >> { %v28763_v23 = vpop.f32.mrf.mxu0 }
 0x30e   : >> { %v28778_v58 = vpop.f32.mrf.mxu1  ;;  %v8819_v3 = vadd.f32 %v28763_v23, %v8738_v59 }
 0x30f   : >> { %v8811_v33 = vpop.f32.mrf.mxu0 }
 0x310   : >> { %v9052_v22 = vpop.f32.mrf.mxu1  ;;  %v8901_v24 = vadd.f32 %v28768_v36, %v8819_v3  ;;  %v8812_v25 = vadd.f32 %v8811_v33, %v8732_v51 }
 0x311   : >> { %v28773_v4 = vpop.f32.mrf.mxu0 }
 0x312   : >> { %v28788_v13 = vpop.f32.mrf.mxu1  ;;  %v8893_v2 = vadd.f32 %v8892_v6, %v8812_v25  ;;  %v8981_v34 = vadd.f32 %v28773_v4, %v8901_v24 }
 0x313   : >> { %v8974_v52 = vpop.f32.mrf.mxu0 }
 0x314   : >> { %v9233_v55 = vpop.f32.mrf.mxu1  ;;  %v9059_v0 = vadd.f32 %v28778_v58, %v8981_v34  ;;  %v8975_v18 = vadd.f32 %v8974_v52, %v8893_v2 }
 0x315   : >> { %v28783_v15 = vpop.f32.mrf.mxu0 }
 0x316   : >> { %v28798_v61 = vpop.f32.mrf.mxu1  ;;  %v9063_v35 = vadd.f32 %v9059_v0, %v8564_v14  ;;  %v9053_v20 = vadd.f32 %v9052_v22, %v8975_v18  ;;  %v9240_v62 = vadd.f32 %v28788_v13, %v28783_v15 }
 0x317   : >> { %v9147_v10 = vpop.f32.mrf.mxu0 }
 0x318   : >> { %v9394_v7 = vpop.f32.mrf.mxu1  ;;  %v9062_v31 = vadd.f32 %v9053_v20, %v8563_v53  ;;  %v9234_v16 = vadd.f32 %v9233_v55, %v9147_v10 }
 0x319   : >> { %v28793_v21 = vpop.f32.mrf.mxu0 }
 0x31a   : >> { %v28808_v54 = vpop.f32.mrf.mxu1  ;;  %v9321_v17 = vadd.f32 %v28793_v21, %v9240_v62 }
 0x31b   : >> { %v9313_v60 = vpop.f32.mrf.mxu0 }
 0x31c   : >> { %v9554_v32 = vpop.f32.mrf.mxu1  ;;  %v9403_v19 = vadd.f32 %v28798_v61, %v9321_v17  ;;  %v9314_v11 = vadd.f32 %v9313_v60, %v9234_v16 }
 0x31d   : >> { %v28803_v5 = vpop.f32.mrf.mxu0 }
 0x31e   : >> { %v28818_v36 = vpop.f32.mrf.mxu1  ;;  %v9395_v1 = vadd.f32 %v9394_v7, %v9314_v11  ;;  %v9483_v59 = vadd.f32 %v28803_v5, %v9403_v19 }
 0x31f   : >> { %v9476_v9 = vpop.f32.mrf.mxu0 }
 0x320   : >> { %v9732_v6 = vpop.f32.mrf.mxu1  ;;  %v9561_v14 = vadd.f32 %v28808_v54, %v9483_v59  ;;  %v9477_v51 = vadd.f32 %v9476_v9, %v9395_v1 }
 0x321   : >> { %v28813_v23 = vpop.f32.mrf.mxu0 }
 0x322   : >> { %v28828_v58 = vpop.f32.mrf.mxu1  ;;  %v9565_v3 = vadd.f32 %v9561_v14, %v9063_v35  ;;  %v9555_v53 = vadd.f32 %v9554_v32, %v9477_v51  ;;  %v9739_v22 = vadd.f32 %v28818_v36, %v28813_v23 }
 0x323   : >> { %v9646_v24 = vpop.f32.mrf.mxu0 }
 0x324   : >> { %v9893_v33 = vpop.f32.mrf.mxu1  ;;  %v9564_v25 = vadd.f32 %v9555_v53, %v9062_v31  ;;  %v9733_v13 = vadd.f32 %v9732_v6, %v9646_v24 }
 0x325   : >> { %v28823_v2 = vpop.f32.mrf.mxu0 }
 0x326   : >> { %v28838_v4 = vpop.f32.mrf.mxu1  ;;  %v9820_v34 = vadd.f32 %v28823_v2, %v9739_v22 }
 0x327   : >> { %v9812_v52 = vpop.f32.mrf.mxu0 }
 0x328   : >> { %v10053_v55 = vpop.f32.mrf.mxu1  ;;  %v9902_v0 = vadd.f32 %v28828_v58, %v9820_v34  ;;  %v9813_v18 = vadd.f32 %v9812_v52, %v9733_v13 }
 0x329   : >> { %v28833_v15 = vpop.f32.mrf.mxu0 }
 0x32a   : >> { %v28848_v61 = vpop.f32.mrf.mxu1  ;;  %v9894_v20 = vadd.f32 %v9893_v33, %v9813_v18  ;;  %v9982_v62 = vadd.f32 %v28833_v15, %v9902_v0 }
 0x32b   : >> { %v9975_v10 = vpop.f32.mrf.mxu0 }
 0x32c   : >> { %v10231_v7 = vpop.f32.mrf.mxu1  ;;  %v10060_v35 = vadd.f32 %v28838_v4, %v9982_v62  ;;  %v9976_v16 = vadd.f32 %v9975_v10, %v9894_v20 }
 0x32d   : >> { %v28843_v21 = vpop.f32.mrf.mxu0 }
 0x32e   : >> { %v28858_v54 = vpop.f32.mrf.mxu1  ;;  %v10064_v17 = vadd.f32 %v10060_v35, %v9565_v3  ;;  %v10054_v31 = vadd.f32 %v10053_v55, %v9976_v16  ;;  %v10238_v32 = vadd.f32 %v28848_v61, %v28843_v21 }
 0x32f   : >> { %v10145_v19 = vpop.f32.mrf.mxu0 }
 0x330   : >> { %v10392_v60 = vpop.f32.mrf.mxu1  ;;  %v10063_v11 = vadd.f32 %v10054_v31, %v9564_v25  ;;  %v10232_v36 = vadd.f32 %v10231_v7, %v10145_v19 }
 0x331   : >> { %v28853_v1 = vpop.f32.mrf.mxu0 }
 0x332   : >> { %v28868_v5 = vpop.f32.mrf.mxu1  ;;  %v10319_v59 = vadd.f32 %v28853_v1, %v10238_v32 }
 0x333   : >> { %v10311_v9 = vpop.f32.mrf.mxu0 }
 0x334   : >> { %v10552_v6 = vpop.f32.mrf.mxu1  ;;  %v10401_v14 = vadd.f32 %v28858_v54, %v10319_v59  ;;  %v10312_v51 = vadd.f32 %v10311_v9, %v10232_v36 }
 0x335   : >> { %v28863_v23 = vpop.f32.mrf.mxu0 }
 0x336   : >> { %v32378_v58 = vpop.f32.mrf.mxu1  ;;  %v10393_v53 = vadd.f32 %v10392_v60, %v10312_v51  ;;  %v10481_v22 = vadd.f32 %v28863_v23, %v10401_v14 }
 0x337   : >> { %v10474_v3 = vpop.f32.mrf.mxu0 }
 0x338   : >> { %v32380_v33 = vpop.f32.mrf.mxu1  ;;  %v10559_v24 = vadd.f32 %v28868_v5, %v10481_v22  ;;  %v10475_v13 = vadd.f32 %v10474_v3, %v10393_v53 }
 0x339   : >> { %v28873_v25 = vpop.f32.mrf.mxu0 }
 0x33a   : >> { %v32382_v4 = vpop.f32.mrf.mxu1  ;;  %v32384_v2 = vadd.f32 %v10559_v24, %v10064_v17  ;;  %v10553_v34 = vadd.f32 %v10552_v6, %v10475_v13  ;;  %v10737_v49 = vadd.f32 %v32378_v58, %v28873_v25 }
 0x33b   : >> { %v10644_v52 = vpop.f32.mrf.mxu0 }
 0x33c   : >> { %34891 = vst [vmem:[#allocation36_spill] sm:$0xff] %v32384_v2  ;;  %v32386_v55 = vpop.f32.mrf.mxu1  ;;  %v32388_v0 = vadd.f32 %v10553_v34, %v10063_v11  ;;  %v10731_v57 = vadd.f32 %v32380_v33, %v10644_v52 }
 0x33d   : >> { %v28883_v61 = vpop.f32.mrf.mxu0 }
 0x33e   : >> { %34892 = vst [vmem:[#allocation37_spill] sm:$0xff] %v32388_v0  ;;  %v32390_v18 = vpop.f32.mrf.mxu1  ;;  %v10818_v63 = vadd.f32 %v28883_v61, %v10737_v49 }
 0x33f   : >> { %v10810_v20 = vpop.f32.mrf.mxu0 }
 0x340   : >> { %v32392_v15 = vpop.f32.mrf.mxu1 }
 0x341   : >> { %v32394_v7 = vpop.f32.mrf.mxu0 }
 0x342   : >> { %v28908_v62 = vpop.f32.mrf.mxu1 }
 0x343   : >> { %v32396_v35 = vpop.f32.mrf.mxu0 }
 0x344   : >> { %v11229_v10 = vpop.f32.mrf.mxu1 }
 0x345   : >> { %v28903_v54 = vpop.f32.mrf.mxu0 }
 0x346   : >> { %v32398_v16 = vpop.f32.mrf.mxu1 }
 0x347   : >> { %v11143_v17 = vpop.f32.mrf.mxu0 }
 0x348   : >> { %v32400_v21 = vpop.f32.mrf.mxu1 }
 0x349   : >> { %v28913_v32 = vpop.f32.mrf.mxu0 }
 0x34a   : >> { %v32402_v31 = vpop.f32.mrf.mxu1 }
 0x34b   : >> { %v11309_v19 = vpop.f32.mrf.mxu0 }
 0x34c   : >> { %v32404_v60 = vpop.f32.mrf.mxu1 }
 0x34d   : >> { %34893 = vst [vmem:[#allocation38_spill] sm:$0xff] %v32404_v60  ;;  %v32406_v36 = vpop.f32.mrf.mxu0 }
 0x34e   : >> { %v28938_v11 = vpop.f32.mrf.mxu1 }
 0x34f   : >> { %v32408_v1 = vpop.f32.mrf.mxu0 }
 0x350   : >> { %v11731_v5 = vpop.f32.mrf.mxu1 }
 0x351   : >> { %v28933_v6 = vpop.f32.mrf.mxu0 }
 0x352   : >> { %v28948_v59 = vpop.f32.mrf.mxu1  ;;  %v11738_v60 = vadd.f32 %v28938_v11, %v28933_v6 }
 0x353   : >> { %v11645_v14 = vpop.f32.mrf.mxu0 }
 0x354   : >> { %v32410_v9 = vpop.f32.mrf.mxu1  ;;  %v11732_v25 = vadd.f32 %v11731_v5, %v11645_v14 }
 0x355   : >> { %v28943_v23 = vpop.f32.mrf.mxu0 }
 0x356   : >> { %v32412_v51 = vpop.f32.mrf.mxu1 }
 0x357   : >> { %34894 = vst [vmem:[#allocation39_spill] sm:$0xff] %v32412_v51  ;;  %v11811_v22 = vpop.f32.mrf.mxu0 }
 0x358   : >> { %v32414_v53 = vpop.f32.mrf.mxu1 }
 0x359   : >> { %34895 = vst [vmem:[#allocation40_spill] sm:$0xff] %v32414_v53  ;;  %v32416_v24 = vpop.f32.mrf.mxu0  ;;  %v10811_v53 = vadd.f32 %v10810_v20, %v10731_v57  ;;  %v11812_v57 = vadd.f32 %v11811_v22, %v11732_v25 }
 0x35a   : >> { %v28968_v3 = vpop.f32.mrf.mxu1 }
 0x35b   : >> { %v32418_v34 = vpop.f32.mrf.mxu0  ;;  %v10892_v49 = vadd.f32 %v32386_v55, %v10811_v53 }
 0x35c   : >> { %v12230_v13 = vpop.f32.mrf.mxu1  ;;  %34896 = vst [vmem:[#allocation41_spill] sm:$0xff] %v32418_v34 }
 0x35d   : >> { %v28963_v26 = vpop.f32.mrf.mxu0 }
 0x35e   : >> { %v28978_v8 = vpop.f32.mrf.mxu1 }
 0x35f   : >> { %v12144_v28 = vpop.f32.mrf.mxu0 }
 0x360   : >> { %v32420_v27 = vpop.f32.mrf.mxu1  ;;  %v12231_v61 = vadd.f32 %v12230_v13, %v12144_v28  ;;  %v34911_v13 = vld [vmem:[#allocation37_spill] sm:$0xff]  ;;  %v34912_v25 = vld [vmem:[#allocation40_spill] sm:$0xff] }
 0x361   : >> { %v28973_v30 = vpop.f32.mrf.mxu0 }
 0x362   : >> { %v32422_v29 = vpop.f32.mrf.mxu1 }
 0x363   : >> { %34897 = vst [vmem:[#allocation42_spill] sm:$0xff] %v32422_v29  ;;  %v12310_v38 = vpop.f32.mrf.mxu0 }
 0x364   : >> { %v32424_v37 = vpop.f32.mrf.mxu1 }
 0x365   : >> { %34898 = vst [vmem:[#allocation43_spill] sm:$0xff] %v32424_v37  ;;  %v32426_v40 = vpop.f32.mrf.mxu0  ;;  %v11236_v37 = vadd.f32 %v28908_v62, %v28903_v54  ;;  %v12311_v54 = vadd.f32 %v12310_v38, %v12231_v61 }
 0x366   : >> { %v28998_v39 = vpop.f32.mrf.mxu1  ;;  %34899 = vst [vmem:[#allocation44_spill] sm:$0xff] %v32426_v40  ;;  %v12237_v40 = vadd.f32 %v28968_v3, %v28963_v26 }
 0x367   : >> { %v32428_v42 = vpop.f32.mrf.mxu0  ;;  %v11317_v51 = vadd.f32 %v28913_v32, %v11236_v37 }
 0x368   : >> { %v12729_v41 = vpop.f32.mrf.mxu1  ;;  %34900 = vst [vmem:[#allocation45_spill] sm:$0xff] %v32428_v42  ;;  %v11230_v42 = vadd.f32 %v11229_v10, %v11143_v17  ;;  %v12318_v20 = vadd.f32 %v28973_v30, %v12237_v40  ;;  %v11893_v40 = vadd.f32 %v32410_v9, %v11812_v57  ;;  %v34907_v9 = vld [vmem:[#allocation36_spill] sm:$0xff] }
 0x369   : >> { %v28993_v44 = vpop.f32.mrf.mxu0  ;;  %v11399_v52 = vadd.f32 %v32398_v16, %v11317_v51  ;;  %v10974_v16 = vadd.f32 %v32396_v35, %v10892_v49  ;;  %v34908_v51 = vld [vmem:[#allocation38_spill] sm:$0xff] }
 0x36a   : >> { %v29008_v43 = vpop.f32.mrf.mxu1  ;;  %v11310_v58 = vadd.f32 %v11309_v19, %v11230_v42  ;;  %v12736_v62 = vadd.f32 %v28998_v39, %v28993_v44  ;;  %v12400_v39 = vadd.f32 %v28978_v8, %v12318_v20 }
 0x36b   : >> { %v12643_v46 = vpop.f32.mrf.mxu0  ;;  %v11479_v28 = vadd.f32 %v32406_v36, %v11399_v52  ;;  %v11052_v11 = vadd.f32 %v32392_v15, %v10974_v16  ;;  %v34913_v52 = vld [vmem:[#allocation42_spill] sm:$0xff] }
 0x36c   : >> { %v32430_v45 = vpop.f32.mrf.mxu1  ;;  %v11391_v42 = vadd.f32 %v32400_v21, %v11310_v58  ;;  %v12730_v17 = vadd.f32 %v12729_v41, %v12643_v46 }
 0x36d   : >> { %34901 = vst [vmem:[#allocation46_spill] sm:$0xff] %v32430_v45  ;;  %v29003_v48 = vpop.f32.mrf.mxu0  ;;  %v11557_v8 = vadd.f32 %v32402_v31, %v11479_v28  ;;  %v34905_v36 = vld [vmem:[#allocation44_spill] sm:$0xff] }
 0x36e   : >> { %v32432_v47 = vpop.f32.mrf.mxu1  ;;  %v12817_v32 = vadd.f32 %v29003_v48, %v12736_v62  ;;  %v11473_v38 = vadd.f32 %v32408_v1, %v11391_v42  ;;  %v12480_v5 = vadd.f32 %v34905_v36, %v12400_v39  ;;  %v34914_v42 = vld [vmem:[#allocation43_spill] sm:$0xff] }
 0x36f   : >> { %34902 = vst [vmem:[#allocation47_spill] sm:$0xff] %v32432_v47  ;;  %v12809_v56 = vpop.f32.mrf.mxu0  ;;  %v10900_v47 = vadd.f32 %v32382_v4, %v10818_v63  ;;  %v34910_v53 = vld [vmem:[#allocation45_spill] sm:$0xff] }
 0x370   : >> { %v32435_v50 = vpop.f32.mrf.mxu1  ;;  %v12810_v30 = vadd.f32 %v12809_v56, %v12730_v17  ;;  %v12899_v48 = vadd.f32 %v29008_v43, %v12817_v32  ;;  %v34904_v56 = vld [vmem:[#allocation41_spill] sm:$0xff]  ;;  %v12558_v57 = vadd.f32 %v34913_v52, %v12480_v5 }
 0x371   : >> { %34903 = vst [vmem:[#allocation48_spill] sm:$0xff] %v32435_v50  ;;  %v29013_v29 = vpop.f32.mrf.mxu0  ;;  %v11819_v50 = vadd.f32 %v28943_v23, %v11738_v60  ;;  %v10980_v63 = vadd.f32 %v32394_v7, %v10900_v47  ;;  %v34909_v23 = vld [vmem:[#allocation39_spill] sm:$0xff] }
 0x372   : >> { %v29028_v12 = vpop.f32.mrf.mxu1 }
 0x373   : >> { %v32438_v2 = vpop.f32.mrf.mxu0  ;;  %v11901_v4 = vadd.f32 %v28948_v59, %v11819_v50  ;;  %v11058_v50 = vadd.f32 %v32390_v18, %v10980_v63 }
 0x374   : >> { %v13228_v0 = vpop.f32.mrf.mxu1  ;;  %v34906_v18 = vld [vmem:[#allocation46_spill] sm:$0xff] }
 0x375   : >> { %v29023_v34 = vpop.f32.mrf.mxu0  ;;  %v11981_v41 = vadd.f32 %v32416_v24, %v11901_v4  ;;  %v12891_v6 = vadd.f32 %v34906_v18, %v12810_v30  ;;  %v11062_v14 = vadd.f32 %v11058_v50, %v34907_v9  ;;  %v12979_v24 = vadd.f32 %v29013_v29, %v12899_v48 }
 0x376   : >> { %v29038_v45 = vpop.f32.mrf.mxu1  ;;  %v13235_v55 = vadd.f32 %v29028_v12, %v29023_v34  ;;  %v12392_v12 = vadd.f32 %v32420_v27, %v12311_v54  ;;  %v11551_v27 = vadd.f32 %v34908_v51, %v11473_v38  ;;  %v11061_v34 = vadd.f32 %v11052_v11, %v34911_v13  ;;  %v34915_v29 = vld [vmem:[#allocation47_spill] sm:$0xff] }
 0x377   : >> { %v13142_v37 = vpop.f32.mrf.mxu0  ;;  %v12059_v43 = vadd.f32 %v34909_v23, %v11981_v41  ;;  %v11561_v58 = vadd.f32 %v11557_v8, %v11062_v14  ;;  %v12973_v61 = vadd.f32 %v32438_v2, %v12891_v6 }
 0x378   : >> { %v13389_v33 = vpop.f32.mrf.mxu1  ;;  %v13229_v19 = vadd.f32 %v13228_v0, %v13142_v37  ;;  %v11975_v0 = vadd.f32 %v34904_v56, %v11893_v40  ;;  %v12474_v22 = vadd.f32 %v34910_v53, %v12392_v12  ;;  %v11560_v62 = vadd.f32 %v11551_v27, %v11061_v34  ;;  %v34916_v39 = vld [vmem:[#allocation48_spill] sm:$0xff] }
 0x379   : >> { %v29033_v26 = vpop.f32.mrf.mxu0  ;;  %v12063_v63 = vadd.f32 %v12059_v43, %v11561_v58 }
 0x37a   : >> { %v32443_v10 = vpop.f32.mrf.mxu1  ;;  %v13316_v47 = vadd.f32 %v29033_v26, %v13235_v55  ;;  %v12053_v49 = vadd.f32 %v34912_v25, %v11975_v0  ;;  %v12552_v4 = vadd.f32 %v34914_v42, %v12474_v22 }
 0x37b   : >> { %v13308_v44 = vpop.f32.mrf.mxu0  ;;  %v12562_v28 = vadd.f32 %v12558_v57, %v12063_v63 }
 0x37c   : >> { %v13549_v60 = vpop.f32.mrf.mxu1  ;;  %v13309_v35 = vadd.f32 %v13308_v44, %v13229_v19  ;;  %v13398_v1 = vadd.f32 %v29038_v45, %v13316_v47  ;;  %v12062_v16 = vadd.f32 %v12053_v49, %v11560_v62  ;;  %v13051_v44 = vadd.f32 %v34916_v39, %v12973_v61 }
 0x37d   : >> { %v29043_v46 = vpop.f32.mrf.mxu0 }
 0x37e   : >> { %v29058_v7 = vpop.f32.mrf.mxu1  ;;  %v13390_v31 = vadd.f32 %v13389_v33, %v13309_v35  ;;  %v13478_v20 = vadd.f32 %v29043_v46, %v13398_v1  ;;  %v13057_v33 = vadd.f32 %v34915_v29, %v12979_v24  ;;  %v12561_v47 = vadd.f32 %v12552_v4, %v12062_v16 }
 0x37f   : >> { %v13471_v59 = vpop.f32.mrf.mxu0 }
 0x380   : >> { %v13727_v21 = vpop.f32.mrf.mxu1  ;;  %v13472_v17 = vadd.f32 %v13471_v59, %v13390_v31  ;;  %v13556_v2 = vadd.f32 %v32443_v10, %v13478_v20  ;;  %v13061_v38 = vadd.f32 %v13057_v33, %v12562_v28  ;;  %v13060_v35 = vadd.f32 %v13051_v44, %v12561_v47  ;;  %v34917_v10 = vld [vmem:[#allocation10_spill] sm:$0xff] }
 0x381   : >> { %v29053_v3 = vpop.f32.mrf.mxu0 }
 0x382   : >> { %v29068_v15 = vpop.f32.mrf.mxu1  ;;  %v13734_v37 = vadd.f32 %v29058_v7, %v29053_v3  ;;  %v13550_v41 = vadd.f32 %v13549_v60, %v13472_v17 }
 0x383   : >> { %v13641_v45 = vpop.f32.mrf.mxu0 }
 0x384   : >> { %v13888_v26 = vpop.f32.mrf.mxu1  ;;  %v13728_v32 = vadd.f32 %v13727_v21, %v13641_v45  ;;  %v13560_v21 = vadd.f32 %v13556_v2, %v13061_v38  ;;  %v13559_v0 = vadd.f32 %v13550_v41, %v13060_v35 }
 0x385   : >> { %v29063_v54 = vpop.f32.mrf.mxu0 }
 0x386   : >> { %v13815_v55 = vadd.f32 %v29063_v54, %v13734_v37  ;;  %v29078_v50 = vpop.f32.mrf.mxu1 }
 0x387   : >> { %v13807_v40 = vpop.f32.mrf.mxu0 }
 0x388   : >> { %v13897_v30 = vadd.f32 %v29068_v15, %v13815_v55  ;;  %v13808_v19 = vadd.f32 %v13807_v40, %v13728_v32  ;;  %v14048_v56 = vpop.f32.mrf.mxu1 }
 0x389   : >> { %v29073_v7 = vpop.f32.mrf.mxu0 }
 0x38a   : >> { %v13889_v12 = vadd.f32 %v13888_v26, %v13808_v19  ;;  %v13977_v46 = vadd.f32 %v29073_v7, %v13897_v30 }
 0x38b   : >> { %v13970_v48 = vpop.f32.mrf.mxu0 }
 0x38c   : >> { %v14055_v11 = vadd.f32 %v29078_v50, %v13977_v46  ;;  %v13971_v8 = vadd.f32 %v13970_v48, %v13889_v12 }
 0x38e   : >> { %v14059_v36 = vadd.f32 %v14055_v11, %v13560_v21  ;;  %v14049_v5 = vadd.f32 %v14048_v56, %v13971_v8 }
 0x390   : >> { %v14067_v59 = vadd.f32 %v34917_v10, %v14059_v36  ;;  %v14058_v18 = vadd.f32 %v14049_v5, %v13559_v0 }
 0x392   : >> { %v14069_v6 = vmax.f32 %v14067_v59, 0.0  ;;  %v14066_v1 = vadd.f32 %v34917_v10, %v14058_v18  ;;  %1572 = sbr.rel (!%p1570_p13) target bundleno = 394 (0x18a), region = 243 }
 0x394   : >> { %14074 = vst.msk [vmem:[%s14070_s14 + $0x8] sm:$0x3] %vm14073_vm10, %v14069_v6  ;;  %v14068_v60 = vmax.f32 %v14066_v1, 0.0 }
 0x396   : >> { %14072 = vst.msk [vmem:[%s14070_s14] sm:$0xff] %vm14071_vm11, %v14068_v60 }
 0x397 LB: >> { %s27325_s15 = sshll.u32 %s30517_s29, 5  ;;  %s27270_s2 = sshll.u32 %s30517_s29, 3  ;;  %vm14121_vm12 = vcmask 126976   ;;  %s30517_s29 = sphi %s32479_s29, %s14080_s29  }
 0x398   : >> { %s14083_s16 = scalar_lea.vmem [#allocation4], %s27325_s15  ;;  %s14120_s25 = scalar_lea.vmem [#allocation5], %s27270_s2 }
 0x399   : >> { %s14080_s29 = sadd.s32 1, %s30517_s29  }
 0x39a   : >> { %p14077_p0 = scmp.ge.s32.totalorder %s14080_s29, 5  }
 0x39b   : > { %v27272_v57 = vld [vmem:[%s34753_s5 + $0x18] sm:$0xff] (%p14077_p0)  ;;  %v27271_v45 = vld [vmem:[%s34753_s5 + $0x10] sm:$0xff] (%p14077_p0)  ;;  %v30520_v20 = vmov (%p14077_p0), 0.0   ;;  %vm30521_vm13 = vmmov (%p14077_p0), 0   ;;  %v14125_v32 = vld [vmem:[%s34753_s5 + $0x8] sm:$0xff] (%p14077_p0)  ;;  %vm25808_vm14 = vcmask (%p14077_p0), 261120  }
 0x39c   : > { %29079 = vmatprep.subr.mxu0 (%p14077_p0), %v30520_v20  ;;  %v14163_v37 = vand.u32 (%p14077_p0), 4294901760, %v27272_v57  ;;  %29086 = vmatprep.subr.mxu1 (%p14077_p0), %v30520_v20  ;;  %v32496_v62 = vand.u32 (%p14077_p0), 4294901760, %v27271_v45  ;;  %v14124_v39 = vld [vmem:[%s34753_s5] sm:$0xff] (%p14077_p0)  ;;  %v32517_v2 = vand.u32 (%p14077_p0), 4294901760, %v14125_v32  ;;  %v27274_v0 = vld [vmem:[%s34753_s5 + $0x28] sm:$0xff] (%p14077_p0)  ;;  %vm26310_vm15 = vcmask (%p14077_p0), 687104  }
 0x39d   : >> { %v14084_v9 = vld [vmem:[%s14083_s16] sm:$0xff]  ;;  %v14085_v14 = vld [vmem:[%s14083_s16 + $0x8] sm:$0x3]  ;;  %v27268_v51 = vld [vmem:[%s14083_s16 + $0x10] sm:$0xff]  ;;  %29083 = vmatprep.mubr.msk.f32.mxu0 (%p14077_p0), %vm30521_vm13, %v30520_v20  ;;  %29090 = vmatprep.mubr.msk.f32.mxu1 (%p14077_p0), %vm30521_vm13, %v30520_v20  ;;  %v32521_v50 = vand.u32 (%p14077_p0), 4294901760, %v14124_v39  ;;  %v32571_v6 = vand.u32 (%p14077_p0), 4294901760, %v27274_v0 }
 0x39e   : >> { %v27269_v27 = vld [vmem:[%s14083_s16 + $0x18] sm:$0x3]  ;;  %v14091_v23 = vmax.f32 %v14084_v9, %v27268_v51  ;;  %29080 = vmatpush3.msra.mxu0 (%p14077_p0), %v14163_v37  ;;  %v14241_v4 = vsub.f32 (%p14077_p0), %v27272_v57, %v14163_v37  ;;  %v14248_v54 = vsub.f32 (%p14077_p0), %v27271_v45, %v32496_v62  ;;  %v32525_v38 = vsub.f32 (%p14077_p0), %v14125_v32, %v32517_v2  ;;  %v27273_v59 = vld [vmem:[%s34753_s5 + $0x20] sm:$0xff] (%p14077_p0)  ;;  %s27319_s13 = sshll.u32 (%p14077_p0), %s30604_s21, 4  ;;  %s26921_s14 = sshll.u32 (%p14077_p0), %s30771_s26, 4  ;;  %s26922_s14 = int_to_ptr.vmem [resolvable:$true] %s26921_s14 }
 0x39f   : >> { %v14092_v43 = vmax.f32 %v14085_v14, %v27269_v27  ;;  %29081 = vmatprep.subr.mxu0 (%p14077_p0), %v30520_v20  ;;  %v32533_v12 = vsub.f32 (%p14077_p0), %v14124_v39, %v32521_v50  ;;  %v32579_v60 = vand.u32 (%p14077_p0), 4294901760, %v27273_v59  ;;  %v32584_v9 = vsub.f32 (%p14077_p0), %v27274_v0, %v32571_v6  ;;  %s26919_s16 = scalar_lea.hbm (%p14077_p0), %s34759_s11, %s27319_s13  ;;  %s34918_s2 = sand.u32 (%p14077_p0), 1, %s30493_s18  }
 0x3a0   : >> { %v14094_v53 = vrot.slane %v14091_v23, 1  ;;  %29082 = vmatpush3.msra.mxu0 (%p14077_p0), %v32496_v62  ;;  %v14242_v33 = vand.u32 (%p14077_p0), 4294901760, %v14241_v4  ;;  %v14249_v17 = vand.u32 (%p14077_p0), 4294901760, %v14248_v54  ;;  %v14704_v46 = vand.u32 (%p14077_p0), 4294901760, %v32525_v38  ;;  %s30425_s30 = scalar_lea.vmem (%p14077_p0), %s26922_s14, 16  ;;  %s30522_s12 = smov (%p14077_p0), [#allocation6]  }
 0x3a1   : >> { %v14098_v22 = vrot.slane %v14092_v43, 1  ;;  %29093 = vmatprep.subr.mxu0 (%p14077_p0), %v30520_v20  ;;  %v14711_v35 = vand.u32 (%p14077_p0), 4294901760, %v32533_v12  ;;  %v32595_v51 = vsub.f32 (%p14077_p0), %v27273_v59, %v32579_v60  ;;  %v15170_v27 = vand.u32 (%p14077_p0), 4294901760, %v32584_v9  ;;  %p30426_p1 = scmp.ne.s32.totalorder (%p14077_p0), %s26922_s14, %s30425_s30  ;;  %s30429_s24 = sshll.u32 (%p14077_p0), %s30522_s12, 4  ;;  %s30430_s24 = int_to_ptr.vmem [resolvable:$false] %s30429_s24 }
 0x3a2   : >> { %v14096_v3 = vmax.f32 %v14091_v23, %v14094_v53  ;;  %v14243_v28 = vsub.f32 (%p14077_p0), %v14241_v4, %v14242_v33  ;;  %v14250_v40 = vsub.f32 (%p14077_p0), %v14248_v54, %v14249_v17  ;;  %v14705_v21 = vsub.f32 (%p14077_p0), %v32525_v38, %v14704_v46  ;;  %s30431_s21 = scalar_lea.vmem (%p14077_p0), %s30430_s24, 32  ;;  %p30432_p4 = scmp.lt.s32.totalorder (%p14077_p0), %s26922_s14, %s30430_s24 }
 0x3a3   : >> { %v14100_v15 = vmax.f32 %v14092_v43, %v14098_v22  ;;  %v14712_v56 = vsub.f32 (%p14077_p0), %v32533_v12, %v14711_v35  ;;  %v15177_v43 = vand.u32 (%p14077_p0), 4294901760, %v32595_v51  ;;  %v15171_v53 = vsub.f32 (%p14077_p0), %v32584_v9, %v15170_v27  ;;  %p30427_p2 = pnand (%p14077_p0), %p30426_p1, %p30621_p5  ;;  %p30433_p7 = scmp.lt.s32.totalorder (%p14077_p0), %s30431_s21, %s30425_s30 }
 0x3a4   : >> { %v14102_v24 = vrot.slane %v14096_v3, 1  ;;  %v14104_v31 = vrot.slane %v14096_v3, 2  ;;  %v14106_v13 = vrot.slane %v14096_v3, 3  ;;  %v14244_v30 = vand.u32 (%p14077_p0), 4294901760, %v14243_v28 }
 0x3a5   : >> { %v14109_v34 = vrot.slane %v14100_v15, 4  ;;  %v14251_v19 = vand.u32 (%p14077_p0), 4294901760, %v14250_v40  ;;  %v14706_v36 = vand.u32 (%p14077_p0), 4294901760, %v14705_v21  ;;  %v14713_v18 = vand.u32 (%p14077_p0), 4294901760, %v14712_v56  ;;  %p30428_p3 = pneg (%p14077_p0), %p30427_p2  ;;  %p30434_p8 = por (%p14077_p0), %p30433_p7, %p30432_p4 }
 0x3a6   : >> { %v14112_v58 = vsel %vm1493_vm2, %v14096_v3, %v14102_v24  ;;  %14079 = sbr.rel (!%p14077_p0) target bundleno = 919 (0x397), region = 254  ;;  %29087 = vmatpush3.msra.mxu1 (%p14077_p0), %v14244_v30  ;;  %v15178_v15 = vsub.f32 (%p14077_p0), %v32595_v51, %v15177_v43  ;;  %v27276_v24 = vld [vmem:[%s34753_s5 + $0x38] sm:$0xff] (%p14077_p0)  ;;  %vm26894_vm0 = vcmask (%p14077_p0), 73728  }
 0x3a7   : >> { %v14114_v25 = vsel %vm1495_vm3, %v14112_v58, %v14104_v31  ;;  %29088 = vmatprep.subr.mxu1 (%p14077_p0), %v30520_v20  ;;  %v15172_v31 = vand.u32 (%p14077_p0), 4294901760, %v15171_v53  ;;  %v27275_v58 = vld [vmem:[%s34753_s5 + $0x30] sm:$0xff] (%p14077_p0)  ;;  %p30435_p9 = pnand (%p14077_p0), %p30434_p8, %p30428_p3 }
 0x3a8   : >> { %v14116_v49 = vsel %vm1497_vm4, %v14114_v25, %v14106_v13  ;;  %29089 = vmatpush3.msra.mxu1 (%p14077_p0), %v14251_v19  ;;  %v15179_v25 = vand.u32 (%p14077_p0), 4294901760, %v15178_v15  ;;  %v32647_v57 = vand.u32 (%p14077_p0), 4294901760, %v27275_v58 }
 0x3a9   : >> { %v14118_v52 = vsel %vm1499_vm5, %v14116_v49, %v14109_v34  ;;  %29100 = vmatprep.subr.mxu1 (%p14077_p0), %v30520_v20  ;;  %v32639_v49 = vand.u32 (%p14077_p0), 4294901760, %v27276_v24 }
 0x3aa   : >> { %14122 = vst.msk [vmem:[%s14120_s25] sm:$0x1f] %vm14121_vm12, %v14118_v52  ;;  %s26909_s25 = scalar_lea.sflag (%p14077_p0), [#allocation7], %s34918_s2 }
 0x3ab   : > { %v32652_v45 = vsub.f32 %v27276_v24, %v32639_v49 }
 0x3b1   : > { %v14126_v61 = vld [vmem:[#allocation5 + $0x1] sm:$0x1]  ;;  %v14123_v26 = vld [vmem:[#allocation5] sm:$0x1]  ;;  %v15055_v8 = vld [vmem:[#allocation5 + $0x2] sm:$0x1] }
 0x3b2   : > { %v14132_v63 = vsel %vm14071_vm11, %v14126_v61, 0  ;;  %v14594_v16 = vsel %vm14071_vm11, %v14123_v26, 0  ;;  %v15060_v5 = vsel %vm14071_vm11, %v15055_v8, 0  ;;  %v15522_v3 = vld [vmem:[#allocation5 + $0x3] sm:$0x1]  ;;  %v27279_v8 = vld [vmem:[%s34753_s5 + $0x50] sm:$0xff] }
 0x3b3   : > { %v32501_v42 = vand.u32 4294901760, %v14132_v63  ;;  %v32519_v47 = vand.u32 4294901760, %v14594_v16  ;;  %v32575_v1 = vand.u32 4294901760, %v15060_v5  ;;  %v15527_v13 = vsel %vm14071_vm11, %v15522_v3, 0  ;;  %v15989_v26 = vld [vmem:[#allocation5 + $0x4] sm:$0x1] }
 0x3b4   : > { %v32643_v52 = vand.u32 4294901760, %v15527_v13  ;;  %v15994_v32 = vsel %vm14071_vm11, %v15989_v26, 0  ;;  %v27281_v3 = vld [vmem:[%s34753_s5 + $0x60] sm:$0xff]  ;;  %v27283_v26 = vld [vmem:[%s34753_s5 + $0x70] sm:$0xff] }
 0x3b5   : > { %v14202_v29 = vsub.f32 %v14132_v63, %v32501_v42  ;;  %v32528_v41 = vsub.f32 %v14594_v16, %v32519_v47  ;;  %29091 = vmatmul.mubr.f32.vlgmr.msra.gmra.mxu1 %v32501_v42  ;;  %v32590_v14 = vsub.f32 %v15060_v5, %v32575_v1  ;;  %v27277_v16 = vld [vmem:[%s34753_s5 + $0x40] sm:$0xff]  ;;  %v32711_v39 = vand.u32 4294901760, %v15994_v32 }
 0x3b6   : > { %29101 = vmatpush3.msra.mxu1 %v14163_v37  ;;  %29104 = vmatprep.mubr.msk.f32.mxu1 %vm30521_vm13, %v30520_v20  ;;  %v32658_v61 = vsub.f32 %v15527_v13, %v32643_v52  ;;  %v32783_v5 = vand.u32 4294901760, %v27279_v8  ;;  %v32851_v13 = vand.u32 4294901760, %v27281_v3 }
 0x3b7   : > { %v14203_v55 = vand.u32 4294901760, %v14202_v29  ;;  %29102 = vmatprep.subr.mxu1 %v30520_v20  ;;  %v14665_v48 = vand.u32 4294901760, %v32528_v41  ;;  %v15131_v23 = vand.u32 4294901760, %v32590_v14  ;;  %v32726_v30 = vsub.f32 %v15994_v32, %v32711_v39 }
 0x3b8   : > { %29103 = vmatpush3.msra.mxu1 %v32496_v62  ;;  %v15598_v63 = vand.u32 4294901760, %v32658_v61  ;;  %v32919_v32 = vand.u32 4294901760, %v27283_v26 }
 0x3b9   : > { %v14204_v44 = vsub.f32 %v14202_v29, %v14203_v55  ;;  %29105 = vmatmul.mubr.f32.vlgmr.msra.gmra.mxu1 %v14203_v55  ;;  %29114 = vmatprep.subr.mxu1 %v30520_v20  ;;  %v14666_v11 = vsub.f32 %v32528_v41, %v14665_v48  ;;  %v15132_v22 = vsub.f32 %v32590_v14, %v15131_v23 }
 0x3ba   : > { %29115 = vmatpush3.msra.mxu1 %v14163_v37  ;;  %29118 = vmatprep.mubr.msk.f32.mxu1 %vm30521_vm13, %v30520_v20  ;;  %v32663_v37 = vsub.f32 %v27275_v58, %v32647_v57 }
 0x3bb   : > { %v14205_v7 = vand.u32 4294901760, %v14204_v44  ;;  %29116 = vmatprep.subr.mxu1 %v30520_v20  ;;  %v14667_v10 = vand.u32 4294901760, %v14666_v11  ;;  %v15133_v34 = vand.u32 4294901760, %v15132_v22  ;;  %v32715_v44 = vand.u32 4294901760, %v27277_v16 }
 0x3bc   : > { %29117 = vmatpush3.msra.mxu1 %v32496_v62  ;;  %v15637_v62 = vand.u32 4294901760, %v32652_v45 }
 0x3bd   : > { %29084 = vmatmul.mubr.f32.vlgmr.msra.gmra.mxu0 %v14205_v7  ;;  %29119 = vmatmul.mubr.f32.vlgmr.msra.gmra.mxu1 %v32501_v42  ;;  %v32731_v19 = vsub.f32 %v27277_v16, %v32715_v44  ;;  %v16065_v7 = vand.u32 4294901760, %v32726_v30 }
 0x3be   : > { %29094 = vmatpush3.msra.mxu0 %v14241_v4  ;;  %29097 = vmatprep.mubr.msk.f32.mxu0 %vm30521_vm13, %v30520_v20  ;;  %v15638_v4 = vsub.f32 %v32652_v45, %v15637_v62 }
 0x3bf   : > { %29095 = vmatprep.subr.mxu0 %v30520_v20  ;;  %29128 = vmatprep.subr.mxu1 %v30520_v20 }
 0x3c0   : > { %29096 = vmatpush3.msra.mxu0 %v14248_v54  ;;  %29129 = vmatpush3.msra.mxu1 %v14706_v36  ;;  %v15599_v54 = vsub.f32 %v32658_v61, %v15598_v63 }
 0x3c1   : > { %29098 = vmatmul.mubr.f32.vlgmr.msra.gmra.mxu0 %v14202_v29  ;;  %29107 = vmatprep.subr.mxu0 %v30520_v20 }
 0x3c2   : > { %29108 = vmatpush3.msra.mxu0 %v14242_v33  ;;  %29111 = vmatprep.mubr.msk.f32.mxu0 %vm30521_vm13, %v30520_v20  ;;  %v27278_v33 = vld [vmem:[%s34753_s5 + $0x48] sm:$0xff]  ;;  %v15600_v55 = vand.u32 4294901760, %v15599_v54 }
 0x3c3   : > { %29109 = vmatprep.subr.mxu0 %v30520_v20  ;;  %29130 = vmatprep.subr.mxu1 %v30520_v20  ;;  %v32707_v40 = vand.u32 4294901760, %v27278_v33 }
 0x3c4   : > { %29110 = vmatpush3.msra.mxu0 %v14249_v17  ;;  %29131 = vmatpush3.msra.mxu1 %v14713_v18  ;;  %v15639_v17 = vand.u32 4294901760, %v15638_v4  ;;  %v32799_v18 = vsub.f32 %v27279_v8, %v32783_v5 }
 0x3c5   : > { %29112 = vmatmul.mubr.f32.vlgmr.msra.gmra.mxu0 %v32501_v42  ;;  %29121 = vmatprep.subr.mxu0 %v30520_v20  ;;  %v15644_v42 = vand.u32 4294901760, %v32663_v37 }
 0x3c6   : > { %29122 = vmatpush3.msra.mxu0 %v32517_v2  ;;  %29125 = vmatprep.mubr.msk.f32.mxu0 %vm30521_vm13, %v30520_v20 }
 0x3c7   : > { %29123 = vmatprep.subr.mxu0 %v30520_v20  ;;  %29132 = vmatprep.mubr.msk.f32.mxu1 %vm30521_vm13, %v30520_v20  ;;  %v15645_v29 = vsub.f32 %v32663_v37, %v15644_v42 }
 0x3c8   : > { %29124 = vmatpush3.msra.mxu0 %v32521_v50  ;;  %29133 = vmatmul.mubr.f32.vlgmr.msra.gmra.mxu1 %v32519_v47 }
 0x3c9   : > { %29126 = vmatmul.mubr.f32.vlgmr.msra.gmra.mxu0 %v14667_v10  ;;  %29135 = vmatprep.subr.mxu0 %v30520_v20  ;;  %v15646_v28 = vand.u32 4294901760, %v15645_v29 }
 0x3ca   : > { %29136 = vmatpush3.msra.mxu0 %v32525_v38  ;;  %29142 = vmatprep.subr.mxu1 %v30520_v20 }
 0x3cb   : > { %29137 = vmatprep.subr.mxu0 %v30520_v20  ;;  %29139 = vmatprep.mubr.msk.f32.mxu0 %vm30521_vm13, %v30520_v20 }
 0x3cc   : > { %29138 = vmatpush3.msra.mxu0 %v32533_v12  ;;  %29143 = vmatpush3.msra.mxu1 %v32517_v2  ;;  %v16457_v12 = vld [vmem:[#allocation5 + $0x8] sm:$0x1] }
 0x3cd   : > { %29140 = vmatmul.mubr.f32.vlgmr.msra.gmra.mxu0 %v32528_v41  ;;  %29144 = vmatprep.subr.mxu1 %v30520_v20  ;;  %v16066_v41 = vsub.f32 %v32726_v30, %v16065_v7  ;;  %v16462_v21 = vsel %vm14071_vm11, %v16457_v12, 0  ;;  %v27285_v12 = vld [vmem:[%s34753_s5 + $0x80] sm:$0xff] }
 0x3ce   : > { %29149 = vmatprep.subr.mxu0 %v30520_v20  ;;  %29145 = vmatpush3.msra.mxu1 %v32521_v50  ;;  %v32779_v36 = vand.u32 4294901760, %v16462_v21 }
 0x3cf   : > { %29146 = vmatprep.mubr.msk.f32.mxu1 %vm30521_vm13, %v30520_v20  ;;  %29150 = vmatpush3.msra.mxu0 %v14704_v46  ;;  %v16067_v11 = vand.u32 4294901760, %v16066_v41 }
 0x3d0   : > { %29147 = vmatmul.mubr.f32.vlgmr.msra.gmra.mxu1 %v14665_v48  ;;  %29151 = vmatprep.subr.mxu0 %v30520_v20  ;;  %v27280_v48 = vld [vmem:[%s34753_s5 + $0x58] sm:$0xff]  ;;  %v32794_v59 = vsub.f32 %v16462_v21, %v32779_v36  ;;  %v32987_v21 = vand.u32 4294901760, %v27285_v12 }
 0x3d1   : > { %29156 = vmatprep.subr.mxu1 %v30520_v20  ;;  %29152 = vmatpush3.msra.mxu0 %v14711_v35  ;;  %v32775_v0 = vand.u32 4294901760, %v27280_v48 }
 0x3d2   : > { %29153 = vmatprep.mubr.msk.f32.mxu0 %vm30521_vm13, %v30520_v20  ;;  %29157 = vmatpush3.msra.mxu1 %v32517_v2  ;;  %v32720_v2 = vsub.f32 %v27278_v33, %v32707_v40 }
 0x3d3   : > { %29154 = vmatmul.mubr.f32.vlgmr.msra.gmra.mxu0 %v32519_v47  ;;  %29158 = vmatprep.subr.mxu1 %v30520_v20  ;;  %v32788_v10 = vsub.f32 %v27280_v48, %v32775_v0 }
 0x3d4   : > { %29163 = vmatprep.subr.mxu0 %v30520_v20  ;;  %29159 = vmatpush3.msra.mxu1 %v32521_v50  ;;  %v16111_v50 = vand.u32 4294901760, %v32731_v19 }
 0x3d5   : > { %29160 = vmatprep.mubr.msk.f32.mxu1 %vm30521_vm13, %v30520_v20  ;;  %29164 = vmatpush3.msra.mxu0 %v32571_v6 }
 0x3d6   : > { %29161 = vmatmul.mubr.f32.vlgmr.msra.gmra.mxu1 %v32519_v47  ;;  %29165 = vmatprep.subr.mxu0 %v30520_v20  ;;  %v16104_v47 = vand.u32 4294901760, %v32720_v2  ;;  %v16112_v46 = vsub.f32 %v32731_v19, %v16111_v50 }
 0x3d7   : > { %29170 = vmatprep.subr.mxu1 %v30520_v20  ;;  %29166 = vmatpush3.msra.mxu0 %v32579_v60 }
 0x3d8   : > { %29167 = vmatprep.mubr.msk.f32.mxu0 %vm30521_vm13, %v30520_v20  ;;  %29171 = vmatpush3.msra.mxu1 %v15172_v31  ;;  %v16105_v38 = vsub.f32 %v32720_v2, %v16104_v47  ;;  %v16113_v56 = vand.u32 4294901760, %v16112_v46 }
 0x3d9   : > { %29168 = vmatmul.mubr.f32.vlgmr.msra.gmra.mxu0 %v15133_v34  ;;  %29172 = vmatprep.subr.mxu1 %v30520_v20 }
 0x3da   : > { %29177 = vmatprep.subr.mxu0 %v30520_v20  ;;  %29173 = vmatpush3.msra.mxu1 %v15179_v25  ;;  %v16106_v35 = vand.u32 4294901760, %v16105_v38  ;;  %v32867_v25 = vsub.f32 %v27281_v3, %v32851_v13 }
 0x3db   : > { %29174 = vmatprep.mubr.msk.f32.mxu1 %vm30521_vm13, %v30520_v20  ;;  %29178 = vmatpush3.msra.mxu0 %v32584_v9 }
 0x3dc   : > { %29175 = vmatmul.mubr.f32.vlgmr.msra.gmra.mxu1 %v32575_v1  ;;  %29179 = vmatprep.subr.mxu0 %v30520_v20 }
 0x3dd   : > { %29184 = vmatprep.subr.mxu1 %v30520_v20  ;;  %29180 = vmatpush3.msra.mxu0 %v32595_v51  ;;  %v16924_v51 = vld [vmem:[#allocation5 + $0x9] sm:$0x1] }
 0x3de   : > { %29181 = vmatprep.mubr.msk.f32.mxu0 %vm30521_vm13, %v30520_v20  ;;  %29185 = vmatpush3.msra.mxu1 %v32571_v6  ;;  %v16929_v53 = vsel %vm14071_vm11, %v16924_v51, 0  ;;  %v27287_v51 = vld [vmem:[%s34753_s5 + $0x90] sm:$0xff] }
 0x3df   : > { %29182 = vmatmul.mubr.f32.vlgmr.msra.gmra.mxu0 %v32590_v14  ;;  %29186 = vmatprep.subr.mxu1 %v30520_v20  ;;  %v32847_v31 = vand.u32 4294901760, %v16929_v53 }
 0x3e0   : > { %29191 = vmatprep.subr.mxu0 %v30520_v20  ;;  %29187 = vmatpush3.msra.mxu1 %v32579_v60 }
 0x3e1   : > { %29188 = vmatprep.mubr.msk.f32.mxu1 %vm30521_vm13, %v30520_v20  ;;  %29192 = vmatpush3.msra.mxu0 %v15170_v27  ;;  %v32862_v58 = vsub.f32 %v16929_v53, %v32847_v31  ;;  %v33055_v53 = vand.u32 4294901760, %v27287_v51 }
 0x3e2   : > { %29189 = vmatmul.mubr.f32.vlgmr.msra.gmra.mxu1 %v15131_v23  ;;  %29193 = vmatprep.subr.mxu0 %v30520_v20  ;;  %v27282_v23 = vld [vmem:[%s34753_s5 + $0x68] sm:$0xff] }
 0x3e3   : > { %29198 = vmatprep.subr.mxu1 %v30520_v20  ;;  %29194 = vmatpush3.msra.mxu0 %v15177_v43  ;;  %v32843_v24 = vand.u32 4294901760, %v27282_v23 }
 0x3e4   : > { %29195 = vmatprep.mubr.msk.f32.mxu0 %vm30521_vm13, %v30520_v20  ;;  %29199 = vmatpush3.msra.mxu1 %v32571_v6  ;;  %v16572_v6 = vand.u32 4294901760, %v32788_v10 }
 0x3e5   : > { %29196 = vmatmul.mubr.f32.vlgmr.msra.gmra.mxu0 %v32575_v1  ;;  %29200 = vmatprep.subr.mxu1 %v30520_v20  ;;  %v32856_v34 = vsub.f32 %v27282_v23, %v32843_v24 }
 0x3e6   : > { %29205 = vmatprep.subr.mxu0 %v30520_v20  ;;  %29201 = vmatpush3.msra.mxu1 %v32579_v60  ;;  %v16579_v60 = vand.u32 4294901760, %v32799_v18  ;;  %v16573_v9 = vsub.f32 %v32788_v10, %v16572_v6 }
 0x3e7   : > { %29202 = vmatprep.mubr.msk.f32.mxu1 %vm30521_vm13, %v30520_v20  ;;  %29206 = vmatpush3.msra.mxu0 %v32639_v49 }
 0x3e8   : > { %29203 = vmatmul.mubr.f32.vlgmr.msra.gmra.mxu1 %v32575_v1  ;;  %29207 = vmatprep.subr.mxu0 %v30520_v20  ;;  %v16533_v1 = vand.u32 4294901760, %v32794_v59  ;;  %v16580_v27 = vsub.f32 %v32799_v18, %v16579_v60  ;;  %v16574_v43 = vand.u32 4294901760, %v16573_v9 }
 0x3e9   : > { %29212 = vmatprep.subr.mxu1 %v30520_v20  ;;  %29208 = vmatpush3.msra.mxu0 %v32647_v57 }
 0x3ea   : > { %29209 = vmatprep.mubr.msk.f32.mxu0 %vm30521_vm13, %v30520_v20  ;;  %29213 = vmatpush3.msra.mxu1 %v15639_v17  ;;  %v16534_v14 = vsub.f32 %v32794_v59, %v16533_v1  ;;  %v16581_v15 = vand.u32 4294901760, %v16580_v27 }
 0x3eb   : > { %29210 = vmatmul.mubr.f32.vlgmr.msra.gmra.mxu0 %v15600_v55  ;;  %29214 = vmatprep.subr.mxu1 %v30520_v20 }
 0x3ec   : > { %29219 = vmatprep.subr.mxu0 %v30520_v20  ;;  %29215 = vmatpush3.msra.mxu1 %v15646_v28  ;;  %v16535_v22 = vand.u32 4294901760, %v16534_v14  ;;  %v32935_v28 = vsub.f32 %v27283_v26, %v32919_v32 }
 0x3ed   : > { %29216 = vmatprep.mubr.msk.f32.mxu1 %vm30521_vm13, %v30520_v20  ;;  %29220 = vmatpush3.msra.mxu0 %v32652_v45 }
 0x3ee   : > { %29217 = vmatmul.mubr.f32.vlgmr.msra.gmra.mxu1 %v32643_v52  ;;  %29221 = vmatprep.subr.mxu0 %v30520_v20 }
 0x3ef   : > { %29226 = vmatprep.subr.mxu1 %v30520_v20  ;;  %29222 = vmatpush3.msra.mxu0 %v32663_v37  ;;  %v17391_v37 = vld [vmem:[#allocation5 + $0xa] sm:$0x1] }
 0x3f0   : > { %29223 = vmatprep.mubr.msk.f32.mxu0 %vm30521_vm13, %v30520_v20  ;;  %29227 = vmatpush3.msra.mxu1 %v32639_v49  ;;  %v17396_v4 = vsel %vm14071_vm11, %v17391_v37, 0  ;;  %v27289_v37 = vld [vmem:[%s34753_s5 + $0xa0] sm:$0xff] }
 0x3f1   : > { %29224 = vmatmul.mubr.f32.vlgmr.msra.gmra.mxu0 %v32658_v61  ;;  %29228 = vmatprep.subr.mxu1 %v30520_v20  ;;  %v32915_v17 = vand.u32 4294901760, %v17396_v4 }
 0x3f2   : > { %29233 = vmatprep.subr.mxu0 %v30520_v20  ;;  %29229 = vmatpush3.msra.mxu1 %v32647_v57 }
 0x3f3   : > { %29230 = vmatprep.mubr.msk.f32.mxu1 %vm30521_vm13, %v30520_v20  ;;  %29234 = vmatpush3.msra.mxu0 %v15637_v62  ;;  %v32930_v16 = vsub.f32 %v17396_v4, %v32915_v17  ;;  %v33123_v4 = vand.u32 4294901760, %v27289_v37 }
 0x3f4   : > { %29231 = vmatmul.mubr.f32.vlgmr.msra.gmra.mxu1 %v15598_v63  ;;  %29235 = vmatprep.subr.mxu0 %v30520_v20  ;;  %v27284_v63 = vld [vmem:[%s34753_s5 + $0x78] sm:$0xff] }
 0x3f5   : > { %29240 = vmatprep.subr.mxu1 %v30520_v20  ;;  %29236 = vmatpush3.msra.mxu0 %v15644_v42  ;;  %v32911_v33 = vand.u32 4294901760, %v27284_v63 }
 0x3f6   : > { %29237 = vmatprep.mubr.msk.f32.mxu0 %vm30521_vm13, %v30520_v20  ;;  %29241 = vmatpush3.msra.mxu1 %v32639_v49  ;;  %v17039_v49 = vand.u32 4294901760, %v32856_v34 }
 0x3f7   : > { %29238 = vmatmul.mubr.f32.vlgmr.msra.gmra.mxu0 %v32643_v52  ;;  %29242 = vmatprep.subr.mxu1 %v30520_v20  ;;  %v32924_v55 = vsub.f32 %v27284_v63, %v32911_v33 }
 0x3f8   : > { %29247 = vmatprep.subr.mxu0 %v30520_v20  ;;  %29243 = vmatpush3.msra.mxu1 %v32647_v57  ;;  %v17046_v57 = vand.u32 4294901760, %v32867_v25  ;;  %v17040_v45 = vsub.f32 %v32856_v34, %v17039_v49 }
 0x3f9   : > { %29244 = vmatprep.mubr.msk.f32.mxu1 %vm30521_vm13, %v30520_v20  ;;  %29248 = vmatpush3.msra.mxu0 %v32707_v40 }
 0x3fa   : > { %29245 = vmatmul.mubr.f32.vlgmr.msra.gmra.mxu1 %v32643_v52  ;;  %29249 = vmatprep.subr.mxu0 %v30520_v20  ;;  %v17000_v52 = vand.u32 4294901760, %v32862_v58  ;;  %v17047_v62 = vsub.f32 %v32867_v25, %v17046_v57  ;;  %v17041_v42 = vand.u32 4294901760, %v17040_v45 }
 0x3fb   : > { %29254 = vmatprep.subr.mxu1 %v30520_v20  ;;  %29250 = vmatpush3.msra.mxu0 %v32715_v44 }
 0x3fc   : > { %29251 = vmatprep.mubr.msk.f32.mxu0 %vm30521_vm13, %v30520_v20  ;;  %29255 = vmatpush3.msra.mxu1 %v16106_v35  ;;  %v17001_v61 = vsub.f32 %v32862_v58, %v17000_v52  ;;  %v17048_v29 = vand.u32 4294901760, %v17047_v62 }
 0x3fd   : > { %29252 = vmatmul.mubr.f32.vlgmr.msra.gmra.mxu0 %v16067_v11  ;;  %29256 = vmatprep.subr.mxu1 %v30520_v20 }
 0x3fe   : > { %29261 = vmatprep.subr.mxu0 %v30520_v20  ;;  %29257 = vmatpush3.msra.mxu1 %v16113_v56  ;;  %v17002_v54 = vand.u32 4294901760, %v17001_v61  ;;  %v33003_v56 = vsub.f32 %v27285_v12, %v32987_v21 }
 0x3ff   : > { %29258 = vmatprep.mubr.msk.f32.mxu1 %vm30521_vm13, %v30520_v20  ;;  %29262 = vmatpush3.msra.mxu0 %v32720_v2 }
 0x400   : > { %29259 = vmatmul.mubr.f32.vlgmr.msra.gmra.mxu1 %v32711_v39  ;;  %29263 = vmatprep.subr.mxu0 %v30520_v20 }
 0x401   : > { %29268 = vmatprep.subr.mxu1 %v30520_v20  ;;  %29264 = vmatpush3.msra.mxu0 %v32731_v19  ;;  %v17858_v19 = vld [vmem:[#allocation5 + $0xb] sm:$0x1] }
 0x402   : > { %29265 = vmatprep.mubr.msk.f32.mxu0 %vm30521_vm13, %v30520_v20  ;;  %29269 = vmatpush3.msra.mxu1 %v32707_v40  ;;  %v17863_v38 = vsel %vm14071_vm11, %v17858_v19, 0  ;;  %v27291_v19 = vld [vmem:[%s34753_s5 + $0xb0] sm:$0xff] }
 0x403   : > { %29266 = vmatmul.mubr.f32.vlgmr.msra.gmra.mxu0 %v32726_v30  ;;  %29270 = vmatprep.subr.mxu1 %v30520_v20  ;;  %v32983_v35 = vand.u32 4294901760, %v17863_v38 }
 0x404   : > { %29275 = vmatprep.subr.mxu0 %v30520_v20  ;;  %29271 = vmatpush3.msra.mxu1 %v32715_v44 }
 0x405   : > { %29272 = vmatprep.mubr.msk.f32.mxu1 %vm30521_vm13, %v30520_v20  ;;  %29276 = vmatpush3.msra.mxu0 %v16104_v47  ;;  %v32998_v8 = vsub.f32 %v17863_v38, %v32983_v35  ;;  %v33191_v38 = vand.u32 4294901760, %v27291_v19 }
 0x406   : > { %29273 = vmatmul.mubr.f32.vlgmr.msra.gmra.mxu1 %v16065_v7  ;;  %29277 = vmatprep.subr.mxu0 %v30520_v20  ;;  %v27286_v7 = vld [vmem:[%s34753_s5 + $0x88] sm:$0xff] }
 0x407   : > { %29282 = vmatprep.subr.mxu1 %v30520_v20  ;;  %29278 = vmatpush3.msra.mxu0 %v16111_v50  ;;  %v32979_v48 = vand.u32 4294901760, %v27286_v7 }
 0x408   : > { %29279 = vmatprep.mubr.msk.f32.mxu0 %vm30521_vm13, %v30520_v20  ;;  %29283 = vmatpush3.msra.mxu1 %v32707_v40  ;;  %v17506_v40 = vand.u32 4294901760, %v32924_v55 }
 0x409   : > { %29280 = vmatmul.mubr.f32.vlgmr.msra.gmra.mxu0 %v32711_v39  ;;  %29284 = vmatprep.subr.mxu1 %v30520_v20  ;;  %v32992_v11 = vsub.f32 %v27286_v7, %v32979_v48 }
 0x40a   : > { %29289 = vmatprep.subr.mxu0 %v30520_v20  ;;  %29285 = vmatpush3.msra.mxu1 %v32715_v44  ;;  %v17513_v44 = vand.u32 4294901760, %v32935_v28  ;;  %v17507_v2 = vsub.f32 %v32924_v55, %v17506_v40 }
 0x40b   : > { %29286 = vmatprep.mubr.msk.f32.mxu1 %vm30521_vm13, %v30520_v20  ;;  %29290 = vmatpush3.msra.mxu0 %v32775_v0 }
 0x40c   : > { %29287 = vmatmul.mubr.f32.vlgmr.msra.gmra.mxu1 %v32711_v39  ;;  %29291 = vmatprep.subr.mxu0 %v30520_v20  ;;  %v17467_v39 = vand.u32 4294901760, %v32930_v16  ;;  %v17514_v47 = vsub.f32 %v32935_v28, %v17513_v44  ;;  %v17508_v50 = vand.u32 4294901760, %v17507_v2 }
 0x40d   : > { %29296 = vmatprep.subr.mxu1 %v30520_v20  ;;  %29292 = vmatpush3.msra.mxu0 %v32783_v5 }
 0x40e   : > { %29293 = vmatprep.mubr.msk.f32.mxu0 %vm30521_vm13, %v30520_v20  ;;  %29297 = vmatpush3.msra.mxu1 %v16574_v43  ;;  %v17468_v30 = vsub.f32 %v32930_v16, %v17467_v39  ;;  %v17515_v46 = vand.u32 4294901760, %v17514_v47 }
 0x40f   : > { %29294 = vmatmul.mubr.f32.vlgmr.msra.gmra.mxu0 %v16535_v22  ;;  %29298 = vmatprep.subr.mxu1 %v30520_v20 }
 0x410   : > { %29303 = vmatprep.subr.mxu0 %v30520_v20  ;;  %29299 = vmatpush3.msra.mxu1 %v16581_v15  ;;  %v17469_v41 = vand.u32 4294901760, %v17468_v30  ;;  %v33071_v15 = vsub.f32 %v27287_v51, %v33055_v53 }
 0x411   : > { %29300 = vmatprep.mubr.msk.f32.mxu1 %vm30521_vm13, %v30520_v20  ;;  %29304 = vmatpush3.msra.mxu0 %v32788_v10 }
 0x412   : > { %29301 = vmatmul.mubr.f32.vlgmr.msra.gmra.mxu1 %v32779_v36  ;;  %29305 = vmatprep.subr.mxu0 %v30520_v20 }
 0x413   : > { %29310 = vmatprep.subr.mxu1 %v30520_v20  ;;  %29306 = vmatpush3.msra.mxu0 %v32799_v18  ;;  %v18325_v18 = vld [vmem:[#allocation5 + $0xc] sm:$0x1] }
 0x414   : > { %29307 = vmatprep.mubr.msk.f32.mxu0 %vm30521_vm13, %v30520_v20  ;;  %29311 = vmatpush3.msra.mxu1 %v32775_v0  ;;  %v18330_v9 = vsel %vm14071_vm11, %v18325_v18, 0 }
 0x415   : > { %29308 = vmatmul.mubr.f32.vlgmr.msra.gmra.mxu0 %v32794_v59  ;;  %29312 = vmatprep.subr.mxu1 %v30520_v20  ;;  %v33051_v43 = vand.u32 4294901760, %v18330_v9 }
 0x416   : > { %29317 = vmatprep.subr.mxu0 %v30520_v20  ;;  %29313 = vmatpush3.msra.mxu1 %v32783_v5 }
 0x417   : > { %29314 = vmatprep.mubr.msk.f32.mxu1 %vm30521_vm13, %v30520_v20  ;;  %29318 = vmatpush3.msra.mxu0 %v16572_v6  ;;  %v33066_v3 = vsub.f32 %v18330_v9, %v33051_v43 }
 0x418   : > { %29315 = vmatmul.mubr.f32.vlgmr.msra.gmra.mxu1 %v16533_v1  ;;  %29319 = vmatprep.subr.mxu0 %v30520_v20  ;;  %v27288_v1 = vld [vmem:[%s34753_s5 + $0x98] sm:$0xff] }
 0x419   : > { %29324 = vmatprep.subr.mxu1 %v30520_v20  ;;  %29320 = vmatpush3.msra.mxu0 %v16579_v60  ;;  %v33047_v23 = vand.u32 4294901760, %v27288_v1 }
 0x41a   : > { %29321 = vmatprep.mubr.msk.f32.mxu0 %vm30521_vm13, %v30520_v20  ;;  %29325 = vmatpush3.msra.mxu1 %v32775_v0  ;;  %v17973_v0 = vand.u32 4294901760, %v32992_v11 }
 0x41b   : > { %29322 = vmatmul.mubr.f32.vlgmr.msra.gmra.mxu0 %v32779_v36  ;;  %29326 = vmatprep.subr.mxu1 %v30520_v20  ;;  %v33060_v22 = vsub.f32 %v27288_v1, %v33047_v23 }
 0x41c   : > { %29331 = vmatprep.subr.mxu0 %v30520_v20  ;;  %29327 = vmatpush3.msra.mxu1 %v32783_v5  ;;  %v17980_v5 = vand.u32 4294901760, %v33003_v56  ;;  %v17974_v10 = vsub.f32 %v32992_v11, %v17973_v0 }
 0x41d   : > { %29328 = vmatprep.mubr.msk.f32.mxu1 %vm30521_vm13, %v30520_v20  ;;  %29332 = vmatpush3.msra.mxu0 %v32843_v24 }
 0x41e   : > { %29329 = vmatmul.mubr.f32.vlgmr.msra.gmra.mxu1 %v32779_v36  ;;  %29333 = vmatprep.subr.mxu0 %v30520_v20  ;;  %v17934_v36 = vand.u32 4294901760, %v32998_v8  ;;  %v17981_v6 = vsub.f32 %v33003_v56, %v17980_v5  ;;  %v17975_v60 = vand.u32 4294901760, %v17974_v10 }
 0x41f   : > { %29338 = vmatprep.subr.mxu1 %v30520_v20  ;;  %29334 = vmatpush3.msra.mxu0 %v32851_v13 }
 0x420   : > { %29335 = vmatprep.mubr.msk.f32.mxu0 %vm30521_vm13, %v30520_v20  ;;  %29339 = vmatpush3.msra.mxu1 %v17041_v42  ;;  %v17935_v59 = vsub.f32 %v32998_v8, %v17934_v36  ;;  %v17982_v27 = vand.u32 4294901760, %v17981_v6  ;;  %v27293_v6 = vld [vmem:[%s34753_s5 + $0xc0] sm:$0xff] }
 0x421   : > { %29336 = vmatmul.mubr.f32.vlgmr.msra.gmra.mxu0 %v17002_v54  ;;  %29340 = vmatprep.subr.mxu1 %v30520_v20 }
 0x422   : > { %29345 = vmatprep.subr.mxu0 %v30520_v20  ;;  %29341 = vmatpush3.msra.mxu1 %v17048_v29  ;;  %v17936_v14 = vand.u32 4294901760, %v17935_v59  ;;  %v33139_v29 = vsub.f32 %v27289_v37, %v33123_v4 }
 0x423   : > { %29342 = vmatprep.mubr.msk.f32.mxu1 %vm30521_vm13, %v30520_v20  ;;  %29346 = vmatpush3.msra.mxu0 %v32856_v34 }
 0x424   : > { %29343 = vmatmul.mubr.f32.vlgmr.msra.gmra.mxu1 %v32847_v31  ;;  %29347 = vmatprep.subr.mxu0 %v30520_v20 }
 0x425   : > { %29352 = vmatprep.subr.mxu1 %v30520_v20  ;;  %29348 = vmatpush3.msra.mxu0 %v32867_v25  ;;  %v18793_v25 = vld [vmem:[#allocation5 + $0x10] sm:$0x1] }
 0x426   : > { %29349 = vmatprep.mubr.msk.f32.mxu0 %vm30521_vm13, %v30520_v20  ;;  %29353 = vmatpush3.msra.mxu1 %v32843_v24  ;;  %v18798_v45 = vsel %vm14071_vm11, %v18793_v25, 0 }
 0x427   : > { %29350 = vmatmul.mubr.f32.vlgmr.msra.gmra.mxu0 %v32862_v58  ;;  %29354 = vmatprep.subr.mxu1 %v30520_v20  ;;  %v33119_v42 = vand.u32 4294901760, %v18798_v45 }
 0x428   : > { %29359 = vmatprep.subr.mxu0 %v30520_v20  ;;  %29355 = vmatpush3.msra.mxu1 %v32851_v13 }
 0x429   : > { %29356 = vmatprep.mubr.msk.f32.mxu1 %vm30521_vm13, %v30520_v20  ;;  %29360 = vmatpush3.msra.mxu0 %v17039_v49  ;;  %v33134_v26 = vsub.f32 %v18798_v45, %v33119_v42 }
 0x42a   : > { %29357 = vmatmul.mubr.f32.vlgmr.msra.gmra.mxu1 %v17000_v52  ;;  %29361 = vmatprep.subr.mxu0 %v30520_v20  ;;  %v27290_v52 = vld [vmem:[%s34753_s5 + $0xa8] sm:$0xff] }
 0x42b   : > { %29366 = vmatprep.subr.mxu1 %v30520_v20  ;;  %29362 = vmatpush3.msra.mxu0 %v17046_v57  ;;  %v33115_v63 = vand.u32 4294901760, %v27290_v52 }
 0x42c   : > { %29363 = vmatprep.mubr.msk.f32.mxu0 %vm30521_vm13, %v30520_v20  ;;  %29367 = vmatpush3.msra.mxu1 %v32843_v24  ;;  %v18440_v24 = vand.u32 4294901760, %v33060_v22 }
 0x42d   : > { %29364 = vmatmul.mubr.f32.vlgmr.msra.gmra.mxu0 %v32847_v31  ;;  %29368 = vmatprep.subr.mxu1 %v30520_v20  ;;  %v33128_v54 = vsub.f32 %v27290_v52, %v33115_v63 }
 0x42e   : > { %29373 = vmatprep.subr.mxu0 %v30520_v20  ;;  %29369 = vmatpush3.msra.mxu1 %v32851_v13  ;;  %v18447_v13 = vand.u32 4294901760, %v33071_v15  ;;  %v18441_v34 = vsub.f32 %v33060_v22, %v18440_v24 }
 0x42f   : > { %29370 = vmatprep.mubr.msk.f32.mxu1 %vm30521_vm13, %v30520_v20  ;;  %29374 = vmatpush3.msra.mxu0 %v32911_v33 }
 0x430   : > { %29371 = vmatmul.mubr.f32.vlgmr.msra.gmra.mxu1 %v32847_v31  ;;  %29375 = vmatprep.subr.mxu0 %v30520_v20  ;;  %v18401_v31 = vand.u32 4294901760, %v33066_v3  ;;  %v18448_v49 = vsub.f32 %v33071_v15, %v18447_v13  ;;  %v18442_v57 = vand.u32 4294901760, %v18441_v34 }
 0x431   : > { %29380 = vmatprep.subr.mxu1 %v30520_v20  ;;  %29376 = vmatpush3.msra.mxu0 %v32919_v32 }
 0x432   : > { %29377 = vmatprep.mubr.msk.f32.mxu0 %vm30521_vm13, %v30520_v20  ;;  %29381 = vmatpush3.msra.mxu1 %v17508_v50  ;;  %v18402_v58 = vsub.f32 %v33066_v3, %v18401_v31  ;;  %v18449_v62 = vand.u32 4294901760, %v18448_v49 }
 0x433   : > { %29378 = vmatmul.mubr.f32.vlgmr.msra.gmra.mxu0 %v17469_v41  ;;  %29382 = vmatprep.subr.mxu1 %v30520_v20 }
 0x434   : > { %29387 = vmatprep.subr.mxu0 %v30520_v20  ;;  %29383 = vmatpush3.msra.mxu1 %v17515_v46  ;;  %v18403_v61 = vand.u32 4294901760, %v18402_v58  ;;  %v33207_v46 = vsub.f32 %v27291_v19, %v33191_v38 }
 0x435   : > { %29384 = vmatprep.mubr.msk.f32.mxu1 %vm30521_vm13, %v30520_v20  ;;  %29388 = vmatpush3.msra.mxu0 %v32924_v55 }
 0x436   : > { %29385 = vmatmul.mubr.f32.vlgmr.msra.gmra.mxu1 %v32915_v17  ;;  %29389 = vmatprep.subr.mxu0 %v30520_v20 }
 0x437   : > { %29394 = vmatprep.subr.mxu1 %v30520_v20  ;;  %29390 = vmatpush3.msra.mxu0 %v32935_v28  ;;  %v19260_v28 = vld [vmem:[#allocation5 + $0x11] sm:$0x1] }
 0x438   : > { %29391 = vmatprep.mubr.msk.f32.mxu0 %vm30521_vm13, %v30520_v20  ;;  %29395 = vmatpush3.msra.mxu1 %v32911_v33  ;;  %v19265_v2 = vsel %vm14071_vm11, %v19260_v28, 0  ;;  %v27295_v28 = vld [vmem:[%s34753_s5 + $0xd0] sm:$0xff] }
 0x439   : > { %29392 = vmatmul.mubr.f32.vlgmr.msra.gmra.mxu0 %v32930_v16  ;;  %29396 = vmatprep.subr.mxu1 %v30520_v20  ;;  %v33187_v50 = vand.u32 4294901760, %v19265_v2 }
 0x43a   : > { %29401 = vmatprep.subr.mxu0 %v30520_v20  ;;  %29397 = vmatpush3.msra.mxu1 %v32919_v32 }
 0x43b   : > { %29398 = vmatprep.mubr.msk.f32.mxu1 %vm30521_vm13, %v30520_v20  ;;  %29402 = vmatpush3.msra.mxu0 %v17506_v40  ;;  %v33202_v12 = vsub.f32 %v19265_v2, %v33187_v50 }
 0x43c   : > { %29399 = vmatmul.mubr.f32.vlgmr.msra.gmra.mxu1 %v17467_v39  ;;  %29403 = vmatprep.subr.mxu0 %v30520_v20  ;;  %v27292_v39 = vld [vmem:[%s34753_s5 + $0xb8] sm:$0xff] }
 0x43d   : > { %29408 = vmatprep.subr.mxu1 %v30520_v20  ;;  %29404 = vmatpush3.msra.mxu0 %v17513_v44  ;;  %v33183_v7 = vand.u32 4294901760, %v27292_v39 }
 0x43e   : > { %29405 = vmatprep.mubr.msk.f32.mxu0 %vm30521_vm13, %v30520_v20  ;;  %29409 = vmatpush3.msra.mxu1 %v32911_v33  ;;  %v18908_v33 = vand.u32 4294901760, %v33128_v54 }
 0x43f   : > { %29406 = vmatmul.mubr.f32.vlgmr.msra.gmra.mxu0 %v32915_v17  ;;  %29410 = vmatprep.subr.mxu1 %v30520_v20  ;;  %v33196_v41 = vsub.f32 %v27292_v39, %v33183_v7 }
 0x440   : > { %29415 = vmatprep.subr.mxu0 %v30520_v20  ;;  %29411 = vmatpush3.msra.mxu1 %v32919_v32  ;;  %v18915_v32 = vand.u32 4294901760, %v33139_v29  ;;  %v18909_v55 = vsub.f32 %v33128_v54, %v18908_v33 }
 0x441   : > { %29412 = vmatprep.mubr.msk.f32.mxu1 %vm30521_vm13, %v30520_v20  ;;  %29416 = vmatpush3.msra.mxu0 %v32979_v48 }
 0x442   : > { %29413 = vmatmul.mubr.f32.vlgmr.msra.gmra.mxu1 %v32915_v17  ;;  %29417 = vmatprep.subr.mxu0 %v30520_v20  ;;  %v18869_v17 = vand.u32 4294901760, %v33134_v26  ;;  %v18916_v40 = vsub.f32 %v33139_v29, %v18915_v32  ;;  %v18910_v44 = vand.u32 4294901760, %v18909_v55 }
 0x443   : > { %29422 = vmatprep.subr.mxu1 %v30520_v20  ;;  %29418 = vmatpush3.msra.mxu0 %v32987_v21 }
 0x444   : > { %29419 = vmatprep.mubr.msk.f32.mxu0 %vm30521_vm13, %v30520_v20  ;;  %29423 = vmatpush3.msra.mxu1 %v17975_v60  ;;  %v18870_v16 = vsub.f32 %v33134_v26, %v18869_v17  ;;  %v18917_v47 = vand.u32 4294901760, %v18916_v40 }
 0x445   : > { %29420 = vmatmul.mubr.f32.vlgmr.msra.gmra.mxu0 %v17936_v14  ;;  %29424 = vmatprep.subr.mxu1 %v30520_v20 }
 0x446   : > { %29429 = vmatprep.subr.mxu0 %v30520_v20  ;;  %29425 = vmatpush3.msra.mxu1 %v17982_v27  ;;  %v18871_v30 = vand.u32 4294901760, %v18870_v16 }
 0x447   : > { %29426 = vmatprep.mubr.msk.f32.mxu1 %vm30521_vm13, %v30520_v20  ;;  %29430 = vmatpush3.msra.mxu0 %v32992_v11 }
 0x448   : > { %29427 = vmatmul.mubr.f32.vlgmr.msra.gmra.mxu1 %v32983_v35  ;;  %29431 = vmatprep.subr.mxu0 %v30520_v20 }
 0x449   : > { %29436 = vmatprep.subr.mxu1 %v30520_v20  ;;  %29432 = vmatpush3.msra.mxu0 %v33003_v56  ;;  %v19727_v56 = vld [vmem:[#allocation5 + $0x12] sm:$0x1] }
 0x44a   : > { %29433 = vmatprep.mubr.msk.f32.mxu0 %vm30521_vm13, %v30520_v20  ;;  %29437 = vmatpush3.msra.mxu1 %v32979_v48  ;;  %v19732_v10 = vsel %vm14071_vm11, %v19727_v56, 0 }
 0x44b   : > { %29434 = vmatmul.mubr.f32.vlgmr.msra.gmra.mxu0 %v32998_v8  ;;  %29438 = vmatprep.subr.mxu1 %v30520_v20  ;;  %v33259_v51 = vand.u32 4294901760, %v19732_v10 }
 0x44c   : > { %29443 = vmatprep.subr.mxu0 %v30520_v20  ;;  %29439 = vmatpush3.msra.mxu1 %v32987_v21 }
 0x44d   : > { %29440 = vmatprep.mubr.msk.f32.mxu1 %vm30521_vm13, %v30520_v20  ;;  %29444 = vmatpush3.msra.mxu0 %v17973_v0 }
 0x44e   : > { %29441 = vmatmul.mubr.f32.vlgmr.msra.gmra.mxu1 %v17934_v36  ;;  %29445 = vmatprep.subr.mxu0 %v30520_v20  ;;  %v27294_v36 = vld [vmem:[%s34753_s5 + $0xc8] sm:$0xff] }
 0x44f   : > { %29450 = vmatprep.subr.mxu1 %v30520_v20  ;;  %29446 = vmatpush3.msra.mxu0 %v17980_v5  ;;  %v33255_v60 = vand.u32 4294901760, %v27294_v36 }
 0x450   : > { %29447 = vmatprep.mubr.msk.f32.mxu0 %vm30521_vm13, %v30520_v20  ;;  %29451 = vmatpush3.msra.mxu1 %v32979_v48  ;;  %v19375_v48 = vand.u32 4294901760, %v33196_v41 }
 0x451   : > { %29448 = vmatmul.mubr.f32.vlgmr.msra.gmra.mxu0 %v32983_v35  ;;  %29452 = vmatprep.subr.mxu1 %v30520_v20 }
 0x452   : > { %29457 = vmatprep.subr.mxu0 %v30520_v20  ;;  %29453 = vmatpush3.msra.mxu1 %v32987_v21  ;;  %v19382_v21 = vand.u32 4294901760, %v33207_v46  ;;  %v19376_v11 = vsub.f32 %v33196_v41, %v19375_v48 }
 0x453   : > { %29454 = vmatprep.mubr.msk.f32.mxu1 %vm30521_vm13, %v30520_v20  ;;  %29458 = vmatpush3.msra.mxu0 %v33047_v23 }
 0x454   : > { %29455 = vmatmul.mubr.f32.vlgmr.msra.gmra.mxu1 %v32983_v35  ;;  %29459 = vmatprep.subr.mxu0 %v30520_v20  ;;  %v19336_v35 = vand.u32 4294901760, %v33202_v12  ;;  %v19383_v0 = vsub.f32 %v33207_v46, %v19382_v21  ;;  %v19377_v5 = vand.u32 4294901760, %v19376_v11 }
 0x455   : > { %29464 = vmatprep.subr.mxu1 %v30520_v20  ;;  %29460 = vmatpush3.msra.mxu0 %v33055_v53 }
 0x456   : > { %29461 = vmatprep.mubr.msk.f32.mxu0 %vm30521_vm13, %v30520_v20  ;;  %29465 = vmatpush3.msra.mxu1 %v18442_v57  ;;  %v19337_v8 = vsub.f32 %v33202_v12, %v19336_v35  ;;  %v19384_v1 = vand.u32 4294901760, %v19383_v0 }
 0x457   : > { %29462 = vmatmul.mubr.f32.vlgmr.msra.gmra.mxu0 %v18403_v61  ;;  %29466 = vmatprep.subr.mxu1 %v30520_v20 }
 0x458   : > { %29471 = vmatprep.subr.mxu0 %v30520_v20  ;;  %29467 = vmatpush3.msra.mxu1 %v18449_v62  ;;  %v19338_v18 = vand.u32 4294901760, %v19337_v8 }
 0x459   : > { %29468 = vmatprep.mubr.msk.f32.mxu1 %vm30521_vm13, %v30520_v20  ;;  %29472 = vmatpush3.msra.mxu0 %v33060_v22  ;;  %v33268_v22 = vsub.f32 %v27294_v36, %v33255_v60 }
 0x45a   : > { %29469 = vmatmul.mubr.f32.vlgmr.msra.gmra.mxu1 %v33051_v43  ;;  %29473 = vmatprep.subr.mxu0 %v30520_v20 }
 0x45b   : > { %29478 = vmatprep.subr.mxu1 %v30520_v20  ;;  %29474 = vmatpush3.msra.mxu0 %v33071_v15  ;;  %v33274_v15 = vsub.f32 %v19732_v10, %v33259_v51  ;;  %v19842_v58 = vand.u32 4294901760, %v33268_v22 }
 0x45c   : > { %29475 = vmatprep.mubr.msk.f32.mxu0 %vm30521_vm13, %v30520_v20  ;;  %29479 = vmatpush3.msra.mxu1 %v33047_v23 }
 0x45d   : > { %29476 = vmatmul.mubr.f32.vlgmr.msra.gmra.mxu0 %v33066_v3  ;;  %29480 = vmatprep.subr.mxu1 %v30520_v20  ;;  %v19803_v49 = vand.u32 4294901760, %v33274_v15  ;;  %v19843_v37 = vsub.f32 %v33268_v22, %v19842_v58 }
 0x45e   : > { %29485 = vmatprep.subr.mxu0 %v30520_v20  ;;  %29481 = vmatpush3.msra.mxu1 %v33055_v53 }
 0x45f   : > { %29482 = vmatprep.mubr.msk.f32.mxu1 %vm30521_vm13, %v30520_v20  ;;  %29486 = vmatpush3.msra.mxu0 %v18440_v24 }
 0x460   : > { %29483 = vmatmul.mubr.f32.vlgmr.msra.gmra.mxu1 %v18401_v31  ;;  %29487 = vmatprep.subr.mxu0 %v30520_v20 }
 0x461   : > { %29492 = vmatprep.subr.mxu1 %v30520_v20  ;;  %29488 = vmatpush3.msra.mxu0 %v18447_v13 }
 0x462   : > { %29489 = vmatprep.mubr.msk.f32.mxu0 %vm30521_vm13, %v30520_v20  ;;  %29493 = vmatpush3.msra.mxu1 %v33047_v23  ;;  %v33263_v23 = vand.u32 4294901760, %v27293_v6 }
 0x463   : > { %29490 = vmatmul.mubr.f32.vlgmr.msra.gmra.mxu0 %v33051_v43  ;;  %29494 = vmatprep.subr.mxu1 %v30520_v20 }
 0x464   : > { %29499 = vmatprep.subr.mxu0 %v30520_v20  ;;  %29495 = vmatpush3.msra.mxu1 %v33055_v53  ;;  %v33279_v31 = vsub.f32 %v27293_v6, %v33263_v23 }
 0x465   : > { %29496 = vmatprep.mubr.msk.f32.mxu1 %vm30521_vm13, %v30520_v20  ;;  %29500 = vmatpush3.msra.mxu0 %v33115_v63 }
 0x466   : > { %29497 = vmatmul.mubr.f32.vlgmr.msra.gmra.mxu1 %v33051_v43  ;;  %29501 = vmatprep.subr.mxu0 %v30520_v20  ;;  %v19849_v57 = vand.u32 4294901760, %v33279_v31 }
 0x467   : > { %29506 = vmatprep.subr.mxu1 %v30520_v20  ;;  %29502 = vmatpush3.msra.mxu0 %v33123_v4 }
 0x468   : > { %29503 = vmatprep.mubr.msk.f32.mxu0 %vm30521_vm13, %v30520_v20  ;;  %29507 = vmatpush3.msra.mxu1 %v18910_v44 }
 0x469   : > { %29504 = vmatmul.mubr.f32.vlgmr.msra.gmra.mxu0 %v18871_v30  ;;  %29508 = vmatprep.subr.mxu1 %v30520_v20 }
 0x46a   : > { %29513 = vmatprep.subr.mxu0 %v30520_v20  ;;  %29509 = vmatpush3.msra.mxu1 %v18917_v47  ;;  %v33339_v47 = vand.u32 4294901760, %v27295_v28 }
 0x46b   : > { %29510 = vmatprep.mubr.msk.f32.mxu1 %vm30521_vm13, %v30520_v20  ;;  %29514 = vmatpush3.msra.mxu0 %v33128_v54  ;;  %v19850_v54 = vsub.f32 %v33279_v31, %v19849_v57 }
 0x46c   : > { %29511 = vmatmul.mubr.f32.vlgmr.msra.gmra.mxu1 %v33119_v42  ;;  %29515 = vmatprep.subr.mxu0 %v30520_v20 }
 0x46d   : > { %29520 = vmatprep.subr.mxu1 %v30520_v20  ;;  %29516 = vmatpush3.msra.mxu0 %v33139_v29  ;;  %v27296_v29 = vld [vmem:[%s34753_s5 + $0xd8] sm:$0xff]  ;;  %v19851_v39 = vand.u32 4294901760, %v19850_v54 }
 0x46e   : > { %29517 = vmatprep.mubr.msk.f32.mxu0 %vm30521_vm13, %v30520_v20  ;;  %29521 = vmatpush3.msra.mxu1 %v33115_v63  ;;  %v33331_v44 = vand.u32 4294901760, %v27296_v29 }
 0x46f   : > { %29518 = vmatmul.mubr.f32.vlgmr.msra.gmra.mxu0 %v33134_v26  ;;  %29522 = vmatprep.subr.mxu1 %v30520_v20 }
 0x470   : > { %29527 = vmatprep.subr.mxu0 %v30520_v20  ;;  %29523 = vmatpush3.msra.mxu1 %v33123_v4 }
 0x471   : > { %29524 = vmatprep.mubr.msk.f32.mxu1 %vm30521_vm13, %v30520_v20  ;;  %29528 = vmatpush3.msra.mxu0 %v18908_v33 }
 0x472   : > { %29525 = vmatmul.mubr.f32.vlgmr.msra.gmra.mxu1 %v18869_v17  ;;  %29529 = vmatprep.subr.mxu0 %v30520_v20  ;;  %v19844_v17 = vand.u32 4294901760, %v19843_v37 }
 0x473   : > { %29534 = vmatprep.subr.mxu1 %v30520_v20  ;;  %29530 = vmatpush3.msra.mxu0 %v18915_v32 }
 0x474   : > { %29531 = vmatprep.mubr.msk.f32.mxu0 %vm30521_vm13, %v30520_v20  ;;  %29535 = vmatpush3.msra.mxu1 %v33115_v63  ;;  %v19804_v63 = vsub.f32 %v33274_v15, %v19803_v49 }
 0x475   : > { %29532 = vmatmul.mubr.f32.vlgmr.msra.gmra.mxu0 %v33119_v42  ;;  %29536 = vmatprep.subr.mxu1 %v30520_v20  ;;  %v14288_v14 = vpop.f32.mrf.mxu1 }
 0x476   : > { %29541 = vmatprep.subr.mxu0 %v30520_v20  ;;  %29537 = vmatpush3.msra.mxu1 %v33123_v4  ;;  %v19805_v16 = vand.u32 4294901760, %v19804_v63 }
 0x477   : > { %29538 = vmatprep.mubr.msk.f32.mxu1 %vm30521_vm13, %v30520_v20  ;;  %29542 = vmatpush3.msra.mxu0 %v33183_v7  ;;  %v29092_v43 = vpop.f32.mrf.mxu1 }
 0x478   : > { %29539 = vmatmul.mubr.f32.vlgmr.msra.gmra.mxu1 %v33119_v42  ;;  %29543 = vmatprep.subr.mxu0 %v30520_v20  ;;  %v20194_v42 = vld [vmem:[#allocation5 + $0x13] sm:$0x1]  ;;  %v27298_v43 = vld [vmem:[%s34753_s5 + $0xe8] sm:$0xff] }
 0x479   : > { %29548 = vmatprep.subr.mxu1 %v30520_v20  ;;  %29544 = vmatpush3.msra.mxu0 %v33191_v38  ;;  %v14439_v13 = vpop.f32.mrf.mxu1  ;;  %v20199_v32 = vsel %vm14071_vm11, %v20194_v42, 0 }
 0x47a   : > { %29545 = vmatprep.mubr.msk.f32.mxu0 %vm30521_vm13, %v30520_v20  ;;  %29549 = vmatpush3.msra.mxu1 %v19377_v5  ;;  %v33335_v30 = vand.u32 4294901760, %v20199_v32 }
 0x47b   : > { %29546 = vmatmul.mubr.f32.vlgmr.msra.gmra.mxu0 %v19338_v18  ;;  %29550 = vmatprep.subr.mxu1 %v30520_v20  ;;  %v29106_v25 = vpop.f32.mrf.mxu1 }
 0x47c   : > { %29555 = vmatprep.subr.mxu0 %v30520_v20  ;;  %29551 = vmatpush3.msra.mxu1 %v19384_v1  ;;  %v20661_v1 = vld [vmem:[#allocation5 + $0x14] sm:$0x1] }
 0x47d   : > { %v14207_v59 = vpop.f32.mrf.mxu0  ;;  %29552 = vmatprep.mubr.msk.f32.mxu1 %vm30521_vm13, %v30520_v20  ;;  %29556 = vmatpush3.msra.mxu0 %v33196_v41  ;;  %v14589_v62 = vpop.f32.mrf.mxu1 }
 0x47e   : > { %v14289_v27 = vadd.f32 %v14288_v14, %v14207_v59  ;;  %29553 = vmatmul.mubr.f32.vlgmr.msra.gmra.mxu1 %v33187_v50  ;;  %29557 = vmatprep.subr.mxu0 %v30520_v20 }
 0x47f   : > { %v29085_v9 = vpop.f32.mrf.mxu0  ;;  %29562 = vmatprep.subr.mxu1 %v30520_v20  ;;  %29558 = vmatpush3.msra.mxu0 %v33207_v46  ;;  %v29120_v26 = vpop.f32.mrf.mxu1 }
 0x480   : > { %29559 = vmatprep.mubr.msk.f32.mxu0 %vm30521_vm13, %v30520_v20  ;;  %29563 = vmatpush3.msra.mxu1 %v33183_v7 }
 0x481   : > { %v14364_v53 = vpop.f32.mrf.mxu0  ;;  %29560 = vmatmul.mubr.f32.vlgmr.msra.gmra.mxu0 %v33202_v12  ;;  %29564 = vmatprep.subr.mxu1 %v30520_v20  ;;  %v33350_v12 = vsub.f32 %v20199_v32, %v33335_v30 }
 0x482   : > { %v14365_v3 = vadd.f32 %v14364_v53, %v14289_v27  ;;  %29569 = vmatprep.subr.mxu0 %v30520_v20  ;;  %29565 = vmatpush3.msra.mxu1 %v33191_v38 }
 0x483   : > { %v29099_v24 = vpop.f32.mrf.mxu0  ;;  %29566 = vmatprep.mubr.msk.f32.mxu1 %vm30521_vm13, %v30520_v20  ;;  %29570 = vmatpush3.msra.mxu0 %v19375_v48  ;;  %v33355_v48 = vsub.f32 %v27295_v28, %v33339_v47  ;;  %v20270_v56 = vand.u32 4294901760, %v33350_v12  ;;  %v21129_v28 = vld [vmem:[#allocation5 + $0x18] sm:$0x1] }
 0x484   : > { %v14440_v34 = vadd.f32 %v14439_v13, %v14365_v3  ;;  %29567 = vmatmul.mubr.f32.vlgmr.msra.gmra.mxu1 %v19336_v35  ;;  %29571 = vmatprep.subr.mxu0 %v30520_v20 }
 0x485   : > { %v14516_v52 = vpop.f32.mrf.mxu0  ;;  %29576 = vmatprep.subr.mxu1 %v30520_v20  ;;  %29572 = vmatpush3.msra.mxu0 %v19382_v21  ;;  %v20316_v36 = vand.u32 4294901760, %v33355_v48  ;;  %v20271_v6 = vsub.f32 %v33350_v12, %v20270_v56 }
 0x486   : > { %v14517_v45 = vadd.f32 %v14516_v52, %v14440_v34  ;;  %29573 = vmatprep.mubr.msk.f32.mxu0 %vm30521_vm13, %v30520_v20  ;;  %29577 = vmatpush3.msra.mxu1 %v33183_v7 }
 0x487   : > { %v29113_v61 = vpop.f32.mrf.mxu0  ;;  %29574 = vmatmul.mubr.f32.vlgmr.msra.gmra.mxu0 %v33187_v50  ;;  %29578 = vmatprep.subr.mxu1 %v30520_v20  ;;  %v20317_v14 = vsub.f32 %v33355_v48, %v20316_v36  ;;  %v20272_v3 = vand.u32 4294901760, %v20271_v6 }
 0x488   : > { %v14590_v4 = vadd.f32 %v14589_v62, %v14517_v45  ;;  %29583 = vmatprep.subr.mxu0 %v30520_v20  ;;  %29579 = vmatpush3.msra.mxu1 %v33191_v38  ;;  %v14750_v2 = vpop.f32.mrf.mxu1  ;;  %v33344_v38 = vsub.f32 %v27296_v29, %v33331_v44 }
 0x489   : > { %v14669_v33 = vpop.f32.mrf.mxu0  ;;  %29580 = vmatprep.mubr.msk.f32.mxu1 %vm30521_vm13, %v30520_v20  ;;  %29584 = vmatpush3.msra.mxu0 %v33255_v60 }
 0x48a   : > { %v14670_v55 = vadd.f32 %v14669_v33, %v14590_v4  ;;  %29581 = vmatmul.mubr.f32.vlgmr.msra.gmra.mxu1 %v33187_v50  ;;  %29585 = vmatprep.subr.mxu0 %v30520_v20  ;;  %v29134_v7 = vpop.f32.mrf.mxu1  ;;  %v20309_v11 = vand.u32 4294901760, %v33344_v38 }
 0x48b   : > { %v29127_v40 = vpop.f32.mrf.mxu0  ;;  %29590 = vmatprep.subr.mxu1 %v30520_v20  ;;  %29586 = vmatpush3.msra.mxu0 %v33263_v23 }
 0x48c   : > { %v14751_v19 = vadd.f32 %v14750_v2, %v14670_v55  ;;  %29587 = vmatprep.mubr.msk.f32.mxu0 %vm30521_vm13, %v30520_v20  ;;  %29591 = vmatpush3.msra.mxu1 %v19844_v17  ;;  %v20310_v59 = vsub.f32 %v33344_v38, %v20309_v11 }
 0x48d   : > { %29588 = vmatmul.mubr.f32.vlgmr.msra.gmra.mxu0 %v19805_v16  ;;  %29592 = vmatprep.subr.mxu1 %v30520_v20  ;;  %v14826_v50 = vpop.f32.mrf.mxu0 }
 0x48e   : > { %29597 = vmatprep.subr.mxu0 %v30520_v20  ;;  %29593 = vmatpush3.msra.mxu1 %v19851_v39  ;;  %v14827_v41 = vadd.f32 %v14826_v50, %v14751_v19  ;;  %v27300_v19 = vld [vmem:[%s34753_s5 + $0xf8] sm:$0xff] }
 0x48f   : > { %29594 = vmatprep.mubr.msk.f32.mxu1 %vm30521_vm13, %v30520_v20  ;;  %29598 = vmatpush3.msra.mxu0 %v33268_v22  ;;  %v29141_v46 = vpop.f32.mrf.mxu0  ;;  %v20311_v22 = vand.u32 4294901760, %v20310_v59 }
 0x490   : > { %29595 = vmatmul.mubr.f32.vlgmr.msra.gmra.mxu1 %v33259_v51  ;;  %29599 = vmatprep.subr.mxu0 %v30520_v20  ;;  %v14901_v35 = vpop.f32.mrf.mxu1 }
 0x491   : > { %29604 = vmatprep.subr.mxu1 %v30520_v20  ;;  %29600 = vmatpush3.msra.mxu0 %v33279_v31  ;;  %v14902_v21 = vadd.f32 %v14901_v35, %v14827_v41  ;;  %v20318_v31 = vand.u32 4294901760, %v20317_v14 }
 0x492   : > { %29601 = vmatprep.mubr.msk.f32.mxu0 %vm30521_vm13, %v30520_v20  ;;  %29605 = vmatpush3.msra.mxu1 %v33255_v60  ;;  %v29148_v8 = vpop.f32.mrf.mxu1 }
 0x493   : > { %29602 = vmatmul.mubr.f32.vlgmr.msra.gmra.mxu0 %v33274_v15  ;;  %29606 = vmatprep.subr.mxu1 %v30520_v20  ;;  %v14978_v0 = vpop.f32.mrf.mxu0  ;;  %v27297_v15 = vld [vmem:[%s34753_s5 + $0xe0] sm:$0xff] }
 0x494   : > { %29611 = vmatprep.subr.mxu0 %v30520_v20  ;;  %29607 = vmatpush3.msra.mxu1 %v33263_v23  ;;  %v14979_v5 = vadd.f32 %v14978_v0, %v14902_v21  ;;  %v33417_v25 = vand.u32 4294901760, %v27297_v15 }
 0x495   : > { %29608 = vmatprep.mubr.msk.f32.mxu1 %vm30521_vm13, %v30520_v20  ;;  %29612 = vmatpush3.msra.mxu0 %v19842_v58  ;;  %v29155_v10 = vpop.f32.mrf.mxu0 }
 0x496   : > { %29609 = vmatmul.mubr.f32.vlgmr.msra.gmra.mxu1 %v19803_v49  ;;  %29613 = vmatprep.subr.mxu0 %v30520_v20  ;;  %v15051_v18 = vpop.f32.mrf.mxu1  ;;  %v33433_v37 = vsub.f32 %v27297_v15, %v33417_v25 }
 0x497   : > { %29618 = vmatprep.subr.mxu1 %v30520_v20  ;;  %29614 = vmatpush3.msra.mxu0 %v19849_v57  ;;  %v33385_v9 = vadd.f32 %v15051_v18, %v14979_v5 }
 0x498   : > { %29615 = vmatprep.mubr.msk.f32.mxu0 %vm30521_vm13, %v30520_v20  ;;  %29619 = vmatpush3.msra.mxu1 %v33255_v60  ;;  %v29162_v27 = vpop.f32.mrf.mxu1  ;;  %v20666_v60 = vsel %vm14071_vm11, %v20661_v1, 0  ;;  %v20783_v29 = vand.u32 4294901760, %v33433_v37 }
 0x499   : > { %29616 = vmatmul.mubr.f32.vlgmr.msra.gmra.mxu0 %v33259_v51  ;;  %29620 = vmatprep.subr.mxu1 %v30520_v20  ;;  %v15135_v53 = vpop.f32.mrf.mxu0  ;;  %v33413_v34 = vand.u32 4294901760, %v20666_v60 }
 0x49a   : > { %29625 = vmatprep.subr.mxu0 %v30520_v20  ;;  %29621 = vmatpush3.msra.mxu1 %v33263_v23  ;;  %v33409_v23 = vand.u32 4294901760, %v27298_v43  ;;  %v20784_v39 = vsub.f32 %v33433_v37, %v20783_v29 }
 0x49b   : > { %29622 = vmatprep.mubr.msk.f32.mxu1 %vm30521_vm13, %v30520_v20  ;;  %29626 = vmatpush3.msra.mxu0 %v33331_v44  ;;  %v29169_v24 = vpop.f32.mrf.mxu0  ;;  %v33428_v45 = vsub.f32 %v20666_v60, %v33413_v34 }
 0x49c   : > { %29623 = vmatmul.mubr.f32.vlgmr.msra.gmra.mxu1 %v33259_v51  ;;  %29627 = vmatprep.subr.mxu0 %v30520_v20  ;;  %v15216_v13 = vpop.f32.mrf.mxu1  ;;  %v33422_v52 = vsub.f32 %v27298_v43, %v33409_v23  ;;  %v21596_v24 = vld [vmem:[#allocation5 + $0x19] sm:$0x1] }
 0x49d   : > { %29632 = vmatprep.subr.mxu1 %v30520_v20  ;;  %29628 = vmatpush3.msra.mxu0 %v33339_v47  ;;  %v15217_v58 = vadd.f32 %v15216_v13, %v15135_v53  ;;  %v20737_v54 = vand.u32 4294901760, %v33428_v45 }
 0x49e   : > { %29629 = vmatprep.mubr.msk.f32.mxu0 %vm30521_vm13, %v30520_v20  ;;  %29633 = vmatpush3.msra.mxu1 %v20311_v22  ;;  %v29176_v51 = vpop.f32.mrf.mxu1  ;;  %v20776_v42 = vand.u32 4294901760, %v33422_v52 }
 0x49f   : > { %29630 = vmatmul.mubr.f32.vlgmr.msra.gmra.mxu0 %v20272_v3  ;;  %29634 = vmatprep.subr.mxu1 %v30520_v20  ;;  %v15292_v49 = vpop.f32.mrf.mxu0  ;;  %v20738_v16 = vsub.f32 %v33428_v45, %v20737_v54  ;;  %v27302_v51 = vld [vmem:[%s34753_s5 + $0x108] sm:$0xff] }
 0x4a0   : > { %29639 = vmatprep.subr.mxu0 %v30520_v20  ;;  %29635 = vmatpush3.msra.mxu1 %v20318_v31  ;;  %v15293_v57 = vadd.f32 %v15292_v49, %v15217_v58  ;;  %v20777_v32 = vsub.f32 %v33422_v52, %v20776_v42 }
 0x4a1   : > { %29636 = vmatprep.mubr.msk.f32.mxu1 %vm30521_vm13, %v30520_v20  ;;  %29640 = vmatpush3.msra.mxu0 %v33344_v38  ;;  %v29183_v61 = vpop.f32.mrf.mxu0  ;;  %v21134_v38 = vsel %vm14071_vm11, %v21129_v28, 0  ;;  %v20739_v41 = vand.u32 4294901760, %v20738_v16 }
 0x4a2   : > { %29637 = vmatmul.mubr.f32.vlgmr.msra.gmra.mxu1 %v33335_v30  ;;  %29641 = vmatprep.subr.mxu0 %v30520_v20  ;;  %v15367_v62 = vpop.f32.mrf.mxu1  ;;  %v33492_v21 = vand.u32 4294901760, %v21134_v38  ;;  %v27301_v61 = vld [vmem:[%s34753_s5 + $0x100] sm:$0xff] }
 0x4a3   : > { %29646 = vmatprep.subr.mxu1 %v30520_v20  ;;  %29642 = vmatpush3.msra.mxu0 %v33355_v48  ;;  %v15368_v63 = vadd.f32 %v15367_v62, %v15293_v57  ;;  %v20785_v48 = vand.u32 4294901760, %v20784_v39  ;;  %v21601_v57 = vsel %vm14071_vm11, %v21596_v24, 0 }
 0x4a4   : > { %29643 = vmatprep.mubr.msk.f32.mxu0 %vm30521_vm13, %v30520_v20  ;;  %29647 = vmatpush3.msra.mxu1 %v33331_v44  ;;  %v29190_v4 = vpop.f32.mrf.mxu1  ;;  %v33507_v5 = vsub.f32 %v21134_v38, %v33492_v21 }
 0x4a5   : > { %29644 = vmatmul.mubr.f32.vlgmr.msra.gmra.mxu0 %v33350_v12  ;;  %29648 = vmatprep.subr.mxu1 %v30520_v20  ;;  %v15444_v26 = vpop.f32.mrf.mxu0  ;;  %v27299_v12 = vld [vmem:[%s34753_s5 + $0xf0] sm:$0xff] }
 0x4a6   : > { %29653 = vmatprep.subr.mxu0 %v30520_v20  ;;  %29649 = vmatpush3.msra.mxu1 %v33339_v47  ;;  %v15445_v33 = vadd.f32 %v15444_v26, %v15368_v63  ;;  %v33496_v8 = vand.u32 4294901760, %v27299_v12  ;;  %v21205_v14 = vand.u32 4294901760, %v33507_v5 }
 0x4a7   : > { %29650 = vmatprep.mubr.msk.f32.mxu1 %vm30521_vm13, %v30520_v20  ;;  %29654 = vmatpush3.msra.mxu0 %v20309_v11  ;;  %v29197_v17 = vpop.f32.mrf.mxu0 }
 0x4a8   : > { %29651 = vmatmul.mubr.f32.vlgmr.msra.gmra.mxu1 %v20270_v56  ;;  %29655 = vmatprep.subr.mxu0 %v30520_v20  ;;  %v15517_v55 = vpop.f32.mrf.mxu1  ;;  %v33512_v59 = vsub.f32 %v27299_v12, %v33496_v8  ;;  %v21206_v15 = vsub.f32 %v33507_v5, %v21205_v14 }
 0x4a9   : > { %29660 = vmatprep.subr.mxu1 %v30520_v20  ;;  %29656 = vmatpush3.msra.mxu0 %v20316_v36  ;;  %v15518_v40 = vadd.f32 %v15517_v55, %v15445_v33 }
 0x4aa   : > { %29657 = vmatprep.mubr.msk.f32.mxu0 %vm30521_vm13, %v30520_v20  ;;  %29661 = vmatpush3.msra.mxu1 %v33331_v44  ;;  %v29204_v2 = vpop.f32.mrf.mxu1  ;;  %v20778_v44 = vand.u32 4294901760, %v20777_v32  ;;  %v21251_v43 = vand.u32 4294901760, %v33512_v59 }
 0x4ab   : > { %29658 = vmatmul.mubr.f32.vlgmr.msra.gmra.mxu0 %v33335_v30  ;;  %29662 = vmatprep.subr.mxu1 %v30520_v20  ;;  %v33475_v7 = vadd.f32 %v15518_v40, %v33385_v9  ;;  %v15602_v50 = vpop.f32.mrf.mxu0 }
 0x4ac   : > { %29667 = vmatprep.subr.mxu0 %v30520_v20  ;;  %29663 = vmatpush3.msra.mxu1 %v33339_v47  ;;  %v33488_v47 = vand.u32 4294901760, %v27300_v19  ;;  %v21252_v13 = vsub.f32 %v33512_v59, %v21251_v43 }
 0x4ad   : > { %29664 = vmatprep.mubr.msk.f32.mxu1 %vm30521_vm13, %v30520_v20  ;;  %29668 = vmatpush3.msra.mxu0 %v33409_v23  ;;  %v29211_v46 = vpop.f32.mrf.mxu0 }
 0x4ae   : > { %29665 = vmatmul.mubr.f32.vlgmr.msra.gmra.mxu1 %v33335_v30  ;;  %29669 = vmatprep.subr.mxu0 %v30520_v20  ;;  %v15683_v35 = vpop.f32.mrf.mxu1  ;;  %v33501_v0 = vsub.f32 %v27300_v19, %v33488_v47  ;;  %v21253_v62 = vand.u32 4294901760, %v21252_v13  ;;  %v22063_v46 = vld [vmem:[#allocation5 + $0x1a] sm:$0x1] }
 0x4af   : > { %29674 = vmatprep.subr.mxu1 %v30520_v20  ;;  %29670 = vmatpush3.msra.mxu0 %v33417_v25  ;;  %v15684_v11 = vadd.f32 %v15683_v35, %v15602_v50 }
 0x4b0   : > { %29671 = vmatprep.mubr.msk.f32.mxu0 %vm30521_vm13, %v30520_v20  ;;  %29675 = vmatpush3.msra.mxu1 %v20778_v44  ;;  %v29218_v30 = vpop.f32.mrf.mxu1  ;;  %v21244_v1 = vand.u32 4294901760, %v33501_v0 }
 0x4b1   : > { %29672 = vmatmul.mubr.f32.vlgmr.msra.gmra.mxu0 %v20739_v41  ;;  %29676 = vmatprep.subr.mxu1 %v30520_v20  ;;  %v15759_v56 = vpop.f32.mrf.mxu0  ;;  %v27304_v30 = vld [vmem:[%s34753_s5 + $0x118] sm:$0xff] }
 0x4b2   : > { %29681 = vmatprep.subr.mxu0 %v30520_v20  ;;  %29677 = vmatpush3.msra.mxu1 %v20785_v48  ;;  %v15760_v36 = vadd.f32 %v15759_v56, %v15684_v11  ;;  %v21245_v60 = vsub.f32 %v33501_v0, %v21244_v1 }
 0x4b3   : > { %29678 = vmatprep.mubr.msk.f32.mxu1 %vm30521_vm13, %v30520_v20  ;;  %29682 = vmatpush3.msra.mxu0 %v33422_v52  ;;  %v29225_v10 = vpop.f32.mrf.mxu0 }
 0x4b4   : > { %29679 = vmatmul.mubr.f32.vlgmr.msra.gmra.mxu1 %v33413_v34  ;;  %29683 = vmatprep.subr.mxu0 %v30520_v20  ;;  %v15834_v18 = vpop.f32.mrf.mxu1  ;;  %v27303_v10 = vld [vmem:[%s34753_s5 + $0x110] sm:$0xff] }
 0x4b5   : > { %29688 = vmatprep.subr.mxu1 %v30520_v20  ;;  %29684 = vmatpush3.msra.mxu0 %v33433_v37  ;;  %v15835_v6 = vadd.f32 %v15834_v18, %v15760_v36  ;;  %v22068_v36 = vsel %vm14071_vm11, %v22063_v46, 0 }
 0x4b6   : > { %29685 = vmatprep.mubr.msk.f32.mxu0 %vm30521_vm13, %v30520_v20  ;;  %29689 = vmatpush3.msra.mxu1 %v33409_v23  ;;  %v29232_v9 = vpop.f32.mrf.mxu1 }
 0x4b7   : > { %29686 = vmatmul.mubr.f32.vlgmr.msra.gmra.mxu0 %v33428_v45  ;;  %29690 = vmatprep.subr.mxu1 %v30520_v20  ;;  %v15911_v27 = vpop.f32.mrf.mxu0  ;;  %v21207_v45 = vand.u32 4294901760, %v21206_v15 }
 0x4b8   : > { %29695 = vmatprep.subr.mxu0 %v30520_v20  ;;  %29691 = vmatpush3.msra.mxu1 %v33417_v25  ;;  %v15912_v53 = vadd.f32 %v15911_v27, %v15835_v6 }
 0x4b9   : > { %29692 = vmatprep.mubr.msk.f32.mxu1 %vm30521_vm13, %v30520_v20  ;;  %29696 = vmatpush3.msra.mxu0 %v20776_v42  ;;  %v29239_v22 = vpop.f32.mrf.mxu0  ;;  %v33571_v42 = vand.u32 4294901760, %v21601_v57 }
 0x4ba   : > { %29693 = vmatmul.mubr.f32.vlgmr.msra.gmra.mxu1 %v20737_v54  ;;  %29697 = vmatprep.subr.mxu0 %v30520_v20  ;;  %v15984_v3 = vpop.f32.mrf.mxu1  ;;  %v33575_v54 = vand.u32 4294901760, %v27301_v61 }
 0x4bb   : > { %29702 = vmatprep.subr.mxu1 %v30520_v20  ;;  %29698 = vmatpush3.msra.mxu0 %v20783_v29  ;;  %v15985_v31 = vadd.f32 %v15984_v3, %v15912_v53  ;;  %v33586_v17 = vsub.f32 %v21601_v57, %v33571_v42 }
 0x4bc   : > { %29699 = vmatprep.mubr.msk.f32.mxu0 %vm30521_vm13, %v30520_v20  ;;  %29703 = vmatpush3.msra.mxu1 %v33409_v23  ;;  %v29246_v58 = vpop.f32.mrf.mxu1  ;;  %v21246_v23 = vand.u32 4294901760, %v21245_v60  ;;  %v33591_v55 = vsub.f32 %v27301_v61, %v33575_v54 }
 0x4bd   : > { %29700 = vmatmul.mubr.f32.vlgmr.msra.gmra.mxu0 %v33413_v34  ;;  %29704 = vmatprep.subr.mxu1 %v30520_v20  ;;  %v33554_v49 = vadd.f32 %v15985_v31, %v33475_v7  ;;  %v16069_v52 = vpop.f32.mrf.mxu0  ;;  %v21672_v2 = vand.u32 4294901760, %v33586_v17 }
 0x4be   : > { %29709 = vmatprep.subr.mxu0 %v30520_v20  ;;  %29705 = vmatpush3.msra.mxu1 %v33417_v25  ;;  %v33567_v25 = vand.u32 4294901760, %v27302_v51  ;;  %v21718_v7 = vand.u32 4294901760, %v33591_v55 }
 0x4bf   : > { %29706 = vmatprep.mubr.msk.f32.mxu1 %vm30521_vm13, %v30520_v20  ;;  %29710 = vmatpush3.msra.mxu0 %v33488_v47  ;;  %v29253_v37 = vpop.f32.mrf.mxu0  ;;  %v21673_v12 = vsub.f32 %v33586_v17, %v21672_v2 }
 0x4c0   : > { %29707 = vmatmul.mubr.f32.vlgmr.msra.gmra.mxu1 %v33413_v34  ;;  %29711 = vmatprep.subr.mxu0 %v30520_v20  ;;  %v16150_v63 = vpop.f32.mrf.mxu1  ;;  %v33580_v29 = vsub.f32 %v27302_v51, %v33567_v25  ;;  %v21719_v35 = vsub.f32 %v33591_v55, %v21718_v7  ;;  %v22530_v37 = vld [vmem:[#allocation5 + $0x1b] sm:$0x1] }
 0x4c1   : > { %29716 = vmatprep.subr.mxu1 %v30520_v20  ;;  %29712 = vmatpush3.msra.mxu0 %v33496_v8  ;;  %v16151_v4 = vadd.f32 %v16150_v63, %v16069_v52 }
 0x4c2   : > { %29713 = vmatprep.mubr.msk.f32.mxu0 %vm30521_vm13, %v30520_v20  ;;  %29717 = vmatpush3.msra.mxu1 %v21246_v23  ;;  %v29260_v34 = vpop.f32.mrf.mxu1  ;;  %v21711_v40 = vand.u32 4294901760, %v33580_v29  ;;  %v21720_v18 = vand.u32 4294901760, %v21719_v35 }
 0x4c3   : > { %29714 = vmatmul.mubr.f32.vlgmr.msra.gmra.mxu0 %v21207_v45  ;;  %29718 = vmatprep.subr.mxu1 %v30520_v20  ;;  %v16226_v26 = vpop.f32.mrf.mxu0  ;;  %v27306_v34 = vld [vmem:[%s34753_s5 + $0x128] sm:$0xff] }
 0x4c4   : > { %29723 = vmatprep.subr.mxu0 %v30520_v20  ;;  %29719 = vmatpush3.msra.mxu1 %v21253_v62  ;;  %v16227_v33 = vadd.f32 %v16226_v26, %v16151_v4  ;;  %v21712_v38 = vsub.f32 %v33580_v29, %v21711_v40 }
 0x4c5   : > { %29720 = vmatprep.mubr.msk.f32.mxu1 %vm30521_vm13, %v30520_v20  ;;  %29724 = vmatpush3.msra.mxu0 %v33501_v0  ;;  %v29267_v32 = vpop.f32.mrf.mxu0 }
 0x4c6   : > { %29721 = vmatmul.mubr.f32.vlgmr.msra.gmra.mxu1 %v33492_v21  ;;  %29725 = vmatprep.subr.mxu0 %v30520_v20  ;;  %v16301_v16 = vpop.f32.mrf.mxu1  ;;  %v27305_v32 = vld [vmem:[%s34753_s5 + $0x120] sm:$0xff] }
 0x4c7   : > { %29730 = vmatprep.subr.mxu1 %v30520_v20  ;;  %29726 = vmatpush3.msra.mxu0 %v33512_v59  ;;  %v16302_v28 = vadd.f32 %v16301_v16, %v16227_v33  ;;  %v22535_v33 = vsel %vm14071_vm11, %v22530_v37, 0 }
 0x4c8   : > { %29727 = vmatprep.mubr.msk.f32.mxu0 %vm30521_vm13, %v30520_v20  ;;  %29731 = vmatpush3.msra.mxu1 %v33488_v47  ;;  %v29274_v39 = vpop.f32.mrf.mxu1 }
 0x4c9   : > { %29728 = vmatmul.mubr.f32.vlgmr.msra.gmra.mxu0 %v33507_v5  ;;  %29732 = vmatprep.subr.mxu1 %v30520_v20  ;;  %v16378_v19 = vpop.f32.mrf.mxu0  ;;  %v21674_v5 = vand.u32 4294901760, %v21673_v12 }
 0x4ca   : > { %29737 = vmatprep.subr.mxu0 %v30520_v20  ;;  %29733 = vmatpush3.msra.mxu1 %v33496_v8  ;;  %v16379_v50 = vadd.f32 %v16378_v19, %v16302_v28 }
 0x4cb   : > { %29734 = vmatprep.mubr.msk.f32.mxu1 %vm30521_vm13, %v30520_v20  ;;  %29738 = vmatpush3.msra.mxu0 %v21244_v1  ;;  %v29281_v44 = vpop.f32.mrf.mxu0  ;;  %v33650_v1 = vand.u32 4294901760, %v22068_v36 }
 0x4cc   : > { %29735 = vmatmul.mubr.f32.vlgmr.msra.gmra.mxu1 %v21205_v14  ;;  %29739 = vmatprep.subr.mxu0 %v30520_v20  ;;  %v16451_v41 = vpop.f32.mrf.mxu1  ;;  %v33654_v14 = vand.u32 4294901760, %v27303_v10 }
 0x4cd   : > { %29744 = vmatprep.subr.mxu1 %v30520_v20  ;;  %29740 = vmatpush3.msra.mxu0 %v21251_v43  ;;  %v16452_v48 = vadd.f32 %v16451_v41, %v16379_v50  ;;  %v33665_v22 = vsub.f32 %v22068_v36, %v33650_v1 }
 0x4ce   : > { %29741 = vmatprep.mubr.msk.f32.mxu0 %vm30521_vm13, %v30520_v20  ;;  %29745 = vmatpush3.msra.mxu1 %v33488_v47  ;;  %v29288_v11 = vpop.f32.mrf.mxu1  ;;  %v21713_v47 = vand.u32 4294901760, %v21712_v38  ;;  %v33670_v3 = vsub.f32 %v27303_v10, %v33654_v14 }
 0x4cf   : > { %29742 = vmatmul.mubr.f32.vlgmr.msra.gmra.mxu0 %v33492_v21  ;;  %29746 = vmatprep.subr.mxu1 %v30520_v20  ;;  %v33633_v56 = vadd.f32 %v16452_v48, %v33554_v49  ;;  %v16537_v0 = vpop.f32.mrf.mxu0  ;;  %v22139_v58 = vand.u32 4294901760, %v33665_v22 }
 0x4d0   : > { %29751 = vmatprep.subr.mxu0 %v30520_v20  ;;  %29747 = vmatpush3.msra.mxu1 %v33496_v8  ;;  %v33646_v8 = vand.u32 4294901760, %v27304_v30  ;;  %v22185_v49 = vand.u32 4294901760, %v33670_v3 }
 0x4d1   : > { %29748 = vmatprep.mubr.msk.f32.mxu1 %vm30521_vm13, %v30520_v20  ;;  %29752 = vmatpush3.msra.mxu0 %v33567_v25  ;;  %v29295_v59 = vpop.f32.mrf.mxu0  ;;  %v22140_v61 = vsub.f32 %v33665_v22, %v22139_v58 }
 0x4d2   : > { %29749 = vmatmul.mubr.f32.vlgmr.msra.gmra.mxu1 %v33492_v21  ;;  %29753 = vmatprep.subr.mxu0 %v30520_v20  ;;  %v16618_v6 = vpop.f32.mrf.mxu1  ;;  %v33659_v43 = vsub.f32 %v27304_v30, %v33646_v8  ;;  %v22186_v63 = vsub.f32 %v33670_v3, %v22185_v49  ;;  %v22997_v59 = vld [vmem:[#allocation5 + $0x1c] sm:$0x1] }
 0x4d3   : > { %29758 = vmatprep.subr.mxu1 %v30520_v20  ;;  %29754 = vmatpush3.msra.mxu0 %v33575_v54  ;;  %v16619_v9 = vadd.f32 %v16618_v6, %v16537_v0 }
 0x4d4   : > { %29755 = vmatprep.mubr.msk.f32.mxu0 %vm30521_vm13, %v30520_v20  ;;  %29759 = vmatpush3.msra.mxu1 %v21713_v47  ;;  %v29302_v21 = vpop.f32.mrf.mxu1  ;;  %v22178_v31 = vand.u32 4294901760, %v33659_v43  ;;  %v22187_v16 = vand.u32 4294901760, %v22186_v63 }
 0x4d5   : > { %29756 = vmatmul.mubr.f32.vlgmr.msra.gmra.mxu0 %v21674_v5  ;;  %29760 = vmatprep.subr.mxu1 %v30520_v20  ;;  %v16694_v27 = vpop.f32.mrf.mxu0  ;;  %v27308_v21 = vld [vmem:[%s34753_s5 + $0x138] sm:$0xff] }
 0x4d6   : > { %29765 = vmatprep.subr.mxu0 %v30520_v20  ;;  %29761 = vmatpush3.msra.mxu1 %v21720_v18  ;;  %v16695_v53 = vadd.f32 %v16694_v27, %v16619_v9  ;;  %v22179_v57 = vsub.f32 %v33659_v43, %v22178_v31 }
 0x4d7   : > { %29762 = vmatprep.mubr.msk.f32.mxu1 %vm30521_vm13, %v30520_v20  ;;  %29766 = vmatpush3.msra.mxu0 %v33580_v29  ;;  %v29309_v60 = vpop.f32.mrf.mxu0 }
 0x4d8   : > { %29763 = vmatmul.mubr.f32.vlgmr.msra.gmra.mxu1 %v33571_v42  ;;  %29767 = vmatprep.subr.mxu0 %v30520_v20  ;;  %v16769_v15 = vpop.f32.mrf.mxu1  ;;  %v27307_v60 = vld [vmem:[%s34753_s5 + $0x130] sm:$0xff] }
 0x4d9   : > { %29772 = vmatprep.subr.mxu1 %v30520_v20  ;;  %29768 = vmatpush3.msra.mxu0 %v33591_v55  ;;  %v16770_v24 = vadd.f32 %v16769_v15, %v16695_v53  ;;  %v23002_v53 = vsel %vm14071_vm11, %v22997_v59, 0 }
 0x4da   : > { %29769 = vmatprep.mubr.msk.f32.mxu0 %vm30521_vm13, %v30520_v20  ;;  %29773 = vmatpush3.msra.mxu1 %v33567_v25  ;;  %v29316_v13 = vpop.f32.mrf.mxu1 }
 0x4db   : > { %29770 = vmatmul.mubr.f32.vlgmr.msra.gmra.mxu0 %v33586_v17  ;;  %29774 = vmatprep.subr.mxu1 %v30520_v20  ;;  %v16846_v51 = vpop.f32.mrf.mxu0  ;;  %v22141_v17 = vand.u32 4294901760, %v22140_v61 }
 0x4dc   : > { %29779 = vmatprep.subr.mxu0 %v30520_v20  ;;  %29775 = vmatpush3.msra.mxu1 %v33575_v54  ;;  %v16847_v52 = vadd.f32 %v16846_v51, %v16770_v24 }
 0x4dd   : > { %29776 = vmatprep.mubr.msk.f32.mxu1 %vm30521_vm13, %v30520_v20  ;;  %29780 = vmatpush3.msra.mxu0 %v21711_v40  ;;  %v29323_v23 = vpop.f32.mrf.mxu0  ;;  %v33729_v40 = vand.u32 4294901760, %v22535_v33 }
 0x4de   : > { %29777 = vmatmul.mubr.f32.vlgmr.msra.gmra.mxu1 %v21672_v2  ;;  %29781 = vmatprep.subr.mxu0 %v30520_v20  ;;  %v16919_v45 = vpop.f32.mrf.mxu1  ;;  %v33733_v2 = vand.u32 4294901760, %v27305_v32 }
 0x4df   : > { %29786 = vmatprep.subr.mxu1 %v30520_v20  ;;  %29782 = vmatpush3.msra.mxu0 %v21718_v7  ;;  %v16920_v62 = vadd.f32 %v16919_v45, %v16847_v52  ;;  %v33744_v44 = vsub.f32 %v22535_v33, %v33729_v40 }
 0x4e0   : > { %29783 = vmatprep.mubr.msk.f32.mxu0 %vm30521_vm13, %v30520_v20  ;;  %29787 = vmatpush3.msra.mxu1 %v33567_v25  ;;  %v29330_v4 = vpop.f32.mrf.mxu1  ;;  %v22180_v25 = vand.u32 4294901760, %v22179_v57  ;;  %v33749_v41 = vsub.f32 %v27305_v32, %v33733_v2 }
 0x4e1   : > { %29784 = vmatmul.mubr.f32.vlgmr.msra.gmra.mxu0 %v33571_v42  ;;  %29788 = vmatprep.subr.mxu1 %v30520_v20  ;;  %v33712_v26 = vadd.f32 %v16920_v62, %v33633_v56  ;;  %v17004_v29 = vpop.f32.mrf.mxu0  ;;  %v22606_v11 = vand.u32 4294901760, %v33744_v44 }
 0x4e2   : > { %29793 = vmatprep.subr.mxu0 %v30520_v20  ;;  %29789 = vmatpush3.msra.mxu1 %v33575_v54  ;;  %v33725_v54 = vand.u32 4294901760, %v27306_v34  ;;  %v22652_v56 = vand.u32 4294901760, %v33749_v41 }
 0x4e3   : > { %29790 = vmatprep.mubr.msk.f32.mxu1 %vm30521_vm13, %v30520_v20  ;;  %29794 = vmatpush3.msra.mxu0 %v33646_v8  ;;  %v29337_v55 = vpop.f32.mrf.mxu0  ;;  %v22607_v10 = vsub.f32 %v33744_v44, %v22606_v11 }
 0x4e4   : > { %29791 = vmatmul.mubr.f32.vlgmr.msra.gmra.mxu1 %v33571_v42  ;;  %29795 = vmatprep.subr.mxu0 %v30520_v20  ;;  %v17085_v28 = vpop.f32.mrf.mxu1  ;;  %v33738_v7 = vsub.f32 %v27306_v34, %v33725_v54  ;;  %v22653_v6 = vsub.f32 %v33749_v41, %v22652_v56  ;;  %v23465_v55 = vld [vmem:[#allocation5 + $0x20] sm:$0x1] }
 0x4e5   : > { %29800 = vmatprep.subr.mxu1 %v30520_v20  ;;  %29796 = vmatpush3.msra.mxu0 %v33654_v14  ;;  %v17086_v39 = vadd.f32 %v17085_v28, %v17004_v29 }
 0x4e6   : > { %29797 = vmatprep.mubr.msk.f32.mxu0 %vm30521_vm13, %v30520_v20  ;;  %29801 = vmatpush3.msra.mxu1 %v22180_v25  ;;  %v29344_v42 = vpop.f32.mrf.mxu1  ;;  %v22645_v48 = vand.u32 4294901760, %v33738_v7  ;;  %v22654_v15 = vand.u32 4294901760, %v22653_v6 }
 0x4e7   : > { %29798 = vmatmul.mubr.f32.vlgmr.msra.gmra.mxu0 %v22141_v17  ;;  %29802 = vmatprep.subr.mxu1 %v30520_v20  ;;  %v17161_v19 = vpop.f32.mrf.mxu0  ;;  %v27310_v42 = vld [vmem:[%s34753_s5 + $0x148] sm:$0xff] }
 0x4e8   : > { %29807 = vmatprep.subr.mxu0 %v30520_v20  ;;  %29803 = vmatpush3.msra.mxu1 %v22187_v16  ;;  %v17162_v50 = vadd.f32 %v17161_v19, %v17086_v39  ;;  %v22646_v36 = vsub.f32 %v33738_v7, %v22645_v48 }
 0x4e9   : > { %29804 = vmatprep.mubr.msk.f32.mxu1 %vm30521_vm13, %v30520_v20  ;;  %29808 = vmatpush3.msra.mxu0 %v33659_v43  ;;  %v29351_v38 = vpop.f32.mrf.mxu0 }
 0x4ea   : > { %29805 = vmatmul.mubr.f32.vlgmr.msra.gmra.mxu1 %v33650_v1  ;;  %29809 = vmatprep.subr.mxu0 %v30520_v20  ;;  %v17236_v12 = vpop.f32.mrf.mxu1  ;;  %v27309_v38 = vld [vmem:[%s34753_s5 + $0x140] sm:$0xff] }
 0x4eb   : > { %29814 = vmatprep.subr.mxu1 %v30520_v20  ;;  %29810 = vmatpush3.msra.mxu0 %v33670_v3  ;;  %v17237_v46 = vadd.f32 %v17236_v12, %v17162_v50  ;;  %v23470_v50 = vsel %vm14071_vm11, %v23465_v55, 0 }
 0x4ec   : > { %29811 = vmatprep.mubr.msk.f32.mxu0 %vm30521_vm13, %v30520_v20  ;;  %29815 = vmatpush3.msra.mxu1 %v33646_v8  ;;  %v29358_v35 = vpop.f32.mrf.mxu1 }
 0x4ed   : > { %29812 = vmatmul.mubr.f32.vlgmr.msra.gmra.mxu0 %v33665_v22  ;;  %29816 = vmatprep.subr.mxu1 %v30520_v20  ;;  %v17313_v30 = vpop.f32.mrf.mxu0  ;;  %v22608_v22 = vand.u32 4294901760, %v22607_v10 }
 0x4ee   : > { %29821 = vmatprep.subr.mxu0 %v30520_v20  ;;  %29817 = vmatpush3.msra.mxu1 %v33654_v14  ;;  %v17314_v0 = vadd.f32 %v17313_v30, %v17237_v46 }
 0x4ef   : > { %29818 = vmatprep.mubr.msk.f32.mxu1 %vm30521_vm13, %v30520_v20  ;;  %29822 = vmatpush3.msra.mxu0 %v22178_v31  ;;  %v29365_v47 = vpop.f32.mrf.mxu0  ;;  %v33808_v31 = vand.u32 4294901760, %v23002_v53 }
 0x4f0   : > { %29819 = vmatmul.mubr.f32.vlgmr.msra.gmra.mxu1 %v22139_v58  ;;  %29823 = vmatprep.subr.mxu0 %v30520_v20  ;;  %v17386_v5 = vpop.f32.mrf.mxu1  ;;  %v33812_v58 = vand.u32 4294901760, %v27307_v60 }
 0x4f1   : > { %29828 = vmatprep.subr.mxu1 %v30520_v20  ;;  %29824 = vmatpush3.msra.mxu0 %v22185_v49  ;;  %v17387_v18 = vadd.f32 %v17386_v5, %v17314_v0  ;;  %v33823_v23 = vsub.f32 %v23002_v53, %v33808_v31 }
 0x4f2   : > { %29825 = vmatprep.mubr.msk.f32.mxu0 %vm30521_vm13, %v30520_v20  ;;  %29829 = vmatpush3.msra.mxu1 %v33646_v8  ;;  %v29372_v9 = vpop.f32.mrf.mxu1  ;;  %v22647_v8 = vand.u32 4294901760, %v22646_v36  ;;  %v33828_v45 = vsub.f32 %v27307_v60, %v33812_v58 }
 0x4f3   : > { %29826 = vmatmul.mubr.f32.vlgmr.msra.gmra.mxu0 %v33650_v1  ;;  %29830 = vmatprep.subr.mxu1 %v30520_v20  ;;  %v33791_v27 = vadd.f32 %v17387_v18, %v33712_v26  ;;  %v17471_v43 = vpop.f32.mrf.mxu0  ;;  %v23073_v4 = vand.u32 4294901760, %v33823_v23 }
 0x4f4   : > { %29835 = vmatprep.subr.mxu0 %v30520_v20  ;;  %29831 = vmatpush3.msra.mxu1 %v33654_v14  ;;  %v33804_v14 = vand.u32 4294901760, %v27308_v21  ;;  %v23119_v26 = vand.u32 4294901760, %v33828_v45 }
 0x4f5   : > { %29832 = vmatprep.mubr.msk.f32.mxu1 %vm30521_vm13, %v30520_v20  ;;  %29836 = vmatpush3.msra.mxu0 %v33725_v54  ;;  %v29379_v3 = vpop.f32.mrf.mxu0  ;;  %v23074_v32 = vsub.f32 %v33823_v23, %v23073_v4 }
 0x4f6   : > { %29833 = vmatmul.mubr.f32.vlgmr.msra.gmra.mxu1 %v33650_v1  ;;  %29837 = vmatprep.subr.mxu0 %v30520_v20  ;;  %v17552_v24 = vpop.f32.mrf.mxu1  ;;  %v33817_v49 = vsub.f32 %v27308_v21, %v33804_v14  ;;  %v23120_v28 = vsub.f32 %v33828_v45, %v23119_v26  ;;  %v23932_v3 = vld [vmem:[#allocation5 + $0x21] sm:$0x1] }
 0x4f7   : > { %29842 = vmatprep.subr.mxu1 %v30520_v20  ;;  %29838 = vmatpush3.msra.mxu0 %v33733_v2  ;;  %v17553_v13 = vadd.f32 %v17552_v24, %v17471_v43 }
 0x4f8   : > { %29839 = vmatprep.mubr.msk.f32.mxu0 %vm30521_vm13, %v30520_v20  ;;  %29843 = vmatpush3.msra.mxu1 %v22647_v8  ;;  %v29386_v1 = vpop.f32.mrf.mxu1  ;;  %v23112_v62 = vand.u32 4294901760, %v33817_v49  ;;  %v23121_v12 = vand.u32 4294901760, %v23120_v28 }
 0x4f9   : > { %29840 = vmatmul.mubr.f32.vlgmr.msra.gmra.mxu0 %v22608_v22  ;;  %29844 = vmatprep.subr.mxu1 %v30520_v20  ;;  %v17628_v51 = vpop.f32.mrf.mxu0  ;;  %v27312_v1 = vld [vmem:[%s34753_s5 + $0x158] sm:$0xff] }
 0x4fa   : > { %29849 = vmatprep.subr.mxu0 %v30520_v20  ;;  %29845 = vmatpush3.msra.mxu1 %v22654_v15  ;;  %v17629_v52 = vadd.f32 %v17628_v51, %v17553_v13  ;;  %v23113_v33 = vsub.f32 %v33817_v49, %v23112_v62 }
 0x4fb   : > { %29846 = vmatprep.mubr.msk.f32.mxu1 %vm30521_vm13, %v30520_v20  ;;  %29850 = vmatpush3.msra.mxu0 %v33738_v7  ;;  %v29393_v57 = vpop.f32.mrf.mxu0 }
 0x4fc   : > { %29847 = vmatmul.mubr.f32.vlgmr.msra.gmra.mxu1 %v33729_v40  ;;  %29851 = vmatprep.subr.mxu0 %v30520_v20  ;;  %v17703_v61 = vpop.f32.mrf.mxu1  ;;  %v27311_v57 = vld [vmem:[%s34753_s5 + $0x150] sm:$0xff] }
 0x4fd   : > { %29856 = vmatprep.subr.mxu1 %v30520_v20  ;;  %29852 = vmatpush3.msra.mxu0 %v33749_v41  ;;  %v17704_v37 = vadd.f32 %v17703_v61, %v17629_v52  ;;  %v23937_v52 = vsel %vm14071_vm11, %v23932_v3, 0 }
 0x4fe   : > { %29853 = vmatprep.mubr.msk.f32.mxu0 %vm30521_vm13, %v30520_v20  ;;  %29857 = vmatpush3.msra.mxu1 %v33725_v54  ;;  %v29400_v63 = vpop.f32.mrf.mxu1 }
 0x4ff   : > { %29854 = vmatmul.mubr.f32.vlgmr.msra.gmra.mxu0 %v33744_v44  ;;  %29858 = vmatprep.subr.mxu1 %v30520_v20  ;;  %v17780_v34 = vpop.f32.mrf.mxu0  ;;  %v23075_v44 = vand.u32 4294901760, %v23074_v32 }
 0x500   : > { %29863 = vmatprep.subr.mxu0 %v30520_v20  ;;  %29859 = vmatpush3.msra.mxu1 %v33733_v2  ;;  %v17781_v29 = vadd.f32 %v17780_v34, %v17704_v37 }
 0x501   : > { %29860 = vmatprep.mubr.msk.f32.mxu1 %vm30521_vm13, %v30520_v20  ;;  %29864 = vmatpush3.msra.mxu0 %v22645_v48  ;;  %v29407_v25 = vpop.f32.mrf.mxu0  ;;  %v33887_v48 = vand.u32 4294901760, %v23470_v50 }
 0x502   : > { %29861 = vmatmul.mubr.f32.vlgmr.msra.gmra.mxu1 %v22606_v11  ;;  %29865 = vmatprep.subr.mxu0 %v30520_v20  ;;  %v17853_v17 = vpop.f32.mrf.mxu1  ;;  %v33891_v11 = vand.u32 4294901760, %v27309_v38 }
 0x503   : > { %29870 = vmatprep.subr.mxu1 %v30520_v20  ;;  %29866 = vmatpush3.msra.mxu0 %v22652_v56  ;;  %v17854_v16 = vadd.f32 %v17853_v17, %v17781_v29  ;;  %v33902_v47 = vsub.f32 %v23470_v50, %v33887_v48 }
 0x504   : > { %29867 = vmatprep.mubr.msk.f32.mxu0 %vm30521_vm13, %v30520_v20  ;;  %29871 = vmatpush3.msra.mxu1 %v33725_v54  ;;  %v29414_v39 = vpop.f32.mrf.mxu1  ;;  %v23114_v54 = vand.u32 4294901760, %v23113_v33  ;;  %v33907_v5 = vsub.f32 %v27309_v38, %v33891_v11 }
 0x505   : > { %29868 = vmatmul.mubr.f32.vlgmr.msra.gmra.mxu0 %v33729_v40  ;;  %29872 = vmatprep.subr.mxu1 %v30520_v20  ;;  %v33870_v19 = vadd.f32 %v17854_v16, %v33791_v27  ;;  %v17938_v7 = vpop.f32.mrf.mxu0  ;;  %v23541_v9 = vand.u32 4294901760, %v33902_v47 }
 0x506   : > { %29877 = vmatprep.subr.mxu0 %v30520_v20  ;;  %29873 = vmatpush3.msra.mxu1 %v33733_v2  ;;  %v33883_v2 = vand.u32 4294901760, %v27310_v42  ;;  %v23587_v27 = vand.u32 4294901760, %v33907_v5 }
 0x507   : > { %29874 = vmatprep.mubr.msk.f32.mxu1 %vm30521_vm13, %v30520_v20  ;;  %29878 = vmatpush3.msra.mxu0 %v33804_v14  ;;  %v29421_v41 = vpop.f32.mrf.mxu0  ;;  %v23542_v60 = vsub.f32 %v33902_v47, %v23541_v9 }
 0x508   : > { %29875 = vmatmul.mubr.f32.vlgmr.msra.gmra.mxu1 %v33729_v40  ;;  %29879 = vmatprep.subr.mxu0 %v30520_v20  ;;  %v18019_v46 = vpop.f32.mrf.mxu1  ;;  %v33896_v56 = vsub.f32 %v27310_v42, %v33883_v2  ;;  %v23588_v24 = vsub.f32 %v33907_v5, %v23587_v27  ;;  %v24399_v41 = vld [vmem:[#allocation5 + $0x22] sm:$0x1] }
 0x509   : > { %29884 = vmatprep.subr.mxu1 %v30520_v20  ;;  %29880 = vmatpush3.msra.mxu0 %v33812_v58  ;;  %v18020_v35 = vadd.f32 %v18019_v46, %v17938_v7 }
 0x50a   : > { %29881 = vmatprep.mubr.msk.f32.mxu0 %vm30521_vm13, %v30520_v20  ;;  %29885 = vmatpush3.msra.mxu1 %v23114_v54  ;;  %v29428_v40 = vpop.f32.mrf.mxu1  ;;  %v23580_v18 = vand.u32 4294901760, %v33896_v56  ;;  %v23589_v61 = vand.u32 4294901760, %v23588_v24 }
 0x50b   : > { %29882 = vmatmul.mubr.f32.vlgmr.msra.gmra.mxu0 %v23075_v44  ;;  %29886 = vmatprep.subr.mxu1 %v30520_v20  ;;  %v18095_v30 = vpop.f32.mrf.mxu0  ;;  %v27314_v40 = vld [vmem:[%s34753_s5 + $0x168] sm:$0xff] }
 0x50c   : > { %29891 = vmatprep.subr.mxu0 %v30520_v20  ;;  %29887 = vmatpush3.msra.mxu1 %v23121_v12  ;;  %v18096_v0 = vadd.f32 %v18095_v30, %v18020_v35  ;;  %v23581_v53 = vsub.f32 %v33896_v56, %v23580_v18 }
 0x50d   : > { %29888 = vmatprep.mubr.msk.f32.mxu1 %vm30521_vm13, %v30520_v20  ;;  %29892 = vmatpush3.msra.mxu0 %v33817_v49  ;;  %v29435_v36 = vpop.f32.mrf.mxu0 }
 0x50e   : > { %29889 = vmatmul.mubr.f32.vlgmr.msra.gmra.mxu1 %v33808_v31  ;;  %29893 = vmatprep.subr.mxu0 %v30520_v20  ;;  %v18170_v10 = vpop.f32.mrf.mxu1  ;;  %v27313_v36 = vld [vmem:[%s34753_s5 + $0x160] sm:$0xff] }
 0x50f   : > { %29898 = vmatprep.subr.mxu1 %v30520_v20  ;;  %29894 = vmatpush3.msra.mxu0 %v33828_v45  ;;  %v18171_v59 = vadd.f32 %v18170_v10, %v18096_v0  ;;  %v24404_v0 = vsel %vm14071_vm11, %v24399_v41, 0 }
 0x510   : > { %29895 = vmatprep.mubr.msk.f32.mxu0 %vm30521_vm13, %v30520_v20  ;;  %29899 = vmatpush3.msra.mxu1 %v33804_v14  ;;  %v29442_v6 = vpop.f32.mrf.mxu1 }
 0x511   : > { %29896 = vmatmul.mubr.f32.vlgmr.msra.gmra.mxu0 %v33823_v23  ;;  %29900 = vmatprep.subr.mxu1 %v30520_v20  ;;  %v18247_v21 = vpop.f32.mrf.mxu0  ;;  %v23543_v23 = vand.u32 4294901760, %v23542_v60 }
 0x512   : > { %29905 = vmatprep.subr.mxu0 %v30520_v20  ;;  %29901 = vmatpush3.msra.mxu1 %v33812_v58  ;;  %v18248_v43 = vadd.f32 %v18247_v21, %v18171_v59 }
 0x513   : > { %29902 = vmatprep.mubr.msk.f32.mxu1 %vm30521_vm13, %v30520_v20  ;;  %29906 = vmatpush3.msra.mxu0 %v23112_v62  ;;  %v29449_v8 = vpop.f32.mrf.mxu0  ;;  %v33966_v62 = vand.u32 4294901760, %v23937_v52 }
 0x514   : > { %29903 = vmatmul.mubr.f32.vlgmr.msra.gmra.mxu1 %v23073_v4  ;;  %29907 = vmatprep.subr.mxu0 %v30520_v20  ;;  %v18320_v22 = vpop.f32.mrf.mxu1  ;;  %v33970_v4 = vand.u32 4294901760, %v27311_v57 }
 0x515   : > { %29912 = vmatprep.subr.mxu1 %v30520_v20  ;;  %29908 = vmatpush3.msra.mxu0 %v23119_v26  ;;  %v18321_v15 = vadd.f32 %v18320_v22, %v18248_v43  ;;  %v33981_v25 = vsub.f32 %v23937_v52, %v33966_v62 }
 0x516   : > { %29909 = vmatprep.mubr.msk.f32.mxu0 %vm30521_vm13, %v30520_v20  ;;  %29913 = vmatpush3.msra.mxu1 %v33804_v14  ;;  %v29456_v13 = vpop.f32.mrf.mxu1  ;;  %v23582_v14 = vand.u32 4294901760, %v23581_v53  ;;  %v33986_v17 = vsub.f32 %v27311_v57, %v33970_v4 }
 0x517   : > { %29910 = vmatmul.mubr.f32.vlgmr.msra.gmra.mxu0 %v33808_v31  ;;  %29914 = vmatprep.subr.mxu1 %v30520_v20  ;;  %v33949_v51 = vadd.f32 %v18321_v15, %v33870_v19  ;;  %v18405_v49 = vpop.f32.mrf.mxu0  ;;  %v24008_v39 = vand.u32 4294901760, %v33981_v25 }
 0x518   : > { %29919 = vmatprep.subr.mxu0 %v30520_v20  ;;  %29915 = vmatpush3.msra.mxu1 %v33812_v58  ;;  %v33962_v58 = vand.u32 4294901760, %v27312_v1  ;;  %v24054_v19 = vand.u32 4294901760, %v33986_v17 }
 0x519   : > { %29916 = vmatprep.mubr.msk.f32.mxu1 %vm30521_vm13, %v30520_v20  ;;  %29920 = vmatpush3.msra.mxu0 %v33883_v2  ;;  %v29463_v45 = vpop.f32.mrf.mxu0  ;;  %v24009_v38 = vsub.f32 %v33981_v25, %v24008_v39 }
 0x51a   : > { %29917 = vmatmul.mubr.f32.vlgmr.msra.gmra.mxu1 %v33808_v31  ;;  %29921 = vmatprep.subr.mxu0 %v30520_v20  ;;  %v18486_v37 = vpop.f32.mrf.mxu1  ;;  %v33975_v26 = vsub.f32 %v27312_v1, %v33962_v58  ;;  %v24055_v46 = vsub.f32 %v33986_v17, %v24054_v19  ;;  %v24866_v45 = vld [vmem:[#allocation5 + $0x23] sm:$0x1] }
 0x51b   : > { %29926 = vmatprep.subr.mxu1 %v30520_v20  ;;  %29922 = vmatpush3.msra.mxu0 %v33891_v11  ;;  %v18487_v63 = vadd.f32 %v18486_v37, %v18405_v49 }
 0x51c   : > { %29923 = vmatprep.mubr.msk.f32.mxu0 %vm30521_vm13, %v30520_v20  ;;  %29927 = vmatpush3.msra.mxu1 %v23582_v14  ;;  %v29470_v31 = vpop.f32.mrf.mxu1  ;;  %v24047_v16 = vand.u32 4294901760, %v33975_v26  ;;  %v24056_v10 = vand.u32 4294901760, %v24055_v46 }
 0x51d   : > { %29924 = vmatmul.mubr.f32.vlgmr.msra.gmra.mxu0 %v23543_v23  ;;  %29928 = vmatprep.subr.mxu1 %v30520_v20  ;;  %v18562_v34 = vpop.f32.mrf.mxu0  ;;  %v27316_v31 = vld [vmem:[%s34753_s5 + $0x178] sm:$0xff] }
 0x51e   : > { %29933 = vmatprep.subr.mxu0 %v30520_v20  ;;  %29929 = vmatpush3.msra.mxu1 %v23589_v61  ;;  %v18563_v29 = vadd.f32 %v18562_v34, %v18487_v63  ;;  %v24048_v50 = vsub.f32 %v33975_v26, %v24047_v16 }
 0x51f   : > { %29930 = vmatprep.mubr.msk.f32.mxu1 %vm30521_vm13, %v30520_v20  ;;  %29934 = vmatpush3.msra.mxu0 %v33896_v56  ;;  %v29477_v33 = vpop.f32.mrf.mxu0 }
 0x520   : > { %29931 = vmatmul.mubr.f32.vlgmr.msra.gmra.mxu1 %v33887_v48  ;;  %29935 = vmatprep.subr.mxu0 %v30520_v20  ;;  %v18637_v32 = vpop.f32.mrf.mxu1  ;;  %v27315_v33 = vld [vmem:[%s34753_s5 + $0x170] sm:$0xff] }
 0x521   : > { %29940 = vmatprep.subr.mxu1 %v30520_v20  ;;  %29936 = vmatpush3.msra.mxu0 %v33907_v5  ;;  %v18638_v55 = vadd.f32 %v18637_v32, %v18563_v29  ;;  %v24871_v29 = vsel %vm14071_vm11, %v24866_v45, 0 }
 0x522   : > { %29937 = vmatprep.mubr.msk.f32.mxu0 %vm30521_vm13, %v30520_v20  ;;  %29941 = vmatpush3.msra.mxu1 %v33883_v2  ;;  %v29484_v28 = vpop.f32.mrf.mxu1 }
 0x523   : > { %29938 = vmatmul.mubr.f32.vlgmr.msra.gmra.mxu0 %v33902_v47  ;;  %29942 = vmatprep.subr.mxu1 %v30520_v20  ;;  %v18714_v42 = vpop.f32.mrf.mxu0  ;;  %v24010_v47 = vand.u32 4294901760, %v24009_v38 }
 0x524   : > { %29947 = vmatprep.subr.mxu0 %v30520_v20  ;;  %29943 = vmatpush3.msra.mxu1 %v33891_v11  ;;  %v18715_v7 = vadd.f32 %v18714_v42, %v18638_v55 }
 0x525   : > { %29944 = vmatprep.mubr.msk.f32.mxu1 %vm30521_vm13, %v30520_v20  ;;  %29948 = vmatpush3.msra.mxu0 %v23580_v18  ;;  %v29491_v54 = vpop.f32.mrf.mxu0  ;;  %v34045_v18 = vand.u32 4294901760, %v24404_v0 }
 0x526   : > { %29945 = vmatmul.mubr.f32.vlgmr.msra.gmra.mxu1 %v23541_v9  ;;  %29949 = vmatprep.subr.mxu0 %v30520_v20  ;;  %v18787_v44 = vpop.f32.mrf.mxu1  ;;  %v34049_v9 = vand.u32 4294901760, %v27313_v36 }
 0x527   : > { %29954 = vmatprep.subr.mxu1 %v30520_v20  ;;  %29950 = vmatpush3.msra.mxu0 %v23587_v27  ;;  %v18788_v12 = vadd.f32 %v18787_v44, %v18715_v7  ;;  %v34060_v8 = vsub.f32 %v24404_v0, %v34045_v18 }
 0x528   : > { %29951 = vmatprep.mubr.msk.f32.mxu0 %vm30521_vm13, %v30520_v20  ;;  %29955 = vmatpush3.msra.mxu1 %v33883_v2  ;;  %v29498_v35 = vpop.f32.mrf.mxu1  ;;  %v24049_v2 = vand.u32 4294901760, %v24048_v50  ;;  %v34065_v22 = vsub.f32 %v27313_v36, %v34049_v9 }
 0x529   : > { %29952 = vmatmul.mubr.f32.vlgmr.msra.gmra.mxu0 %v33887_v48  ;;  %29956 = vmatprep.subr.mxu1 %v30520_v20  ;;  %v34028_v30 = vadd.f32 %v18788_v12, %v33949_v51  ;;  %v18873_v56 = vpop.f32.mrf.mxu0  ;;  %v24475_v13 = vand.u32 4294901760, %v34060_v8 }
 0x52a   : > { %29961 = vmatprep.subr.mxu0 %v30520_v20  ;;  %29957 = vmatpush3.msra.mxu1 %v33891_v11  ;;  %v34041_v11 = vand.u32 4294901760, %v27314_v40  ;;  %v24521_v51 = vand.u32 4294901760, %v34065_v22 }
 0x52b   : > { %29958 = vmatprep.mubr.msk.f32.mxu1 %vm30521_vm13, %v30520_v20  ;;  %29962 = vmatpush3.msra.mxu0 %v33962_v58  ;;  %v29505_v5 = vpop.f32.mrf.mxu0  ;;  %v24476_v57 = vsub.f32 %v34060_v8, %v24475_v13 }
 0x52c   : > { %29959 = vmatmul.mubr.f32.vlgmr.msra.gmra.mxu1 %v33887_v48  ;;  %29963 = vmatprep.subr.mxu0 %v30520_v20  ;;  %v18954_v59 = vpop.f32.mrf.mxu1  ;;  %v34054_v27 = vsub.f32 %v27314_v40, %v34041_v11  ;;  %v24522_v37 = vsub.f32 %v34065_v22, %v24521_v51  ;;  %v25333_v5 = vld [vmem:[#allocation5 + $0x24] sm:$0x1] }
 0x52d   : > { %29968 = vmatprep.subr.mxu1 %v30520_v20  ;;  %29964 = vmatpush3.msra.mxu0 %v33970_v4  ;;  %v18955_v6 = vadd.f32 %v18954_v59, %v18873_v56 }
 0x52e   : > { %29965 = vmatprep.mubr.msk.f32.mxu0 %vm30521_vm13, %v30520_v20  ;;  %29969 = vmatpush3.msra.mxu1 %v24049_v2  ;;  %v29512_v48 = vpop.f32.mrf.mxu1  ;;  %v24514_v15 = vand.u32 4294901760, %v34054_v27  ;;  %v24523_v32 = vand.u32 4294901760, %v24522_v37 }
 0x52f   : > { %29966 = vmatmul.mubr.f32.vlgmr.msra.gmra.mxu0 %v24010_v47  ;;  %29970 = vmatprep.subr.mxu1 %v30520_v20  ;;  %v19030_v21 = vpop.f32.mrf.mxu0  ;;  %v27318_v48 = vld [vmem:[%s34753_s5 + $0x188] sm:$0xff] }
 0x530   : > { %29975 = vmatprep.subr.mxu0 %v30520_v20  ;;  %29971 = vmatpush3.msra.mxu1 %v24056_v10  ;;  %v19031_v43 = vadd.f32 %v19030_v21, %v18955_v6  ;;  %v24515_v52 = vsub.f32 %v34054_v27, %v24514_v15 }
 0x531   : > { %29972 = vmatprep.mubr.msk.f32.mxu1 %vm30521_vm13, %v30520_v20  ;;  %29976 = vmatpush3.msra.mxu0 %v33975_v26  ;;  %v29519_v53 = vpop.f32.mrf.mxu0 }
 0x532   : > { %29973 = vmatmul.mubr.f32.vlgmr.msra.gmra.mxu1 %v33966_v62  ;;  %29977 = vmatprep.subr.mxu0 %v30520_v20  ;;  %v19105_v60 = vpop.f32.mrf.mxu1  ;;  %v27317_v53 = vld [vmem:[%s34753_s5 + $0x180] sm:$0xff] }
 0x533   : > { %29982 = vmatprep.subr.mxu1 %v30520_v20  ;;  %29978 = vmatpush3.msra.mxu0 %v33986_v17  ;;  %v19106_v3 = vadd.f32 %v19105_v60, %v19031_v43  ;;  %v25338_v43 = vsel %vm14071_vm11, %v25333_v5, 0 }
 0x534   : > { %29979 = vmatprep.mubr.msk.f32.mxu0 %vm30521_vm13, %v30520_v20  ;;  %29983 = vmatpush3.msra.mxu1 %v33962_v58  ;;  %v29526_v24 = vpop.f32.mrf.mxu1 }
 0x535   : > { %29980 = vmatmul.mubr.f32.vlgmr.msra.gmra.mxu0 %v33981_v25  ;;  %29984 = vmatprep.subr.mxu1 %v30520_v20  ;;  %v19182_v1 = vpop.f32.mrf.mxu0  ;;  %v24477_v25 = vand.u32 4294901760, %v24476_v57 }
 0x536   : > { %29989 = vmatprep.subr.mxu0 %v30520_v20  ;;  %29985 = vmatpush3.msra.mxu1 %v33970_v4  ;;  %v19183_v49 = vadd.f32 %v19182_v1, %v19106_v3 }
 0x537   : > { %29986 = vmatprep.mubr.msk.f32.mxu1 %vm30521_vm13, %v30520_v20  ;;  %29990 = vmatpush3.msra.mxu0 %v24047_v16  ;;  %v29533_v14 = vpop.f32.mrf.mxu0  ;;  %v34124_v16 = vand.u32 4294901760, %v24871_v29 }
 0x538   : > { %29987 = vmatmul.mubr.f32.vlgmr.msra.gmra.mxu1 %v24008_v39  ;;  %29991 = vmatprep.subr.mxu0 %v30520_v20  ;;  %v19255_v23 = vpop.f32.mrf.mxu1  ;;  %v34128_v39 = vand.u32 4294901760, %v27315_v33 }
 0x539   : > { %29996 = vmatprep.subr.mxu1 %v30520_v20  ;;  %29992 = vmatpush3.msra.mxu0 %v24054_v19  ;;  %v19256_v61 = vadd.f32 %v19255_v23, %v19183_v49  ;;  %v34139_v54 = vsub.f32 %v24871_v29, %v34124_v16 }
 0x53a   : > { %29993 = vmatprep.mubr.msk.f32.mxu0 %vm30521_vm13, %v30520_v20  ;;  %29997 = vmatpush3.msra.mxu1 %v33962_v58  ;;  %v29540_v63 = vpop.f32.mrf.mxu1  ;;  %v24516_v58 = vand.u32 4294901760, %v24515_v52  ;;  %v34144_v44 = vsub.f32 %v27315_v33, %v34128_v39 }
 0x53b   : > { %29994 = vmatmul.mubr.f32.vlgmr.msra.gmra.mxu0 %v33966_v62  ;;  %29998 = vmatprep.subr.mxu1 %v30520_v20  ;;  %v34107_v34 = vadd.f32 %v19256_v61, %v34028_v30  ;;  %v19340_v26 = vpop.f32.mrf.mxu0  ;;  %v24942_v35 = vand.u32 4294901760, %v34139_v54 }
 0x53c   : > { %30003 = vmatprep.subr.mxu0 %v30520_v20  ;;  %29999 = vmatpush3.msra.mxu1 %v33970_v4  ;;  %v34120_v4 = vand.u32 4294901760, %v27316_v31  ;;  %v24988_v30 = vand.u32 4294901760, %v34144_v44 }
 0x53d   : > { %30000 = vmatprep.mubr.msk.f32.mxu1 %vm30521_vm13, %v30520_v20  ;;  %30004 = vmatpush3.msra.mxu0 %v34041_v11  ;;  %v29547_v17 = vpop.f32.mrf.mxu0  ;;  %v24943_v36 = vsub.f32 %v34139_v54, %v24942_v35 }
 0x53e   : > { %30001 = vmatmul.mubr.f32.vlgmr.msra.gmra.mxu1 %v33966_v62  ;;  %30005 = vmatprep.subr.mxu0 %v30520_v20  ;;  %v19421_v55 = vpop.f32.mrf.mxu1  ;;  %v34133_v19 = vsub.f32 %v27316_v31, %v34120_v4  ;;  %v24989_v59 = vsub.f32 %v34144_v44, %v24988_v30 }
 0x53f   : > { %30010 = vmatprep.subr.mxu1 %v30520_v20  ;;  %30006 = vmatpush3.msra.mxu0 %v34049_v9  ;;  %v19422_v28 = vadd.f32 %v19421_v55, %v19340_v26 }
 0x540   : > { %30007 = vmatprep.mubr.msk.f32.mxu0 %vm30521_vm13, %v30520_v20  ;;  %30011 = vmatpush3.msra.mxu1 %v24516_v58  ;;  %v29554_v62 = vpop.f32.mrf.mxu1  ;;  %v24981_v12 = vand.u32 4294901760, %v34133_v19  ;;  %v24990_v60 = vand.u32 4294901760, %v24989_v59 }
 0x541   : > { %30008 = vmatmul.mubr.f32.vlgmr.msra.gmra.mxu0 %v24477_v25  ;;  %30012 = vmatprep.subr.mxu1 %v30520_v20  ;;  %v19497_v42 = vpop.f32.mrf.mxu0 }
 0x542   : > { %30017 = vmatprep.subr.mxu0 %v30520_v20  ;;  %30013 = vmatpush3.msra.mxu1 %v24523_v32  ;;  %v19498_v7 = vadd.f32 %v19497_v42, %v19422_v28  ;;  %v24982_v0 = vsub.f32 %v34133_v19, %v24981_v12 }
 0x543   : > { %30014 = vmatprep.mubr.msk.f32.mxu1 %vm30521_vm13, %v30520_v20  ;;  %30018 = vmatpush3.msra.mxu0 %v34054_v27  ;;  %v29561_v50 = vpop.f32.mrf.mxu0 }
 0x544   : > { %30015 = vmatmul.mubr.f32.vlgmr.msra.gmra.mxu1 %v34045_v18  ;;  %30019 = vmatprep.subr.mxu0 %v30520_v20  ;;  %v19572_v38 = vpop.f32.mrf.mxu1 }
 0x545   : > { %30024 = vmatprep.subr.mxu1 %v30520_v20  ;;  %30020 = vmatpush3.msra.mxu0 %v34065_v22  ;;  %v19573_v41 = vadd.f32 %v19572_v38, %v19498_v7 }
 0x546   : > { %30021 = vmatprep.mubr.msk.f32.mxu0 %vm30521_vm13, %v30520_v20  ;;  %30025 = vmatpush3.msra.mxu1 %v34041_v11  ;;  %v29568_v46 = vpop.f32.mrf.mxu1 }
 0x547   : > { %30022 = vmatmul.mubr.f32.vlgmr.msra.gmra.mxu0 %v34060_v8  ;;  %30026 = vmatprep.subr.mxu1 %v30520_v20  ;;  %v19649_v40 = vpop.f32.mrf.mxu0  ;;  %v24944_v8 = vand.u32 4294901760, %v24943_v36 }
 0x548   : > { %30031 = vmatprep.subr.mxu0 %v30520_v20  ;;  %30027 = vmatpush3.msra.mxu1 %v34049_v9  ;;  %v19650_v56 = vadd.f32 %v19649_v40, %v19573_v41 }
 0x549   : > { %30028 = vmatprep.mubr.msk.f32.mxu1 %vm30521_vm13, %v30520_v20  ;;  %30032 = vmatpush3.msra.mxu0 %v24514_v15  ;;  %v29575_v2 = vpop.f32.mrf.mxu0  ;;  %v34203_v15 = vand.u32 4294901760, %v25338_v43 }
 0x54a   : > { %30029 = vmatmul.mubr.f32.vlgmr.msra.gmra.mxu1 %v24475_v13  ;;  %30033 = vmatprep.subr.mxu0 %v30520_v20  ;;  %v19722_v47 = vpop.f32.mrf.mxu1  ;;  %v34207_v13 = vand.u32 4294901760, %v27317_v53 }
 0x54b   : > { %30038 = vmatprep.subr.mxu1 %v30520_v20  ;;  %30034 = vmatpush3.msra.mxu0 %v24521_v51  ;;  %v19723_v10 = vadd.f32 %v19722_v47, %v19650_v56  ;;  %v34218_v14 = vsub.f32 %v25338_v43, %v34203_v15 }
 0x54c   : > { %30035 = vmatprep.mubr.msk.f32.mxu0 %vm30521_vm13, %v30520_v20  ;;  %30039 = vmatpush3.msra.mxu1 %v34041_v11  ;;  %v29582_v6 = vpop.f32.mrf.mxu1  ;;  %v24983_v11 = vand.u32 4294901760, %v24982_v0  ;;  %v34223_v23 = vsub.f32 %v27317_v53, %v34207_v13 }
 0x54d   : > { %30036 = vmatmul.mubr.f32.vlgmr.msra.gmra.mxu0 %v34045_v18  ;;  %30040 = vmatprep.subr.mxu1 %v30520_v20  ;;  %v34186_v21 = vadd.f32 %v19723_v10, %v34107_v34  ;;  %v19807_v27 = vpop.f32.mrf.mxu0  ;;  %v25409_v63 = vand.u32 4294901760, %v34218_v14 }
 0x54e   : > { %30045 = vmatprep.subr.mxu0 %v30520_v20  ;;  %30041 = vmatpush3.msra.mxu1 %v34049_v9  ;;  %v34199_v9 = vand.u32 4294901760, %v27318_v48  ;;  %v25455_v34 = vand.u32 4294901760, %v34223_v23 }
 0x54f   : > { %30042 = vmatprep.mubr.msk.f32.mxu1 %vm30521_vm13, %v30520_v20  ;;  %30046 = vmatpush3.msra.mxu0 %v34120_v4  ;;  %v29589_v22 = vpop.f32.mrf.mxu0  ;;  %v25410_v33 = vsub.f32 %v34218_v14, %v25409_v63 }
 0x550   : > { %30043 = vmatmul.mubr.f32.vlgmr.msra.gmra.mxu1 %v34045_v18  ;;  %30047 = vmatprep.subr.mxu0 %v30520_v20  ;;  %v19888_v3 = vpop.f32.mrf.mxu1  ;;  %v34212_v51 = vsub.f32 %v27318_v48, %v34199_v9  ;;  %v25456_v32 = vsub.f32 %v34223_v23, %v25455_v34 }
 0x551   : > { %30052 = vmatprep.subr.mxu1 %v30520_v20  ;;  %30048 = vmatpush3.msra.mxu0 %v34128_v39  ;;  %v19889_v24 = vadd.f32 %v19888_v3, %v19807_v27 }
 0x552   : > { %30049 = vmatprep.mubr.msk.f32.mxu0 %vm30521_vm13, %v30520_v20  ;;  %30053 = vmatpush3.msra.mxu1 %v24983_v11  ;;  %v29596_v18 = vpop.f32.mrf.mxu1  ;;  %v25448_v61 = vand.u32 4294901760, %v34212_v51  ;;  %v25457_v7 = vand.u32 4294901760, %v25456_v32 }
 0x553   : > { %30050 = vmatmul.mubr.f32.vlgmr.msra.gmra.mxu0 %v24944_v8  ;;  %30054 = vmatprep.subr.mxu1 %v30520_v20  ;;  %v19964_v1 = vpop.f32.mrf.mxu0 }
 0x554   : > { %30059 = vmatprep.subr.mxu0 %v30520_v20  ;;  %30055 = vmatpush3.msra.mxu1 %v24990_v60  ;;  %v19965_v49 = vadd.f32 %v19964_v1, %v19889_v24  ;;  %v25449_v29 = vsub.f32 %v34212_v51, %v25448_v61 }
 0x555   : > { %30056 = vmatprep.mubr.msk.f32.mxu1 %vm30521_vm13, %v30520_v20  ;;  %30060 = vmatpush3.msra.mxu0 %v34133_v19  ;;  %v29603_v52 = vpop.f32.mrf.mxu0 }
 0x556   : > { %30057 = vmatmul.mubr.f32.vlgmr.msra.gmra.mxu1 %v34124_v16  ;;  %30061 = vmatprep.subr.mxu0 %v30520_v20  ;;  %v20039_v57 = vpop.f32.mrf.mxu1  ;;  %v25450_v42 = vand.u32 4294901760, %v25449_v29 }
 0x557   : > { %30066 = vmatprep.subr.mxu1 %v30520_v20  ;;  %30062 = vmatpush3.msra.mxu0 %v34144_v44  ;;  %v20040_v45 = vadd.f32 %v20039_v57, %v19965_v49 }
 0x558   : > { %30063 = vmatprep.mubr.msk.f32.mxu0 %vm30521_vm13, %v30520_v20  ;;  %30067 = vmatpush3.msra.mxu1 %v34120_v4  ;;  %v29610_v37 = vpop.f32.mrf.mxu1 }
 0x559   : > { %30064 = vmatmul.mubr.f32.vlgmr.msra.gmra.mxu0 %v34139_v54  ;;  %30068 = vmatprep.subr.mxu1 %v30520_v20  ;;  %v20116_v31 = vpop.f32.mrf.mxu0 }
 0x55a   : > { %30073 = vmatprep.subr.mxu0 %v30520_v20  ;;  %30069 = vmatpush3.msra.mxu1 %v34128_v39  ;;  %v20117_v26 = vadd.f32 %v20116_v31, %v20040_v45 }
 0x55b   : > { %30070 = vmatprep.mubr.msk.f32.mxu1 %vm30521_vm13, %v30520_v20  ;;  %30074 = vmatpush3.msra.mxu0 %v24981_v12  ;;  %v29617_v58 = vpop.f32.mrf.mxu0 }
 0x55c   : > { %30071 = vmatmul.mubr.f32.vlgmr.msra.gmra.mxu1 %v24942_v35  ;;  %30075 = vmatprep.subr.mxu0 %v30520_v20  ;;  %v20189_v25 = vpop.f32.mrf.mxu1 }
 0x55d   : > { %30080 = vmatprep.subr.mxu1 %v30520_v20  ;;  %30076 = vmatpush3.msra.mxu0 %v24988_v30  ;;  %v20190_v17 = vadd.f32 %v20189_v25, %v20117_v26 }
 0x55e   : > { %30077 = vmatprep.mubr.msk.f32.mxu0 %vm30521_vm13, %v30520_v20  ;;  %30081 = vmatpush3.msra.mxu1 %v34120_v4  ;;  %v29624_v55 = vpop.f32.mrf.mxu1  ;;  %v25411_v4 = vand.u32 4294901760, %v25410_v33 }
 0x55f   : > { %30078 = vmatmul.mubr.f32.vlgmr.msra.gmra.mxu0 %v34124_v16  ;;  %30082 = vmatprep.subr.mxu1 %v30520_v20  ;;  %v20193_v28 = vadd.f32 %v20190_v17, %v34186_v21  ;;  %v20274_v62 = vpop.f32.mrf.mxu0 }
 0x560   : > { %30087 = vmatprep.subr.mxu0 %v30520_v20  ;;  %30083 = vmatpush3.msra.mxu1 %v34128_v39 }
 0x561   : > { %30084 = vmatprep.mubr.msk.f32.mxu1 %vm30521_vm13, %v30520_v20  ;;  %30088 = vmatpush3.msra.mxu0 %v34199_v9  ;;  %v29631_v19 = vpop.f32.mrf.mxu0 }
 0x562   : > { %30085 = vmatmul.mubr.f32.vlgmr.msra.gmra.mxu1 %v34124_v16  ;;  %30089 = vmatprep.subr.mxu0 %v30520_v20  ;;  %v20355_v54 = vpop.f32.mrf.mxu1 }
 0x563   : > { %30094 = vmatprep.subr.mxu1 %v30520_v20  ;;  %30090 = vmatpush3.msra.mxu0 %v34207_v13  ;;  %v20356_v50 = vadd.f32 %v20355_v54, %v20274_v62 }
 0x564   : > { %30091 = vmatprep.mubr.msk.f32.mxu0 %vm30521_vm13, %v30520_v20  ;;  %30095 = vmatpush3.msra.mxu1 %v25450_v42  ;;  %v29638_v39 = vpop.f32.mrf.mxu1 }
 0x565   : > { %30092 = vmatmul.mubr.f32.vlgmr.msra.gmra.mxu0 %v25411_v4  ;;  %30096 = vmatprep.subr.mxu1 %v30520_v20  ;;  %v20431_v44 = vpop.f32.mrf.mxu0 }
 0x566   : > { %30101 = vmatprep.subr.mxu0 %v30520_v20  ;;  %30097 = vmatpush3.msra.mxu1 %v25457_v7  ;;  %v20432_v16 = vadd.f32 %v20431_v44, %v20356_v50 }
 0x567   : > { %30098 = vmatprep.mubr.msk.f32.mxu1 %vm30521_vm13, %v30520_v20  ;;  %30102 = vmatpush3.msra.mxu0 %v34212_v51  ;;  %v29645_v38 = vpop.f32.mrf.mxu0 }
 0x568   : > { %30099 = vmatmul.mubr.f32.vlgmr.msra.gmra.mxu1 %v34203_v15  ;;  %30103 = vmatprep.subr.mxu0 %v30520_v20  ;;  %v20506_v41 = vpop.f32.mrf.mxu1 }
 0x569   : > { %30108 = vmatprep.subr.mxu1 %v30520_v20  ;;  %30104 = vmatpush3.msra.mxu0 %v34223_v23  ;;  %v20507_v12 = vadd.f32 %v20506_v41, %v20432_v16 }
 0x56a   : > { %30105 = vmatprep.mubr.msk.f32.mxu0 %vm30521_vm13, %v30520_v20  ;;  %30109 = vmatpush3.msra.mxu1 %v34199_v9  ;;  %v29652_v46 = vpop.f32.mrf.mxu1 }
 0x56b   : > { %30106 = vmatmul.mubr.f32.vlgmr.msra.gmra.mxu0 %v34218_v14  ;;  %30110 = vmatprep.subr.mxu1 %v30520_v20  ;;  %v20583_v35 = vpop.f32.mrf.mxu0 }
 0x56c   : > { %30115 = vmatprep.subr.mxu0 %v30520_v20  ;;  %30111 = vmatpush3.msra.mxu1 %v34207_v13  ;;  %v20584_v40 = vadd.f32 %v20583_v35, %v20507_v12 }
 0x56d   : > { %30112 = vmatprep.mubr.msk.f32.mxu1 %vm30521_vm13, %v30520_v20  ;;  %30116 = vmatpush3.msra.mxu0 %v25448_v61  ;;  %v29659_v30 = vpop.f32.mrf.mxu0 }
 0x56e   : > { %30113 = vmatmul.mubr.f32.vlgmr.msra.gmra.mxu1 %v25409_v63  ;;  %30117 = vmatprep.subr.mxu0 %v30520_v20  ;;  %v20656_v56 = vpop.f32.mrf.mxu1 }
 0x56f   : > { %30122 = vmatprep.subr.mxu1 %v30520_v20  ;;  %30118 = vmatpush3.msra.mxu0 %v25455_v34  ;;  %v20657_v2 = vadd.f32 %v20656_v56, %v20584_v40  ;;  %v25806_v56 = vld [vmem:[%s34755_s7 + $0x18] sm:$0xff] }
 0x570   : > { %30119 = vmatprep.mubr.msk.f32.mxu0 %vm30521_vm13, %v30520_v20  ;;  %30123 = vmatpush3.msra.mxu1 %v34199_v9  ;;  %v29666_v0 = vpop.f32.mrf.mxu1 }
 0x571   : > { %30120 = vmatmul.mubr.f32.vlgmr.msra.gmra.mxu0 %v34203_v15  ;;  %30124 = vmatprep.subr.mxu1 %v30520_v20  ;;  %v20660_v47 = vadd.f32 %v20657_v2, %v20193_v28  ;;  %v20741_v36 = vpop.f32.mrf.mxu0  ;;  %v34317_v0 = vand.u32 4294901760, %v25806_v56 }
 0x572   : > { %30125 = vmatpush3.msra.mxu1 %v34207_v13  ;;  %30126 = vmatprep.mubr.msk.f32.mxu1 %vm30521_vm13, %v30520_v20 }
 0x573   : > { %30127 = vmatmul.mubr.f32.vlgmr.msra.gmra.mxu1 %v34203_v15  ;;  %v29673_v5 = vpop.f32.mrf.mxu0  ;;  %30140 = vmatprep.subr.mxu1 %v30520_v20 }
 0x574   : > { %v20822_v10 = vpop.f32.mrf.mxu1  ;;  %30129 = vmatprep.subr.mxu0 %v30520_v20  ;;  %30148 = vmatprep.mubr.msk.f32.mxu1 %vm30521_vm13, %v30520_v20 }
 0x575   : > { %v20823_v59 = vadd.f32 %v20822_v10, %v20741_v36  ;;  %30137 = vmatprep.mubr.msk.f32.mxu0 %vm30521_vm13, %v30520_v20  ;;  %v25805_v36 = vld [vmem:[%s34755_s7 + $0x10] sm:$0xff]  ;;  %v34323_v10 = vsub.f32 %v25806_v56, %v34317_v0  ;;  %30130 = vmatpush3.msra.mxu0 %v34317_v0 }
 0x576   : > { %v29680_v6 = vpop.f32.mrf.mxu1  ;;  %30131 = vmatprep.subr.mxu0 %v30520_v20 }
 0x577   : > { %v20898_v48 = vpop.f32.mrf.mxu0 }
 0x578   : > { %v20899_v21 = vadd.f32 %v20898_v48, %v20823_v59  ;;  %v34325_v59 = vand.u32 4294901760, %v25805_v36  ;;  %v25804_v48 = vld [vmem:[%s34755_s7 + $0x8] sm:$0xff] }
 0x579   : > { %v29687_v27 = vpop.f32.mrf.mxu0 }
 0x57a   : > { %v20973_v11 = vpop.f32.mrf.mxu1  ;;  %v25918_v27 = vand.u32 4294901760, %v34323_v10  ;;  %30132 = vmatpush3.msra.mxu0 %v34325_v59 }
 0x57b   : > { %v20974_v43 = vadd.f32 %v20973_v11, %v20899_v21  ;;  %v34334_v11 = vsub.f32 %v25805_v36, %v34325_v59  ;;  %30133 = vmatprep.subr.mxu0 %v30520_v20 }
 0x57c   : > { %v29694_v8 = vpop.f32.mrf.mxu1 }
 0x57d   : > { %v21050_v53 = vpop.f32.mrf.mxu0 }
 0x57e   : > { %v21051_v22 = vadd.f32 %v21050_v53, %v20974_v43  ;;  %v34336_v43 = vand.u32 4294901760, %v25804_v48  ;;  %v25803_v53 = vld [vmem:[%s34755_s7] sm:$0xff] }
 0x57f   : > { %v29701_v60 = vpop.f32.mrf.mxu0 }
 0x580   : > { %v21123_v9 = vpop.f32.mrf.mxu1  ;;  %v25919_v60 = vsub.f32 %v34323_v10, %v25918_v27  ;;  %30134 = vmatpush3.msra.mxu0 %v34336_v43 }
 0x581   : > { %v21124_v3 = vadd.f32 %v21123_v9, %v21051_v22  ;;  %v25925_v9 = vand.u32 4294901760, %v34334_v11  ;;  %30135 = vmatprep.subr.mxu0 %v30520_v20 }
 0x582   : > { %v29708_v15 = vpop.f32.mrf.mxu1 }
 0x583   : > { %v21127_v24 = vadd.f32 %v21124_v3, %v20660_v47  ;;  %v21209_v13 = vpop.f32.mrf.mxu0  ;;  %v34348_v3 = vsub.f32 %v25804_v48, %v34336_v43  ;;  %v34350_v15 = vand.u32 4294901760, %v25803_v53 }
 0x585   : > { %v29715_v18 = vpop.f32.mrf.mxu0  ;;  %30136 = vmatpush3.msra.mxu0 %v34350_v15 }
 0x586   : > { %v21290_v1 = vpop.f32.mrf.mxu1  ;;  %v25920_v18 = vand.u32 4294901760, %v25919_v60  ;;  %30151 = vmatprep.subr.mxu0 %v30520_v20 }
 0x587   : > { %v21291_v51 = vadd.f32 %v21290_v1, %v21209_v13  ;;  %v25926_v1 = vsub.f32 %v34334_v11, %v25925_v9 }
 0x588   : > { %v29722_v49 = vpop.f32.mrf.mxu1  ;;  %30141 = vmatpush3.msra.mxu1 %v25920_v18 }
 0x589   : > { %v21366_v14 = vpop.f32.mrf.mxu0  ;;  %v34359_v49 = vsub.f32 %v25803_v53, %v34350_v15  ;;  %30142 = vmatprep.subr.mxu1 %v30520_v20 }
 0x58a   : > { %v21367_v52 = vadd.f32 %v21366_v14, %v21291_v51  ;;  %v25932_v51 = vand.u32 4294901760, %v34348_v3 }
 0x58b   : > { %v29729_v23 = vpop.f32.mrf.mxu0 }
 0x58c   : > { %v21441_v57 = vpop.f32.mrf.mxu1  ;;  %v25927_v23 = vand.u32 4294901760, %v25926_v1 }
 0x58d   : > { %v21442_v45 = vadd.f32 %v21441_v57, %v21367_v52  ;;  %v25933_v57 = vsub.f32 %v34348_v3, %v25932_v51 }
 0x58e   : > { %v29736_v61 = vpop.f32.mrf.mxu1  ;;  %30143 = vmatpush3.msra.mxu1 %v25927_v23 }
 0x58f   : > { %v21518_v37 = vpop.f32.mrf.mxu0  ;;  %30144 = vmatprep.subr.mxu1 %v30520_v20 }
 0x590   : > { %v21519_v63 = vadd.f32 %v21518_v37, %v21442_v45  ;;  %v25939_v45 = vand.u32 4294901760, %v34359_v49 }
 0x591   : > { %v29743_v31 = vpop.f32.mrf.mxu0 }
 0x592   : > { %v21591_v34 = vpop.f32.mrf.mxu1  ;;  %v25934_v31 = vand.u32 4294901760, %v25933_v57 }
 0x593   : > { %v21592_v26 = vadd.f32 %v21591_v34, %v21519_v63  ;;  %v25940_v34 = vsub.f32 %v34359_v49, %v25939_v45 }
 0x594   : > { %v29750_v58 = vpop.f32.mrf.mxu1  ;;  %30145 = vmatpush3.msra.mxu1 %v25934_v31 }
 0x595   : > { %v21595_v29 = vadd.f32 %v21592_v26, %v21127_v24  ;;  %v21676_v25 = vpop.f32.mrf.mxu0  ;;  %v25941_v58 = vand.u32 4294901760, %v25940_v34  ;;  %30146 = vmatprep.subr.mxu1 %v30520_v20 }
 0x597   : > { %v29757_v33 = vpop.f32.mrf.mxu0  ;;  %30147 = vmatpush3.msra.mxu1 %v25941_v58 }
 0x598   : > { %v21757_v17 = vpop.f32.mrf.mxu1  ;;  %30162 = vmatprep.subr.mxu1 %v30520_v20 }
 0x599   : > { %v21758_v32 = vadd.f32 %v21757_v17, %v21676_v25 }
 0x59a   : > { %v29764_v55 = vpop.f32.mrf.mxu1 }
 0x59b   : > { %v21833_v28 = vpop.f32.mrf.mxu0 }
 0x59c   : > { %v21834_v62 = vadd.f32 %v21833_v28, %v21758_v32 }
 0x59d   : > { %v29771_v42 = vpop.f32.mrf.mxu0 }
 0x59e   : > { %v21908_v4 = vpop.f32.mrf.mxu1 }
 0x59f   : > { %v21909_v19 = vadd.f32 %v21908_v4, %v21834_v62 }
 0x5a0   : > { %v29778_v7 = vpop.f32.mrf.mxu1 }
 0x5a1   : > { %v21985_v54 = vpop.f32.mrf.mxu0 }
 0x5a2   : > { %v21986_v50 = vadd.f32 %v21985_v54, %v21909_v19 }
 0x5a3   : > { %v29785_v39 = vpop.f32.mrf.mxu0 }
 0x5a4   : > { %v22058_v44 = vpop.f32.mrf.mxu1 }
 0x5a5   : > { %v22059_v16 = vadd.f32 %v22058_v44, %v21986_v50 }
 0x5a6   : > { %v29792_v38 = vpop.f32.mrf.mxu1 }
 0x5a7   : > { %v22062_v41 = vadd.f32 %v22059_v16, %v21595_v29  ;;  %v22143_v12 = vpop.f32.mrf.mxu0 }
 0x5a9   : > { %v29799_v46 = vpop.f32.mrf.mxu0 }
 0x5aa   : > { %v22224_v35 = vpop.f32.mrf.mxu1 }
 0x5ab   : > { %v22225_v40 = vadd.f32 %v22224_v35, %v22143_v12 }
 0x5ac   : > { %v29806_v30 = vpop.f32.mrf.mxu1 }
 0x5ad   : > { %v22300_v2 = vpop.f32.mrf.mxu0 }
 0x5ae   : > { %v22301_v47 = vadd.f32 %v22300_v2, %v22225_v40 }
 0x5af   : > { %v29813_v5 = vpop.f32.mrf.mxu0 }
 0x5b0   : > { %v22375_v6 = vpop.f32.mrf.mxu1 }
 0x5b1   : > { %v22376_v21 = vadd.f32 %v22375_v6, %v22301_v47 }
 0x5b2   : > { %v29820_v8 = vpop.f32.mrf.mxu1 }
 0x5b3   : > { %v22452_v22 = vpop.f32.mrf.mxu0 }
 0x5b4   : > { %v22453_v24 = vadd.f32 %v22452_v22, %v22376_v21 }
 0x5b5   : > { %v29827_v13 = vpop.f32.mrf.mxu0 }
 0x5b6   : > { %v22525_v14 = vpop.f32.mrf.mxu1 }
 0x5b7   : > { %v22526_v52 = vadd.f32 %v22525_v14, %v22453_v24 }
 0x5b8   : > { %v29834_v61 = vpop.f32.mrf.mxu1 }
 0x5b9   : > { %v22529_v37 = vadd.f32 %v22526_v52, %v22062_v41  ;;  %v22610_v63 = vpop.f32.mrf.mxu0 }
 0x5bb   : > { %v29841_v26 = vpop.f32.mrf.mxu0 }
 0x5bc   : > { %v22691_v29 = vpop.f32.mrf.mxu1 }
 0x5bd   : > { %v22692_v25 = vadd.f32 %v22691_v29, %v22610_v63 }
 0x5be   : > { %v29848_v33 = vpop.f32.mrf.mxu1 }
 0x5bf   : > { %v22767_v17 = vpop.f32.mrf.mxu0 }
 0x5c0   : > { %v22768_v32 = vadd.f32 %v22767_v17, %v22692_v25 }
 0x5c1   : > { %v29855_v55 = vpop.f32.mrf.mxu0 }
 0x5c2   : > { %v22842_v28 = vpop.f32.mrf.mxu1 }
 0x5c3   : > { %v22843_v62 = vadd.f32 %v22842_v28, %v22768_v32 }
 0x5c4   : > { %v29862_v42 = vpop.f32.mrf.mxu1 }
 0x5c5   : > { %v22919_v4 = vpop.f32.mrf.mxu0 }
 0x5c6   : > { %v22920_v19 = vadd.f32 %v22919_v4, %v22843_v62 }
 0x5c7   : > { %v29869_v7 = vpop.f32.mrf.mxu0 }
 0x5c8   : > { %v22992_v54 = vpop.f32.mrf.mxu1 }
 0x5c9   : > { %v22993_v50 = vadd.f32 %v22992_v54, %v22920_v19 }
 0x5ca   : > { %v29876_v39 = vpop.f32.mrf.mxu1 }
 0x5cb   : > { %v22996_v44 = vadd.f32 %v22993_v50, %v22529_v37  ;;  %v23077_v16 = vpop.f32.mrf.mxu0 }
 0x5cd   : > { %v29883_v38 = vpop.f32.mrf.mxu0 }
 0x5ce   : > { %v23158_v41 = vpop.f32.mrf.mxu1 }
 0x5cf   : > { %v23159_v12 = vadd.f32 %v23158_v41, %v23077_v16 }
 0x5d0   : > { %v29890_v46 = vpop.f32.mrf.mxu1 }
 0x5d1   : > { %v23234_v35 = vpop.f32.mrf.mxu0 }
 0x5d2   : > { %v23235_v40 = vadd.f32 %v23234_v35, %v23159_v12 }
 0x5d3   : > { %v29897_v30 = vpop.f32.mrf.mxu0 }
 0x5d4   : > { %v23309_v56 = vpop.f32.mrf.mxu1 }
 0x5d5   : > { %v23310_v2 = vadd.f32 %v23309_v56, %v23235_v40 }
 0x5d6   : > { %v29904_v47 = vpop.f32.mrf.mxu1 }
 0x5d7   : > { %v23386_v36 = vpop.f32.mrf.mxu0 }
 0x5d8   : > { %v23387_v5 = vadd.f32 %v23386_v36, %v23310_v2 }
 0x5d9   : > { %v29911_v6 = vpop.f32.mrf.mxu0 }
 0x5da   : > { %v23459_v48 = vpop.f32.mrf.mxu1 }
 0x5db   : > { %v23460_v21 = vadd.f32 %v23459_v48, %v23387_v5 }
 0x5dc   : > { %v29918_v8 = vpop.f32.mrf.mxu1 }
 0x5dd   : > { %v23463_v53 = vadd.f32 %v23460_v21, %v22996_v44  ;;  %v23545_v22 = vpop.f32.mrf.mxu0 }
 0x5df   : > { %v29925_v60 = vpop.f32.mrf.mxu0 }
 0x5e0   : > { %v23626_v24 = vpop.f32.mrf.mxu1 }
 0x5e1   : > { %v23627_v13 = vadd.f32 %v23626_v24, %v23545_v22 }
 0x5e2   : > { %v29932_v18 = vpop.f32.mrf.mxu1 }
 0x5e3   : > { %v23702_v1 = vpop.f32.mrf.mxu0 }
 0x5e4   : > { %v23703_v14 = vadd.f32 %v23702_v1, %v23627_v13 }
 0x5e5   : > { %v29939_v52 = vpop.f32.mrf.mxu0 }
 0x5e6   : > { %v23777_v23 = vpop.f32.mrf.mxu1 }
 0x5e7   : > { %v23778_v57 = vadd.f32 %v23777_v23, %v23703_v14 }
 0x5e8   : > { %v29946_v61 = vpop.f32.mrf.mxu1 }
 0x5e9   : > { %v23854_v37 = vpop.f32.mrf.mxu0 }
 0x5ea   : > { %v23855_v63 = vadd.f32 %v23854_v37, %v23778_v57 }
 0x5eb   : > { %v29953_v31 = vpop.f32.mrf.mxu0 }
 0x5ec   : > { %v23927_v34 = vpop.f32.mrf.mxu1 }
 0x5ed   : > { %v23928_v26 = vadd.f32 %v23927_v34, %v23855_v63 }
 0x5ee   : > { %v29960_v58 = vpop.f32.mrf.mxu1 }
 0x5ef   : > { %v23931_v29 = vadd.f32 %v23928_v26, %v23463_v53  ;;  %v24012_v25 = vpop.f32.mrf.mxu0 }
 0x5f1   : > { %v29967_v33 = vpop.f32.mrf.mxu0 }
 0x5f2   : > { %v24093_v17 = vpop.f32.mrf.mxu1 }
 0x5f3   : > { %v24094_v21 = vadd.f32 %v24093_v17, %v24012_v25 }
 0x5f4   : > { %v29974_v32 = vpop.f32.mrf.mxu1 }
 0x5f5   : > { %v24169_v55 = vpop.f32.mrf.mxu0 }
 0x5f6   : > { %v24170_v24 = vadd.f32 %v24169_v55, %v24094_v21 }
 0x5f7   : > { %v29981_v28 = vpop.f32.mrf.mxu0 }
 0x5f8   : > { %v24244_v62 = vpop.f32.mrf.mxu1 }
 0x5f9   : > { %v24245_v52 = vadd.f32 %v24244_v62, %v24170_v24 }
 0x5fa   : > { %v29988_v42 = vpop.f32.mrf.mxu1 }
 0x5fb   : > { %v24321_v4 = vpop.f32.mrf.mxu0 }
 0x5fc   : > { %v24322_v31 = vadd.f32 %v24321_v4, %v24245_v52 }
 0x5fd   : > { %v29995_v19 = vpop.f32.mrf.mxu0 }
 0x5fe   : > { %v24394_v7 = vpop.f32.mrf.mxu1 }
 0x5ff   : > { %v24395_v32 = vadd.f32 %v24394_v7, %v24322_v31  ;;  %v25800_v7 = vld [vmem:[%s34754_s6] sm:$0x1] }
 0x600   : > { %v30002_v54 = vpop.f32.mrf.mxu1 }
 0x601   : > { %v24479_v50 = vpop.f32.mrf.mxu0  ;;  %v24398_v62 = vadd.f32 %v24395_v32, %v23931_v29 }
 0x603   : > { %v30009_v39 = vpop.f32.mrf.mxu0 }
 0x604   : > { %v24560_v44 = vpop.f32.mrf.mxu1 }
 0x605   : > { %v24561_v53 = vadd.f32 %v24560_v44, %v24479_v50 }
 0x606   : > { %v30016_v16 = vpop.f32.mrf.mxu1 }
 0x607   : > { %v24636_v38 = vpop.f32.mrf.mxu0 }
 0x608   : > { %v24637_v1 = vadd.f32 %v24636_v38, %v24561_v53 }
 0x609   : > { %v30023_v41 = vpop.f32.mrf.mxu0 }
 0x60a   : > { %v24711_v12 = vpop.f32.mrf.mxu1 }
 0x60b   : > { %v24712_v37 = vadd.f32 %v24711_v12, %v24637_v1 }
 0x60c   : > { %v30030_v46 = vpop.f32.mrf.mxu1 }
 0x60d   : > { %v24788_v35 = vpop.f32.mrf.mxu0 }
 0x60e   : > { %v24789_v25 = vadd.f32 %v24788_v35, %v24712_v37 }
 0x60f   : > { %v30037_v40 = vpop.f32.mrf.mxu0 }
 0x610   : > { %v24861_v30 = vpop.f32.mrf.mxu1 }
 0x611   : > { %v24862_v19 = vadd.f32 %v24861_v30, %v24789_v25 }
 0x612   : > { %v30044_v56 = vpop.f32.mrf.mxu1 }
 0x613   : > { %v24946_v2 = vpop.f32.mrf.mxu0  ;;  %v24865_v38 = vadd.f32 %v24862_v19, %v24398_v62  ;;  %v26300_v19 = vld [vmem:[%s34757_s9 + $0x10] sm:$0xff] }
 0x615   : > { %v30051_v47 = vpop.f32.mrf.mxu0 }
 0x616   : > { %v25027_v36 = vpop.f32.mrf.mxu1 }
 0x617   : > { %v25028_v13 = vadd.f32 %v25027_v36, %v24946_v2 }
 0x618   : > { %v30058_v5 = vpop.f32.mrf.mxu1 }
 0x619   : > { %v25103_v6 = vpop.f32.mrf.mxu0 }
 0x61a   : > { %v25104_v23 = vadd.f32 %v25103_v6, %v25028_v13 }
 0x61b   : > { %v30065_v48 = vpop.f32.mrf.mxu0 }
 0x61c   : > { %v25178_v8 = vpop.f32.mrf.mxu1 }
 0x61d   : > { %v25179_v34 = vadd.f32 %v25178_v8, %v25104_v23 }
 0x61e   : > { %v30072_v22 = vpop.f32.mrf.mxu1 }
 0x61f   : > { %v25255_v60 = vpop.f32.mrf.mxu0  ;;  %v26304_v22 = vld [vmem:[%s34757_s9 + $0x30] sm:$0xff] }
 0x620   : > { %v25256_v28 = vadd.f32 %v25255_v60, %v25179_v34  ;;  %v34477_v1 = vand.u32 4294901760, %v26304_v22 }
 0x621   : > { %v30079_v18 = vpop.f32.mrf.mxu0 }
 0x622   : > { %v25328_v14 = vpop.f32.mrf.mxu1  ;;  %v34491_v37 = vsub.f32 %v26304_v22, %v34477_v1 }
 0x623   : > { %v25329_v39 = vadd.f32 %v25328_v14, %v25256_v28  ;;  %v26303_v14 = vld [vmem:[%s34757_s9 + $0x28] sm:$0xff] }
 0x624   : > { %v30086_v57 = vpop.f32.mrf.mxu1  ;;  %v26445_v25 = vand.u32 4294901760, %v34491_v37 }
 0x625   : > { %v25413_v61 = vpop.f32.mrf.mxu0  ;;  %v25332_v46 = vadd.f32 %v25329_v39, %v24865_v38  ;;  %v34534_v39 = vand.u32 4294901760, %v26300_v19 }
 0x627   : > { %v30093_v63 = vpop.f32.mrf.mxu0 }
 0x628   : > { %v25494_v26 = vpop.f32.mrf.mxu1  ;;  %v26302_v63 = vld [vmem:[%s34757_s9 + $0x20] sm:$0xff] }
 0x629   : > { %v25495_v58 = vadd.f32 %v25494_v26, %v25413_v61  ;;  %v34487_v61 = vand.u32 4294901760, %v26303_v14 }
 0x62a   : > { %v30100_v33 = vpop.f32.mrf.mxu1 }
 0x62b   : > { %v25570_v17 = vpop.f32.mrf.mxu0  ;;  %v34501_v26 = vsub.f32 %v26303_v14, %v34487_v61  ;;  %v26301_v33 = vld [vmem:[%s34757_s9 + $0x18] sm:$0xff] }
 0x62c   : > { %v25571_v55 = vadd.f32 %v25570_v17, %v25495_v58  ;;  %v34503_v58 = vand.u32 4294901760, %v26302_v63 }
 0x62d   : > { %v30107_v42 = vpop.f32.mrf.mxu0  ;;  %v26452_v32 = vand.u32 4294901760, %v34501_v26 }
 0x62e   : > { %v25645_v54 = vpop.f32.mrf.mxu1  ;;  %v34514_v28 = vsub.f32 %v26302_v63, %v34503_v58  ;;  %v26446_v42 = vsub.f32 %v34491_v37, %v26445_v25 }
 0x62f   : > { %v25646_v50 = vadd.f32 %v25645_v54, %v25571_v55  ;;  %v34516_v55 = vand.u32 4294901760, %v26301_v33  ;;  %v26453_v54 = vsub.f32 %v34501_v26, %v26452_v32 }
 0x630   : > { %v30114_v44 = vpop.f32.mrf.mxu1 }
 0x631   : > { %v25722_v16 = vpop.f32.mrf.mxu0  ;;  %v34532_v62 = vsub.f32 %v26301_v33, %v34516_v55  ;;  %v26447_v44 = vand.u32 4294901760, %v26446_v42  ;;  %v26454_v38 = vand.u32 4294901760, %v26453_v54 }
 0x632   : > { %v25723_v41 = vadd.f32 %v25722_v16, %v25646_v50  ;;  %v26459_v50 = vand.u32 4294901760, %v34514_v28  ;;  %v26299_v16 = vld [vmem:[%s34757_s9 + $0x8] sm:$0xff] }
 0x633   : > { %v30121_v4 = vpop.f32.mrf.mxu0  ;;  %v25795_v12 = vpop.f32.mrf.mxu1 }
 0x634   : > { %v25796_v40 = vadd.f32 %v25795_v12, %v25723_v41  ;;  %v26460_v41 = vsub.f32 %v34514_v28, %v26459_v50  ;;  %v26466_v4 = vand.u32 4294901760, %v34532_v62  ;;  %v34547_v12 = vsub.f32 %v26300_v19, %v34534_v39 }
 0x635   : > { %v30128_v35 = vpop.f32.mrf.mxu1 }
 0x636   : > { %v25799_v56 = vadd.f32 %v25796_v40, %v25332_v46  ;;  %v34550_v46 = vand.u32 4294901760, %v26299_v16  ;;  %v26298_v40 = vld [vmem:[%s34757_s9] sm:$0xff]  ;;  %v26467_v35 = vsub.f32 %v34532_v62, %v26466_v4 }
 0x638   : > { %v25801_v2 = vadd.f32 %v25800_v7, %v25799_v56  ;;  %v26461_v7 = vand.u32 4294901760, %v26460_v41  ;;  %v26473_v56 = vand.u32 4294901760, %v34547_v12 }
 0x63a   : > { %v25802_v30 = vmax.f32 %v25801_v2, 0.0  ;;  %v34561_v2 = vand.u32 4294901760, %v26298_v40 }
 0x63c   : > { %v25810_v47 = vsel %vm25808_vm14, %v25802_v30, 0  ;;  %v34565_v30 = vsub.f32 %v26299_v16, %v34550_v46 }
 0x63d   : > { %v25881_v29 = vand.u32 4294901760, %v25810_v47 }
 0x63f   : > { %v25882_v36 = vsub.f32 %v25810_v47, %v25881_v29  ;;  %30149 = vmatmul.mubr.f32.vlgmr.msra.gmra.mxu1 %v25881_v29  ;;  %v26468_v47 = vand.u32 4294901760, %v26467_v35 }
 0x640   : > { %30163 = vmatpush3.msra.mxu1 %v34317_v0  ;;  %30170 = vmatprep.mubr.msk.f32.mxu1 %vm30521_vm13, %v30520_v20 }
 0x641   : > { %30164 = vmatprep.subr.mxu1 %v30520_v20  ;;  %v25883_v5 = vand.u32 4294901760, %v25882_v36 }
 0x642   : > { %30165 = vmatpush3.msra.mxu1 %v34325_v59 }
 0x643   : > { %30166 = vmatprep.subr.mxu1 %v30520_v20  ;;  %v25884_v6 = vsub.f32 %v25882_v36, %v25883_v5 }
 0x644   : > { %30167 = vmatpush3.msra.mxu1 %v34336_v43 }
 0x645   : > { %30168 = vmatprep.subr.mxu1 %v30520_v20  ;;  %v25885_v48 = vand.u32 4294901760, %v25884_v6 }
 0x646   : > { %30169 = vmatpush3.msra.mxu1 %v34350_v15 }
 0x647   : > { %30171 = vmatmul.mubr.f32.vlgmr.msra.gmra.mxu1 %v25883_v5  ;;  %30184 = vmatprep.subr.mxu1 %v30520_v20  ;;  %v26480_v5 = vand.u32 4294901760, %v34565_v30 }
 0x648   : > { %30138 = vmatmul.mubr.f32.vlgmr.msra.gmra.mxu0 %v25885_v48  ;;  %30185 = vmatpush3.msra.mxu1 %v34317_v0  ;;  %v26308_v0 = vld [vmem:[%s34757_s9 + $0x50] sm:$0xf] }
 0x649   : > { %30152 = vmatpush3.msra.mxu0 %v34323_v10  ;;  %30186 = vmatprep.subr.mxu1 %v30520_v20  ;;  %v26316_v10 = vsel %vm1499_vm5, %v26308_v0, 0  ;;  %v26481_v0 = vsub.f32 %v34565_v30, %v26480_v5 }
 0x64a   : > { %30153 = vmatprep.subr.mxu0 %v30520_v20  ;;  %30187 = vmatpush3.msra.mxu1 %v34325_v59  ;;  %v34429_v59 = vand.u32 4294901760, %v26316_v10 }
 0x64b   : > { %30154 = vmatpush3.msra.mxu0 %v34334_v11  ;;  %30188 = vmatprep.subr.mxu1 %v30520_v20 }
 0x64c   : > { %30155 = vmatprep.subr.mxu0 %v30520_v20  ;;  %30189 = vmatpush3.msra.mxu1 %v34336_v43  ;;  %v34435_v11 = vsub.f32 %v26316_v10, %v34429_v59 }
 0x64d   : > { %30156 = vmatpush3.msra.mxu0 %v34348_v3  ;;  %30190 = vmatprep.subr.mxu1 %v30520_v20 }
 0x64e   : > { %30157 = vmatprep.subr.mxu0 %v30520_v20  ;;  %30159 = vmatprep.mubr.msk.f32.mxu0 %vm30521_vm13, %v30520_v20  ;;  %v26417_v3 = vand.u32 4294901760, %v34435_v11 }
 0x64f   : > { %30158 = vmatpush3.msra.mxu0 %v34359_v49  ;;  %30191 = vmatpush3.msra.mxu1 %v34350_v15  ;;  %v26305_v49 = vld [vmem:[%s34757_s9 + $0x38] sm:$0xff] }
 0x650   : > { %30192 = vmatprep.mubr.msk.f32.mxu1 %vm30521_vm13, %v30520_v20  ;;  %30160 = vmatmul.mubr.f32.vlgmr.msra.gmra.mxu0 %v25882_v36  ;;  %v34462_v53 = vand.u32 4294901760, %v26305_v49  ;;  %v34573_v36 = vsub.f32 %v26298_v40, %v34561_v2 }
 0x651   : > { %30173 = vmatprep.subr.mxu0 %v30520_v20  ;;  %30193 = vmatmul.mubr.f32.vlgmr.msra.gmra.mxu1 %v25881_v29 }
 0x652   : > { %30174 = vmatpush3.msra.mxu0 %v25918_v27  ;;  %30181 = vmatprep.mubr.msk.f32.mxu0 %vm30521_vm13, %v30520_v20  ;;  %v26307_v27 = vld [vmem:[%s34757_s9 + $0x48] sm:$0xff]  ;;  %v34474_v18 = vsub.f32 %v26305_v49, %v34462_v53  ;;  %v26487_v48 = vand.u32 4294901760, %v34573_v36 }
 0x653   : > { %30175 = vmatprep.subr.mxu0 %v30520_v20  ;;  %30220 = vmatprep.subr.mxu1 %v30520_v20  ;;  %v34437_v43 = vand.u32 4294901760, %v26307_v27 }
 0x654   : > { %30176 = vmatpush3.msra.mxu0 %v25925_v9  ;;  %30242 = vmatprep.mubr.msk.f32.mxu1 %vm30521_vm13, %v30520_v20  ;;  %v26306_v9 = vld [vmem:[%s34757_s9 + $0x40] sm:$0xff]  ;;  %v26438_v57 = vand.u32 4294901760, %v34474_v18  ;;  %v26488_v10 = vsub.f32 %v34573_v36, %v26487_v48 }
 0x655   : > { %30177 = vmatprep.subr.mxu0 %v30520_v20  ;;  %v34446_v15 = vsub.f32 %v26307_v27, %v34437_v43  ;;  %v26482_v27 = vand.u32 4294901760, %v26481_v0 }
 0x656   : > { %30178 = vmatpush3.msra.mxu0 %v25932_v51  ;;  %v34448_v51 = vand.u32 4294901760, %v26306_v9  ;;  %v26439_v34 = vsub.f32 %v34474_v18, %v26438_v57 }
 0x657   : > { %30179 = vmatprep.subr.mxu0 %v30520_v20  ;;  %v26424_v21 = vand.u32 4294901760, %v34446_v15 }
 0x658   : > { %30180 = vmatpush3.msra.mxu0 %v25939_v45  ;;  %v26418_v45 = vsub.f32 %v34435_v11, %v26417_v3  ;;  %v34460_v8 = vsub.f32 %v26306_v9, %v34448_v51  ;;  %v26440_v17 = vand.u32 4294901760, %v26439_v34  ;;  %v26489_v9 = vand.u32 4294901760, %v26488_v10 }
 0x659   : > { %30182 = vmatmul.mubr.f32.vlgmr.msra.gmra.mxu0 %v25881_v29  ;;  %30195 = vmatprep.subr.mxu0 %v30520_v20  ;;  %v26425_v24 = vsub.f32 %v34446_v15, %v26424_v21  ;;  %v26474_v29 = vsub.f32 %v34547_v12, %v26473_v56 }
 0x65a   : > { %30217 = vmatprep.mubr.msk.f32.mxu0 %vm30521_vm13, %v30520_v20  ;;  %30196 = vmatpush3.msra.mxu0 %v34429_v59  ;;  %v26419_v60 = vand.u32 4294901760, %v26418_v45  ;;  %v26431_v13 = vand.u32 4294901760, %v34460_v8 }
 0x65b   : > { %30197 = vmatprep.subr.mxu0 %v30520_v20  ;;  %v26426_v52 = vand.u32 4294901760, %v26425_v24  ;;  %v26475_v6 = vand.u32 4294901760, %v26474_v29 }
 0x65c   : > { %30198 = vmatpush3.msra.mxu0 %v34437_v43  ;;  %30221 = vmatpush3.msra.mxu1 %v26419_v60  ;;  %v26432_v23 = vsub.f32 %v34460_v8, %v26431_v13 }
 0x65d   : > { %30199 = vmatprep.subr.mxu0 %v30520_v20  ;;  %30222 = vmatprep.subr.mxu1 %v30520_v20 }
 0x65e   : > { %30200 = vmatpush3.msra.mxu0 %v34448_v51  ;;  %30223 = vmatpush3.msra.mxu1 %v26426_v52  ;;  %v26433_v31 = vand.u32 4294901760, %v26432_v23  ;;  %v25807_v52 = vld [vmem:[%s34756_s8] sm:$0x1] }
 0x65f   : > { %30201 = vmatprep.subr.mxu0 %v30520_v20  ;;  %30224 = vmatprep.subr.mxu1 %v30520_v20 }
 0x660   : > { %30202 = vmatpush3.msra.mxu0 %v34462_v53  ;;  %30225 = vmatpush3.msra.mxu1 %v26433_v31 }
 0x661   : > { %30203 = vmatprep.subr.mxu0 %v30520_v20  ;;  %30226 = vmatprep.subr.mxu1 %v30520_v20 }
 0x662   : > { %30204 = vmatpush3.msra.mxu0 %v34477_v1  ;;  %30227 = vmatpush3.msra.mxu1 %v26440_v17 }
 0x663   : > { %30205 = vmatprep.subr.mxu0 %v30520_v20  ;;  %30228 = vmatprep.subr.mxu1 %v30520_v20 }
 0x664   : > { %30206 = vmatpush3.msra.mxu0 %v34487_v61  ;;  %30229 = vmatpush3.msra.mxu1 %v26447_v44 }
 0x665   : > { %30207 = vmatprep.subr.mxu0 %v30520_v20  ;;  %30230 = vmatprep.subr.mxu1 %v30520_v20 }
 0x666   : > { %30208 = vmatpush3.msra.mxu0 %v34503_v58  ;;  %30231 = vmatpush3.msra.mxu1 %v26454_v38 }
 0x667   : > { %30209 = vmatprep.subr.mxu0 %v30520_v20  ;;  %30232 = vmatprep.subr.mxu1 %v30520_v20 }
 0x668   : > { %30210 = vmatpush3.msra.mxu0 %v34516_v55  ;;  %30233 = vmatpush3.msra.mxu1 %v26461_v7 }
 0x669   : > { %30211 = vmatprep.subr.mxu0 %v30520_v20  ;;  %30234 = vmatprep.subr.mxu1 %v30520_v20 }
 0x66a   : > { %30212 = vmatpush3.msra.mxu0 %v34534_v39  ;;  %30235 = vmatpush3.msra.mxu1 %v26468_v47 }
 0x66b   : > { %30213 = vmatprep.subr.mxu0 %v30520_v20  ;;  %30236 = vmatprep.subr.mxu1 %v30520_v20 }
 0x66c   : > { %30214 = vmatpush3.msra.mxu0 %v34550_v46  ;;  %30237 = vmatpush3.msra.mxu1 %v26475_v6 }
 0x66d   : > { %30215 = vmatprep.subr.mxu0 %v30520_v20  ;;  %30238 = vmatprep.subr.mxu1 %v30520_v20 }
 0x66e   : > { %30216 = vmatpush3.msra.mxu0 %v34561_v2  ;;  %30239 = vmatpush3.msra.mxu1 %v26482_v27 }
 0x66f   : > { %30245 = vmatprep.subr.mxu0 %v30520_v20  ;;  %30240 = vmatprep.subr.mxu1 %v30520_v20 }
 0x670   : > { %30241 = vmatpush3.msra.mxu1 %v26489_v9 }
 0x671   : > { %30270 = vmatprep.subr.mxu1 %v30520_v20 }
 0x6ff   : > { %v25978_v49 = vpop.f32.mrf.mxu1 }
 0x701   : > { %v30150_v45 = vpop.f32.mrf.mxu1 }
 0x707   : > { %v26135_v22 = vpop.f32.mrf.mxu1 }
 0x708   : > { %v25887_v60 = vpop.f32.mrf.mxu0 }
 0x709   : > { %v30172_v24 = vpop.f32.mrf.mxu1  ;;  %v25888_v23 = vadd.f32 %v25887_v60, %v25807_v52 }
 0x70a   : > { %v30139_v14 = vpop.f32.mrf.mxu0 }
 0x70b   : > { %v25979_v34 = vadd.f32 %v25978_v49, %v25888_v23 }
 0x710   : > { %v26058_v63 = vpop.f32.mrf.mxu0 }
 0x711   : > { %v26293_v31 = vpop.f32.mrf.mxu1  ;;  %v26059_v42 = vadd.f32 %v26058_v63, %v25979_v34 }
 0x712   : > { %v30161_v33 = vpop.f32.mrf.mxu0 }
 0x713   : > { %v30194_v17 = vpop.f32.mrf.mxu1  ;;  %v26136_v19 = vadd.f32 %v26135_v22, %v26059_v42 }
 0x719   : > { %v26218_v54 = vpop.f32.mrf.mxu0 }
 0x71a   : > { %v26219_v44 = vadd.f32 %v26218_v54, %v26136_v19 }
 0x71b   : > { %v30183_v16 = vpop.f32.mrf.mxu0 }
 0x71c   : > { %v26294_v38 = vadd.f32 %v26293_v31, %v26219_v44 }
 0x71e   : > { %v26297_v41 = vmax.f32 %v26294_v38, 0.0 }
 0x720   : > { %v26312_v40 = vsel %vm26310_vm15, %v26297_v41, 0 }
 0x721   : > { %v34594_v7 = vand.u32 4294901760, %v26312_v40 }
 0x723   : > { %v26395_v35 = vsub.f32 %v26312_v40, %v34594_v7  ;;  %30243 = vmatmul.mubr.f32.vlgmr.msra.gmra.mxu1 %v34594_v7 }
 0x724   : > { %30271 = vmatpush3.msra.mxu1 %v34429_v59  ;;  %30292 = vmatprep.mubr.msk.f32.mxu1 %vm30521_vm13, %v30520_v20 }
 0x725   : > { %v26396_v47 = vand.u32 4294901760, %v26395_v35  ;;  %30272 = vmatprep.subr.mxu1 %v30520_v20 }
 0x726   : > { %30273 = vmatpush3.msra.mxu1 %v34437_v43 }
 0x727   : > { %v26397_v29 = vsub.f32 %v26395_v35, %v26396_v47  ;;  %30274 = vmatprep.subr.mxu1 %v30520_v20 }
 0x728   : > { %30275 = vmatpush3.msra.mxu1 %v34448_v51 }
 0x729   : > { %v26398_v6 = vand.u32 4294901760, %v26397_v29  ;;  %30276 = vmatprep.subr.mxu1 %v30520_v20 }
 0x72a   : > { %30277 = vmatpush3.msra.mxu1 %v34462_v53 }
 0x72b   : > { %30278 = vmatprep.subr.mxu1 %v30520_v20  ;;  %30218 = vmatmul.mubr.f32.vlgmr.msra.gmra.mxu0 %v26398_v6 }
 0x72c   : > { %30246 = vmatpush3.msra.mxu0 %v34435_v11  ;;  %30279 = vmatpush3.msra.mxu1 %v34477_v1 }
 0x72d   : > { %30247 = vmatprep.subr.mxu0 %v30520_v20  ;;  %30280 = vmatprep.subr.mxu1 %v30520_v20 }
 0x72e   : > { %30248 = vmatpush3.msra.mxu0 %v34446_v15  ;;  %30281 = vmatpush3.msra.mxu1 %v34487_v61 }
 0x72f   : > { %30249 = vmatprep.subr.mxu0 %v30520_v20  ;;  %30282 = vmatprep.subr.mxu1 %v30520_v20 }
 0x730   : > { %30250 = vmatpush3.msra.mxu0 %v34460_v8  ;;  %30283 = vmatpush3.msra.mxu1 %v34503_v58 }
 0x731   : > { %30251 = vmatprep.subr.mxu0 %v30520_v20  ;;  %30284 = vmatprep.subr.mxu1 %v30520_v20 }
 0x732   : > { %30252 = vmatpush3.msra.mxu0 %v34474_v18  ;;  %30285 = vmatpush3.msra.mxu1 %v34516_v55 }
 0x733   : > { %30253 = vmatprep.subr.mxu0 %v30520_v20  ;;  %30286 = vmatprep.subr.mxu1 %v30520_v20 }
 0x734   : > { %30254 = vmatpush3.msra.mxu0 %v34491_v37  ;;  %30287 = vmatpush3.msra.mxu1 %v34534_v39 }
 0x735   : > { %30255 = vmatprep.subr.mxu0 %v30520_v20  ;;  %30288 = vmatprep.subr.mxu1 %v30520_v20 }
 0x736   : > { %30256 = vmatpush3.msra.mxu0 %v34501_v26  ;;  %30289 = vmatpush3.msra.mxu1 %v34550_v46 }
 0x737   : > { %30257 = vmatprep.subr.mxu0 %v30520_v20  ;;  %30290 = vmatprep.subr.mxu1 %v30520_v20 }
 0x738   : > { %30258 = vmatpush3.msra.mxu0 %v34514_v28  ;;  %30291 = vmatpush3.msra.mxu1 %v34561_v2 }
 0x739   : > { %30259 = vmatprep.subr.mxu0 %v30520_v20  ;;  %30293 = vmatmul.mubr.f32.vlgmr.msra.gmra.mxu1 %v26396_v47 }
 0x73a   : > { %30320 = vmatprep.subr.mxu1 %v30520_v20  ;;  %30260 = vmatpush3.msra.mxu0 %v34532_v62 }
 0x73b   : > { %30321 = vmatpush3.msra.mxu1 %v34429_v59  ;;  %30261 = vmatprep.subr.mxu0 %v30520_v20 }
 0x73c   : > { %30322 = vmatprep.subr.mxu1 %v30520_v20  ;;  %30262 = vmatpush3.msra.mxu0 %v34547_v12 }
 0x73d   : > { %30323 = vmatpush3.msra.mxu1 %v34437_v43  ;;  %30263 = vmatprep.subr.mxu0 %v30520_v20 }
 0x73e   : > { %30324 = vmatprep.subr.mxu1 %v30520_v20  ;;  %30264 = vmatpush3.msra.mxu0 %v34565_v30 }
 0x73f   : > { %30325 = vmatpush3.msra.mxu1 %v34448_v51  ;;  %30265 = vmatprep.subr.mxu0 %v30520_v20 }
 0x740   : > { %30326 = vmatprep.subr.mxu1 %v30520_v20  ;;  %30266 = vmatpush3.msra.mxu0 %v34573_v36 }
 0x741   : > { %30267 = vmatprep.mubr.msk.f32.mxu0 %vm30521_vm13, %v30520_v20  ;;  %30327 = vmatpush3.msra.mxu1 %v34462_v53  ;;  %v26309_v53 = vld [vmem:[%s34758_s10] sm:$0x1] }
 0x742   : > { %30268 = vmatmul.mubr.f32.vlgmr.msra.gmra.mxu0 %v26395_v35  ;;  %30295 = vmatprep.subr.mxu0 %v30520_v20 }
 0x743   : > { %30328 = vmatprep.subr.mxu1 %v30520_v20  ;;  %30296 = vmatpush3.msra.mxu0 %v26417_v3 }
 0x744   : > { %30329 = vmatpush3.msra.mxu1 %v34477_v1  ;;  %30297 = vmatprep.subr.mxu0 %v30520_v20 }
 0x745   : > { %30330 = vmatprep.subr.mxu1 %v30520_v20  ;;  %30298 = vmatpush3.msra.mxu0 %v26424_v21 }
 0x746   : > { %30331 = vmatpush3.msra.mxu1 %v34487_v61  ;;  %30299 = vmatprep.subr.mxu0 %v30520_v20 }
 0x747   : > { %30332 = vmatprep.subr.mxu1 %v30520_v20  ;;  %30300 = vmatpush3.msra.mxu0 %v26431_v13 }
 0x748   : > { %30333 = vmatpush3.msra.mxu1 %v34503_v58  ;;  %30301 = vmatprep.subr.mxu0 %v30520_v20 }
 0x749   : > { %30334 = vmatprep.subr.mxu1 %v30520_v20  ;;  %30302 = vmatpush3.msra.mxu0 %v26438_v57 }
 0x74a   : > { %30335 = vmatpush3.msra.mxu1 %v34516_v55  ;;  %30303 = vmatprep.subr.mxu0 %v30520_v20 }
 0x74b   : > { %30336 = vmatprep.subr.mxu1 %v30520_v20  ;;  %30304 = vmatpush3.msra.mxu0 %v26445_v25 }
 0x74c   : > { %30337 = vmatpush3.msra.mxu1 %v34534_v39  ;;  %30305 = vmatprep.subr.mxu0 %v30520_v20 }
 0x74d   : > { %30338 = vmatprep.subr.mxu1 %v30520_v20  ;;  %30306 = vmatpush3.msra.mxu0 %v26452_v32 }
 0x74e   : > { %30339 = vmatpush3.msra.mxu1 %v34550_v46  ;;  %30307 = vmatprep.subr.mxu0 %v30520_v20 }
 0x74f   : > { %30340 = vmatprep.subr.mxu1 %v30520_v20  ;;  %30308 = vmatpush3.msra.mxu0 %v26459_v50 }
 0x750   : > { %30341 = vmatpush3.msra.mxu1 %v34561_v2  ;;  %30342 = vmatprep.mubr.msk.f32.mxu1 %vm30521_vm13, %v30520_v20 }
 0x751   : > { %30309 = vmatprep.subr.mxu0 %v30520_v20  ;;  %30343 = vmatmul.mubr.f32.vlgmr.msra.gmra.mxu1 %v34594_v7 }
 0x752   : > { %30310 = vmatpush3.msra.mxu0 %v26466_v4  ;;  %30317 = vmatprep.mubr.msk.f32.mxu0 %vm30521_vm13, %v30520_v20 }
 0x753   : > { %30311 = vmatprep.subr.mxu0 %v30520_v20 }
 0x754   : > { %30312 = vmatpush3.msra.mxu0 %v26473_v56 }
 0x755   : > { %30313 = vmatprep.subr.mxu0 %v30520_v20 }
 0x756   : > { %30314 = vmatpush3.msra.mxu0 %v26480_v5 }
 0x757   : > { %30315 = vmatprep.subr.mxu0 %v30520_v20 }
 0x758   : > { %30316 = vmatpush3.msra.mxu0 %v26487_v48 }
 0x759   : > { %30318 = vmatmul.mubr.f32.vlgmr.msra.gmra.mxu0 %v34594_v7 }
 0x7e3   : > { %v26526_v59 = vpop.f32.mrf.mxu1 }
 0x7e5   : > { %v30244_v11 = vpop.f32.mrf.mxu1 }
 0x7eb   : > { %v26400_v43 = vpop.f32.mrf.mxu0 }
 0x7ec   : > { %v26401_v13 = vadd.f32 %v26400_v43, %v26309_v53 }
 0x7ed   : > { %v30219_v3 = vpop.f32.mrf.mxu0 }
 0x7ee   : > { %v26527_v20 = vadd.f32 %v26526_v59, %v26401_v13 }
 0x7f9   : > { %v26704_v15 = vpop.f32.mrf.mxu1 }
 0x7fb   : > { %v30294_v51 = vpop.f32.mrf.mxu1 }
 0x802   : > { %v26620_v21 = vpop.f32.mrf.mxu0 }
 0x803   : > { %v26621_v57 = vadd.f32 %v26620_v21, %v26527_v20 }
 0x804   : > { %v30269_v8 = vpop.f32.mrf.mxu0 }
 0x805   : > { %v26705_v61 = vadd.f32 %v26704_v15, %v26621_v57 }
 0x811   : > { %v26890_v18 = vpop.f32.mrf.mxu1 }
 0x813   : > { %v30344_v1 = vpop.f32.mrf.mxu1 }
 0x819   : > { %v26808_v37 = vpop.f32.mrf.mxu0 }
 0x81a   : > { %v26809_v26 = vadd.f32 %v26808_v37, %v26705_v61 }
 0x81b   : > { %v30319_v58 = vpop.f32.mrf.mxu0 }
 0x81c   : > { %v26891_v25 = vadd.f32 %v26890_v18, %v26809_v26 }
 0x81e   : > { %v26895_v32 = vsel %vm26894_vm0, %v26891_v25, -inf }
 0x81f   : > { %26896 = vmax.xlane.f32.xlu0 %v26895_v32 }
 0x8a8   : > { %v26897_v28 = vpop.xlane.xlu0 %26896 }
 0x8a9   : > { %v26898_v55 = vsub.f32 %v26891_v25, %v26897_v28 }
 0x8ab   : > { %v26899_v50 = vmul.f32 1.442695, %v26898_v55 }
 0x8ad   : > { %30421 = vpow2.f32 %v26899_v50 }
 0x8ba   : > { %v30422_v62 = vpop.eup %30421 }
 0x8bb   : > { %v26901_v39 = vsel %vm26894_vm0, %v30422_v62, 0.0 }
 0x8bc   : > { %26902 = vadd.xlane.f32.xlu0 %v26901_v39 }
 0x945   : > { %v26903_v4 = vpop.xlane.xlu0 %26902 }
 0x946   : > { %30423 = vlog2.f32 %v26903_v4 }
 0x953   : > { %v30424_v12 = vpop.eup %30423 }
 0x954   : > { %v26905_v46 = vmul.f32 0.6931472, %v30424_v12 }
 0x956   : > { %v26906_v56 = vsub.f32 %v26898_v55, %v26905_v46 }
 0x958   : > { %26907 = vst.msk [vmem:[%s30771_s26] sm:$0x1] %vm26894_vm0, %v26906_v56 }
 0x959   : > { %30438 = shalt.err (!%p30435_p9)
}
 0x95a   : > { %s30439_s22 = scalar_lea.hbm %s26919_s16, 16  ;;  %s30443_s29 = scalar_lea.hbm %s34759_s11, 32 }
 0x95b   : > { %p30440_p10 = scmp.ne.s32.totalorder %s26919_s16, %s30439_s22  ;;  %p30444_p13 = scmp.lt.s32.totalorder %s26919_s16, %s34759_s11 }
 0x95c   : > { %p30445_p0 = scmp.lt.s32.totalorder %s30443_s29, %s30439_s22 }
 0x95d   : > { %p30441_p11 = pnand %p30440_p10, %p30621_p5 }
 0x95e   : > { %p30446_p1 = por %p30445_p0, %p30444_p13 }
 0x95f   : > { %p30442_p12 = pneg %p30441_p11 }
 0x961   : > { %p30447_p2 = pnand %p30446_p1, %p30442_p12 }
 0x963   : > { %30450 = shalt.err (!%p30447_p2)
}
 0x964   : > { %30345 = dma.vmem_to_hbm [thread:$0]  (%p30621_p5), %s26922_s14, 16, %s26919_s16, %s26909_s25  }
 0x965 PF: > { %p30351_p3 = scmp.ge.s32.totalorder %s30501_s20, 2  ;;  %s26933_s30 = sand.u32 1, %s30489_s17  }
 0x966   : > { %s26934_s12 = scalar_lea.sflag [#allocation7], %s26933_s30 }
 0x967   : > { %p30348_p4 = pnand %p30351_p3, %p30625_p6 }
 0x969   : > { %p30349_p7 = pneg %p30348_p4 }
 0x96b   : > { %30484 = dma.done.wait (%p30349_p7), %s26934_s12, 16  }
 0x96c   : > { %30486 = vsyncadd (%p30349_p7), %s26934_s12, 4294967280  ;;  %s34919_s24 = sld [smem:[#allocation9_spill]]  ;;  %p21_p8 = scmp.ge.s32.totalorder %s30608_s23, 4  }
 0x96d   : > { %s34920_s17 = smov %s30493_s18  ;;  %s34921_s18 = smov %s30497_s19 }
 0x96e   : > { %s34923_s20 = smov %s30608_s23  ;;  %23 = sbr.rel (!%p21_p8) target bundleno = 5 (0x5), region = 265 }
 0x972   : > { %s34922_s19 = smov %s34919_s24 }
 0x973   :  { %26938 = vsyncpa [#allocation7], 1 }
 0x974   :  { %26940 = vsyncpa [#allocation7 + $0x1], 1 }

</bundles_post_ra>
